<compile_context>
chip_gen: v7x
topology: tpu7x:2x2x1
jax: 0.10.0
libtpu: 0.0.40
codegen_flags: <defaults>
</compile_context>

<pallas_src>
import functools
import math

import jax
import jax.numpy as jnp
from jax.experimental import pallas as pl
from jax.experimental.pallas import tpu as pltpu

_LANE = 128
_SUB = 8
_VMEM_LIMIT = 32 * 1024 * 1024   # per-step working sets are small; safe on all gens
_CONV_BH = 8                     # conv row-tile height (image rows per grid step)


def _round_up(x, m):
    return ((x + m - 1) // m) * m


# ---------------------------------------------------------------------------
# Fused streaming linear kernel:  y = act( prologue(x) @ W^T + b )
#   grid = (M tiles,)  -- full K and full N per step, weight stays resident.
# ---------------------------------------------------------------------------

def _linear_kernel(x_ref, w_ref, b_ref, g_ref, bb_ref, a_ref, o_ref, *,
                   k_true, kp, use_ln, use_prelu, act):
    x = x_ref[...]
    if use_ln or use_prelu:
        x = x.astype(jnp.float32)
    if use_ln:
        inv = 1.0 / float(k_true)
        mean = jnp.sum(x, axis=-1, keepdims=True) * inv
        xc = x - mean
        if kp > k_true:                      # zero the padded feature columns
            col = jax.lax.broadcasted_iota(jnp.int32, x.shape, 1)
            xc = jnp.where(col < k_true, xc, 0.0)
        var = jnp.sum(xc * xc, axis=-1, keepdims=True) * inv
        x = xc * jax.lax.rsqrt(var + 1e-5) * g_ref[...] + bb_ref[...]
    if use_prelu:
        x = jnp.where(x >= 0.0, x, a_ref[...] * x)
    y = jax.lax.dot_general(x.astype(jnp.bfloat16), w_ref[...],
                            (((1,), (1,)), ((), ())),
                            preferred_element_type=jnp.float32)
    y = y + b_ref[...]
    if act == "relu":
        y = jnp.maximum(y, 0.0)
    o_ref[...] = y.astype(o_ref.dtype)


def pallas_linear(x2d, lin, nout, *, ln=None, prelu=None, act=None,
                  out_dtype=jnp.float32):
    """PyTorch Linear semantics: y = act(pro(x) @ w.T + b).

    `lin` holds the pre-padded bf16 weight (Np, Kp) and f32 bias (1, Np)."""
    M, K = x2d.shape
    wp, bp = lin['w'], lin['b']
    Np, Kp = wp.shape

    Mp = _round_up(M, _SUB)
    tm = min(512, Mp)
    grid_m = pl.cdiv(Mp, tm)

    xp = x2d
    if Mp > M or Kp > K:
        xp = jnp.pad(xp, ((0, Mp - M), (0, Kp - K)))

    if ln is not None:
        gp, btp = ln
    else:
        gp = jnp.zeros((1, Kp), jnp.float32)
        btp = jnp.zeros((1, Kp), jnp.float32)
    alpha = prelu if prelu is not None else jnp.zeros((1, 1), jnp.float32)

    out = pl.pallas_call(
        functools.partial(_linear_kernel, k_true=K, kp=Kp,
                          use_ln=ln is not None, use_prelu=prelu is not None,
                          act=act),
        grid=(grid_m,),
        in_specs=[
            pl.BlockSpec((tm, Kp), lambda i: (i, 0)),
            pl.BlockSpec((Np, Kp), lambda i: (0, 0)),   # weight resident
            pl.BlockSpec((1, Np), lambda i: (0, 0)),
            pl.BlockSpec((1, Kp), lambda i: (0, 0)),
            pl.BlockSpec((1, Kp), lambda i: (0, 0)),
            pl.BlockSpec((1, 1), lambda i: (0, 0)),
        ],
        out_specs=pl.BlockSpec((tm, Np), lambda i: (i, 0)),
        out_shape=jax.ShapeDtypeStruct((Mp, Np), out_dtype),
        compiler_params=pltpu.CompilerParams(
            dimension_semantics=("parallel",), vmem_limit_bytes=_VMEM_LIMIT),
        cost_estimate=pl.CostEstimate(
            flops=2 * Mp * Kp * Np, transcendentals=0,
            bytes_accessed=Mp * Kp * jnp.dtype(xp.dtype).itemsize
            + 2 * Np * Kp + Mp * Np * jnp.dtype(out_dtype).itemsize),
    )(xp, wp, bp, gp, btp, alpha)
    return out[:M, :nout]


# ---------------------------------------------------------------------------
# Multi-head self-attention: G segments (all heads) per grid step, bf16 I/O.
# ---------------------------------------------------------------------------

def _mha_kernel(qkv_ref, o_ref, *, nhead, dh, scale):
    x = qkv_ref[...]                                     # (G, T, 3N) bf16
    n = nhead * dh
    outs = []
    for h in range(nhead):
        q = x[:, :, h * dh:(h + 1) * dh]
        k = x[:, :, n + h * dh:n + (h + 1) * dh]
        v = x[:, :, 2 * n + h * dh:2 * n + (h + 1) * dh]
        s = jax.lax.dot_general(q, k, (((2,), (2,)), ((0,), (0,))),
                                preferred_element_type=jnp.float32) * scale
        s = s - jnp.max(s, axis=-1, keepdims=True)
        p = jnp.exp(s)
        p = p / jnp.sum(p, axis=-1, keepdims=True)       # exact softmax
        o = jax.lax.dot_general(p.astype(jnp.bfloat16), v,
                                (((2,), (1,)), ((0,), (0,))),
                                preferred_element_type=jnp.float32)
        outs.append(o)                                   # (G, T, dh)
    o_ref[...] = jnp.concatenate(outs, axis=-1).astype(o_ref.dtype)


def multihead_attention(z1, p, nhead):
    """z1: (Bq, T, N) f32; LayerNorm1 is fused into the QKV projection."""
    Bq, T, N = z1.shape
    dh = N // nhead
    qkv = pallas_linear(z1.reshape(Bq * T, N), p['in_proj'], 3 * N,
                        ln=p['ln1'], out_dtype=jnp.bfloat16)
    qkv = qkv.reshape(Bq, T, 3 * N)                      # free metadata reshape
    G = min(8, Bq)
    o = pl.pallas_call(
        functools.partial(_mha_kernel, nhead=nhead, dh=dh,
                          scale=1.0 / math.sqrt(dh)),
        grid=(pl.cdiv(Bq, G),),
        in_specs=[pl.BlockSpec((G, T, 3 * N), lambda i: (i, 0, 0))],
        out_specs=pl.BlockSpec((G, T, N), lambda i: (i, 0, 0)),
        out_shape=jax.ShapeDtypeStruct((Bq, T, N), jnp.bfloat16),
        compiler_params=pltpu.CompilerParams(
            dimension_semantics=("parallel",), vmem_limit_bytes=_VMEM_LIMIT),
    )(qkv)
    o = pallas_linear(o.reshape(Bq * T, N), p['out_proj'], N)
    return o.reshape(Bq, T, N)


# ---------------------------------------------------------------------------
# 3x3 Conv2d (padding=1), row-tiled with a 1-row halo; 9 shifted matmuls.
# ---------------------------------------------------------------------------

def _conv3x3_kernel(x_ref, w_ref, b_ref, o_ref, *, wp, rout):
    acc = None
    for kh in range(3):
        for kw in range(3):
            start = 8 + wp + (kh - 1) * wp + (kw - 1)
            xs = x_ref[pl.ds(start, rout), :].astype(jnp.bfloat16)
            c = jax.lax.dot_general(xs, w_ref[kh * 3 + kw],
                                    (((1,), (1,)), ((), ())),
                                    preferred_element_type=jnp.float32)
            acc = c if acc is None else acc + c
    o_ref[...] = (acc + b_ref[...]).astype(o_ref.dtype)


def conv2d_3x3(x_hwc, w9, b2):
    """x_hwc: (H, W, Cin) image (channels last) -> (H, W, Cout). 3x3, pad=1."""
    Himg, Wimg, Cin = x_hwc.shape
    Cout = w9.shape[1]
    bh = _CONV_BH
    Hp = _round_up(Himg, bh)
    nb = Hp // bh
    Wp = _round_up(Wimg + 2, _SUB)          # sublane-aligned padded width
    # TODO(synk): stream the conv image as bf16 once unaligned packed-sublane
    # slices are validated on the target toolchain; f32 keeps the proven path.
    img = jnp.pad(x_hwc.astype(jnp.float32),
                  ((1, 1 + Hp - Himg), (1, Wp - Wimg - 1), (0, 0)))
    row_idx = jnp.arange(nb)[:, None] * bh + jnp.arange(bh + 2)[None, :]
    blocks = img[row_idx]                                    # (nb, bh+2, Wp, Cin)
    flat = jnp.pad(blocks.reshape(nb, (bh + 2) * Wp, Cin),
                   ((0, 0), (8, 8), (0, 0)))                 # aligned guard rows
    rows_b = (bh + 2) * Wp + 16
    rout = bh * Wp
    out = pl.pallas_call(
        functools.partial(_conv3x3_kernel, wp=Wp, rout=rout),
        grid=(nb,),
        in_specs=[pl.BlockSpec((None, rows_b, Cin), lambda i: (i, 0, 0)),
                  pl.BlockSpec((9, Cout, Cin), lambda i: (0, 0, 0)),
                  pl.BlockSpec((1, Cout), lambda i: (0, 0))],
        out_specs=pl.BlockSpec((None, rout, Cout), lambda i: (i, 0, 0)),
        out_shape=jax.ShapeDtypeStruct((nb, rout, Cout), jnp.float32),
        compiler_params=pltpu.CompilerParams(
            dimension_semantics=("parallel",), vmem_limit_bytes=_VMEM_LIMIT),
    )(flat, w9, b2)
    out = out.reshape(nb, bh, Wp, Cout)[:, :, 1:Wimg + 1, :]
    return out.reshape(Hp, Wimg, Cout)[:Himg]


# ---------------------------------------------------------------------------
# Decoder: mask*x -> ConvTranspose1d frames -> overlap-add, lane-dense output.
# ---------------------------------------------------------------------------

def _decoder_kernel(m_ref, x_ref, w_ref, o_ref, *, stride):
    xm = (m_ref[...] * x_ref[...]).astype(jnp.bfloat16)          # (T, N)
    frames_t = jax.lax.dot_general(w_ref[...], xm,
                                   (((1,), (1,)), ((), ())),
                                   preferred_element_type=jnp.float32)  # (L, T)
    zcol = jnp.zeros((stride, 1), jnp.float32)
    top = jnp.concatenate([frames_t[:stride, :], zcol], axis=1)  # (stride, T+1)
    bot = jnp.concatenate([zcol, frames_t[stride:, :]], axis=1)  # (stride, T+1)
    o_ref[...] = top + bot


def pallas_decode(masks_cb, x_t, dec_wT, L):
    """masks_cb: (C, B, T, N) bf16; x_t: (B, T, N); dec_wT: (L, N) bf16."""
    C, B, T, N = masks_cb.shape
    stride = L // 2
    # TODO(synk): tile the T axis for very long signals (full-T block per step).
    out = pl.pallas_call(
        functools.partial(_decoder_kernel, stride=stride),
        grid=(B, C),                                # C innermost: x stays resident
        in_specs=[pl.BlockSpec((None, None, T, N), lambda b, c: (c, b, 0, 0)),
                  pl.BlockSpec((None, T, N), lambda b, c: (b, 0, 0)),
                  pl.BlockSpec((L, N), lambda b, c: (0, 0))],
        out_specs=pl.BlockSpec((None, None, stride, T + 1),
                               lambda b, c: (c, b, 0, 0)),
        out_shape=jax.ShapeDtypeStruct((C, B, stride, T + 1), jnp.float32),
        compiler_params=pltpu.CompilerParams(
            dimension_semantics=("parallel", "arbitrary"),
            vmem_limit_bytes=_VMEM_LIMIT),
    )(masks_cb, x_t.astype(jnp.bfloat16), dec_wT)
    audio = jnp.transpose(out, (0, 1, 3, 2)).reshape(C, B, 1, (T + 1) * stride)
    return audio


# ---------------------------------------------------------------------------
# Model building blocks (XLA glue around the Pallas kernels), batch-first.
# ---------------------------------------------------------------------------

def positional_encoding(length, d_model):
    position = jnp.arange(length, dtype=jnp.float32)[:, None]
    div_term = jnp.exp(jnp.arange(0, d_model, 2, dtype=jnp.float32)
                       * (-math.log(10000.0) / d_model))
    pe = jnp.zeros((length, d_model), jnp.float32)
    pe = pe.at[:, 0::2].set(jnp.sin(position * div_term))
    pe = pe.at[:, 1::2].set(jnp.cos(position * div_term))
    return pe


def transformer_layer(z1, p, nhead):
    """z1: (Bq, T, N) batch-first. Matches TransformerEncoderLayer.forward."""
    Bq, T, N = z1.shape
    z2 = multihead_attention(z1, p, nhead)                       # LN1 fused inside
    r = z2 + z1
    ff = pallas_linear(r.reshape(Bq * T, N), p['ff'], 2 * N,
                       ln=p['ln2'], act="relu")                  # LN2+Linear+ReLU
    z3 = conv2d_3x3(ff.reshape(Bq, T, 2 * N), p['conv_w9'], p['conv_b'])
    return z3 + r


def dpt_block(z, p, nhead, Local_B):
    B, N, K, P = z.shape
    row_z = jnp.transpose(z, (0, 3, 2, 1)).reshape(B * P, K, N)
    row_z1 = row_z + positional_encoding(K, N)[None]
    for i in range(Local_B):
        row_z1 = transformer_layer(row_z1, p['intra'][i], nhead)
    row_f = row_z1 + row_z
    row_output = jnp.transpose(row_f.reshape(B, P, K, N), (0, 3, 2, 1))

    col_z = jnp.transpose(row_output, (0, 2, 3, 1)).reshape(B * K, P, N)
    col_z1 = col_z + positional_encoding(P, N)[None]
    for i in range(Local_B):
        col_z1 = transformer_layer(col_z1, p['inter'][i], nhead)
    col_f = col_z1 + col_z
    return jnp.transpose(col_f.reshape(B, K, P, N), (0, 3, 1, 2))


def pad_segment(x, K):
    B, D, T = x.shape
    stride = K // 2
    rest = K - (stride + T % K) % K
    if rest > 0:
        x = jnp.concatenate([x, jnp.zeros((B, D, rest), x.dtype)], axis=2)
    pad_aux = jnp.zeros((B, D, stride), x.dtype)
    return jnp.concatenate([pad_aux, x, pad_aux], axis=2), rest


def split_feature(x, K):
    x, rest = pad_segment(x, K)
    B, D, T = x.shape
    stride = K // 2
    seg1 = x[:, :, :-stride].reshape(B, D, -1, K)
    seg2 = x[:, :, stride:].reshape(B, D, -1, K)
    segs = jnp.concatenate([seg1, seg2], axis=3).reshape(B, D, -1, K)
    return jnp.transpose(segs, (0, 1, 3, 2)), rest


def merge_feature(x, rest):
    B, D, K, _ = x.shape
    stride = K // 2
    x = jnp.transpose(x, (0, 1, 3, 2)).reshape(B, D, -1, K * 2)
    in1 = x[:, :, :, :K].reshape(B, D, -1)[:, :, stride:]
    in2 = x[:, :, :, K:].reshape(B, D, -1)[:, :, :-stride]
    out = in1 + in2
    if rest > 0:
        out = out[:, :, :-rest]
    return out


# ---------------------------------------------------------------------------
# Separator forward
# ---------------------------------------------------------------------------

def separator_forward(params, x_original, rest, *, N, C, H, K, L,
                      Global_B, Local_B):
    B, _, T = x_original.shape
    xt = jnp.transpose(x_original, (0, 2, 1))                    # (B, T, N)
    x = pallas_linear(xt.reshape(B * T, N), params['lin1'], N,
                      ln=params['ln'])                           # LN + Linear1
    x = jnp.transpose(x.reshape(B, T, N), (0, 2, 1))             # (B, N, T)
    out, gap = split_feature(x, K)                               # (B, N, K, S)

    outputs = []
    for gi in range(Global_B):
        out = dpt_block(out, params['dpt'][gi], H, Local_B)
        Bb, _, Kk, Ss = out.shape
        # PReLU (single shared alpha) fused as Linear2 prologue.
        o2 = jnp.transpose(out, (0, 3, 2, 1)).reshape(Bb * Ss * Kk, N)
        o2 = pallas_linear(o2, params['lin2'], 2 * N, prelu=params['prelu_a'])
        o2 = jnp.transpose(o2.reshape(Bb, Ss, Kk, 2 * N), (0, 3, 2, 1))
        o2 = o2.reshape(Bb, -1, C, Kk, Ss)
        o2 = jnp.transpose(o2, (0, 2, 1, 3, 4)).reshape(Bb * C, -1, Kk, Ss)
        merged = merge_feature(o2, gap)                          # (B*C, N, T)

        m = jnp.transpose(merged, (0, 2, 1))                     # (B*C, T, N)
        BC, Tt, _ = m.shape
        m2 = m.reshape(BC * Tt, N)
        h1 = pallas_linear(m2, params['ff1_1'], 4 * N, act="relu",
                           out_dtype=jnp.bfloat16)
        h1 = pallas_linear(h1, params['ff1_2'], N, out_dtype=jnp.bfloat16)
        h2 = pallas_linear(h1, params['ff2_1'], 4 * N, act="relu",
                           out_dtype=jnp.bfloat16)
        masks = pallas_linear(h2, params['ff2_2'], N, act="relu",
                              out_dtype=jnp.bfloat16)            # mask ReLU fused
        # Replicate PyTorch's masks.view(C, B, ...) quirk on the (b,c)-ordered axis.
        masks_cb = masks.reshape(BC, Tt, N).reshape(C, -1, Tt, N)

        audio = pallas_decode(masks_cb, xt, params['dec_wT'], L)
        lo = L // 2
        hi = audio.shape[3] - (rest + L // 2)
        audio = audio[:, :, :, lo:hi]
        outputs.append(jnp.concatenate([audio[ci] for ci in range(C)], axis=1))
    return outputs


# ---------------------------------------------------------------------------
# Parameter init (PyTorch layout) + one-time prep into kernel layout
# ---------------------------------------------------------------------------

def init_params(key, N, C, H, L, Global_B, Local_B):
    state = {'key': key}

    def nrm(shape, scale=0.1):
        state['key'], sub = jax.random.split(state['key'])
        return scale * jax.random.normal(sub, shape, jnp.float32)

    def init_tel():
        return dict(
            ln1_g=jnp.ones((N,), jnp.float32), ln1_b=jnp.zeros((N,), jnp.float32),
            in_w=nrm((3 * N, N)), in_b=nrm((3 * N,), 0.01),
            out_w=nrm((N, N)), out_b=nrm((N,), 0.01),
            ln2_g=jnp.ones((N,), jnp.float32), ln2_b=jnp.zeros((N,), jnp.float32),
            ff_w=nrm((2 * N, N)), ff_b=nrm((2 * N,), 0.01),
            conv_w=nrm((N, 2 * N, 3, 3), 0.05), conv_b=nrm((N,), 0.01))

    dpt = [dict(intra=[init_tel() for _ in range(Local_B)],
                inter=[init_tel() for _ in range(Local_B)])
           for _ in range(Global_B)]
    return dict(
        ln_g=jnp.ones((N,), jnp.float32), ln_b=jnp.zeros((N,), jnp.float32),
        lin1_w=nrm((N, N)),
        prelu_a=jnp.array([0.25], jnp.float32),
        lin2_w=nrm((2 * N, N)),
        ff1_w1=nrm((4 * N, N)), ff1_b1=nrm((4 * N,), 0.01),
        ff1_w2=nrm((N, 4 * N)), ff1_b2=nrm((N,), 0.01),
        ff2_w1=nrm((4 * N, N)), ff2_b1=nrm((4 * N,), 0.01),
        ff2_w2=nrm((N, 4 * N)), ff2_b2=nrm((N,), 0.01),
        dec_w=nrm((N, 1, L)),
        dpt=dpt)


def _prep_linear(w, b=None):
    nout, kin = w.shape
    npad, kpad = _round_up(nout, _LANE), _round_up(kin, _LANE)
    wp = jnp.pad(w.astype(jnp.float32),
                 ((0, npad - nout), (0, kpad - kin))).astype(jnp.bfloat16)
    bias = b if b is not None else jnp.zeros((nout,), jnp.float32)
    bp = jnp.pad(bias.astype(jnp.float32), (0, npad - nout)).reshape(1, npad)
    return {'w': wp, 'b': bp}


def _prep_ln(g, b):
    kin = g.shape[0]
    kpad = _round_up(kin, _LANE)
    return (jnp.pad(g.astype(jnp.float32), (0, kpad - kin)).reshape(1, kpad),
            jnp.pad(b.astype(jnp.float32), (0, kpad - kin)).reshape(1, kpad))


def prepare_params(raw):
    """Pre-pad / pre-cast every weight to its kernel layout ONCE (outside jit)."""
    def prep_tel(t):
        cout, cin = t['conv_w'].shape[0], t['conv_w'].shape[1]
        return dict(
            ln1=_prep_ln(t['ln1_g'], t['ln1_b']),
            in_proj=_prep_linear(t['in_w'], t['in_b']),
            out_proj=_prep_linear(t['out_w'], t['out_b']),
            ln2=_prep_ln(t['ln2_g'], t['ln2_b']),
            ff=_prep_linear(t['ff_w'], t['ff_b']),
            conv_w9=jnp.transpose(t['conv_w'], (2, 3, 0, 1))
                       .reshape(9, cout, cin).astype(jnp.bfloat16),
            conv_b=t['conv_b'].reshape(1, cout).astype(jnp.float32))

    return dict(
        ln=_prep_ln(raw['ln_g'], raw['ln_b']),
        lin1=_prep_linear(raw['lin1_w']),
        prelu_a=raw['prelu_a'].reshape(1, 1).astype(jnp.float32),
        lin2=_prep_linear(raw['lin2_w']),
        ff1_1=_prep_linear(raw['ff1_w1'], raw['ff1_b1']),
        ff1_2=_prep_linear(raw['ff1_w2'], raw['ff1_b2']),
        ff2_1=_prep_linear(raw['ff2_w1'], raw['ff2_b1']),
        ff2_2=_prep_linear(raw['ff2_w2'], raw['ff2_b2']),
        dec_wT=jnp.transpose(raw['dec_w'][:, 0, :], (1, 0)).astype(jnp.bfloat16),
        dpt=[dict(intra=[prep_tel(t) for t in blk['intra']],
                  inter=[prep_tel(t) for t in blk['inter']])
             for blk in raw['dpt']])


# ---------------------------------------------------------------------------
# Main
# ---------------------------------------------------------------------------

if __name__ == "__main__":
    N, C, H, K, L = 16, 2, 4, 8, 8
    Global_B, Local_B = 1, 1
    B, T = 1, 12
    rest = 2            # the `rest` argument of Separator.forward (encoder padding)

    key = jax.random.PRNGKey(0)
    kx, kp = jax.random.split(key)
    x_original = jax.random.normal(kx, (B, N, T), jnp.float32)
    raw = init_params(kp, N, C, H, L, Global_B, Local_B)
    params = prepare_params(raw)        # one-time weight pad/cast, outside jit

    fwd = jax.jit(functools.partial(
        separator_forward, rest=rest, N=N, C=C, H=H, K=K, L=L,
        Global_B=Global_B, Local_B=Local_B))
    outs = fwd(params, x_original)
    for o in outs:
        jax.block_until_ready(o)
    print("KERNEL_OK")
</pallas_src>

<mosaic_0001>
module attributes {stable_mosaic.version = 11 : i64} {
  func.func @_linear_kernel(%arg0: i32, %arg1: memref<16x128xf32, #tpu.memory_space<vmem>>, %arg2: memref<128x128xbf16, #tpu.memory_space<vmem>>, %arg3: memref<1x128xf32, #tpu.memory_space<vmem>>, %arg4: memref<1x128xf32, #tpu.memory_space<vmem>>, %arg5: memref<1x128xf32, #tpu.memory_space<vmem>>, %arg6: memref<1x1xf32, #tpu.memory_space<vmem>>, %arg7: memref<16x128xf32, #tpu.memory_space<vmem>>) attributes {dimension_semantics = [#tpu.dimension_semantics<parallel>], iteration_bounds = array<i64: 1>, scalar_prefetch = 0 : i64, scratch_operands = 0 : i64, tpu.core_type = #tpu.core_type<tc>, window_params = [{transform_indices = @transform_0, window_bounds = array<i64: 16, 128>}, {pipeline_mode = #tpu.pipeline_mode<synchronous>, transform_indices = @transform_1, window_bounds = array<i64: 128, 128>}, {pipeline_mode = #tpu.pipeline_mode<synchronous>, transform_indices = @transform_2, window_bounds = array<i64: 1, 128>}, {pipeline_mode = #tpu.pipeline_mode<synchronous>, transform_indices = @transform_3, window_bounds = array<i64: 1, 128>}, {pipeline_mode = #tpu.pipeline_mode<synchronous>, transform_indices = @transform_4, window_bounds = array<i64: 1, 128>}, {pipeline_mode = #tpu.pipeline_mode<synchronous>, transform_indices = @transform_5, window_bounds = array<i64: 1, 1>}, {transform_indices = @transform_6, window_bounds = array<i64: 16, 128>}]} {
    %c0 = arith.constant 0 : index
    %c0_0 = arith.constant 0 : index
    %0 = vector.load %arg1[%c0, %c0_0] : memref<16x128xf32, #tpu.memory_space<vmem>>, vector<16x128xf32>
    %cst = arith.constant dense<0.000000e+00> : vector<16xf32>
    %1 = vector.multi_reduction <add>, %0, %cst [1] : vector<16x128xf32> to vector<16xf32>
    %2 = vector.shape_cast %1 : vector<16xf32> to vector<16x1xf32>
    %cst_1 = arith.constant 6.250000e-02 : f32
    %3 = vector.broadcast %cst_1 : f32 to vector<16x1xf32>
    %4 = arith.mulf %2, %3 : vector<16x1xf32>
    %5 = vector.broadcast %4 : vector<16x1xf32> to vector<16x128xf32>
    %6 = arith.subf %0, %5 : vector<16x128xf32>
    %7 = tpu.iota {dimensions = array<i32: 1>} : vector<16x128xi32>
    %c16_i32 = arith.constant 16 : i32
    %8 = vector.broadcast %c16_i32 : i32 to vector<16x128xi32>
    %9 = arith.cmpi slt, %7, %8 : vector<16x128xi32>
    %cst_2 = arith.constant 0.000000e+00 : f32
    %10 = vector.broadcast %cst_2 : f32 to vector<16x128xf32>
    %11 = arith.select %9, %6, %10 : vector<16x128xi1>, vector<16x128xf32>
    %12 = arith.mulf %11, %11 : vector<16x128xf32>
    %cst_3 = arith.constant dense<0.000000e+00> : vector<16xf32>
    %13 = vector.multi_reduction <add>, %12, %cst_3 [1] : vector<16x128xf32> to vector<16xf32>
    %14 = vector.shape_cast %13 : vector<16xf32> to vector<16x1xf32>
    %cst_4 = arith.constant 6.250000e-02 : f32
    %15 = vector.broadcast %cst_4 : f32 to vector<16x1xf32>
    %16 = arith.mulf %14, %15 : vector<16x1xf32>
    %cst_5 = arith.constant 9.99999974E-6 : f32
    %17 = vector.broadcast %cst_5 : f32 to vector<16x1xf32>
    %18 = arith.addf %16, %17 : vector<16x1xf32>
    %19 = math.rsqrt %18 : vector<16x1xf32>
    %20 = vector.broadcast %19 : vector<16x1xf32> to vector<16x128xf32>
    %21 = arith.mulf %11, %20 : vector<16x128xf32>
    %c0_6 = arith.constant 0 : index
    %c0_7 = arith.constant 0 : index
    %22 = vector.load %arg4[%c0_6, %c0_7] : memref<1x128xf32, #tpu.memory_space<vmem>>, vector<1x128xf32>
    %23 = vector.broadcast %22 : vector<1x128xf32> to vector<16x128xf32>
    %24 = arith.mulf %21, %23 : vector<16x128xf32>
    %c0_8 = arith.constant 0 : index
    %c0_9 = arith.constant 0 : index
    %25 = vector.load %arg5[%c0_8, %c0_9] : memref<1x128xf32, #tpu.memory_space<vmem>>, vector<1x128xf32>
    %26 = vector.broadcast %25 : vector<1x128xf32> to vector<16x128xf32>
    %27 = arith.addf %24, %26 : vector<16x128xf32>
    %28 = arith.truncf %27 : vector<16x128xf32> to vector<16x128xbf16>
    %c0_10 = arith.constant 0 : index
    %c0_11 = arith.constant 0 : index
    %29 = vector.load %arg2[%c0_10, %c0_11] : memref<128x128xbf16, #tpu.memory_space<vmem>>, vector<128x128xbf16>
    %cst_12 = arith.constant dense<0.000000e+00> : vector<16x128xf32>
    %30 = tpu.matmul %28, %29, %cst_12 {dimension_numbers = #tpu.dot_dimension_numbers<[1], [1], [0], [0], [0, 0, 1, 0], [], []>} : vector<16x128xbf16>, vector<128x128xbf16>, vector<16x128xf32> -> vector<16x128xf32>
    %c0_13 = arith.constant 0 : index
    %c0_14 = arith.constant 0 : index
    %31 = vector.load %arg3[%c0_13, %c0_14] : memref<1x128xf32, #tpu.memory_space<vmem>>, vector<1x128xf32>
    %32 = vector.broadcast %31 : vector<1x128xf32> to vector<16x128xf32>
    %33 = arith.addf %30, %32 : vector<16x128xf32>
    %c0_15 = arith.constant 0 : index
    %c0_16 = arith.constant 0 : index
    %34 = vector.load %arg7[%c0_15, %c0_16] : memref<16x128xf32, #tpu.memory_space<vmem>>, vector<16x128xf32>
    tpu.vector_store %arg7[%c0_15, %c0_16], %33 {strides = array<i32>} : memref<16x128xf32, #tpu.memory_space<vmem>>, vector<16x128xf32>,
    return
  }
  func.func @transform_0(%arg0: i32) -> (i32, i32) {
    %c0_i32 = arith.constant 0 : i32
    %c0_i32_0 = arith.constant 0 : i32
    return %arg0, %c0_i32 : i32, i32
  }
  func.func @transform_1(%arg0: i32) -> (i32, i32) {
    %c0_i32 = arith.constant 0 : i32
    %c0_i32_0 = arith.constant 0 : i32
    %c0_i32_1 = arith.constant 0 : i32
    return %c0_i32, %c0_i32_0 : i32, i32
  }
  func.func @transform_2(%arg0: i32) -> (i32, i32) {
    %c0_i32 = arith.constant 0 : i32
    %c0_i32_0 = arith.constant 0 : i32
    %c0_i32_1 = arith.constant 0 : i32
    return %c0_i32, %c0_i32_0 : i32, i32
  }
  func.func @transform_3(%arg0: i32) -> (i32, i32) {
    %c0_i32 = arith.constant 0 : i32
    %c0_i32_0 = arith.constant 0 : i32
    %c0_i32_1 = arith.constant 0 : i32
    return %c0_i32, %c0_i32_0 : i32, i32
  }
  func.func @transform_4(%arg0: i32) -> (i32, i32) {
    %c0_i32 = arith.constant 0 : i32
    %c0_i32_0 = arith.constant 0 : i32
    %c0_i32_1 = arith.constant 0 : i32
    return %c0_i32, %c0_i32_0 : i32, i32
  }
  func.func @transform_5(%arg0: i32) -> (i32, i32) {
    %c0_i32 = arith.constant 0 : i32
    %c0_i32_0 = arith.constant 0 : i32
    %c0_i32_1 = arith.constant 0 : i32
    return %c0_i32, %c0_i32_0 : i32, i32
  }
  func.func @transform_6(%arg0: i32) -> (i32, i32) {
    %c0_i32 = arith.constant 0 : i32
    %c0_i32_0 = arith.constant 0 : i32
    return %arg0, %c0_i32 : i32, i32
  }
}

module attributes {stable_mosaic.version = 11 : i64} {
  func.func @_linear_kernel(%arg0: i32, %arg1: memref<48x128xf32, #tpu.memory_space<vmem>>, %arg2: memref<128x128xbf16, #tpu.memory_space<vmem>>, %arg3: memref<1x128xf32, #tpu.memory_space<vmem>>, %arg4: memref<1x128xf32, #tpu.memory_space<vmem>>, %arg5: memref<1x128xf32, #tpu.memory_space<vmem>>, %arg6: memref<1x1xf32, #tpu.memory_space<vmem>>, %arg7: memref<48x128xbf16, #tpu.memory_space<vmem>>) attributes {dimension_semantics = [#tpu.dimension_semantics<parallel>], iteration_bounds = array<i64: 1>, scalar_prefetch = 0 : i64, scratch_operands = 0 : i64, tpu.core_type = #tpu.core_type<tc>, window_params = [{transform_indices = @transform_0, window_bounds = array<i64: 48, 128>}, {pipeline_mode = #tpu.pipeline_mode<synchronous>, transform_indices = @transform_1, window_bounds = array<i64: 128, 128>}, {pipeline_mode = #tpu.pipeline_mode<synchronous>, transform_indices = @transform_2, window_bounds = array<i64: 1, 128>}, {pipeline_mode = #tpu.pipeline_mode<synchronous>, transform_indices = @transform_3, window_bounds = array<i64: 1, 128>}, {pipeline_mode = #tpu.pipeline_mode<synchronous>, transform_indices = @transform_4, window_bounds = array<i64: 1, 128>}, {pipeline_mode = #tpu.pipeline_mode<synchronous>, transform_indices = @transform_5, window_bounds = array<i64: 1, 1>}, {transform_indices = @transform_6, window_bounds = array<i64: 48, 128>}]} {
    %c0 = arith.constant 0 : index
    %c0_0 = arith.constant 0 : index
    %0 = vector.load %arg1[%c0, %c0_0] : memref<48x128xf32, #tpu.memory_space<vmem>>, vector<48x128xf32>
    %cst = arith.constant dense<0.000000e+00> : vector<48xf32>
    %1 = vector.multi_reduction <add>, %0, %cst [1] : vector<48x128xf32> to vector<48xf32>
    %2 = vector.shape_cast %1 : vector<48xf32> to vector<48x1xf32>
    %cst_1 = arith.constant 6.250000e-02 : f32
    %3 = vector.broadcast %cst_1 : f32 to vector<48x1xf32>
    %4 = arith.mulf %2, %3 : vector<48x1xf32>
    %5 = vector.broadcast %4 : vector<48x1xf32> to vector<48x128xf32>
    %6 = arith.subf %0, %5 : vector<48x128xf32>
    %7 = tpu.iota {dimensions = array<i32: 1>} : vector<48x128xi32>
    %c16_i32 = arith.constant 16 : i32
    %8 = vector.broadcast %c16_i32 : i32 to vector<48x128xi32>
    %9 = arith.cmpi slt, %7, %8 : vector<48x128xi32>
    %cst_2 = arith.constant 0.000000e+00 : f32
    %10 = vector.broadcast %cst_2 : f32 to vector<48x128xf32>
    %11 = arith.select %9, %6, %10 : vector<48x128xi1>, vector<48x128xf32>
    %12 = arith.mulf %11, %11 : vector<48x128xf32>
    %cst_3 = arith.constant dense<0.000000e+00> : vector<48xf32>
    %13 = vector.multi_reduction <add>, %12, %cst_3 [1] : vector<48x128xf32> to vector<48xf32>
    %14 = vector.shape_cast %13 : vector<48xf32> to vector<48x1xf32>
    %cst_4 = arith.constant 6.250000e-02 : f32
    %15 = vector.broadcast %cst_4 : f32 to vector<48x1xf32>
    %16 = arith.mulf %14, %15 : vector<48x1xf32>
    %cst_5 = arith.constant 9.99999974E-6 : f32
    %17 = vector.broadcast %cst_5 : f32 to vector<48x1xf32>
    %18 = arith.addf %16, %17 : vector<48x1xf32>
    %19 = math.rsqrt %18 : vector<48x1xf32>
    %20 = vector.broadcast %19 : vector<48x1xf32> to vector<48x128xf32>
    %21 = arith.mulf %11, %20 : vector<48x128xf32>
    %c0_6 = arith.constant 0 : index
    %c0_7 = arith.constant 0 : index
    %22 = vector.load %arg4[%c0_6, %c0_7] : memref<1x128xf32, #tpu.memory_space<vmem>>, vector<1x128xf32>
    %23 = vector.broadcast %22 : vector<1x128xf32> to vector<48x128xf32>
    %24 = arith.mulf %21, %23 : vector<48x128xf32>
    %c0_8 = arith.constant 0 : index
    %c0_9 = arith.constant 0 : index
    %25 = vector.load %arg5[%c0_8, %c0_9] : memref<1x128xf32, #tpu.memory_space<vmem>>, vector<1x128xf32>
    %26 = vector.broadcast %25 : vector<1x128xf32> to vector<48x128xf32>
    %27 = arith.addf %24, %26 : vector<48x128xf32>
    %28 = arith.truncf %27 : vector<48x128xf32> to vector<48x128xbf16>
    %c0_10 = arith.constant 0 : index
    %c0_11 = arith.constant 0 : index
    %29 = vector.load %arg2[%c0_10, %c0_11] : memref<128x128xbf16, #tpu.memory_space<vmem>>, vector<128x128xbf16>
    %cst_12 = arith.constant dense<0.000000e+00> : vector<48x128xf32>
    %30 = tpu.matmul %28, %29, %cst_12 {dimension_numbers = #tpu.dot_dimension_numbers<[1], [1], [0], [0], [0, 0, 1, 0], [], []>} : vector<48x128xbf16>, vector<128x128xbf16>, vector<48x128xf32> -> vector<48x128xf32>
    %c0_13 = arith.constant 0 : index
    %c0_14 = arith.constant 0 : index
    %31 = vector.load %arg3[%c0_13, %c0_14] : memref<1x128xf32, #tpu.memory_space<vmem>>, vector<1x128xf32>
    %32 = vector.broadcast %31 : vector<1x128xf32> to vector<48x128xf32>
    %33 = arith.addf %30, %32 : vector<48x128xf32>
    %34 = arith.truncf %33 : vector<48x128xf32> to vector<48x128xbf16>
    %c0_15 = arith.constant 0 : index
    %c0_16 = arith.constant 0 : index
    %35 = vector.load %arg7[%c0_15, %c0_16] : memref<48x128xbf16, #tpu.memory_space<vmem>>, vector<48x128xbf16>
    tpu.vector_store %arg7[%c0_15, %c0_16], %34 {strides = array<i32>} : memref<48x128xbf16, #tpu.memory_space<vmem>>, vector<48x128xbf16>,
    return
  }
  func.func @transform_0(%arg0: i32) -> (i32, i32) {
    %c0_i32 = arith.constant 0 : i32
    %c0_i32_0 = arith.constant 0 : i32
    return %arg0, %c0_i32 : i32, i32
  }
  func.func @transform_1(%arg0: i32) -> (i32, i32) {
    %c0_i32 = arith.constant 0 : i32
    %c0_i32_0 = arith.constant 0 : i32
    %c0_i32_1 = arith.constant 0 : i32
    return %c0_i32, %c0_i32_0 : i32, i32
  }
  func.func @transform_2(%arg0: i32) -> (i32, i32) {
    %c0_i32 = arith.constant 0 : i32
    %c0_i32_0 = arith.constant 0 : i32
    %c0_i32_1 = arith.constant 0 : i32
    return %c0_i32, %c0_i32_0 : i32, i32
  }
  func.func @transform_3(%arg0: i32) -> (i32, i32) {
    %c0_i32 = arith.constant 0 : i32
    %c0_i32_0 = arith.constant 0 : i32
    %c0_i32_1 = arith.constant 0 : i32
    return %c0_i32, %c0_i32_0 : i32, i32
  }
  func.func @transform_4(%arg0: i32) -> (i32, i32) {
    %c0_i32 = arith.constant 0 : i32
    %c0_i32_0 = arith.constant 0 : i32
    %c0_i32_1 = arith.constant 0 : i32
    return %c0_i32, %c0_i32_0 : i32, i32
  }
  func.func @transform_5(%arg0: i32) -> (i32, i32) {
    %c0_i32 = arith.constant 0 : i32
    %c0_i32_0 = arith.constant 0 : i32
    %c0_i32_1 = arith.constant 0 : i32
    return %c0_i32, %c0_i32_0 : i32, i32
  }
  func.func @transform_6(%arg0: i32) -> (i32, i32) {
    %c0_i32 = arith.constant 0 : i32
    %c0_i32_0 = arith.constant 0 : i32
    return %arg0, %c0_i32 : i32, i32
  }
}

module attributes {stable_mosaic.version = 11 : i64} {
  func.func @_mha_kernel(%arg0: i32, %arg1: memref<6x8x48xbf16, #tpu.memory_space<vmem>>, %arg2: memref<6x8x16xbf16, #tpu.memory_space<vmem>>) attributes {dimension_semantics = [#tpu.dimension_semantics<parallel>], iteration_bounds = array<i64: 1>, scalar_prefetch = 0 : i64, scratch_operands = 0 : i64, tpu.core_type = #tpu.core_type<tc>, window_params = [{transform_indices = @transform_0, window_bounds = array<i64: 6, 8, 48>}, {transform_indices = @transform_1, window_bounds = array<i64: 6, 8, 16>}]} {
    %c0 = arith.constant 0 : index
    %c0_0 = arith.constant 0 : index
    %c0_1 = arith.constant 0 : index
    %0 = vector.load %arg1[%c0, %c0_0, %c0_1] : memref<6x8x48xbf16, #tpu.memory_space<vmem>>, vector<6x8x48xbf16>
    %1 = vector.extract_strided_slice %0 {offsets = [0, 0, 0], sizes = [6, 8, 4], strides = [1, 1, 1]} : vector<6x8x48xbf16> to vector<6x8x4xbf16>
    %2 = vector.extract_strided_slice %0 {offsets = [0, 0, 16], sizes = [6, 8, 4], strides = [1, 1, 1]} : vector<6x8x48xbf16> to vector<6x8x4xbf16>
    %3 = vector.extract_strided_slice %0 {offsets = [0, 0, 32], sizes = [6, 8, 4], strides = [1, 1, 1]} : vector<6x8x48xbf16> to vector<6x8x4xbf16>
    %cst = arith.constant dense<0.000000e+00> : vector<6x8x8xf32>
    %4 = tpu.matmul %1, %2, %cst {dimension_numbers = #tpu.dot_dimension_numbers<[2], [2], [1], [1], [0, 0, 0, 1, 1, 1], [0], [0]>} : vector<6x8x4xbf16>, vector<6x8x4xbf16>, vector<6x8x8xf32> -> vector<6x8x8xf32>
    %cst_2 = arith.constant 5.000000e-01 : f32
    %5 = vector.broadcast %cst_2 : f32 to vector<6x8x8xf32>
    %6 = arith.mulf %4, %5 : vector<6x8x8xf32>
    %cst_3 = arith.constant dense<0xFF800000> : vector<6x8xf32>
    %7 = vector.multi_reduction <maximumf>, %6, %cst_3 [2] : vector<6x8x8xf32> to vector<6x8xf32>
    %8 = vector.shape_cast %7 : vector<6x8xf32> to vector<6x8x1xf32>
    %9 = vector.broadcast %8 : vector<6x8x1xf32> to vector<6x8x8xf32>
    %10 = arith.subf %6, %9 : vector<6x8x8xf32>
    %11 = math.exp %10 : vector<6x8x8xf32>
    %cst_4 = arith.constant dense<0.000000e+00> : vector<6x8xf32>
    %12 = vector.multi_reduction <add>, %11, %cst_4 [2] : vector<6x8x8xf32> to vector<6x8xf32>
    %13 = vector.shape_cast %12 : vector<6x8xf32> to vector<6x8x1xf32>
    %14 = vector.broadcast %13 : vector<6x8x1xf32> to vector<6x8x8xf32>
    %15 = arith.divf %11, %14 : vector<6x8x8xf32>
    %16 = arith.truncf %15 : vector<6x8x8xf32> to vector<6x8x8xbf16>
    %cst_5 = arith.constant dense<0.000000e+00> : vector<6x8x4xf32>
    %17 = tpu.matmul %16, %3, %cst_5 {dimension_numbers = #tpu.dot_dimension_numbers<[2], [1], [1], [2], [0, 0, 0, 1, 1, 2], [0], [0]>} : vector<6x8x8xbf16>, vector<6x8x4xbf16>, vector<6x8x4xf32> -> vector<6x8x4xf32>
    %18 = vector.extract_strided_slice %0 {offsets = [0, 0, 4], sizes = [6, 8, 4], strides = [1, 1, 1]} : vector<6x8x48xbf16> to vector<6x8x4xbf16>
    %19 = vector.extract_strided_slice %0 {offsets = [0, 0, 20], sizes = [6, 8, 4], strides = [1, 1, 1]} : vector<6x8x48xbf16> to vector<6x8x4xbf16>
    %20 = vector.extract_strided_slice %0 {offsets = [0, 0, 36], sizes = [6, 8, 4], strides = [1, 1, 1]} : vector<6x8x48xbf16> to vector<6x8x4xbf16>
    %cst_6 = arith.constant dense<0.000000e+00> : vector<6x8x8xf32>
    %21 = tpu.matmul %18, %19, %cst_6 {dimension_numbers = #tpu.dot_dimension_numbers<[2], [2], [1], [1], [0, 0, 0, 1, 1, 1], [0], [0]>} : vector<6x8x4xbf16>, vector<6x8x4xbf16>, vector<6x8x8xf32> -> vector<6x8x8xf32>
    %cst_7 = arith.constant 5.000000e-01 : f32
    %22 = vector.broadcast %cst_7 : f32 to vector<6x8x8xf32>
    %23 = arith.mulf %21, %22 : vector<6x8x8xf32>
    %cst_8 = arith.constant dense<0xFF800000> : vector<6x8xf32>
    %24 = vector.multi_reduction <maximumf>, %23, %cst_8 [2] : vector<6x8x8xf32> to vector<6x8xf32>
    %25 = vector.shape_cast %24 : vector<6x8xf32> to vector<6x8x1xf32>
    %26 = vector.broadcast %25 : vector<6x8x1xf32> to vector<6x8x8xf32>
    %27 = arith.subf %23, %26 : vector<6x8x8xf32>
    %28 = math.exp %27 : vector<6x8x8xf32>
    %cst_9 = arith.constant dense<0.000000e+00> : vector<6x8xf32>
    %29 = vector.multi_reduction <add>, %28, %cst_9 [2] : vector<6x8x8xf32> to vector<6x8xf32>
    %30 = vector.shape_cast %29 : vector<6x8xf32> to vector<6x8x1xf32>
    %31 = vector.broadcast %30 : vector<6x8x1xf32> to vector<6x8x8xf32>
    %32 = arith.divf %28, %31 : vector<6x8x8xf32>
    %33 = arith.truncf %32 : vector<6x8x8xf32> to vector<6x8x8xbf16>
    %cst_10 = arith.constant dense<0.000000e+00> : vector<6x8x4xf32>
    %34 = tpu.matmul %33, %20, %cst_10 {dimension_numbers = #tpu.dot_dimension_numbers<[2], [1], [1], [2], [0, 0, 0, 1, 1, 2], [0], [0]>} : vector<6x8x8xbf16>, vector<6x8x4xbf16>, vector<6x8x4xf32> -> vector<6x8x4xf32>
    %35 = vector.extract_strided_slice %0 {offsets = [0, 0, 8], sizes = [6, 8, 4], strides = [1, 1, 1]} : vector<6x8x48xbf16> to vector<6x8x4xbf16>
    %36 = vector.extract_strided_slice %0 {offsets = [0, 0, 24], sizes = [6, 8, 4], strides = [1, 1, 1]} : vector<6x8x48xbf16> to vector<6x8x4xbf16>
    %37 = vector.extract_strided_slice %0 {offsets = [0, 0, 40], sizes = [6, 8, 4], strides = [1, 1, 1]} : vector<6x8x48xbf16> to vector<6x8x4xbf16>
    %cst_11 = arith.constant dense<0.000000e+00> : vector<6x8x8xf32>
    %38 = tpu.matmul %35, %36, %cst_11 {dimension_numbers = #tpu.dot_dimension_numbers<[2], [2], [1], [1], [0, 0, 0, 1, 1, 1], [0], [0]>} : vector<6x8x4xbf16>, vector<6x8x4xbf16>, vector<6x8x8xf32> -> vector<6x8x8xf32>
    %cst_12 = arith.constant 5.000000e-01 : f32
    %39 = vector.broadcast %cst_12 : f32 to vector<6x8x8xf32>
    %40 = arith.mulf %38, %39 : vector<6x8x8xf32>
    %cst_13 = arith.constant dense<0xFF800000> : vector<6x8xf32>
    %41 = vector.multi_reduction <maximumf>, %40, %cst_13 [2] : vector<6x8x8xf32> to vector<6x8xf32>
    %42 = vector.shape_cast %41 : vector<6x8xf32> to vector<6x8x1xf32>
    %43 = vector.broadcast %42 : vector<6x8x1xf32> to vector<6x8x8xf32>
    %44 = arith.subf %40, %43 : vector<6x8x8xf32>
    %45 = math.exp %44 : vector<6x8x8xf32>
    %cst_14 = arith.constant dense<0.000000e+00> : vector<6x8xf32>
    %46 = vector.multi_reduction <add>, %45, %cst_14 [2] : vector<6x8x8xf32> to vector<6x8xf32>
    %47 = vector.shape_cast %46 : vector<6x8xf32> to vector<6x8x1xf32>
    %48 = vector.broadcast %47 : vector<6x8x1xf32> to vector<6x8x8xf32>
    %49 = arith.divf %45, %48 : vector<6x8x8xf32>
    %50 = arith.truncf %49 : vector<6x8x8xf32> to vector<6x8x8xbf16>
    %cst_15 = arith.constant dense<0.000000e+00> : vector<6x8x4xf32>
    %51 = tpu.matmul %50, %37, %cst_15 {dimension_numbers = #tpu.dot_dimension_numbers<[2], [1], [1], [2], [0, 0, 0, 1, 1, 2], [0], [0]>} : vector<6x8x8xbf16>, vector<6x8x4xbf16>, vector<6x8x4xf32> -> vector<6x8x4xf32>
    %52 = vector.extract_strided_slice %0 {offsets = [0, 0, 12], sizes = [6, 8, 4], strides = [1, 1, 1]} : vector<6x8x48xbf16> to vector<6x8x4xbf16>
    %53 = vector.extract_strided_slice %0 {offsets = [0, 0, 28], sizes = [6, 8, 4], strides = [1, 1, 1]} : vector<6x8x48xbf16> to vector<6x8x4xbf16>
    %54 = vector.extract_strided_slice %0 {offsets = [0, 0, 44], sizes = [6, 8, 4], strides = [1, 1, 1]} : vector<6x8x48xbf16> to vector<6x8x4xbf16>
    %cst_16 = arith.constant dense<0.000000e+00> : vector<6x8x8xf32>
    %55 = tpu.matmul %52, %53, %cst_16 {dimension_numbers = #tpu.dot_dimension_numbers<[2], [2], [1], [1], [0, 0, 0, 1, 1, 1], [0], [0]>} : vector<6x8x4xbf16>, vector<6x8x4xbf16>, vector<6x8x8xf32> -> vector<6x8x8xf32>
    %cst_17 = arith.constant 5.000000e-01 : f32
    %56 = vector.broadcast %cst_17 : f32 to vector<6x8x8xf32>
    %57 = arith.mulf %55, %56 : vector<6x8x8xf32>
    %cst_18 = arith.constant dense<0xFF800000> : vector<6x8xf32>
    %58 = vector.multi_reduction <maximumf>, %57, %cst_18 [2] : vector<6x8x8xf32> to vector<6x8xf32>
    %59 = vector.shape_cast %58 : vector<6x8xf32> to vector<6x8x1xf32>
    %60 = vector.broadcast %59 : vector<6x8x1xf32> to vector<6x8x8xf32>
    %61 = arith.subf %57, %60 : vector<6x8x8xf32>
    %62 = math.exp %61 : vector<6x8x8xf32>
    %cst_19 = arith.constant dense<0.000000e+00> : vector<6x8xf32>
    %63 = vector.multi_reduction <add>, %62, %cst_19 [2] : vector<6x8x8xf32> to vector<6x8xf32>
    %64 = vector.shape_cast %63 : vector<6x8xf32> to vector<6x8x1xf32>
    %65 = vector.broadcast %64 : vector<6x8x1xf32> to vector<6x8x8xf32>
    %66 = arith.divf %62, %65 : vector<6x8x8xf32>
    %67 = arith.truncf %66 : vector<6x8x8xf32> to vector<6x8x8xbf16>
    %cst_20 = arith.constant dense<0.000000e+00> : vector<6x8x4xf32>
    %68 = tpu.matmul %67, %54, %cst_20 {dimension_numbers = #tpu.dot_dimension_numbers<[2], [1], [1], [2], [0, 0, 0, 1, 1, 2], [0], [0]>} : vector<6x8x8xbf16>, vector<6x8x4xbf16>, vector<6x8x4xf32> -> vector<6x8x4xf32>
    %69 = tpu.concatenate %17, %34, %51, %68 in 2 : vector<6x8x4xf32>, vector<6x8x4xf32>, vector<6x8x4xf32>, vector<6x8x4xf32> -> vector<6x8x16xf32>
    %70 = arith.truncf %69 : vector<6x8x16xf32> to vector<6x8x16xbf16>
    %c0_21 = arith.constant 0 : index
    %c0_22 = arith.constant 0 : index
    %c0_23 = arith.constant 0 : index
    %71 = vector.load %arg2[%c0_21, %c0_22, %c0_23] : memref<6x8x16xbf16, #tpu.memory_space<vmem>>, vector<6x8x16xbf16>
    tpu.vector_store %arg2[%c0_21, %c0_22, %c0_23], %70 {strides = array<i32>} : memref<6x8x16xbf16, #tpu.memory_space<vmem>>, vector<6x8x16xbf16>,
    return
  }
  func.func @transform_0(%arg0: i32) -> (i32, i32, i32) {
    %c0_i32 = arith.constant 0 : i32
    %c0_i32_0 = arith.constant 0 : i32
    %c0_i32_1 = arith.constant 0 : i32
    return %arg0, %c0_i32, %c0_i32_0 : i32, i32, i32
  }
  func.func @transform_1(%arg0: i32) -> (i32, i32, i32) {
    %c0_i32 = arith.constant 0 : i32
    %c0_i32_0 = arith.constant 0 : i32
    %c0_i32_1 = arith.constant 0 : i32
    return %arg0, %c0_i32, %c0_i32_0 : i32, i32, i32
  }
}

module attributes {stable_mosaic.version = 11 : i64} {
  func.func @_linear_kernel(%arg0: i32, %arg1: memref<48x128xbf16, #tpu.memory_space<vmem>>, %arg2: memref<128x128xbf16, #tpu.memory_space<vmem>>, %arg3: memref<1x128xf32, #tpu.memory_space<vmem>>, %arg4: memref<1x128xf32, #tpu.memory_space<vmem>>, %arg5: memref<1x128xf32, #tpu.memory_space<vmem>>, %arg6: memref<1x1xf32, #tpu.memory_space<vmem>>, %arg7: memref<48x128xf32, #tpu.memory_space<vmem>>) attributes {dimension_semantics = [#tpu.dimension_semantics<parallel>], iteration_bounds = array<i64: 1>, scalar_prefetch = 0 : i64, scratch_operands = 0 : i64, tpu.core_type = #tpu.core_type<tc>, window_params = [{transform_indices = @transform_0, window_bounds = array<i64: 48, 128>}, {pipeline_mode = #tpu.pipeline_mode<synchronous>, transform_indices = @transform_1, window_bounds = array<i64: 128, 128>}, {pipeline_mode = #tpu.pipeline_mode<synchronous>, transform_indices = @transform_2, window_bounds = array<i64: 1, 128>}, {pipeline_mode = #tpu.pipeline_mode<synchronous>, transform_indices = @transform_3, window_bounds = array<i64: 1, 128>}, {pipeline_mode = #tpu.pipeline_mode<synchronous>, transform_indices = @transform_4, window_bounds = array<i64: 1, 128>}, {pipeline_mode = #tpu.pipeline_mode<synchronous>, transform_indices = @transform_5, window_bounds = array<i64: 1, 1>}, {transform_indices = @transform_6, window_bounds = array<i64: 48, 128>}]} {
    %c0 = arith.constant 0 : index
    %c0_0 = arith.constant 0 : index
    %0 = vector.load %arg1[%c0, %c0_0] : memref<48x128xbf16, #tpu.memory_space<vmem>>, vector<48x128xbf16>
    %c0_1 = arith.constant 0 : index
    %c0_2 = arith.constant 0 : index
    %1 = vector.load %arg2[%c0_1, %c0_2] : memref<128x128xbf16, #tpu.memory_space<vmem>>, vector<128x128xbf16>
    %cst = arith.constant dense<0.000000e+00> : vector<48x128xf32>
    %2 = tpu.matmul %0, %1, %cst {dimension_numbers = #tpu.dot_dimension_numbers<[1], [1], [0], [0], [0, 0, 1, 0], [], []>} : vector<48x128xbf16>, vector<128x128xbf16>, vector<48x128xf32> -> vector<48x128xf32>
    %c0_3 = arith.constant 0 : index
    %c0_4 = arith.constant 0 : index
    %3 = vector.load %arg3[%c0_3, %c0_4] : memref<1x128xf32, #tpu.memory_space<vmem>>, vector<1x128xf32>
    %4 = vector.broadcast %3 : vector<1x128xf32> to vector<48x128xf32>
    %5 = arith.addf %2, %4 : vector<48x128xf32>
    %c0_5 = arith.constant 0 : index
    %c0_6 = arith.constant 0 : index
    %6 = vector.load %arg7[%c0_5, %c0_6] : memref<48x128xf32, #tpu.memory_space<vmem>>, vector<48x128xf32>
    tpu.vector_store %arg7[%c0_5, %c0_6], %5 {strides = array<i32>} : memref<48x128xf32, #tpu.memory_space<vmem>>, vector<48x128xf32>,
    return
  }
  func.func @transform_0(%arg0: i32) -> (i32, i32) {
    %c0_i32 = arith.constant 0 : i32
    %c0_i32_0 = arith.constant 0 : i32
    return %arg0, %c0_i32 : i32, i32
  }
  func.func @transform_1(%arg0: i32) -> (i32, i32) {
    %c0_i32 = arith.constant 0 : i32
    %c0_i32_0 = arith.constant 0 : i32
    %c0_i32_1 = arith.constant 0 : i32
    return %c0_i32, %c0_i32_0 : i32, i32
  }
  func.func @transform_2(%arg0: i32) -> (i32, i32) {
    %c0_i32 = arith.constant 0 : i32
    %c0_i32_0 = arith.constant 0 : i32
    %c0_i32_1 = arith.constant 0 : i32
    return %c0_i32, %c0_i32_0 : i32, i32
  }
  func.func @transform_3(%arg0: i32) -> (i32, i32) {
    %c0_i32 = arith.constant 0 : i32
    %c0_i32_0 = arith.constant 0 : i32
    %c0_i32_1 = arith.constant 0 : i32
    return %c0_i32, %c0_i32_0 : i32, i32
  }
  func.func @transform_4(%arg0: i32) -> (i32, i32) {
    %c0_i32 = arith.constant 0 : i32
    %c0_i32_0 = arith.constant 0 : i32
    %c0_i32_1 = arith.constant 0 : i32
    return %c0_i32, %c0_i32_0 : i32, i32
  }
  func.func @transform_5(%arg0: i32) -> (i32, i32) {
    %c0_i32 = arith.constant 0 : i32
    %c0_i32_0 = arith.constant 0 : i32
    %c0_i32_1 = arith.constant 0 : i32
    return %c0_i32, %c0_i32_0 : i32, i32
  }
  func.func @transform_6(%arg0: i32) -> (i32, i32) {
    %c0_i32 = arith.constant 0 : i32
    %c0_i32_0 = arith.constant 0 : i32
    return %arg0, %c0_i32 : i32, i32
  }
}

module attributes {stable_mosaic.version = 11 : i64} {
  func.func @_linear_kernel(%arg0: i32, %arg1: memref<48x128xf32, #tpu.memory_space<vmem>>, %arg2: memref<128x128xbf16, #tpu.memory_space<vmem>>, %arg3: memref<1x128xf32, #tpu.memory_space<vmem>>, %arg4: memref<1x128xf32, #tpu.memory_space<vmem>>, %arg5: memref<1x128xf32, #tpu.memory_space<vmem>>, %arg6: memref<1x1xf32, #tpu.memory_space<vmem>>, %arg7: memref<48x128xf32, #tpu.memory_space<vmem>>) attributes {dimension_semantics = [#tpu.dimension_semantics<parallel>], iteration_bounds = array<i64: 1>, scalar_prefetch = 0 : i64, scratch_operands = 0 : i64, tpu.core_type = #tpu.core_type<tc>, window_params = [{transform_indices = @transform_0, window_bounds = array<i64: 48, 128>}, {pipeline_mode = #tpu.pipeline_mode<synchronous>, transform_indices = @transform_1, window_bounds = array<i64: 128, 128>}, {pipeline_mode = #tpu.pipeline_mode<synchronous>, transform_indices = @transform_2, window_bounds = array<i64: 1, 128>}, {pipeline_mode = #tpu.pipeline_mode<synchronous>, transform_indices = @transform_3, window_bounds = array<i64: 1, 128>}, {pipeline_mode = #tpu.pipeline_mode<synchronous>, transform_indices = @transform_4, window_bounds = array<i64: 1, 128>}, {pipeline_mode = #tpu.pipeline_mode<synchronous>, transform_indices = @transform_5, window_bounds = array<i64: 1, 1>}, {transform_indices = @transform_6, window_bounds = array<i64: 48, 128>}]} {
    %c0 = arith.constant 0 : index
    %c0_0 = arith.constant 0 : index
    %0 = vector.load %arg1[%c0, %c0_0] : memref<48x128xf32, #tpu.memory_space<vmem>>, vector<48x128xf32>
    %cst = arith.constant dense<0.000000e+00> : vector<48xf32>
    %1 = vector.multi_reduction <add>, %0, %cst [1] : vector<48x128xf32> to vector<48xf32>
    %2 = vector.shape_cast %1 : vector<48xf32> to vector<48x1xf32>
    %cst_1 = arith.constant 6.250000e-02 : f32
    %3 = vector.broadcast %cst_1 : f32 to vector<48x1xf32>
    %4 = arith.mulf %2, %3 : vector<48x1xf32>
    %5 = vector.broadcast %4 : vector<48x1xf32> to vector<48x128xf32>
    %6 = arith.subf %0, %5 : vector<48x128xf32>
    %7 = tpu.iota {dimensions = array<i32: 1>} : vector<48x128xi32>
    %c16_i32 = arith.constant 16 : i32
    %8 = vector.broadcast %c16_i32 : i32 to vector<48x128xi32>
    %9 = arith.cmpi slt, %7, %8 : vector<48x128xi32>
    %cst_2 = arith.constant 0.000000e+00 : f32
    %10 = vector.broadcast %cst_2 : f32 to vector<48x128xf32>
    %11 = arith.select %9, %6, %10 : vector<48x128xi1>, vector<48x128xf32>
    %12 = arith.mulf %11, %11 : vector<48x128xf32>
    %cst_3 = arith.constant dense<0.000000e+00> : vector<48xf32>
    %13 = vector.multi_reduction <add>, %12, %cst_3 [1] : vector<48x128xf32> to vector<48xf32>
    %14 = vector.shape_cast %13 : vector<48xf32> to vector<48x1xf32>
    %cst_4 = arith.constant 6.250000e-02 : f32
    %15 = vector.broadcast %cst_4 : f32 to vector<48x1xf32>
    %16 = arith.mulf %14, %15 : vector<48x1xf32>
    %cst_5 = arith.constant 9.99999974E-6 : f32
    %17 = vector.broadcast %cst_5 : f32 to vector<48x1xf32>
    %18 = arith.addf %16, %17 : vector<48x1xf32>
    %19 = math.rsqrt %18 : vector<48x1xf32>
    %20 = vector.broadcast %19 : vector<48x1xf32> to vector<48x128xf32>
    %21 = arith.mulf %11, %20 : vector<48x128xf32>
    %c0_6 = arith.constant 0 : index
    %c0_7 = arith.constant 0 : index
    %22 = vector.load %arg4[%c0_6, %c0_7] : memref<1x128xf32, #tpu.memory_space<vmem>>, vector<1x128xf32>
    %23 = vector.broadcast %22 : vector<1x128xf32> to vector<48x128xf32>
    %24 = arith.mulf %21, %23 : vector<48x128xf32>
    %c0_8 = arith.constant 0 : index
    %c0_9 = arith.constant 0 : index
    %25 = vector.load %arg5[%c0_8, %c0_9] : memref<1x128xf32, #tpu.memory_space<vmem>>, vector<1x128xf32>
    %26 = vector.broadcast %25 : vector<1x128xf32> to vector<48x128xf32>
    %27 = arith.addf %24, %26 : vector<48x128xf32>
    %28 = arith.truncf %27 : vector<48x128xf32> to vector<48x128xbf16>
    %c0_10 = arith.constant 0 : index
    %c0_11 = arith.constant 0 : index
    %29 = vector.load %arg2[%c0_10, %c0_11] : memref<128x128xbf16, #tpu.memory_space<vmem>>, vector<128x128xbf16>
    %cst_12 = arith.constant dense<0.000000e+00> : vector<48x128xf32>
    %30 = tpu.matmul %28, %29, %cst_12 {dimension_numbers = #tpu.dot_dimension_numbers<[1], [1], [0], [0], [0, 0, 1, 0], [], []>} : vector<48x128xbf16>, vector<128x128xbf16>, vector<48x128xf32> -> vector<48x128xf32>
    %c0_13 = arith.constant 0 : index
    %c0_14 = arith.constant 0 : index
    %31 = vector.load %arg3[%c0_13, %c0_14] : memref<1x128xf32, #tpu.memory_space<vmem>>, vector<1x128xf32>
    %32 = vector.broadcast %31 : vector<1x128xf32> to vector<48x128xf32>
    %33 = arith.addf %30, %32 : vector<48x128xf32>
    %cst_15 = arith.constant 0.000000e+00 : f32
    %34 = vector.broadcast %cst_15 : f32 to vector<48x128xf32>
    %35 = arith.maximumf %33, %34 : vector<48x128xf32>
    %c0_16 = arith.constant 0 : index
    %c0_17 = arith.constant 0 : index
    %36 = vector.load %arg7[%c0_16, %c0_17] : memref<48x128xf32, #tpu.memory_space<vmem>>, vector<48x128xf32>
    tpu.vector_store %arg7[%c0_16, %c0_17], %35 {strides = array<i32>} : memref<48x128xf32, #tpu.memory_space<vmem>>, vector<48x128xf32>,
    return
  }
  func.func @transform_0(%arg0: i32) -> (i32, i32) {
    %c0_i32 = arith.constant 0 : i32
    %c0_i32_0 = arith.constant 0 : i32
    return %arg0, %c0_i32 : i32, i32
  }
  func.func @transform_1(%arg0: i32) -> (i32, i32) {
    %c0_i32 = arith.constant 0 : i32
    %c0_i32_0 = arith.constant 0 : i32
    %c0_i32_1 = arith.constant 0 : i32
    return %c0_i32, %c0_i32_0 : i32, i32
  }
  func.func @transform_2(%arg0: i32) -> (i32, i32) {
    %c0_i32 = arith.constant 0 : i32
    %c0_i32_0 = arith.constant 0 : i32
    %c0_i32_1 = arith.constant 0 : i32
    return %c0_i32, %c0_i32_0 : i32, i32
  }
  func.func @transform_3(%arg0: i32) -> (i32, i32) {
    %c0_i32 = arith.constant 0 : i32
    %c0_i32_0 = arith.constant 0 : i32
    %c0_i32_1 = arith.constant 0 : i32
    return %c0_i32, %c0_i32_0 : i32, i32
  }
  func.func @transform_4(%arg0: i32) -> (i32, i32) {
    %c0_i32 = arith.constant 0 : i32
    %c0_i32_0 = arith.constant 0 : i32
    %c0_i32_1 = arith.constant 0 : i32
    return %c0_i32, %c0_i32_0 : i32, i32
  }
  func.func @transform_5(%arg0: i32) -> (i32, i32) {
    %c0_i32 = arith.constant 0 : i32
    %c0_i32_0 = arith.constant 0 : i32
    %c0_i32_1 = arith.constant 0 : i32
    return %c0_i32, %c0_i32_0 : i32, i32
  }
  func.func @transform_6(%arg0: i32) -> (i32, i32) {
    %c0_i32 = arith.constant 0 : i32
    %c0_i32_0 = arith.constant 0 : i32
    return %arg0, %c0_i32 : i32, i32
  }
}

module attributes {stable_mosaic.version = 11 : i64} {
  func.func @_conv3x3_kernel(%arg0: i32, %arg1: memref<1x176x32xf32, #tpu.memory_space<vmem>>, %arg2: memref<9x16x32xbf16, #tpu.memory_space<vmem>>, %arg3: memref<1x16xf32, #tpu.memory_space<vmem>>, %arg4: memref<1x128x16xf32, #tpu.memory_space<vmem>>) attributes {dimension_semantics = [#tpu.dimension_semantics<parallel>], iteration_bounds = array<i64: 1>, scalar_prefetch = 0 : i64, scratch_operands = 0 : i64, tpu.core_type = #tpu.core_type<tc>, window_params = [{transform_indices = @transform_0, window_bounds = array<i64: 1, 176, 32>}, {pipeline_mode = #tpu.pipeline_mode<synchronous>, transform_indices = @transform_1, window_bounds = array<i64: 9, 16, 32>}, {pipeline_mode = #tpu.pipeline_mode<synchronous>, transform_indices = @transform_2, window_bounds = array<i64: 1, 16>}, {transform_indices = @transform_3, window_bounds = array<i64: 1, 128, 16>}]} {
    %c0 = arith.constant 0 : index
    %c7 = arith.constant 7 : index
    %c0_0 = arith.constant 0 : index
    %0 = vector.load %arg1[%c0, %c7, %c0_0] : memref<1x176x32xf32, #tpu.memory_space<vmem>>, vector<1x128x32xf32>
    %1 = vector.shape_cast %0 : vector<1x128x32xf32> to vector<128x32xf32>
    %2 = arith.truncf %1 : vector<128x32xf32> to vector<128x32xbf16>
    %c0_1 = arith.constant 0 : index
    %c0_2 = arith.constant 0 : index
    %c0_3 = arith.constant 0 : index
    %3 = vector.load %arg2[%c0_1, %c0_2, %c0_3] : memref<9x16x32xbf16, #tpu.memory_space<vmem>>, vector<1x16x32xbf16>
    %4 = vector.shape_cast %3 : vector<1x16x32xbf16> to vector<16x32xbf16>
    %cst = arith.constant dense<0.000000e+00> : vector<128x16xf32>
    %5 = tpu.matmul %2, %4, %cst {dimension_numbers = #tpu.dot_dimension_numbers<[1], [1], [0], [0], [0, 0, 1, 0], [], []>} : vector<128x32xbf16>, vector<16x32xbf16>, vector<128x16xf32> -> vector<128x16xf32>
    %c0_4 = arith.constant 0 : index
    %c8 = arith.constant 8 : index
    %c0_5 = arith.constant 0 : index
    %6 = vector.load %arg1[%c0_4, %c8, %c0_5] : memref<1x176x32xf32, #tpu.memory_space<vmem>>, vector<1x128x32xf32>
    %7 = vector.shape_cast %6 : vector<1x128x32xf32> to vector<128x32xf32>
    %8 = arith.truncf %7 : vector<128x32xf32> to vector<128x32xbf16>
    %c1 = arith.constant 1 : index
    %c0_6 = arith.constant 0 : index
    %c0_7 = arith.constant 0 : index
    %9 = vector.load %arg2[%c1, %c0_6, %c0_7] : memref<9x16x32xbf16, #tpu.memory_space<vmem>>, vector<1x16x32xbf16>
    %10 = vector.shape_cast %9 : vector<1x16x32xbf16> to vector<16x32xbf16>
    %cst_8 = arith.constant dense<0.000000e+00> : vector<128x16xf32>
    %11 = tpu.matmul %8, %10, %cst_8 {dimension_numbers = #tpu.dot_dimension_numbers<[1], [1], [0], [0], [0, 0, 1, 0], [], []>} : vector<128x32xbf16>, vector<16x32xbf16>, vector<128x16xf32> -> vector<128x16xf32>
    %12 = arith.addf %5, %11 : vector<128x16xf32>
    %c0_9 = arith.constant 0 : index
    %c9 = arith.constant 9 : index
    %c0_10 = arith.constant 0 : index
    %13 = vector.load %arg1[%c0_9, %c9, %c0_10] : memref<1x176x32xf32, #tpu.memory_space<vmem>>, vector<1x128x32xf32>
    %14 = vector.shape_cast %13 : vector<1x128x32xf32> to vector<128x32xf32>
    %15 = arith.truncf %14 : vector<128x32xf32> to vector<128x32xbf16>
    %c2 = arith.constant 2 : index
    %c0_11 = arith.constant 0 : index
    %c0_12 = arith.constant 0 : index
    %16 = vector.load %arg2[%c2, %c0_11, %c0_12] : memref<9x16x32xbf16, #tpu.memory_space<vmem>>, vector<1x16x32xbf16>
    %17 = vector.shape_cast %16 : vector<1x16x32xbf16> to vector<16x32xbf16>
    %cst_13 = arith.constant dense<0.000000e+00> : vector<128x16xf32>
    %18 = tpu.matmul %15, %17, %cst_13 {dimension_numbers = #tpu.dot_dimension_numbers<[1], [1], [0], [0], [0, 0, 1, 0], [], []>} : vector<128x32xbf16>, vector<16x32xbf16>, vector<128x16xf32> -> vector<128x16xf32>
    %19 = arith.addf %12, %18 : vector<128x16xf32>
    %c0_14 = arith.constant 0 : index
    %c23 = arith.constant 23 : index
    %c0_15 = arith.constant 0 : index
    %20 = vector.load %arg1[%c0_14, %c23, %c0_15] : memref<1x176x32xf32, #tpu.memory_space<vmem>>, vector<1x128x32xf32>
    %21 = vector.shape_cast %20 : vector<1x128x32xf32> to vector<128x32xf32>
    %22 = arith.truncf %21 : vector<128x32xf32> to vector<128x32xbf16>
    %c3 = arith.constant 3 : index
    %c0_16 = arith.constant 0 : index
    %c0_17 = arith.constant 0 : index
    %23 = vector.load %arg2[%c3, %c0_16, %c0_17] : memref<9x16x32xbf16, #tpu.memory_space<vmem>>, vector<1x16x32xbf16>
    %24 = vector.shape_cast %23 : vector<1x16x32xbf16> to vector<16x32xbf16>
    %cst_18 = arith.constant dense<0.000000e+00> : vector<128x16xf32>
    %25 = tpu.matmul %22, %24, %cst_18 {dimension_numbers = #tpu.dot_dimension_numbers<[1], [1], [0], [0], [0, 0, 1, 0], [], []>} : vector<128x32xbf16>, vector<16x32xbf16>, vector<128x16xf32> -> vector<128x16xf32>
    %26 = arith.addf %19, %25 : vector<128x16xf32>
    %c0_19 = arith.constant 0 : index
    %c24 = arith.constant 24 : index
    %c0_20 = arith.constant 0 : index
    %27 = vector.load %arg1[%c0_19, %c24, %c0_20] : memref<1x176x32xf32, #tpu.memory_space<vmem>>, vector<1x128x32xf32>
    %28 = vector.shape_cast %27 : vector<1x128x32xf32> to vector<128x32xf32>
    %29 = arith.truncf %28 : vector<128x32xf32> to vector<128x32xbf16>
    %c4 = arith.constant 4 : index
    %c0_21 = arith.constant 0 : index
    %c0_22 = arith.constant 0 : index
    %30 = vector.load %arg2[%c4, %c0_21, %c0_22] : memref<9x16x32xbf16, #tpu.memory_space<vmem>>, vector<1x16x32xbf16>
    %31 = vector.shape_cast %30 : vector<1x16x32xbf16> to vector<16x32xbf16>
    %cst_23 = arith.constant dense<0.000000e+00> : vector<128x16xf32>
    %32 = tpu.matmul %29, %31, %cst_23 {dimension_numbers = #tpu.dot_dimension_numbers<[1], [1], [0], [0], [0, 0, 1, 0], [], []>} : vector<128x32xbf16>, vector<16x32xbf16>, vector<128x16xf32> -> vector<128x16xf32>
    %33 = arith.addf %26, %32 : vector<128x16xf32>
    %c0_24 = arith.constant 0 : index
    %c25 = arith.constant 25 : index
    %c0_25 = arith.constant 0 : index
    %34 = vector.load %arg1[%c0_24, %c25, %c0_25] : memref<1x176x32xf32, #tpu.memory_space<vmem>>, vector<1x128x32xf32>
    %35 = vector.shape_cast %34 : vector<1x128x32xf32> to vector<128x32xf32>
    %36 = arith.truncf %35 : vector<128x32xf32> to vector<128x32xbf16>
    %c5 = arith.constant 5 : index
    %c0_26 = arith.constant 0 : index
    %c0_27 = arith.constant 0 : index
    %37 = vector.load %arg2[%c5, %c0_26, %c0_27] : memref<9x16x32xbf16, #tpu.memory_space<vmem>>, vector<1x16x32xbf16>
    %38 = vector.shape_cast %37 : vector<1x16x32xbf16> to vector<16x32xbf16>
    %cst_28 = arith.constant dense<0.000000e+00> : vector<128x16xf32>
    %39 = tpu.matmul %36, %38, %cst_28 {dimension_numbers = #tpu.dot_dimension_numbers<[1], [1], [0], [0], [0, 0, 1, 0], [], []>} : vector<128x32xbf16>, vector<16x32xbf16>, vector<128x16xf32> -> vector<128x16xf32>
    %40 = arith.addf %33, %39 : vector<128x16xf32>
    %c0_29 = arith.constant 0 : index
    %c39 = arith.constant 39 : index
    %c0_30 = arith.constant 0 : index
    %41 = vector.load %arg1[%c0_29, %c39, %c0_30] : memref<1x176x32xf32, #tpu.memory_space<vmem>>, vector<1x128x32xf32>
    %42 = vector.shape_cast %41 : vector<1x128x32xf32> to vector<128x32xf32>
    %43 = arith.truncf %42 : vector<128x32xf32> to vector<128x32xbf16>
    %c6 = arith.constant 6 : index
    %c0_31 = arith.constant 0 : index
    %c0_32 = arith.constant 0 : index
    %44 = vector.load %arg2[%c6, %c0_31, %c0_32] : memref<9x16x32xbf16, #tpu.memory_space<vmem>>, vector<1x16x32xbf16>
    %45 = vector.shape_cast %44 : vector<1x16x32xbf16> to vector<16x32xbf16>
    %cst_33 = arith.constant dense<0.000000e+00> : vector<128x16xf32>
    %46 = tpu.matmul %43, %45, %cst_33 {dimension_numbers = #tpu.dot_dimension_numbers<[1], [1], [0], [0], [0, 0, 1, 0], [], []>} : vector<128x32xbf16>, vector<16x32xbf16>, vector<128x16xf32> -> vector<128x16xf32>
    %47 = arith.addf %40, %46 : vector<128x16xf32>
    %c0_34 = arith.constant 0 : index
    %c40 = arith.constant 40 : index
    %c0_35 = arith.constant 0 : index
    %48 = vector.load %arg1[%c0_34, %c40, %c0_35] : memref<1x176x32xf32, #tpu.memory_space<vmem>>, vector<1x128x32xf32>
    %49 = vector.shape_cast %48 : vector<1x128x32xf32> to vector<128x32xf32>
    %50 = arith.truncf %49 : vector<128x32xf32> to vector<128x32xbf16>
    %c7_36 = arith.constant 7 : index
    %c0_37 = arith.constant 0 : index
    %c0_38 = arith.constant 0 : index
    %51 = vector.load %arg2[%c7_36, %c0_37, %c0_38] : memref<9x16x32xbf16, #tpu.memory_space<vmem>>, vector<1x16x32xbf16>
    %52 = vector.shape_cast %51 : vector<1x16x32xbf16> to vector<16x32xbf16>
    %cst_39 = arith.constant dense<0.000000e+00> : vector<128x16xf32>
    %53 = tpu.matmul %50, %52, %cst_39 {dimension_numbers = #tpu.dot_dimension_numbers<[1], [1], [0], [0], [0, 0, 1, 0], [], []>} : vector<128x32xbf16>, vector<16x32xbf16>, vector<128x16xf32> -> vector<128x16xf32>
    %54 = arith.addf %47, %53 : vector<128x16xf32>
    %c0_40 = arith.constant 0 : index
    %c41 = arith.constant 41 : index
    %c0_41 = arith.constant 0 : index
    %55 = vector.load %arg1[%c0_40, %c41, %c0_41] : memref<1x176x32xf32, #tpu.memory_space<vmem>>, vector<1x128x32xf32>
    %56 = vector.shape_cast %55 : vector<1x128x32xf32> to vector<128x32xf32>
    %57 = arith.truncf %56 : vector<128x32xf32> to vector<128x32xbf16>
    %c8_42 = arith.constant 8 : index
    %c0_43 = arith.constant 0 : index
    %c0_44 = arith.constant 0 : index
    %58 = vector.load %arg2[%c8_42, %c0_43, %c0_44] : memref<9x16x32xbf16, #tpu.memory_space<vmem>>, vector<1x16x32xbf16>
    %59 = vector.shape_cast %58 : vector<1x16x32xbf16> to vector<16x32xbf16>
    %cst_45 = arith.constant dense<0.000000e+00> : vector<128x16xf32>
    %60 = tpu.matmul %57, %59, %cst_45 {dimension_numbers = #tpu.dot_dimension_numbers<[1], [1], [0], [0], [0, 0, 1, 0], [], []>} : vector<128x32xbf16>, vector<16x32xbf16>, vector<128x16xf32> -> vector<128x16xf32>
    %61 = arith.addf %54, %60 : vector<128x16xf32>
    %c0_46 = arith.constant 0 : index
    %c0_47 = arith.constant 0 : index
    %62 = vector.load %arg3[%c0_46, %c0_47] : memref<1x16xf32, #tpu.memory_space<vmem>>, vector<1x16xf32>
    %63 = vector.broadcast %62 : vector<1x16xf32> to vector<128x16xf32>
    %64 = arith.addf %61, %63 : vector<128x16xf32>
    %c0_48 = arith.constant 0 : index
    %c0_49 = arith.constant 0 : index
    %c0_50 = arith.constant 0 : index
    %65 = vector.load %arg4[%c0_48, %c0_49, %c0_50] : memref<1x128x16xf32, #tpu.memory_space<vmem>>, vector<1x128x16xf32>
    %66 = vector.shape_cast %65 : vector<1x128x16xf32> to vector<128x16xf32>
    %67 = vector.shape_cast %64 : vector<128x16xf32> to vector<1x128x16xf32>
    tpu.vector_store %arg4[%c0_48, %c0_49, %c0_50], %67 {strides = array<i32>} : memref<1x128x16xf32, #tpu.memory_space<vmem>>, vector<1x128x16xf32>,
    return
  }
  func.func @transform_0(%arg0: i32) -> (i32, i32, i32) {
    %c0_i32 = arith.constant 0 : i32
    %c0_i32_0 = arith.constant 0 : i32
    %c0_i32_1 = arith.constant 0 : i32
    return %arg0, %c0_i32, %c0_i32_0 : i32, i32, i32
  }
  func.func @transform_1(%arg0: i32) -> (i32, i32, i32) {
    %c0_i32 = arith.constant 0 : i32
    %c0_i32_0 = arith.constant 0 : i32
    %c0_i32_1 = arith.constant 0 : i32
    %c0_i32_2 = arith.constant 0 : i32
    return %c0_i32, %c0_i32_0, %c0_i32_1 : i32, i32, i32
  }
  func.func @transform_2(%arg0: i32) -> (i32, i32) {
    %c0_i32 = arith.constant 0 : i32
    %c0_i32_0 = arith.constant 0 : i32
    %c0_i32_1 = arith.constant 0 : i32
    return %c0_i32, %c0_i32_0 : i32, i32
  }
  func.func @transform_3(%arg0: i32) -> (i32, i32, i32) {
    %c0_i32 = arith.constant 0 : i32
    %c0_i32_0 = arith.constant 0 : i32
    %c0_i32_1 = arith.constant 0 : i32
    return %arg0, %c0_i32, %c0_i32_0 : i32, i32, i32
  }
}

module attributes {stable_mosaic.version = 11 : i64} {
  func.func @_mha_kernel(%arg0: i32, %arg1: memref<8x6x48xbf16, #tpu.memory_space<vmem>>, %arg2: memref<8x6x16xbf16, #tpu.memory_space<vmem>>) attributes {dimension_semantics = [#tpu.dimension_semantics<parallel>], iteration_bounds = array<i64: 1>, scalar_prefetch = 0 : i64, scratch_operands = 0 : i64, tpu.core_type = #tpu.core_type<tc>, window_params = [{transform_indices = @transform_0, window_bounds = array<i64: 8, 6, 48>}, {transform_indices = @transform_1, window_bounds = array<i64: 8, 6, 16>}]} {
    %c0 = arith.constant 0 : index
    %c0_0 = arith.constant 0 : index
    %c0_1 = arith.constant 0 : index
    %0 = vector.load %arg1[%c0, %c0_0, %c0_1] : memref<8x6x48xbf16, #tpu.memory_space<vmem>>, vector<8x6x48xbf16>
    %1 = vector.extract_strided_slice %0 {offsets = [0, 0, 0], sizes = [8, 6, 4], strides = [1, 1, 1]} : vector<8x6x48xbf16> to vector<8x6x4xbf16>
    %2 = vector.extract_strided_slice %0 {offsets = [0, 0, 16], sizes = [8, 6, 4], strides = [1, 1, 1]} : vector<8x6x48xbf16> to vector<8x6x4xbf16>
    %3 = vector.extract_strided_slice %0 {offsets = [0, 0, 32], sizes = [8, 6, 4], strides = [1, 1, 1]} : vector<8x6x48xbf16> to vector<8x6x4xbf16>
    %cst = arith.constant dense<0.000000e+00> : vector<8x6x6xf32>
    %4 = tpu.matmul %1, %2, %cst {dimension_numbers = #tpu.dot_dimension_numbers<[2], [2], [1], [1], [0, 0, 0, 1, 1, 1], [0], [0]>} : vector<8x6x4xbf16>, vector<8x6x4xbf16>, vector<8x6x6xf32> -> vector<8x6x6xf32>
    %cst_2 = arith.constant 5.000000e-01 : f32
    %5 = vector.broadcast %cst_2 : f32 to vector<8x6x6xf32>
    %6 = arith.mulf %4, %5 : vector<8x6x6xf32>
    %cst_3 = arith.constant dense<0xFF800000> : vector<8x6xf32>
    %7 = vector.multi_reduction <maximumf>, %6, %cst_3 [2] : vector<8x6x6xf32> to vector<8x6xf32>
    %8 = vector.shape_cast %7 : vector<8x6xf32> to vector<8x6x1xf32>
    %9 = vector.broadcast %8 : vector<8x6x1xf32> to vector<8x6x6xf32>
    %10 = arith.subf %6, %9 : vector<8x6x6xf32>
    %11 = math.exp %10 : vector<8x6x6xf32>
    %cst_4 = arith.constant dense<0.000000e+00> : vector<8x6xf32>
    %12 = vector.multi_reduction <add>, %11, %cst_4 [2] : vector<8x6x6xf32> to vector<8x6xf32>
    %13 = vector.shape_cast %12 : vector<8x6xf32> to vector<8x6x1xf32>
    %14 = vector.broadcast %13 : vector<8x6x1xf32> to vector<8x6x6xf32>
    %15 = arith.divf %11, %14 : vector<8x6x6xf32>
    %16 = arith.truncf %15 : vector<8x6x6xf32> to vector<8x6x6xbf16>
    %cst_5 = arith.constant dense<0.000000e+00> : vector<8x6x4xf32>
    %17 = tpu.matmul %16, %3, %cst_5 {dimension_numbers = #tpu.dot_dimension_numbers<[2], [1], [1], [2], [0, 0, 0, 1, 1, 2], [0], [0]>} : vector<8x6x6xbf16>, vector<8x6x4xbf16>, vector<8x6x4xf32> -> vector<8x6x4xf32>
    %18 = vector.extract_strided_slice %0 {offsets = [0, 0, 4], sizes = [8, 6, 4], strides = [1, 1, 1]} : vector<8x6x48xbf16> to vector<8x6x4xbf16>
    %19 = vector.extract_strided_slice %0 {offsets = [0, 0, 20], sizes = [8, 6, 4], strides = [1, 1, 1]} : vector<8x6x48xbf16> to vector<8x6x4xbf16>
    %20 = vector.extract_strided_slice %0 {offsets = [0, 0, 36], sizes = [8, 6, 4], strides = [1, 1, 1]} : vector<8x6x48xbf16> to vector<8x6x4xbf16>
    %cst_6 = arith.constant dense<0.000000e+00> : vector<8x6x6xf32>
    %21 = tpu.matmul %18, %19, %cst_6 {dimension_numbers = #tpu.dot_dimension_numbers<[2], [2], [1], [1], [0, 0, 0, 1, 1, 1], [0], [0]>} : vector<8x6x4xbf16>, vector<8x6x4xbf16>, vector<8x6x6xf32> -> vector<8x6x6xf32>
    %cst_7 = arith.constant 5.000000e-01 : f32
    %22 = vector.broadcast %cst_7 : f32 to vector<8x6x6xf32>
    %23 = arith.mulf %21, %22 : vector<8x6x6xf32>
    %cst_8 = arith.constant dense<0xFF800000> : vector<8x6xf32>
    %24 = vector.multi_reduction <maximumf>, %23, %cst_8 [2] : vector<8x6x6xf32> to vector<8x6xf32>
    %25 = vector.shape_cast %24 : vector<8x6xf32> to vector<8x6x1xf32>
    %26 = vector.broadcast %25 : vector<8x6x1xf32> to vector<8x6x6xf32>
    %27 = arith.subf %23, %26 : vector<8x6x6xf32>
    %28 = math.exp %27 : vector<8x6x6xf32>
    %cst_9 = arith.constant dense<0.000000e+00> : vector<8x6xf32>
    %29 = vector.multi_reduction <add>, %28, %cst_9 [2] : vector<8x6x6xf32> to vector<8x6xf32>
    %30 = vector.shape_cast %29 : vector<8x6xf32> to vector<8x6x1xf32>
    %31 = vector.broadcast %30 : vector<8x6x1xf32> to vector<8x6x6xf32>
    %32 = arith.divf %28, %31 : vector<8x6x6xf32>
    %33 = arith.truncf %32 : vector<8x6x6xf32> to vector<8x6x6xbf16>
    %cst_10 = arith.constant dense<0.000000e+00> : vector<8x6x4xf32>
    %34 = tpu.matmul %33, %20, %cst_10 {dimension_numbers = #tpu.dot_dimension_numbers<[2], [1], [1], [2], [0, 0, 0, 1, 1, 2], [0], [0]>} : vector<8x6x6xbf16>, vector<8x6x4xbf16>, vector<8x6x4xf32> -> vector<8x6x4xf32>
    %35 = vector.extract_strided_slice %0 {offsets = [0, 0, 8], sizes = [8, 6, 4], strides = [1, 1, 1]} : vector<8x6x48xbf16> to vector<8x6x4xbf16>
    %36 = vector.extract_strided_slice %0 {offsets = [0, 0, 24], sizes = [8, 6, 4], strides = [1, 1, 1]} : vector<8x6x48xbf16> to vector<8x6x4xbf16>
    %37 = vector.extract_strided_slice %0 {offsets = [0, 0, 40], sizes = [8, 6, 4], strides = [1, 1, 1]} : vector<8x6x48xbf16> to vector<8x6x4xbf16>
    %cst_11 = arith.constant dense<0.000000e+00> : vector<8x6x6xf32>
    %38 = tpu.matmul %35, %36, %cst_11 {dimension_numbers = #tpu.dot_dimension_numbers<[2], [2], [1], [1], [0, 0, 0, 1, 1, 1], [0], [0]>} : vector<8x6x4xbf16>, vector<8x6x4xbf16>, vector<8x6x6xf32> -> vector<8x6x6xf32>
    %cst_12 = arith.constant 5.000000e-01 : f32
    %39 = vector.broadcast %cst_12 : f32 to vector<8x6x6xf32>
    %40 = arith.mulf %38, %39 : vector<8x6x6xf32>
    %cst_13 = arith.constant dense<0xFF800000> : vector<8x6xf32>
    %41 = vector.multi_reduction <maximumf>, %40, %cst_13 [2] : vector<8x6x6xf32> to vector<8x6xf32>
    %42 = vector.shape_cast %41 : vector<8x6xf32> to vector<8x6x1xf32>
    %43 = vector.broadcast %42 : vector<8x6x1xf32> to vector<8x6x6xf32>
    %44 = arith.subf %40, %43 : vector<8x6x6xf32>
    %45 = math.exp %44 : vector<8x6x6xf32>
    %cst_14 = arith.constant dense<0.000000e+00> : vector<8x6xf32>
    %46 = vector.multi_reduction <add>, %45, %cst_14 [2] : vector<8x6x6xf32> to vector<8x6xf32>
    %47 = vector.shape_cast %46 : vector<8x6xf32> to vector<8x6x1xf32>
    %48 = vector.broadcast %47 : vector<8x6x1xf32> to vector<8x6x6xf32>
    %49 = arith.divf %45, %48 : vector<8x6x6xf32>
    %50 = arith.truncf %49 : vector<8x6x6xf32> to vector<8x6x6xbf16>
    %cst_15 = arith.constant dense<0.000000e+00> : vector<8x6x4xf32>
    %51 = tpu.matmul %50, %37, %cst_15 {dimension_numbers = #tpu.dot_dimension_numbers<[2], [1], [1], [2], [0, 0, 0, 1, 1, 2], [0], [0]>} : vector<8x6x6xbf16>, vector<8x6x4xbf16>, vector<8x6x4xf32> -> vector<8x6x4xf32>
    %52 = vector.extract_strided_slice %0 {offsets = [0, 0, 12], sizes = [8, 6, 4], strides = [1, 1, 1]} : vector<8x6x48xbf16> to vector<8x6x4xbf16>
    %53 = vector.extract_strided_slice %0 {offsets = [0, 0, 28], sizes = [8, 6, 4], strides = [1, 1, 1]} : vector<8x6x48xbf16> to vector<8x6x4xbf16>
    %54 = vector.extract_strided_slice %0 {offsets = [0, 0, 44], sizes = [8, 6, 4], strides = [1, 1, 1]} : vector<8x6x48xbf16> to vector<8x6x4xbf16>
    %cst_16 = arith.constant dense<0.000000e+00> : vector<8x6x6xf32>
    %55 = tpu.matmul %52, %53, %cst_16 {dimension_numbers = #tpu.dot_dimension_numbers<[2], [2], [1], [1], [0, 0, 0, 1, 1, 1], [0], [0]>} : vector<8x6x4xbf16>, vector<8x6x4xbf16>, vector<8x6x6xf32> -> vector<8x6x6xf32>
    %cst_17 = arith.constant 5.000000e-01 : f32
    %56 = vector.broadcast %cst_17 : f32 to vector<8x6x6xf32>
    %57 = arith.mulf %55, %56 : vector<8x6x6xf32>
    %cst_18 = arith.constant dense<0xFF800000> : vector<8x6xf32>
    %58 = vector.multi_reduction <maximumf>, %57, %cst_18 [2] : vector<8x6x6xf32> to vector<8x6xf32>
    %59 = vector.shape_cast %58 : vector<8x6xf32> to vector<8x6x1xf32>
    %60 = vector.broadcast %59 : vector<8x6x1xf32> to vector<8x6x6xf32>
    %61 = arith.subf %57, %60 : vector<8x6x6xf32>
    %62 = math.exp %61 : vector<8x6x6xf32>
    %cst_19 = arith.constant dense<0.000000e+00> : vector<8x6xf32>
    %63 = vector.multi_reduction <add>, %62, %cst_19 [2] : vector<8x6x6xf32> to vector<8x6xf32>
    %64 = vector.shape_cast %63 : vector<8x6xf32> to vector<8x6x1xf32>
    %65 = vector.broadcast %64 : vector<8x6x1xf32> to vector<8x6x6xf32>
    %66 = arith.divf %62, %65 : vector<8x6x6xf32>
    %67 = arith.truncf %66 : vector<8x6x6xf32> to vector<8x6x6xbf16>
    %cst_20 = arith.constant dense<0.000000e+00> : vector<8x6x4xf32>
    %68 = tpu.matmul %67, %54, %cst_20 {dimension_numbers = #tpu.dot_dimension_numbers<[2], [1], [1], [2], [0, 0, 0, 1, 1, 2], [0], [0]>} : vector<8x6x6xbf16>, vector<8x6x4xbf16>, vector<8x6x4xf32> -> vector<8x6x4xf32>
    %69 = tpu.concatenate %17, %34, %51, %68 in 2 : vector<8x6x4xf32>, vector<8x6x4xf32>, vector<8x6x4xf32>, vector<8x6x4xf32> -> vector<8x6x16xf32>
    %70 = arith.truncf %69 : vector<8x6x16xf32> to vector<8x6x16xbf16>
    %c0_21 = arith.constant 0 : index
    %c0_22 = arith.constant 0 : index
    %c0_23 = arith.constant 0 : index
    %71 = vector.load %arg2[%c0_21, %c0_22, %c0_23] : memref<8x6x16xbf16, #tpu.memory_space<vmem>>, vector<8x6x16xbf16>
    tpu.vector_store %arg2[%c0_21, %c0_22, %c0_23], %70 {strides = array<i32>} : memref<8x6x16xbf16, #tpu.memory_space<vmem>>, vector<8x6x16xbf16>,
    return
  }
  func.func @transform_0(%arg0: i32) -> (i32, i32, i32) {
    %c0_i32 = arith.constant 0 : i32
    %c0_i32_0 = arith.constant 0 : i32
    %c0_i32_1 = arith.constant 0 : i32
    return %arg0, %c0_i32, %c0_i32_0 : i32, i32, i32
  }
  func.func @transform_1(%arg0: i32) -> (i32, i32, i32) {
    %c0_i32 = arith.constant 0 : i32
    %c0_i32_0 = arith.constant 0 : i32
    %c0_i32_1 = arith.constant 0 : i32
    return %arg0, %c0_i32, %c0_i32_0 : i32, i32, i32
  }
}

module attributes {stable_mosaic.version = 11 : i64} {
  func.func @_linear_kernel(%arg0: i32, %arg1: memref<48x128xf32, #tpu.memory_space<vmem>>, %arg2: memref<128x128xbf16, #tpu.memory_space<vmem>>, %arg3: memref<1x128xf32, #tpu.memory_space<vmem>>, %arg4: memref<1x128xf32, #tpu.memory_space<vmem>>, %arg5: memref<1x128xf32, #tpu.memory_space<vmem>>, %arg6: memref<1x1xf32, #tpu.memory_space<vmem>>, %arg7: memref<48x128xf32, #tpu.memory_space<vmem>>) attributes {dimension_semantics = [#tpu.dimension_semantics<parallel>], iteration_bounds = array<i64: 1>, scalar_prefetch = 0 : i64, scratch_operands = 0 : i64, tpu.core_type = #tpu.core_type<tc>, window_params = [{transform_indices = @transform_0, window_bounds = array<i64: 48, 128>}, {pipeline_mode = #tpu.pipeline_mode<synchronous>, transform_indices = @transform_1, window_bounds = array<i64: 128, 128>}, {pipeline_mode = #tpu.pipeline_mode<synchronous>, transform_indices = @transform_2, window_bounds = array<i64: 1, 128>}, {pipeline_mode = #tpu.pipeline_mode<synchronous>, transform_indices = @transform_3, window_bounds = array<i64: 1, 128>}, {pipeline_mode = #tpu.pipeline_mode<synchronous>, transform_indices = @transform_4, window_bounds = array<i64: 1, 128>}, {pipeline_mode = #tpu.pipeline_mode<synchronous>, transform_indices = @transform_5, window_bounds = array<i64: 1, 1>}, {transform_indices = @transform_6, window_bounds = array<i64: 48, 128>}]} {
    %c0 = arith.constant 0 : index
    %c0_0 = arith.constant 0 : index
    %0 = vector.load %arg1[%c0, %c0_0] : memref<48x128xf32, #tpu.memory_space<vmem>>, vector<48x128xf32>
    %cst = arith.constant 0.000000e+00 : f32
    %1 = vector.broadcast %cst : f32 to vector<48x128xf32>
    %2 = arith.cmpf oge, %0, %1 : vector<48x128xf32>
    %c0_1 = arith.constant 0 : index
    %c0_2 = arith.constant 0 : index
    %3 = vector.load %arg6[%c0_1, %c0_2] : memref<1x1xf32, #tpu.memory_space<vmem>>, vector<1x1xf32>
    %4 = vector.broadcast %3 : vector<1x1xf32> to vector<48x128xf32>
    %5 = arith.mulf %4, %0 : vector<48x128xf32>
    %6 = arith.select %2, %0, %5 : vector<48x128xi1>, vector<48x128xf32>
    %7 = arith.truncf %6 : vector<48x128xf32> to vector<48x128xbf16>
    %c0_3 = arith.constant 0 : index
    %c0_4 = arith.constant 0 : index
    %8 = vector.load %arg2[%c0_3, %c0_4] : memref<128x128xbf16, #tpu.memory_space<vmem>>, vector<128x128xbf16>
    %cst_5 = arith.constant dense<0.000000e+00> : vector<48x128xf32>
    %9 = tpu.matmul %7, %8, %cst_5 {dimension_numbers = #tpu.dot_dimension_numbers<[1], [1], [0], [0], [0, 0, 1, 0], [], []>} : vector<48x128xbf16>, vector<128x128xbf16>, vector<48x128xf32> -> vector<48x128xf32>
    %c0_6 = arith.constant 0 : index
    %c0_7 = arith.constant 0 : index
    %10 = vector.load %arg3[%c0_6, %c0_7] : memref<1x128xf32, #tpu.memory_space<vmem>>, vector<1x128xf32>
    %11 = vector.broadcast %10 : vector<1x128xf32> to vector<48x128xf32>
    %12 = arith.addf %9, %11 : vector<48x128xf32>
    %c0_8 = arith.constant 0 : index
    %c0_9 = arith.constant 0 : index
    %13 = vector.load %arg7[%c0_8, %c0_9] : memref<48x128xf32, #tpu.memory_space<vmem>>, vector<48x128xf32>
    tpu.vector_store %arg7[%c0_8, %c0_9], %12 {strides = array<i32>} : memref<48x128xf32, #tpu.memory_space<vmem>>, vector<48x128xf32>,
    return
  }
  func.func @transform_0(%arg0: i32) -> (i32, i32) {
    %c0_i32 = arith.constant 0 : i32
    %c0_i32_0 = arith.constant 0 : i32
    return %arg0, %c0_i32 : i32, i32
  }
  func.func @transform_1(%arg0: i32) -> (i32, i32) {
    %c0_i32 = arith.constant 0 : i32
    %c0_i32_0 = arith.constant 0 : i32
    %c0_i32_1 = arith.constant 0 : i32
    return %c0_i32, %c0_i32_0 : i32, i32
  }
  func.func @transform_2(%arg0: i32) -> (i32, i32) {
    %c0_i32 = arith.constant 0 : i32
    %c0_i32_0 = arith.constant 0 : i32
    %c0_i32_1 = arith.constant 0 : i32
    return %c0_i32, %c0_i32_0 : i32, i32
  }
  func.func @transform_3(%arg0: i32) -> (i32, i32) {
    %c0_i32 = arith.constant 0 : i32
    %c0_i32_0 = arith.constant 0 : i32
    %c0_i32_1 = arith.constant 0 : i32
    return %c0_i32, %c0_i32_0 : i32, i32
  }
  func.func @transform_4(%arg0: i32) -> (i32, i32) {
    %c0_i32 = arith.constant 0 : i32
    %c0_i32_0 = arith.constant 0 : i32
    %c0_i32_1 = arith.constant 0 : i32
    return %c0_i32, %c0_i32_0 : i32, i32
  }
  func.func @transform_5(%arg0: i32) -> (i32, i32) {
    %c0_i32 = arith.constant 0 : i32
    %c0_i32_0 = arith.constant 0 : i32
    %c0_i32_1 = arith.constant 0 : i32
    return %c0_i32, %c0_i32_0 : i32, i32
  }
  func.func @transform_6(%arg0: i32) -> (i32, i32) {
    %c0_i32 = arith.constant 0 : i32
    %c0_i32_0 = arith.constant 0 : i32
    return %arg0, %c0_i32 : i32, i32
  }
}

module attributes {stable_mosaic.version = 11 : i64} {
  func.func @_conv3x3_kernel(%arg0: i32, %arg1: memref<1x96x32xf32, #tpu.memory_space<vmem>>, %arg2: memref<9x16x32xbf16, #tpu.memory_space<vmem>>, %arg3: memref<1x16xf32, #tpu.memory_space<vmem>>, %arg4: memref<1x64x16xf32, #tpu.memory_space<vmem>>) attributes {dimension_semantics = [#tpu.dimension_semantics<parallel>], iteration_bounds = array<i64: 1>, scalar_prefetch = 0 : i64, scratch_operands = 0 : i64, tpu.core_type = #tpu.core_type<tc>, window_params = [{transform_indices = @transform_0, window_bounds = array<i64: 1, 96, 32>}, {pipeline_mode = #tpu.pipeline_mode<synchronous>, transform_indices = @transform_1, window_bounds = array<i64: 9, 16, 32>}, {pipeline_mode = #tpu.pipeline_mode<synchronous>, transform_indices = @transform_2, window_bounds = array<i64: 1, 16>}, {transform_indices = @transform_3, window_bounds = array<i64: 1, 64, 16>}]} {
    %c0 = arith.constant 0 : index
    %c7 = arith.constant 7 : index
    %c0_0 = arith.constant 0 : index
    %0 = vector.load %arg1[%c0, %c7, %c0_0] : memref<1x96x32xf32, #tpu.memory_space<vmem>>, vector<1x64x32xf32>
    %1 = vector.shape_cast %0 : vector<1x64x32xf32> to vector<64x32xf32>
    %2 = arith.truncf %1 : vector<64x32xf32> to vector<64x32xbf16>
    %c0_1 = arith.constant 0 : index
    %c0_2 = arith.constant 0 : index
    %c0_3 = arith.constant 0 : index
    %3 = vector.load %arg2[%c0_1, %c0_2, %c0_3] : memref<9x16x32xbf16, #tpu.memory_space<vmem>>, vector<1x16x32xbf16>
    %4 = vector.shape_cast %3 : vector<1x16x32xbf16> to vector<16x32xbf16>
    %cst = arith.constant dense<0.000000e+00> : vector<64x16xf32>
    %5 = tpu.matmul %2, %4, %cst {dimension_numbers = #tpu.dot_dimension_numbers<[1], [1], [0], [0], [0, 0, 1, 0], [], []>} : vector<64x32xbf16>, vector<16x32xbf16>, vector<64x16xf32> -> vector<64x16xf32>
    %c0_4 = arith.constant 0 : index
    %c8 = arith.constant 8 : index
    %c0_5 = arith.constant 0 : index
    %6 = vector.load %arg1[%c0_4, %c8, %c0_5] : memref<1x96x32xf32, #tpu.memory_space<vmem>>, vector<1x64x32xf32>
    %7 = vector.shape_cast %6 : vector<1x64x32xf32> to vector<64x32xf32>
    %8 = arith.truncf %7 : vector<64x32xf32> to vector<64x32xbf16>
    %c1 = arith.constant 1 : index
    %c0_6 = arith.constant 0 : index
    %c0_7 = arith.constant 0 : index
    %9 = vector.load %arg2[%c1, %c0_6, %c0_7] : memref<9x16x32xbf16, #tpu.memory_space<vmem>>, vector<1x16x32xbf16>
    %10 = vector.shape_cast %9 : vector<1x16x32xbf16> to vector<16x32xbf16>
    %cst_8 = arith.constant dense<0.000000e+00> : vector<64x16xf32>
    %11 = tpu.matmul %8, %10, %cst_8 {dimension_numbers = #tpu.dot_dimension_numbers<[1], [1], [0], [0], [0, 0, 1, 0], [], []>} : vector<64x32xbf16>, vector<16x32xbf16>, vector<64x16xf32> -> vector<64x16xf32>
    %12 = arith.addf %5, %11 : vector<64x16xf32>
    %c0_9 = arith.constant 0 : index
    %c9 = arith.constant 9 : index
    %c0_10 = arith.constant 0 : index
    %13 = vector.load %arg1[%c0_9, %c9, %c0_10] : memref<1x96x32xf32, #tpu.memory_space<vmem>>, vector<1x64x32xf32>
    %14 = vector.shape_cast %13 : vector<1x64x32xf32> to vector<64x32xf32>
    %15 = arith.truncf %14 : vector<64x32xf32> to vector<64x32xbf16>
    %c2 = arith.constant 2 : index
    %c0_11 = arith.constant 0 : index
    %c0_12 = arith.constant 0 : index
    %16 = vector.load %arg2[%c2, %c0_11, %c0_12] : memref<9x16x32xbf16, #tpu.memory_space<vmem>>, vector<1x16x32xbf16>
    %17 = vector.shape_cast %16 : vector<1x16x32xbf16> to vector<16x32xbf16>
    %cst_13 = arith.constant dense<0.000000e+00> : vector<64x16xf32>
    %18 = tpu.matmul %15, %17, %cst_13 {dimension_numbers = #tpu.dot_dimension_numbers<[1], [1], [0], [0], [0, 0, 1, 0], [], []>} : vector<64x32xbf16>, vector<16x32xbf16>, vector<64x16xf32> -> vector<64x16xf32>
    %19 = arith.addf %12, %18 : vector<64x16xf32>
    %c0_14 = arith.constant 0 : index
    %c15 = arith.constant 15 : index
    %c0_15 = arith.constant 0 : index
    %20 = vector.load %arg1[%c0_14, %c15, %c0_15] : memref<1x96x32xf32, #tpu.memory_space<vmem>>, vector<1x64x32xf32>
    %21 = vector.shape_cast %20 : vector<1x64x32xf32> to vector<64x32xf32>
    %22 = arith.truncf %21 : vector<64x32xf32> to vector<64x32xbf16>
    %c3 = arith.constant 3 : index
    %c0_16 = arith.constant 0 : index
    %c0_17 = arith.constant 0 : index
    %23 = vector.load %arg2[%c3, %c0_16, %c0_17] : memref<9x16x32xbf16, #tpu.memory_space<vmem>>, vector<1x16x32xbf16>
    %24 = vector.shape_cast %23 : vector<1x16x32xbf16> to vector<16x32xbf16>
    %cst_18 = arith.constant dense<0.000000e+00> : vector<64x16xf32>
    %25 = tpu.matmul %22, %24, %cst_18 {dimension_numbers = #tpu.dot_dimension_numbers<[1], [1], [0], [0], [0, 0, 1, 0], [], []>} : vector<64x32xbf16>, vector<16x32xbf16>, vector<64x16xf32> -> vector<64x16xf32>
    %26 = arith.addf %19, %25 : vector<64x16xf32>
    %c0_19 = arith.constant 0 : index
    %c16 = arith.constant 16 : index
    %c0_20 = arith.constant 0 : index
    %27 = vector.load %arg1[%c0_19, %c16, %c0_20] : memref<1x96x32xf32, #tpu.memory_space<vmem>>, vector<1x64x32xf32>
    %28 = vector.shape_cast %27 : vector<1x64x32xf32> to vector<64x32xf32>
    %29 = arith.truncf %28 : vector<64x32xf32> to vector<64x32xbf16>
    %c4 = arith.constant 4 : index
    %c0_21 = arith.constant 0 : index
    %c0_22 = arith.constant 0 : index
    %30 = vector.load %arg2[%c4, %c0_21, %c0_22] : memref<9x16x32xbf16, #tpu.memory_space<vmem>>, vector<1x16x32xbf16>
    %31 = vector.shape_cast %30 : vector<1x16x32xbf16> to vector<16x32xbf16>
    %cst_23 = arith.constant dense<0.000000e+00> : vector<64x16xf32>
    %32 = tpu.matmul %29, %31, %cst_23 {dimension_numbers = #tpu.dot_dimension_numbers<[1], [1], [0], [0], [0, 0, 1, 0], [], []>} : vector<64x32xbf16>, vector<16x32xbf16>, vector<64x16xf32> -> vector<64x16xf32>
    %33 = arith.addf %26, %32 : vector<64x16xf32>
    %c0_24 = arith.constant 0 : index
    %c17 = arith.constant 17 : index
    %c0_25 = arith.constant 0 : index
    %34 = vector.load %arg1[%c0_24, %c17, %c0_25] : memref<1x96x32xf32, #tpu.memory_space<vmem>>, vector<1x64x32xf32>
    %35 = vector.shape_cast %34 : vector<1x64x32xf32> to vector<64x32xf32>
    %36 = arith.truncf %35 : vector<64x32xf32> to vector<64x32xbf16>
    %c5 = arith.constant 5 : index
    %c0_26 = arith.constant 0 : index
    %c0_27 = arith.constant 0 : index
    %37 = vector.load %arg2[%c5, %c0_26, %c0_27] : memref<9x16x32xbf16, #tpu.memory_space<vmem>>, vector<1x16x32xbf16>
    %38 = vector.shape_cast %37 : vector<1x16x32xbf16> to vector<16x32xbf16>
    %cst_28 = arith.constant dense<0.000000e+00> : vector<64x16xf32>
    %39 = tpu.matmul %36, %38, %cst_28 {dimension_numbers = #tpu.dot_dimension_numbers<[1], [1], [0], [0], [0, 0, 1, 0], [], []>} : vector<64x32xbf16>, vector<16x32xbf16>, vector<64x16xf32> -> vector<64x16xf32>
    %40 = arith.addf %33, %39 : vector<64x16xf32>
    %c0_29 = arith.constant 0 : index
    %c23 = arith.constant 23 : index
    %c0_30 = arith.constant 0 : index
    %41 = vector.load %arg1[%c0_29, %c23, %c0_30] : memref<1x96x32xf32, #tpu.memory_space<vmem>>, vector<1x64x32xf32>
    %42 = vector.shape_cast %41 : vector<1x64x32xf32> to vector<64x32xf32>
    %43 = arith.truncf %42 : vector<64x32xf32> to vector<64x32xbf16>
    %c6 = arith.constant 6 : index
    %c0_31 = arith.constant 0 : index
    %c0_32 = arith.constant 0 : index
    %44 = vector.load %arg2[%c6, %c0_31, %c0_32] : memref<9x16x32xbf16, #tpu.memory_space<vmem>>, vector<1x16x32xbf16>
    %45 = vector.shape_cast %44 : vector<1x16x32xbf16> to vector<16x32xbf16>
    %cst_33 = arith.constant dense<0.000000e+00> : vector<64x16xf32>
    %46 = tpu.matmul %43, %45, %cst_33 {dimension_numbers = #tpu.dot_dimension_numbers<[1], [1], [0], [0], [0, 0, 1, 0], [], []>} : vector<64x32xbf16>, vector<16x32xbf16>, vector<64x16xf32> -> vector<64x16xf32>
    %47 = arith.addf %40, %46 : vector<64x16xf32>
    %c0_34 = arith.constant 0 : index
    %c24 = arith.constant 24 : index
    %c0_35 = arith.constant 0 : index
    %48 = vector.load %arg1[%c0_34, %c24, %c0_35] : memref<1x96x32xf32, #tpu.memory_space<vmem>>, vector<1x64x32xf32>
    %49 = vector.shape_cast %48 : vector<1x64x32xf32> to vector<64x32xf32>
    %50 = arith.truncf %49 : vector<64x32xf32> to vector<64x32xbf16>
    %c7_36 = arith.constant 7 : index
    %c0_37 = arith.constant 0 : index
    %c0_38 = arith.constant 0 : index
    %51 = vector.load %arg2[%c7_36, %c0_37, %c0_38] : memref<9x16x32xbf16, #tpu.memory_space<vmem>>, vector<1x16x32xbf16>
    %52 = vector.shape_cast %51 : vector<1x16x32xbf16> to vector<16x32xbf16>
    %cst_39 = arith.constant dense<0.000000e+00> : vector<64x16xf32>
    %53 = tpu.matmul %50, %52, %cst_39 {dimension_numbers = #tpu.dot_dimension_numbers<[1], [1], [0], [0], [0, 0, 1, 0], [], []>} : vector<64x32xbf16>, vector<16x32xbf16>, vector<64x16xf32> -> vector<64x16xf32>
    %54 = arith.addf %47, %53 : vector<64x16xf32>
    %c0_40 = arith.constant 0 : index
    %c25 = arith.constant 25 : index
    %c0_41 = arith.constant 0 : index
    %55 = vector.load %arg1[%c0_40, %c25, %c0_41] : memref<1x96x32xf32, #tpu.memory_space<vmem>>, vector<1x64x32xf32>
    %56 = vector.shape_cast %55 : vector<1x64x32xf32> to vector<64x32xf32>
    %57 = arith.truncf %56 : vector<64x32xf32> to vector<64x32xbf16>
    %c8_42 = arith.constant 8 : index
    %c0_43 = arith.constant 0 : index
    %c0_44 = arith.constant 0 : index
    %58 = vector.load %arg2[%c8_42, %c0_43, %c0_44] : memref<9x16x32xbf16, #tpu.memory_space<vmem>>, vector<1x16x32xbf16>
    %59 = vector.shape_cast %58 : vector<1x16x32xbf16> to vector<16x32xbf16>
    %cst_45 = arith.constant dense<0.000000e+00> : vector<64x16xf32>
    %60 = tpu.matmul %57, %59, %cst_45 {dimension_numbers = #tpu.dot_dimension_numbers<[1], [1], [0], [0], [0, 0, 1, 0], [], []>} : vector<64x32xbf16>, vector<16x32xbf16>, vector<64x16xf32> -> vector<64x16xf32>
    %61 = arith.addf %54, %60 : vector<64x16xf32>
    %c0_46 = arith.constant 0 : index
    %c0_47 = arith.constant 0 : index
    %62 = vector.load %arg3[%c0_46, %c0_47] : memref<1x16xf32, #tpu.memory_space<vmem>>, vector<1x16xf32>
    %63 = vector.broadcast %62 : vector<1x16xf32> to vector<64x16xf32>
    %64 = arith.addf %61, %63 : vector<64x16xf32>
    %c0_48 = arith.constant 0 : index
    %c0_49 = arith.constant 0 : index
    %c0_50 = arith.constant 0 : index
    %65 = vector.load %arg4[%c0_48, %c0_49, %c0_50] : memref<1x64x16xf32, #tpu.memory_space<vmem>>, vector<1x64x16xf32>
    %66 = vector.shape_cast %65 : vector<1x64x16xf32> to vector<64x16xf32>
    %67 = vector.shape_cast %64 : vector<64x16xf32> to vector<1x64x16xf32>
    tpu.vector_store %arg4[%c0_48, %c0_49, %c0_50], %67 {strides = array<i32>} : memref<1x64x16xf32, #tpu.memory_space<vmem>>, vector<1x64x16xf32>,
    return
  }
  func.func @transform_0(%arg0: i32) -> (i32, i32, i32) {
    %c0_i32 = arith.constant 0 : i32
    %c0_i32_0 = arith.constant 0 : i32
    %c0_i32_1 = arith.constant 0 : i32
    return %arg0, %c0_i32, %c0_i32_0 : i32, i32, i32
  }
  func.func @transform_1(%arg0: i32) -> (i32, i32, i32) {
    %c0_i32 = arith.constant 0 : i32
    %c0_i32_0 = arith.constant 0 : i32
    %c0_i32_1 = arith.constant 0 : i32
    %c0_i32_2 = arith.constant 0 : i32
    return %c0_i32, %c0_i32_0, %c0_i32_1 : i32, i32, i32
  }
  func.func @transform_2(%arg0: i32) -> (i32, i32) {
    %c0_i32 = arith.constant 0 : i32
    %c0_i32_0 = arith.constant 0 : i32
    %c0_i32_1 = arith.constant 0 : i32
    return %c0_i32, %c0_i32_0 : i32, i32
  }
  func.func @transform_3(%arg0: i32) -> (i32, i32, i32) {
    %c0_i32 = arith.constant 0 : i32
    %c0_i32_0 = arith.constant 0 : i32
    %c0_i32_1 = arith.constant 0 : i32
    return %arg0, %c0_i32, %c0_i32_0 : i32, i32, i32
  }
}

module attributes {stable_mosaic.version = 11 : i64} {
  func.func @_linear_kernel(%arg0: i32, %arg1: memref<24x128xf32, #tpu.memory_space<vmem>>, %arg2: memref<128x128xbf16, #tpu.memory_space<vmem>>, %arg3: memref<1x128xf32, #tpu.memory_space<vmem>>, %arg4: memref<1x128xf32, #tpu.memory_space<vmem>>, %arg5: memref<1x128xf32, #tpu.memory_space<vmem>>, %arg6: memref<1x1xf32, #tpu.memory_space<vmem>>, %arg7: memref<24x128xbf16, #tpu.memory_space<vmem>>) attributes {dimension_semantics = [#tpu.dimension_semantics<parallel>], iteration_bounds = array<i64: 1>, scalar_prefetch = 0 : i64, scratch_operands = 0 : i64, tpu.core_type = #tpu.core_type<tc>, window_params = [{transform_indices = @transform_0, window_bounds = array<i64: 24, 128>}, {pipeline_mode = #tpu.pipeline_mode<synchronous>, transform_indices = @transform_1, window_bounds = array<i64: 128, 128>}, {pipeline_mode = #tpu.pipeline_mode<synchronous>, transform_indices = @transform_2, window_bounds = array<i64: 1, 128>}, {pipeline_mode = #tpu.pipeline_mode<synchronous>, transform_indices = @transform_3, window_bounds = array<i64: 1, 128>}, {pipeline_mode = #tpu.pipeline_mode<synchronous>, transform_indices = @transform_4, window_bounds = array<i64: 1, 128>}, {pipeline_mode = #tpu.pipeline_mode<synchronous>, transform_indices = @transform_5, window_bounds = array<i64: 1, 1>}, {transform_indices = @transform_6, window_bounds = array<i64: 24, 128>}]} {
    %c0 = arith.constant 0 : index
    %c0_0 = arith.constant 0 : index
    %0 = vector.load %arg1[%c0, %c0_0] : memref<24x128xf32, #tpu.memory_space<vmem>>, vector<24x128xf32>
    %1 = arith.truncf %0 : vector<24x128xf32> to vector<24x128xbf16>
    %c0_1 = arith.constant 0 : index
    %c0_2 = arith.constant 0 : index
    %2 = vector.load %arg2[%c0_1, %c0_2] : memref<128x128xbf16, #tpu.memory_space<vmem>>, vector<128x128xbf16>
    %cst = arith.constant dense<0.000000e+00> : vector<24x128xf32>
    %3 = tpu.matmul %1, %2, %cst {dimension_numbers = #tpu.dot_dimension_numbers<[1], [1], [0], [0], [0, 0, 1, 0], [], []>} : vector<24x128xbf16>, vector<128x128xbf16>, vector<24x128xf32> -> vector<24x128xf32>
    %c0_3 = arith.constant 0 : index
    %c0_4 = arith.constant 0 : index
    %4 = vector.load %arg3[%c0_3, %c0_4] : memref<1x128xf32, #tpu.memory_space<vmem>>, vector<1x128xf32>
    %5 = vector.broadcast %4 : vector<1x128xf32> to vector<24x128xf32>
    %6 = arith.addf %3, %5 : vector<24x128xf32>
    %cst_5 = arith.constant 0.000000e+00 : f32
    %7 = vector.broadcast %cst_5 : f32 to vector<24x128xf32>
    %8 = arith.maximumf %6, %7 : vector<24x128xf32>
    %9 = arith.truncf %8 : vector<24x128xf32> to vector<24x128xbf16>
    %c0_6 = arith.constant 0 : index
    %c0_7 = arith.constant 0 : index
    %10 = vector.load %arg7[%c0_6, %c0_7] : memref<24x128xbf16, #tpu.memory_space<vmem>>, vector<24x128xbf16>
    tpu.vector_store %arg7[%c0_6, %c0_7], %9 {strides = array<i32>} : memref<24x128xbf16, #tpu.memory_space<vmem>>, vector<24x128xbf16>,
    return
  }
  func.func @transform_0(%arg0: i32) -> (i32, i32) {
    %c0_i32 = arith.constant 0 : i32
    %c0_i32_0 = arith.constant 0 : i32
    return %arg0, %c0_i32 : i32, i32
  }
  func.func @transform_1(%arg0: i32) -> (i32, i32) {
    %c0_i32 = arith.constant 0 : i32
    %c0_i32_0 = arith.constant 0 : i32
    %c0_i32_1 = arith.constant 0 : i32
    return %c0_i32, %c0_i32_0 : i32, i32
  }
  func.func @transform_2(%arg0: i32) -> (i32, i32) {
    %c0_i32 = arith.constant 0 : i32
    %c0_i32_0 = arith.constant 0 : i32
    %c0_i32_1 = arith.constant 0 : i32
    return %c0_i32, %c0_i32_0 : i32, i32
  }
  func.func @transform_3(%arg0: i32) -> (i32, i32) {
    %c0_i32 = arith.constant 0 : i32
    %c0_i32_0 = arith.constant 0 : i32
    %c0_i32_1 = arith.constant 0 : i32
    return %c0_i32, %c0_i32_0 : i32, i32
  }
  func.func @transform_4(%arg0: i32) -> (i32, i32) {
    %c0_i32 = arith.constant 0 : i32
    %c0_i32_0 = arith.constant 0 : i32
    %c0_i32_1 = arith.constant 0 : i32
    return %c0_i32, %c0_i32_0 : i32, i32
  }
  func.func @transform_5(%arg0: i32) -> (i32, i32) {
    %c0_i32 = arith.constant 0 : i32
    %c0_i32_0 = arith.constant 0 : i32
    %c0_i32_1 = arith.constant 0 : i32
    return %c0_i32, %c0_i32_0 : i32, i32
  }
  func.func @transform_6(%arg0: i32) -> (i32, i32) {
    %c0_i32 = arith.constant 0 : i32
    %c0_i32_0 = arith.constant 0 : i32
    return %arg0, %c0_i32 : i32, i32
  }
}

module attributes {stable_mosaic.version = 11 : i64} {
  func.func @_linear_kernel(%arg0: i32, %arg1: memref<24x128xbf16, #tpu.memory_space<vmem>>, %arg2: memref<128x128xbf16, #tpu.memory_space<vmem>>, %arg3: memref<1x128xf32, #tpu.memory_space<vmem>>, %arg4: memref<1x128xf32, #tpu.memory_space<vmem>>, %arg5: memref<1x128xf32, #tpu.memory_space<vmem>>, %arg6: memref<1x1xf32, #tpu.memory_space<vmem>>, %arg7: memref<24x128xbf16, #tpu.memory_space<vmem>>) attributes {dimension_semantics = [#tpu.dimension_semantics<parallel>], iteration_bounds = array<i64: 1>, scalar_prefetch = 0 : i64, scratch_operands = 0 : i64, tpu.core_type = #tpu.core_type<tc>, window_params = [{transform_indices = @transform_0, window_bounds = array<i64: 24, 128>}, {pipeline_mode = #tpu.pipeline_mode<synchronous>, transform_indices = @transform_1, window_bounds = array<i64: 128, 128>}, {pipeline_mode = #tpu.pipeline_mode<synchronous>, transform_indices = @transform_2, window_bounds = array<i64: 1, 128>}, {pipeline_mode = #tpu.pipeline_mode<synchronous>, transform_indices = @transform_3, window_bounds = array<i64: 1, 128>}, {pipeline_mode = #tpu.pipeline_mode<synchronous>, transform_indices = @transform_4, window_bounds = array<i64: 1, 128>}, {pipeline_mode = #tpu.pipeline_mode<synchronous>, transform_indices = @transform_5, window_bounds = array<i64: 1, 1>}, {transform_indices = @transform_6, window_bounds = array<i64: 24, 128>}]} {
    %c0 = arith.constant 0 : index
    %c0_0 = arith.constant 0 : index
    %0 = vector.load %arg1[%c0, %c0_0] : memref<24x128xbf16, #tpu.memory_space<vmem>>, vector<24x128xbf16>
    %c0_1 = arith.constant 0 : index
    %c0_2 = arith.constant 0 : index
    %1 = vector.load %arg2[%c0_1, %c0_2] : memref<128x128xbf16, #tpu.memory_space<vmem>>, vector<128x128xbf16>
    %cst = arith.constant dense<0.000000e+00> : vector<24x128xf32>
    %2 = tpu.matmul %0, %1, %cst {dimension_numbers = #tpu.dot_dimension_numbers<[1], [1], [0], [0], [0, 0, 1, 0], [], []>} : vector<24x128xbf16>, vector<128x128xbf16>, vector<24x128xf32> -> vector<24x128xf32>
    %c0_3 = arith.constant 0 : index
    %c0_4 = arith.constant 0 : index
    %3 = vector.load %arg3[%c0_3, %c0_4] : memref<1x128xf32, #tpu.memory_space<vmem>>, vector<1x128xf32>
    %4 = vector.broadcast %3 : vector<1x128xf32> to vector<24x128xf32>
    %5 = arith.addf %2, %4 : vector<24x128xf32>
    %6 = arith.truncf %5 : vector<24x128xf32> to vector<24x128xbf16>
    %c0_5 = arith.constant 0 : index
    %c0_6 = arith.constant 0 : index
    %7 = vector.load %arg7[%c0_5, %c0_6] : memref<24x128xbf16, #tpu.memory_space<vmem>>, vector<24x128xbf16>
    tpu.vector_store %arg7[%c0_5, %c0_6], %6 {strides = array<i32>} : memref<24x128xbf16, #tpu.memory_space<vmem>>, vector<24x128xbf16>,
    return
  }
  func.func @transform_0(%arg0: i32) -> (i32, i32) {
    %c0_i32 = arith.constant 0 : i32
    %c0_i32_0 = arith.constant 0 : i32
    return %arg0, %c0_i32 : i32, i32
  }
  func.func @transform_1(%arg0: i32) -> (i32, i32) {
    %c0_i32 = arith.constant 0 : i32
    %c0_i32_0 = arith.constant 0 : i32
    %c0_i32_1 = arith.constant 0 : i32
    return %c0_i32, %c0_i32_0 : i32, i32
  }
  func.func @transform_2(%arg0: i32) -> (i32, i32) {
    %c0_i32 = arith.constant 0 : i32
    %c0_i32_0 = arith.constant 0 : i32
    %c0_i32_1 = arith.constant 0 : i32
    return %c0_i32, %c0_i32_0 : i32, i32
  }
  func.func @transform_3(%arg0: i32) -> (i32, i32) {
    %c0_i32 = arith.constant 0 : i32
    %c0_i32_0 = arith.constant 0 : i32
    %c0_i32_1 = arith.constant 0 : i32
    return %c0_i32, %c0_i32_0 : i32, i32
  }
  func.func @transform_4(%arg0: i32) -> (i32, i32) {
    %c0_i32 = arith.constant 0 : i32
    %c0_i32_0 = arith.constant 0 : i32
    %c0_i32_1 = arith.constant 0 : i32
    return %c0_i32, %c0_i32_0 : i32, i32
  }
  func.func @transform_5(%arg0: i32) -> (i32, i32) {
    %c0_i32 = arith.constant 0 : i32
    %c0_i32_0 = arith.constant 0 : i32
    %c0_i32_1 = arith.constant 0 : i32
    return %c0_i32, %c0_i32_0 : i32, i32
  }
  func.func @transform_6(%arg0: i32) -> (i32, i32) {
    %c0_i32 = arith.constant 0 : i32
    %c0_i32_0 = arith.constant 0 : i32
    return %arg0, %c0_i32 : i32, i32
  }
}

module attributes {stable_mosaic.version = 11 : i64} {
  func.func @_linear_kernel(%arg0: i32, %arg1: memref<24x128xbf16, #tpu.memory_space<vmem>>, %arg2: memref<128x128xbf16, #tpu.memory_space<vmem>>, %arg3: memref<1x128xf32, #tpu.memory_space<vmem>>, %arg4: memref<1x128xf32, #tpu.memory_space<vmem>>, %arg5: memref<1x128xf32, #tpu.memory_space<vmem>>, %arg6: memref<1x1xf32, #tpu.memory_space<vmem>>, %arg7: memref<24x128xbf16, #tpu.memory_space<vmem>>) attributes {dimension_semantics = [#tpu.dimension_semantics<parallel>], iteration_bounds = array<i64: 1>, scalar_prefetch = 0 : i64, scratch_operands = 0 : i64, tpu.core_type = #tpu.core_type<tc>, window_params = [{transform_indices = @transform_0, window_bounds = array<i64: 24, 128>}, {pipeline_mode = #tpu.pipeline_mode<synchronous>, transform_indices = @transform_1, window_bounds = array<i64: 128, 128>}, {pipeline_mode = #tpu.pipeline_mode<synchronous>, transform_indices = @transform_2, window_bounds = array<i64: 1, 128>}, {pipeline_mode = #tpu.pipeline_mode<synchronous>, transform_indices = @transform_3, window_bounds = array<i64: 1, 128>}, {pipeline_mode = #tpu.pipeline_mode<synchronous>, transform_indices = @transform_4, window_bounds = array<i64: 1, 128>}, {pipeline_mode = #tpu.pipeline_mode<synchronous>, transform_indices = @transform_5, window_bounds = array<i64: 1, 1>}, {transform_indices = @transform_6, window_bounds = array<i64: 24, 128>}]} {
    %c0 = arith.constant 0 : index
    %c0_0 = arith.constant 0 : index
    %0 = vector.load %arg1[%c0, %c0_0] : memref<24x128xbf16, #tpu.memory_space<vmem>>, vector<24x128xbf16>
    %c0_1 = arith.constant 0 : index
    %c0_2 = arith.constant 0 : index
    %1 = vector.load %arg2[%c0_1, %c0_2] : memref<128x128xbf16, #tpu.memory_space<vmem>>, vector<128x128xbf16>
    %cst = arith.constant dense<0.000000e+00> : vector<24x128xf32>
    %2 = tpu.matmul %0, %1, %cst {dimension_numbers = #tpu.dot_dimension_numbers<[1], [1], [0], [0], [0, 0, 1, 0], [], []>} : vector<24x128xbf16>, vector<128x128xbf16>, vector<24x128xf32> -> vector<24x128xf32>
    %c0_3 = arith.constant 0 : index
    %c0_4 = arith.constant 0 : index
    %3 = vector.load %arg3[%c0_3, %c0_4] : memref<1x128xf32, #tpu.memory_space<vmem>>, vector<1x128xf32>
    %4 = vector.broadcast %3 : vector<1x128xf32> to vector<24x128xf32>
    %5 = arith.addf %2, %4 : vector<24x128xf32>
    %cst_5 = arith.constant 0.000000e+00 : f32
    %6 = vector.broadcast %cst_5 : f32 to vector<24x128xf32>
    %7 = arith.maximumf %5, %6 : vector<24x128xf32>
    %8 = arith.truncf %7 : vector<24x128xf32> to vector<24x128xbf16>
    %c0_6 = arith.constant 0 : index
    %c0_7 = arith.constant 0 : index
    %9 = vector.load %arg7[%c0_6, %c0_7] : memref<24x128xbf16, #tpu.memory_space<vmem>>, vector<24x128xbf16>
    tpu.vector_store %arg7[%c0_6, %c0_7], %8 {strides = array<i32>} : memref<24x128xbf16, #tpu.memory_space<vmem>>, vector<24x128xbf16>,
    return
  }
  func.func @transform_0(%arg0: i32) -> (i32, i32) {
    %c0_i32 = arith.constant 0 : i32
    %c0_i32_0 = arith.constant 0 : i32
    return %arg0, %c0_i32 : i32, i32
  }
  func.func @transform_1(%arg0: i32) -> (i32, i32) {
    %c0_i32 = arith.constant 0 : i32
    %c0_i32_0 = arith.constant 0 : i32
    %c0_i32_1 = arith.constant 0 : i32
    return %c0_i32, %c0_i32_0 : i32, i32
  }
  func.func @transform_2(%arg0: i32) -> (i32, i32) {
    %c0_i32 = arith.constant 0 : i32
    %c0_i32_0 = arith.constant 0 : i32
    %c0_i32_1 = arith.constant 0 : i32
    return %c0_i32, %c0_i32_0 : i32, i32
  }
  func.func @transform_3(%arg0: i32) -> (i32, i32) {
    %c0_i32 = arith.constant 0 : i32
    %c0_i32_0 = arith.constant 0 : i32
    %c0_i32_1 = arith.constant 0 : i32
    return %c0_i32, %c0_i32_0 : i32, i32
  }
  func.func @transform_4(%arg0: i32) -> (i32, i32) {
    %c0_i32 = arith.constant 0 : i32
    %c0_i32_0 = arith.constant 0 : i32
    %c0_i32_1 = arith.constant 0 : i32
    return %c0_i32, %c0_i32_0 : i32, i32
  }
  func.func @transform_5(%arg0: i32) -> (i32, i32) {
    %c0_i32 = arith.constant 0 : i32
    %c0_i32_0 = arith.constant 0 : i32
    %c0_i32_1 = arith.constant 0 : i32
    return %c0_i32, %c0_i32_0 : i32, i32
  }
  func.func @transform_6(%arg0: i32) -> (i32, i32) {
    %c0_i32 = arith.constant 0 : i32
    %c0_i32_0 = arith.constant 0 : i32
    return %arg0, %c0_i32 : i32, i32
  }
}

module attributes {stable_mosaic.version = 11 : i64} {
  func.func @_decoder_kernel(%arg0: i32, %arg1: i32, %arg2: memref<1x1x12x16xbf16, #tpu.memory_space<vmem>>, %arg3: memref<1x12x16xbf16, #tpu.memory_space<vmem>>, %arg4: memref<8x16xbf16, #tpu.memory_space<vmem>>, %arg5: memref<1x1x4x13xf32, #tpu.memory_space<vmem>>) attributes {dimension_semantics = [#tpu.dimension_semantics<parallel>, #tpu.dimension_semantics<arbitrary>], iteration_bounds = array<i64: 1, 2>, scalar_prefetch = 0 : i64, scratch_operands = 0 : i64, tpu.core_type = #tpu.core_type<tc>, window_params = [{transform_indices = @transform_0, window_bounds = array<i64: 1, 1, 12, 16>}, {transform_indices = @transform_1, window_bounds = array<i64: 1, 12, 16>}, {pipeline_mode = #tpu.pipeline_mode<synchronous>, transform_indices = @transform_2, window_bounds = array<i64: 8, 16>}, {transform_indices = @transform_3, window_bounds = array<i64: 1, 1, 4, 13>}]} {
    %c0 = arith.constant 0 : index
    %c0_0 = arith.constant 0 : index
    %c0_1 = arith.constant 0 : index
    %c0_2 = arith.constant 0 : index
    %0 = vector.load %arg2[%c0, %c0_0, %c0_1, %c0_2] : memref<1x1x12x16xbf16, #tpu.memory_space<vmem>>, vector<1x1x12x16xbf16>
    %1 = vector.shape_cast %0 : vector<1x1x12x16xbf16> to vector<12x16xbf16>
    %c0_3 = arith.constant 0 : index
    %c0_4 = arith.constant 0 : index
    %c0_5 = arith.constant 0 : index
    %2 = vector.load %arg3[%c0_3, %c0_4, %c0_5] : memref<1x12x16xbf16, #tpu.memory_space<vmem>>, vector<1x12x16xbf16>
    %3 = vector.shape_cast %2 : vector<1x12x16xbf16> to vector<12x16xbf16>
    %4 = arith.mulf %1, %3 : vector<12x16xbf16>
    %c0_6 = arith.constant 0 : index
    %c0_7 = arith.constant 0 : index
    %5 = vector.load %arg4[%c0_6, %c0_7] : memref<8x16xbf16, #tpu.memory_space<vmem>>, vector<8x16xbf16>
    %cst = arith.constant dense<0.000000e+00> : vector<8x12xf32>
    %6 = tpu.matmul %5, %4, %cst {dimension_numbers = #tpu.dot_dimension_numbers<[1], [1], [0], [0], [0, 0, 1, 0], [], []>} : vector<8x16xbf16>, vector<12x16xbf16>, vector<8x12xf32> -> vector<8x12xf32>
    %cst_8 = arith.constant 0.000000e+00 : f32
    %7 = vector.broadcast %cst_8 : f32 to vector<4x1xf32>
    %8 = vector.extract_strided_slice %6 {offsets = [0, 0], sizes = [4, 12], strides = [1, 1]} : vector<8x12xf32> to vector<4x12xf32>
    %9 = tpu.concatenate %8, %7 in 1 : vector<4x12xf32>, vector<4x1xf32> -> vector<4x13xf32>
    %10 = vector.extract_strided_slice %6 {offsets = [4, 0], sizes = [4, 12], strides = [1, 1]} : vector<8x12xf32> to vector<4x12xf32>
    %11 = tpu.concatenate %7, %10 in 1 : vector<4x1xf32>, vector<4x12xf32> -> vector<4x13xf32>
    %12 = arith.addf %9, %11 : vector<4x13xf32>
    %c0_9 = arith.constant 0 : index
    %c0_10 = arith.constant 0 : index
    %c0_11 = arith.constant 0 : index
    %c0_12 = arith.constant 0 : index
    %13 = vector.load %arg5[%c0_9, %c0_10, %c0_11, %c0_12] : memref<1x1x4x13xf32, #tpu.memory_space<vmem>>, vector<1x1x4x13xf32>
    %14 = vector.shape_cast %13 : vector<1x1x4x13xf32> to vector<4x13xf32>
    %15 = vector.shape_cast %12 : vector<4x13xf32> to vector<1x1x4x13xf32>
    tpu.vector_store %arg5[%c0_9, %c0_10, %c0_11, %c0_12], %15 {strides = array<i32>} : memref<1x1x4x13xf32, #tpu.memory_space<vmem>>, vector<1x1x4x13xf32>,
    return
  }
  func.func @transform_0(%arg0: i32, %arg1: i32) -> (i32, i32, i32, i32) {
    %c0_i32 = arith.constant 0 : i32
    %c0_i32_0 = arith.constant 0 : i32
    %c0_i32_1 = arith.constant 0 : i32
    return %arg1, %arg0, %c0_i32, %c0_i32_0 : i32, i32, i32, i32
  }
  func.func @transform_1(%arg0: i32, %arg1: i32) -> (i32, i32, i32) {
    %c0_i32 = arith.constant 0 : i32
    %c0_i32_0 = arith.constant 0 : i32
    %c0_i32_1 = arith.constant 0 : i32
    return %arg0, %c0_i32, %c0_i32_0 : i32, i32, i32
  }
  func.func @transform_2(%arg0: i32, %arg1: i32) -> (i32, i32) {
    %c0_i32 = arith.constant 0 : i32
    %c0_i32_0 = arith.constant 0 : i32
    %c0_i32_1 = arith.constant 0 : i32
    return %c0_i32, %c0_i32_0 : i32, i32
  }
  func.func @transform_3(%arg0: i32, %arg1: i32) -> (i32, i32, i32, i32) {
    %c0_i32 = arith.constant 0 : i32
    %c0_i32_0 = arith.constant 0 : i32
    %c0_i32_1 = arith.constant 0 : i32
    return %arg1, %arg0, %c0_i32, %c0_i32_0 : i32, i32, i32, i32
  }
}

</mosaic_0001>

<bundles_post_ra>
// kernel: separator_forward.17
= control target key start
LH: loop header
LB: loop body
LE: loop exit
PB: predicated region body
PF: predicated region fallthrough
CT: control target
= control target key end

     0   :  { %v246_v2 = vmov 0.0   ;;  %v36_v8 = vlaneseq  ;;  %vm247_vm1 = vmmov 0   ;;  %s328_s0 = inlined_call_operand.vmem [shape: f32[16,128], index: 0, kind: input, shape index: {}]   ;;  %s329_s5 = inlined_call_operand.<no memory space> [shape: f32[1,1], index: 5, kind: input, shape index: {}]   ;;  %s330_s1 = inlined_call_operand.vmem [shape: bf16[128,128], index: 1, kind: input, shape index: {}]   ;;  %s331_s3 = inlined_call_operand.vmem [shape: f32[1,128], index: 3, kind: input, shape index: {}]   ;;  %s332_s4 = inlined_call_operand.vmem [shape: f32[1,128], index: 4, kind: input, shape index: {}]   ;;  %s333_s2 = inlined_call_operand.vmem [shape: f32[1,128], index: 2, kind: input, shape index: {}]   ;;  %s334_s6 = inlined_call_operand.vmem [shape: f32[16,128], index: 6, kind: output, shape index: {}]  }
   0x1   :  { %v26_v0 = vld [vmem:[%s328_s0] sm:$0xff]  ;;  %v27_v1 = vld [vmem:[%s328_s0 + $0x8] sm:$0xff]  ;;  %212 = vmatprep.subr.bf16.mxu0 %v246_v2  ;;  %v236_v5 = vld [vmem:[%s330_s1 + $0x10] sm:$0xff]   ;;  %228 = vmatprep.mubr.msk.bf16.mxu0 %vm247_vm1, %v246_v2 }
   0x2   :  { %28 = vadd.xlane.f32.xlu0 %v26_v0  ;;  %v234_v3 = vld [vmem:[%s330_s1] sm:$0xff]   ;;  %v235_v4 = vld [vmem:[%s330_s1 + $0x8] sm:$0xff]   ;;  %v237_v6 = vld [vmem:[%s330_s1 + $0x18] sm:$0xff]   ;;  %v37_v9 = vand.u32 127, %v36_v8 }
   0x3   :  { %213 = vmatpush3.bf16.xpose.msra.mxu0 %v234_v3  ;;  %v238_v7 = vld [vmem:[%s330_s1 + $0x20] sm:$0xff]   ;;  %v239_v20 = vld [vmem:[%s330_s1 + $0x28] sm:$0xff]   ;;  %v240_v21 = vld [vmem:[%s330_s1 + $0x30] sm:$0xff]  }
   0x4   :  { %214 = vmatprep.subr.bf16.mxu0 %v246_v2  ;;  %vm38_vm0 = vcmp.lt.s32.totalorder %v37_v9, 16  ;;  %v241_v22 = vld [vmem:[%s330_s1 + $0x38] sm:$0xff]   ;;  %v192_v31 = vld [vmem:[%s331_s3] ss:$0 sm:$0xff] }
   0x5   :  { %v193_v35 = vld [vmem:[%s332_s4] ss:$0 sm:$0xff] }
   0x6   :  { %30 = vadd.xlane.f32.xlu0 %v27_v1  ;;  %v194_v40 = vld [vmem:[%s333_s2] ss:$0 sm:$0xff] }
   0xb   :  { %215 = vmatpush3.bf16.xpose.msra.mxu0 %v235_v4 }
   0xc   :  { %216 = vmatprep.subr.bf16.mxu0 %v246_v2 }
  0x13   :  { %217 = vmatpush3.bf16.xpose.msra.mxu0 %v236_v5 }
  0x14   :  { %218 = vmatprep.subr.bf16.mxu0 %v246_v2 }
  0x1b   :  { %219 = vmatpush3.bf16.xpose.msra.mxu0 %v237_v6 }
  0x1c   :  { %220 = vmatprep.subr.bf16.mxu0 %v246_v2 }
  0x23   :  { %221 = vmatpush3.bf16.xpose.msra.mxu0 %v238_v7 }
  0x24   :  { %222 = vmatprep.subr.bf16.mxu0 %v246_v2 }
  0x2b   :  { %223 = vmatpush3.bf16.xpose.msra.mxu0 %v239_v20 }
  0x2c   :  { %224 = vmatprep.subr.bf16.mxu0 %v246_v2 }
  0x33   :  { %225 = vmatpush3.bf16.xpose.msra.mxu0 %v240_v21 }
  0x34   :  { %226 = vmatprep.subr.bf16.mxu0 %v246_v2 }
  0x3b   :  { %227 = vmatpush3.bf16.xpose.msra.mxu0 %v241_v22 }
  0x8f   :  { %v29_v10 = vpop.xlane.xlu0 %28 }
  0x90   :  { %v32_v11 = vmul.f32 0.0625, %v29_v10 }
  0x92   :  { %v34_v12 = vsub.f32 %v26_v0, %v32_v11 }
  0x93   :  { %v31_v13 = vpop.xlane.xlu0 %30 }
  0x94   :  { %v33_v14 = vmul.f32 0.0625, %v31_v13  ;;  %v39_v15 = vsel %vm38_vm0, %v34_v12, 0.0 }
  0x95   :  { %v41_v16 = vmul.f32 %v39_v15, %v39_v15 }
  0x96   :  { %v35_v17 = vsub.f32 %v27_v1, %v33_v14 }
  0x97   :  { %43 = vadd.xlane.f32.xlu1 %v41_v16 }
  0x98   :  { %v40_v18 = vsel %vm38_vm0, %v35_v17, 0.0 }
  0x99   :  { %v42_v19 = vmul.f32 %v40_v18, %v40_v18 }
  0x9b   :  { %45 = vadd.xlane.f32.xlu1 %v42_v19 }
 0x124   :  { %v44_v23 = vpop.xlane.xlu1 %43 }
 0x125   :  { %v47_v24 = vmul.f32 0.0625, %v44_v23 }
 0x127   :  { %v49_v25 = vadd.f32 1e-05, %v47_v24 }
 0x128   :  { %v46_v26 = vpop.xlane.xlu1 %45 }
 0x129   :  { %242 = vrsqrt.f32 %v49_v25  ;;  %v48_v27 = vmul.f32 0.0625, %v46_v26 }
 0x12b   :  { %v50_v28 = vadd.f32 1e-05, %v48_v27 }
 0x12d   :  { %244 = vrsqrt.f32 %v50_v28 }
 0x133   :  { %v243_v29 = vpop.eup %242 }
 0x134   :  { %v53_v30 = vmul.f32 %v243_v29, %v39_v15 }
 0x136   :  { %v62_v34 = vmul.f32 %v192_v31, %v53_v30 }
 0x137   :  { %v245_v32 = vpop.eup %244 }
 0x138   :  { %v54_v33 = vmul.f32 %v245_v32, %v40_v18  ;;  %v71_v37 = vadd.f32 %v193_v35, %v62_v34 }
 0x13a   :  { %v63_v36 = vmul.f32 %v192_v31, %v54_v33 }
 0x13c   :  { %v72_v38 = vadd.f32 %v193_v35, %v63_v36 }
 0x13e   :  { %v73_v39 = vpack.c.bf16 %v72_v38, %v71_v37 }
 0x140   :  { %229 = vmatmul.mubr.bf16.vlgmr.msra.gmra.mrb[0].mxu0 %v73_v39 }
 0x213   :  { %v179_v41 = vpop.f32.mrb[0].mxu0 }
 0x214   :  { %v180_v42 = vadd.f32 %v194_v40, %v179_v41  ;;  %v230_v43 = vpop.f32.mrb[1].mxu0 }
 0x215   :  { %v182_v44 = vpop.f32.mrb[2].mxu0 }
 0x216   :  { %186 = vst [vmem:[%s334_s6] sm:$0xff] %v180_v42  ;;  %v183_v45 = vadd.f32 %v194_v40, %v182_v44  ;;  %v231_v46 = vpop.f32.mrb[3].mxu0 }
 0x218   :  { %187 = vst [vmem:[%s334_s6 + $0x8] sm:$0xff] %v183_v45 }

// kernel: separator_forward.18
= control target key start
LH: loop header
LB: loop body
LE: loop exit
PB: predicated region body
PF: predicated region fallthrough
CT: control target
= control target key end

     0   :  { %v415_v6 = vmov 0.0   ;;  %v56_v12 = vlaneseq  ;;  %vm416_vm1 = vmmov 0   ;;  %s577_s0 = inlined_call_operand.vmem [shape: f32[48,128], index: 0, kind: input, shape index: {}]   ;;  %s578_s1 = inlined_call_operand.vmem [shape: bf16[128,128], index: 1, kind: input, shape index: {}]   ;;  %s579_s5 = inlined_call_operand.<no memory space> [shape: f32[1,1], index: 5, kind: input, shape index: {}]   ;;  %s580_s3 = inlined_call_operand.vmem [shape: f32[1,128], index: 3, kind: input, shape index: {}]   ;;  %s581_s4 = inlined_call_operand.vmem [shape: f32[1,128], index: 4, kind: input, shape index: {}]   ;;  %s582_s2 = inlined_call_operand.vmem [shape: f32[1,128], index: 2, kind: input, shape index: {}]   ;;  %s583_s6 = inlined_call_operand.vmem [shape: bf16[48,128], index: 6, kind: output, shape index: {}]  }
   0x1   :  { %v28_v0 = vld [vmem:[%s577_s0 + $0x10] sm:$0xff]  ;;  %v26_v1 = vld [vmem:[%s577_s0] sm:$0xff]  ;;  %v29_v2 = vld [vmem:[%s577_s0 + $0x18] sm:$0xff]  ;;  %377 = vmatprep.subr.bf16.mxu1 %v415_v6  ;;  %349 = vmatprep.subr.bf16.mxu0 %v415_v6 }
   0x2   :  { %36 = vadd.xlane.f32.xlu0 %v28_v0  ;;  %32 = vadd.xlane.f32.xlu1 %v26_v1  ;;  %v464_v3 = vld [vmem:[%s577_s0 + $0x8] sm:$0xff]  ;;  %v470_v4 = vld [vmem:[%s577_s0 + $0x20] sm:$0xff]  ;;  %v397_v9 = vld [vmem:[%s578_s1 + $0x10] sm:$0xff]   ;;  %v57_v13 = vand.u32 127, %v56_v12 }
   0x3   :  { %v475_v5 = vld [vmem:[%s577_s0 + $0x28] sm:$0xff]  ;;  %v395_v7 = vld [vmem:[%s578_s1] sm:$0xff]   ;;  %v398_v10 = vld [vmem:[%s578_s1 + $0x18] sm:$0xff]   ;;  %369 = vmatprep.mubr.msk.bf16.mxu1 %vm416_vm1, %v415_v6  ;;  %365 = vmatprep.mubr.msk.bf16.mxu0 %vm416_vm1, %v415_v6 }
   0x4   :  { %385 = vmatpush3.bf16.xpose.msra.mxu1 %v395_v7  ;;  %350 = vmatpush3.bf16.xpose.msra.mxu0 %v395_v7  ;;  %v396_v8 = vld [vmem:[%s578_s1 + $0x8] sm:$0xff]   ;;  %v399_v11 = vld [vmem:[%s578_s1 + $0x20] sm:$0xff]   ;;  %vm58_vm0 = vcmp.lt.s32.totalorder %v57_v13, 16  ;;  %v401_v45 = vld [vmem:[%s578_s1 + $0x30] sm:$0xff]  }
   0x5   :  { %378 = vmatprep.subr.bf16.mxu1 %v415_v6  ;;  %351 = vmatprep.subr.bf16.mxu0 %v415_v6  ;;  %v400_v44 = vld [vmem:[%s578_s1 + $0x28] sm:$0xff]   ;;  %v402_v46 = vld [vmem:[%s578_s1 + $0x38] sm:$0xff]  }
   0x6   :  { %38 = vadd.xlane.f32.xlu0 %v29_v2  ;;  %34 = vadd.xlane.f32.xlu1 %v464_v3 }
   0xa   :  { %40 = vadd.xlane.f32.xlu0 %v470_v4  ;;  %42 = vadd.xlane.f32.xlu1 %v475_v5 }
   0xc   :  { %386 = vmatpush3.bf16.xpose.msra.mxu1 %v396_v8  ;;  %352 = vmatpush3.bf16.xpose.msra.mxu0 %v396_v8 }
   0xd   :  { %379 = vmatprep.subr.bf16.mxu1 %v415_v6  ;;  %353 = vmatprep.subr.bf16.mxu0 %v415_v6 }
  0x14   :  { %387 = vmatpush3.bf16.xpose.msra.mxu1 %v397_v9  ;;  %354 = vmatpush3.bf16.xpose.msra.mxu0 %v397_v9 }
  0x15   :  { %380 = vmatprep.subr.bf16.mxu1 %v415_v6  ;;  %355 = vmatprep.subr.bf16.mxu0 %v415_v6 }
  0x1c   :  { %388 = vmatpush3.bf16.xpose.msra.mxu1 %v398_v10  ;;  %356 = vmatpush3.bf16.xpose.msra.mxu0 %v398_v10  ;;  %v299_v10 = vld [vmem:[%s581_s4] ss:$0 sm:$0xff] }
  0x1d   :  { %381 = vmatprep.subr.bf16.mxu1 %v415_v6  ;;  %357 = vmatprep.subr.bf16.mxu0 %v415_v6 }
  0x24   :  { %389 = vmatpush3.bf16.xpose.msra.mxu1 %v399_v11  ;;  %358 = vmatpush3.bf16.xpose.msra.mxu0 %v399_v11 }
  0x25   :  { %382 = vmatprep.subr.bf16.mxu1 %v415_v6  ;;  %359 = vmatprep.subr.bf16.mxu0 %v415_v6 }
  0x2c   :  { %390 = vmatpush3.bf16.xpose.msra.mxu1 %v400_v44  ;;  %360 = vmatpush3.bf16.xpose.msra.mxu0 %v400_v44 }
  0x2d   :  { %383 = vmatprep.subr.bf16.mxu1 %v415_v6  ;;  %361 = vmatprep.subr.bf16.mxu0 %v415_v6 }
  0x34   :  { %391 = vmatpush3.bf16.xpose.msra.mxu1 %v401_v45  ;;  %362 = vmatpush3.bf16.xpose.msra.mxu0 %v401_v45 }
  0x35   :  { %384 = vmatprep.subr.bf16.mxu1 %v415_v6  ;;  %363 = vmatprep.subr.bf16.mxu0 %v415_v6 }
  0x3c   :  { %392 = vmatpush3.bf16.xpose.msra.mxu1 %v402_v46  ;;  %364 = vmatpush3.bf16.xpose.msra.mxu0 %v402_v46 }
  0x8f   :  { %v37_v14 = vpop.xlane.xlu0 %36  ;;  %v33_v15 = vpop.xlane.xlu1 %32 }
  0x90   :  { %v46_v16 = vmul.f32 0.0625, %v37_v14  ;;  %v44_v17 = vmul.f32 0.0625, %v33_v15 }
  0x92   :  { %v52_v18 = vsub.f32 %v28_v0, %v46_v16  ;;  %v50_v19 = vsub.f32 %v26_v1, %v44_v17 }
  0x93   :  { %v39_v20 = vpop.xlane.xlu0 %38  ;;  %v35_v21 = vpop.xlane.xlu1 %34 }
  0x94   :  { %v47_v22 = vmul.f32 0.0625, %v39_v20  ;;  %v507_v23 = vsel %vm58_vm0, %v52_v18, 0.0  ;;  %v45_v24 = vmul.f32 0.0625, %v35_v21  ;;  %v510_v25 = vsel %vm58_vm0, %v50_v19, 0.0 }
  0x95   :  { %v67_v26 = vmul.f32 %v507_v23, %v507_v23  ;;  %v65_v30 = vmul.f32 %v510_v25, %v510_v25 }
  0x96   :  { %v53_v27 = vsub.f32 %v29_v2, %v47_v22  ;;  %v51_v28 = vsub.f32 %v464_v3, %v45_v24  ;;  %v298_v3 = vld [vmem:[%s580_s3] ss:$0 sm:$0xff] }
  0x97   :  { %75 = vadd.xlane.f32.xlu0 %v67_v26  ;;  %v41_v29 = vpop.xlane.xlu0 %40  ;;  %v43_v31 = vpop.xlane.xlu1 %42 }
  0x98   :  { %v48_v32 = vmul.f32 0.0625, %v41_v29  ;;  %v518_v33 = vsel %vm58_vm0, %v53_v27, 0.0  ;;  %v49_v34 = vmul.f32 0.0625, %v43_v31  ;;  %v521_v35 = vsel %vm58_vm0, %v51_v28, 0.0  ;;  %v300_v31 = vld [vmem:[%s582_s2] ss:$0 sm:$0xff] }
  0x99   :  { %v68_v36 = vmul.f32 %v518_v33, %v518_v33  ;;  %v66_v39 = vmul.f32 %v521_v35, %v521_v35 }
  0x9a   :  { %v54_v37 = vsub.f32 %v470_v4, %v48_v32  ;;  %v55_v38 = vsub.f32 %v475_v5, %v49_v34 }
  0x9b   :  { %77 = vadd.xlane.f32.xlu1 %v68_v36  ;;  %71 = vadd.xlane.f32.xlu0 %v65_v30 }
  0x9c   :  { %v63_v40 = vsel %vm58_vm0, %v54_v37, 0.0  ;;  %v531_v41 = vsel %vm58_vm0, %v55_v38, 0.0 }
  0x9d   :  { %v69_v42 = vmul.f32 %v63_v40, %v63_v40  ;;  %v70_v43 = vmul.f32 %v531_v41, %v531_v41 }
  0x9f   :  { %79 = vadd.xlane.f32.xlu0 %v69_v42  ;;  %73 = vadd.xlane.f32.xlu1 %v66_v39 }
  0xa3   :  { %81 = vadd.xlane.f32.xlu1 %v70_v43 }
 0x124   :  { %v76_v47 = vpop.xlane.xlu0 %75 }
 0x125   :  { %v85_v48 = vmul.f32 0.0625, %v76_v47 }
 0x127   :  { %v91_v49 = vadd.f32 1e-05, %v85_v48 }
 0x128   :  { %v72_v50 = vpop.xlane.xlu0 %71  ;;  %v78_v51 = vpop.xlane.xlu1 %77 }
 0x129   :  { %403 = vrsqrt.f32 %v91_v49  ;;  %v83_v52 = vmul.f32 0.0625, %v72_v50  ;;  %v86_v53 = vmul.f32 0.0625, %v78_v51 }
 0x12b   :  { %v89_v54 = vadd.f32 1e-05, %v83_v52  ;;  %v92_v55 = vadd.f32 1e-05, %v86_v53 }
 0x12c   :  { %v80_v56 = vpop.xlane.xlu0 %79  ;;  %v74_v57 = vpop.xlane.xlu1 %73 }
 0x12d   :  { %405 = vrsqrt.f32 %v89_v54  ;;  %v87_v58 = vmul.f32 0.0625, %v80_v56  ;;  %v84_v59 = vmul.f32 0.0625, %v74_v57 }
 0x12e   :  { %407 = vrsqrt.f32 %v92_v55 }
 0x12f   :  { %v93_v60 = vadd.f32 1e-05, %v87_v58  ;;  %v90_v61 = vadd.f32 1e-05, %v84_v59 }
 0x130   :  { %v82_v62 = vpop.xlane.xlu1 %81 }
 0x131   :  { %409 = vrsqrt.f32 %v93_v60  ;;  %v88_v63 = vmul.f32 0.0625, %v82_v62 }
 0x132   :  { %411 = vrsqrt.f32 %v90_v61 }
 0x133   :  { %v404_v0 = vpop.eup %403  ;;  %v94_v1 = vadd.f32 1e-05, %v88_v63 }
 0x134   :  { %v103_v2 = vmul.f32 %v404_v0, %v507_v23 }
 0x135   :  { %413 = vrsqrt.f32 %v94_v1 }
 0x136   :  { %v116_v8 = vmul.f32 %v298_v3, %v103_v2 }
 0x137   :  { %v406_v4 = vpop.eup %405 }
 0x138   :  { %v408_v5 = vpop.eup %407  ;;  %v101_v9 = vmul.f32 %v406_v4, %v510_v25  ;;  %v129_v15 = vadd.f32 %v299_v10, %v116_v8 }
 0x139   :  { %v104_v7 = vmul.f32 %v408_v5, %v518_v33 }
 0x13a   :  { %v114_v18 = vmul.f32 %v298_v3, %v101_v9 }
 0x13b   :  { %v410_v11 = vpop.eup %409  ;;  %v117_v12 = vmul.f32 %v298_v3, %v104_v7 }
 0x13c   :  { %v412_v13 = vpop.eup %411  ;;  %v105_v14 = vmul.f32 %v410_v11, %v63_v40  ;;  %v127_v24 = vadd.f32 %v299_v10, %v114_v18 }
 0x13d   :  { %v130_v16 = vadd.f32 %v299_v10, %v117_v12  ;;  %v102_v17 = vmul.f32 %v412_v13, %v521_v35 }
 0x13e   :  { %v118_v23 = vmul.f32 %v298_v3, %v105_v14 }
 0x13f   :  { %v414_v19 = vpop.eup %413  ;;  %v134_v20 = vpack.c.bf16 %v130_v16, %v129_v15  ;;  %v115_v21 = vmul.f32 %v298_v3, %v102_v17 }
 0x140   :  { %v106_v22 = vmul.f32 %v414_v19, %v531_v41  ;;  %v131_v28 = vadd.f32 %v299_v10, %v118_v23 }
 0x141   :  { %370 = vmatmul.mubr.bf16.vlgmr.msra.gmra.mrb[0].mxu1 %v134_v20  ;;  %v128_v25 = vadd.f32 %v299_v10, %v115_v21 }
 0x142   :  { %373 = vmatprep.mubr.msk.bf16.mxu1 %vm416_vm1, %v415_v6  ;;  %v119_v26 = vmul.f32 %v298_v3, %v106_v22 }
 0x143   :  { %v133_v27 = vpack.c.bf16 %v128_v25, %v127_v24 }
 0x144   :  { %v132_v29 = vadd.f32 %v299_v10, %v119_v26 }
 0x145   :  { %366 = vmatmul.mubr.bf16.vlgmr.msra.gmra.mrb[0].mxu0 %v133_v27 }
 0x146   :  { %v135_v30 = vpack.c.bf16 %v132_v29, %v131_v28 }
 0x149   :  { %374 = vmatmul.mubr.bf16.gmra.mrb[4].mxu1 %v135_v30 }
 0x214   :  { %v249_v32 = vpop.f32.mrb[0].mxu1 }
 0x215   :  { %v371_v33 = vpop.f32.mrb[1].mxu1  ;;  %v250_v35 = vadd.f32 %v300_v31, %v249_v32 }
 0x216   :  { %v252_v34 = vpop.f32.mrb[2].mxu1 }
 0x217   :  { %v253_v36 = vadd.f32 %v300_v31, %v252_v34  ;;  %v372_v37 = vpop.f32.mrb[3].mxu1 }
 0x218   :  { %v241_v38 = vpop.f32.mrb[0].mxu0 }
 0x219   :  { %v329_v39 = vpack.c.bf16 %v253_v36, %v250_v35  ;;  %v367_v6 = vpop.f32.mrb[1].mxu0  ;;  %v242_v41 = vadd.f32 %v300_v31, %v241_v38 }
 0x21a   :  { %v244_v40 = vpop.f32.mrb[2].mxu0 }
 0x21b   :  { %336 = vst [vmem:[%s583_s6 + $0x8] sm:$0xff] %v329_v39   ;;  %v245_v42 = vadd.f32 %v300_v31, %v244_v40  ;;  %v368_v43 = vpop.f32.mrb[3].mxu0 }
 0x21c   :  { %v257_v44 = vpop.f32.mrb[4].mxu1 }
 0x21d   :  { %v324_v45 = vpack.c.bf16 %v245_v42, %v242_v41  ;;  %v375_v46 = vpop.f32.mrb[5].mxu1  ;;  %v258_v48 = vadd.f32 %v300_v31, %v257_v44 }
 0x21e   :  { %v260_v47 = vpop.f32.mrb[6].mxu1 }
 0x21f   :  { %325 = vst [vmem:[%s583_s6] sm:$0xff] %v324_v45   ;;  %v261_v49 = vadd.f32 %v300_v31, %v260_v47  ;;  %v376_v50 = vpop.f32.mrb[7].mxu1 }
 0x221   :  { %v334_v51 = vpack.c.bf16 %v261_v49, %v258_v48 }
 0x223   :  { %337 = vst [vmem:[%s583_s6 + $0x10] sm:$0xff] %v334_v51  }

// kernel: separator_forward.20
= control target key start
LH: loop header
LB: loop body
LE: loop exit
PB: predicated region body
PF: predicated region fallthrough
CT: control target
= control target key end

     0   :  { %v268_v0 = vmov 0.0   ;;  %vm269_vm0 = vmmov 0   ;;  %s362_s1 = inlined_call_operand.vmem [shape: bf16[128,128], index: 1, kind: input, shape index: {}]   ;;  %s363_s3 = inlined_call_operand.vmem [shape: f32[1,128], index: 3, kind: input, shape index: {}, may-alias: {3,4}]   ;;  %s364_s4 = inlined_call_operand.vmem [shape: f32[1,128], index: 4, kind: input, shape index: {}, may-alias: {3,4}]   ;;  %s365_s5 = inlined_call_operand.<no memory space> [shape: f32[1,1], index: 5, kind: input, shape index: {}]   ;;  %s366_s0 = inlined_call_operand.vmem [shape: bf16[48,128], index: 0, kind: input, shape index: {}]   ;;  %s367_s2 = inlined_call_operand.vmem [shape: f32[1,128], index: 2, kind: input, shape index: {}]   ;;  %s368_s6 = inlined_call_operand.vmem [shape: f32[48,128], index: 6, kind: output, shape index: {}]  }
   0x1   :  { %239 = vmatprep.subr.bf16.mxu1 %v268_v0  ;;  %v257_v1 = vld [vmem:[%s362_s1] sm:$0xff]   ;;  %211 = vmatprep.subr.bf16.mxu0 %v268_v0  ;;  %v258_v2 = vld [vmem:[%s362_s1 + $0x8] sm:$0xff]   ;;  %v259_v3 = vld [vmem:[%s362_s1 + $0x10] sm:$0xff]  }
   0x2   :  { %231 = vmatprep.mubr.msk.bf16.mxu1 %vm269_vm0, %v268_v0  ;;  %227 = vmatprep.mubr.msk.bf16.mxu0 %vm269_vm0, %v268_v0  ;;  %v260_v4 = vld [vmem:[%s362_s1 + $0x18] sm:$0xff]   ;;  %v261_v5 = vld [vmem:[%s362_s1 + $0x20] sm:$0xff]   ;;  %v262_v6 = vld [vmem:[%s362_s1 + $0x28] sm:$0xff]  }
   0x3   :  { %247 = vmatpush3.bf16.xpose.msra.mxu1 %v257_v1  ;;  %212 = vmatpush3.bf16.xpose.msra.mxu0 %v257_v1  ;;  %v263_v7 = vld [vmem:[%s362_s1 + $0x30] sm:$0xff]   ;;  %v264_v8 = vld [vmem:[%s362_s1 + $0x38] sm:$0xff]   ;;  %v265_v9 = vld [vmem:[%s366_s0 + $0x8] sm:$0xff]  }
   0x4   :  { %240 = vmatprep.subr.bf16.mxu1 %v268_v0  ;;  %213 = vmatprep.subr.bf16.mxu0 %v268_v0  ;;  %v266_v10 = vld [vmem:[%s366_s0] sm:$0xff]   ;;  %v267_v11 = vld [vmem:[%s366_s0 + $0x10] sm:$0xff]  }
   0x5   :  { %v188_v12 = vld [vmem:[%s367_s2] ss:$0 sm:$0xff] }
   0xb   :  { %248 = vmatpush3.bf16.xpose.msra.mxu1 %v258_v2  ;;  %214 = vmatpush3.bf16.xpose.msra.mxu0 %v258_v2 }
   0xc   :  { %241 = vmatprep.subr.bf16.mxu1 %v268_v0  ;;  %215 = vmatprep.subr.bf16.mxu0 %v268_v0 }
  0x13   :  { %249 = vmatpush3.bf16.xpose.msra.mxu1 %v259_v3  ;;  %216 = vmatpush3.bf16.xpose.msra.mxu0 %v259_v3 }
  0x14   :  { %242 = vmatprep.subr.bf16.mxu1 %v268_v0  ;;  %217 = vmatprep.subr.bf16.mxu0 %v268_v0 }
  0x1b   :  { %250 = vmatpush3.bf16.xpose.msra.mxu1 %v260_v4  ;;  %218 = vmatpush3.bf16.xpose.msra.mxu0 %v260_v4 }
  0x1c   :  { %243 = vmatprep.subr.bf16.mxu1 %v268_v0  ;;  %219 = vmatprep.subr.bf16.mxu0 %v268_v0 }
  0x23   :  { %251 = vmatpush3.bf16.xpose.msra.mxu1 %v261_v5  ;;  %220 = vmatpush3.bf16.xpose.msra.mxu0 %v261_v5 }
  0x24   :  { %244 = vmatprep.subr.bf16.mxu1 %v268_v0  ;;  %221 = vmatprep.subr.bf16.mxu0 %v268_v0 }
  0x2b   :  { %252 = vmatpush3.bf16.xpose.msra.mxu1 %v262_v6  ;;  %222 = vmatpush3.bf16.xpose.msra.mxu0 %v262_v6 }
  0x2c   :  { %245 = vmatprep.subr.bf16.mxu1 %v268_v0  ;;  %223 = vmatprep.subr.bf16.mxu0 %v268_v0 }
  0x33   :  { %253 = vmatpush3.bf16.xpose.msra.mxu1 %v263_v7  ;;  %224 = vmatpush3.bf16.xpose.msra.mxu0 %v263_v7 }
  0x34   :  { %246 = vmatprep.subr.bf16.mxu1 %v268_v0  ;;  %225 = vmatprep.subr.bf16.mxu0 %v268_v0 }
  0x3b   :  { %254 = vmatpush3.bf16.xpose.msra.mxu1 %v264_v8  ;;  %226 = vmatpush3.bf16.xpose.msra.mxu0 %v264_v8 }
  0x42   :  { %232 = vmatmul.mubr.bf16.vlgmr.msra.gmra.mrb[0].mxu1 %v265_v9  ;;  %228 = vmatmul.mubr.bf16.vlgmr.msra.gmra.mrb[0].mxu0 %v266_v10 }
  0x43   :  { %235 = vmatprep.mubr.msk.bf16.mxu1 %vm269_vm0, %v268_v0 }
  0x4a   :  { %236 = vmatmul.mubr.bf16.gmra.mrb[4].mxu1 %v267_v11 }
 0x115   :  { %v163_v13 = vpop.f32.mrb[0].mxu1  ;;  %v155_v14 = vpop.f32.mrb[0].mxu0 }
 0x116   :  { %v164_v15 = vadd.f32 %v188_v12, %v163_v13  ;;  %v233_v16 = vpop.f32.mrb[1].mxu1  ;;  %v156_v17 = vadd.f32 %v188_v12, %v155_v14  ;;  %v229_v18 = vpop.f32.mrb[1].mxu0 }
 0x117   :  { %v166_v19 = vpop.f32.mrb[2].mxu1  ;;  %v158_v20 = vpop.f32.mrb[2].mxu0 }
 0x118   :  { %180 = vst [vmem:[%s368_s6 + $0x10] sm:$0xff] %v164_v15  ;;  %v167_v21 = vadd.f32 %v188_v12, %v166_v19  ;;  %v234_v22 = vpop.f32.mrb[3].mxu1  ;;  %178 = vst [vmem:[%s368_s6] sm:$0xff] %v156_v17  ;;  %v159_v23 = vadd.f32 %v188_v12, %v158_v20  ;;  %v230_v24 = vpop.f32.mrb[3].mxu0 }
 0x11a   :  { %181 = vst [vmem:[%s368_s6 + $0x18] sm:$0xff] %v167_v21  ;;  %179 = vst [vmem:[%s368_s6 + $0x8] sm:$0xff] %v159_v23 }
 0x11d   :  { %v171_v25 = vpop.f32.mrb[4].mxu1 }
 0x11e   :  { %v172_v26 = vadd.f32 %v188_v12, %v171_v25  ;;  %v237_v27 = vpop.f32.mrb[5].mxu1 }
 0x11f   :  { %v174_v28 = vpop.f32.mrb[6].mxu1 }
 0x120   :  { %182 = vst [vmem:[%s368_s6 + $0x20] sm:$0xff] %v172_v26  ;;  %v175_v29 = vadd.f32 %v188_v12, %v174_v28  ;;  %v238_v30 = vpop.f32.mrb[7].mxu1 }
 0x122   :  { %183 = vst [vmem:[%s368_s6 + $0x28] sm:$0xff] %v175_v29 }

// kernel: separator_forward.21
= control target key start
LH: loop header
LB: loop body
LE: loop exit
PB: predicated region body
PF: predicated region fallthrough
CT: control target
= control target key end

     0   :  { %v368_v6 = vmov 0.0   ;;  %v56_v12 = vlaneseq  ;;  %vm369_vm1 = vmmov 0   ;;  %s539_s0 = inlined_call_operand.vmem [shape: f32[48,128], index: 0, kind: input, shape index: {}]   ;;  %s540_s1 = inlined_call_operand.vmem [shape: bf16[128,128], index: 1, kind: input, shape index: {}]   ;;  %s541_s5 = inlined_call_operand.<no memory space> [shape: f32[1,1], index: 5, kind: input, shape index: {}]   ;;  %s542_s3 = inlined_call_operand.vmem [shape: f32[1,128], index: 3, kind: input, shape index: {}]   ;;  %s543_s4 = inlined_call_operand.vmem [shape: f32[1,128], index: 4, kind: input, shape index: {}]   ;;  %s544_s2 = inlined_call_operand.vmem [shape: f32[1,128], index: 2, kind: input, shape index: {}]   ;;  %s545_s6 = inlined_call_operand.vmem [shape: f32[48,128], index: 6, kind: output, shape index: {}]  }
   0x1   :  { %v28_v0 = vld [vmem:[%s539_s0 + $0x10] sm:$0xff]  ;;  %v26_v1 = vld [vmem:[%s539_s0] sm:$0xff]  ;;  %v29_v2 = vld [vmem:[%s539_s0 + $0x18] sm:$0xff]  ;;  %330 = vmatprep.subr.bf16.mxu1 %v368_v6  ;;  %302 = vmatprep.subr.bf16.mxu0 %v368_v6 }
   0x2   :  { %36 = vadd.xlane.f32.xlu0 %v28_v0  ;;  %32 = vadd.xlane.f32.xlu1 %v26_v1  ;;  %v417_v3 = vld [vmem:[%s539_s0 + $0x8] sm:$0xff]  ;;  %v423_v4 = vld [vmem:[%s539_s0 + $0x20] sm:$0xff]  ;;  %v350_v9 = vld [vmem:[%s540_s1 + $0x10] sm:$0xff]   ;;  %v57_v13 = vand.u32 127, %v56_v12 }
   0x3   :  { %v428_v5 = vld [vmem:[%s539_s0 + $0x28] sm:$0xff]  ;;  %v348_v7 = vld [vmem:[%s540_s1] sm:$0xff]   ;;  %v351_v10 = vld [vmem:[%s540_s1 + $0x18] sm:$0xff]   ;;  %322 = vmatprep.mubr.msk.bf16.mxu1 %vm369_vm1, %v368_v6  ;;  %318 = vmatprep.mubr.msk.bf16.mxu0 %vm369_vm1, %v368_v6 }
   0x4   :  { %338 = vmatpush3.bf16.xpose.msra.mxu1 %v348_v7  ;;  %303 = vmatpush3.bf16.xpose.msra.mxu0 %v348_v7  ;;  %v349_v8 = vld [vmem:[%s540_s1 + $0x8] sm:$0xff]   ;;  %v352_v11 = vld [vmem:[%s540_s1 + $0x20] sm:$0xff]   ;;  %vm58_vm0 = vcmp.lt.s32.totalorder %v57_v13, 16  ;;  %v354_v45 = vld [vmem:[%s540_s1 + $0x30] sm:$0xff]  }
   0x5   :  { %331 = vmatprep.subr.bf16.mxu1 %v368_v6  ;;  %304 = vmatprep.subr.bf16.mxu0 %v368_v6  ;;  %v353_v44 = vld [vmem:[%s540_s1 + $0x28] sm:$0xff]   ;;  %v355_v46 = vld [vmem:[%s540_s1 + $0x38] sm:$0xff]  }
   0x6   :  { %38 = vadd.xlane.f32.xlu0 %v29_v2  ;;  %34 = vadd.xlane.f32.xlu1 %v417_v3 }
   0xa   :  { %40 = vadd.xlane.f32.xlu0 %v423_v4  ;;  %42 = vadd.xlane.f32.xlu1 %v428_v5 }
   0xc   :  { %339 = vmatpush3.bf16.xpose.msra.mxu1 %v349_v8  ;;  %305 = vmatpush3.bf16.xpose.msra.mxu0 %v349_v8 }
   0xd   :  { %332 = vmatprep.subr.bf16.mxu1 %v368_v6  ;;  %306 = vmatprep.subr.bf16.mxu0 %v368_v6 }
  0x14   :  { %340 = vmatpush3.bf16.xpose.msra.mxu1 %v350_v9  ;;  %307 = vmatpush3.bf16.xpose.msra.mxu0 %v350_v9 }
  0x15   :  { %333 = vmatprep.subr.bf16.mxu1 %v368_v6  ;;  %308 = vmatprep.subr.bf16.mxu0 %v368_v6 }
  0x1c   :  { %341 = vmatpush3.bf16.xpose.msra.mxu1 %v351_v10  ;;  %309 = vmatpush3.bf16.xpose.msra.mxu0 %v351_v10  ;;  %v281_v10 = vld [vmem:[%s543_s4] ss:$0 sm:$0xff] }
  0x1d   :  { %334 = vmatprep.subr.bf16.mxu1 %v368_v6  ;;  %310 = vmatprep.subr.bf16.mxu0 %v368_v6 }
  0x24   :  { %342 = vmatpush3.bf16.xpose.msra.mxu1 %v352_v11  ;;  %311 = vmatpush3.bf16.xpose.msra.mxu0 %v352_v11 }
  0x25   :  { %335 = vmatprep.subr.bf16.mxu1 %v368_v6  ;;  %312 = vmatprep.subr.bf16.mxu0 %v368_v6 }
  0x2c   :  { %343 = vmatpush3.bf16.xpose.msra.mxu1 %v353_v44  ;;  %313 = vmatpush3.bf16.xpose.msra.mxu0 %v353_v44 }
  0x2d   :  { %336 = vmatprep.subr.bf16.mxu1 %v368_v6  ;;  %314 = vmatprep.subr.bf16.mxu0 %v368_v6 }
  0x34   :  { %344 = vmatpush3.bf16.xpose.msra.mxu1 %v354_v45  ;;  %315 = vmatpush3.bf16.xpose.msra.mxu0 %v354_v45 }
  0x35   :  { %337 = vmatprep.subr.bf16.mxu1 %v368_v6  ;;  %316 = vmatprep.subr.bf16.mxu0 %v368_v6 }
  0x3c   :  { %345 = vmatpush3.bf16.xpose.msra.mxu1 %v355_v46  ;;  %317 = vmatpush3.bf16.xpose.msra.mxu0 %v355_v46 }
  0x8f   :  { %v37_v14 = vpop.xlane.xlu0 %36  ;;  %v33_v15 = vpop.xlane.xlu1 %32 }
  0x90   :  { %v46_v16 = vmul.f32 0.0625, %v37_v14  ;;  %v44_v17 = vmul.f32 0.0625, %v33_v15 }
  0x92   :  { %v52_v18 = vsub.f32 %v28_v0, %v46_v16  ;;  %v50_v19 = vsub.f32 %v26_v1, %v44_v17 }
  0x93   :  { %v39_v20 = vpop.xlane.xlu0 %38  ;;  %v35_v21 = vpop.xlane.xlu1 %34 }
  0x94   :  { %v47_v22 = vmul.f32 0.0625, %v39_v20  ;;  %v460_v23 = vsel %vm58_vm0, %v52_v18, 0.0  ;;  %v45_v24 = vmul.f32 0.0625, %v35_v21  ;;  %v463_v25 = vsel %vm58_vm0, %v50_v19, 0.0 }
  0x95   :  { %v67_v26 = vmul.f32 %v460_v23, %v460_v23  ;;  %v65_v30 = vmul.f32 %v463_v25, %v463_v25 }
  0x96   :  { %v53_v27 = vsub.f32 %v29_v2, %v47_v22  ;;  %v51_v28 = vsub.f32 %v417_v3, %v45_v24  ;;  %v280_v3 = vld [vmem:[%s542_s3] ss:$0 sm:$0xff] }
  0x97   :  { %75 = vadd.xlane.f32.xlu0 %v67_v26  ;;  %v41_v29 = vpop.xlane.xlu0 %40  ;;  %v43_v31 = vpop.xlane.xlu1 %42 }
  0x98   :  { %v48_v32 = vmul.f32 0.0625, %v41_v29  ;;  %v471_v33 = vsel %vm58_vm0, %v53_v27, 0.0  ;;  %v49_v34 = vmul.f32 0.0625, %v43_v31  ;;  %v474_v35 = vsel %vm58_vm0, %v51_v28, 0.0  ;;  %v282_v31 = vld [vmem:[%s544_s2] ss:$0 sm:$0xff] }
  0x99   :  { %v68_v36 = vmul.f32 %v471_v33, %v471_v33  ;;  %v66_v39 = vmul.f32 %v474_v35, %v474_v35 }
  0x9a   :  { %v54_v37 = vsub.f32 %v423_v4, %v48_v32  ;;  %v55_v38 = vsub.f32 %v428_v5, %v49_v34 }
  0x9b   :  { %77 = vadd.xlane.f32.xlu1 %v68_v36  ;;  %71 = vadd.xlane.f32.xlu0 %v65_v30 }
  0x9c   :  { %v63_v40 = vsel %vm58_vm0, %v54_v37, 0.0  ;;  %v484_v41 = vsel %vm58_vm0, %v55_v38, 0.0 }
  0x9d   :  { %v69_v42 = vmul.f32 %v63_v40, %v63_v40  ;;  %v70_v43 = vmul.f32 %v484_v41, %v484_v41 }
  0x9f   :  { %79 = vadd.xlane.f32.xlu0 %v69_v42  ;;  %73 = vadd.xlane.f32.xlu1 %v66_v39 }
  0xa3   :  { %81 = vadd.xlane.f32.xlu1 %v70_v43 }
 0x124   :  { %v76_v47 = vpop.xlane.xlu0 %75 }
 0x125   :  { %v85_v48 = vmul.f32 0.0625, %v76_v47 }
 0x127   :  { %v91_v49 = vadd.f32 1e-05, %v85_v48 }
 0x128   :  { %v72_v50 = vpop.xlane.xlu0 %71  ;;  %v78_v51 = vpop.xlane.xlu1 %77 }
 0x129   :  { %356 = vrsqrt.f32 %v91_v49  ;;  %v83_v52 = vmul.f32 0.0625, %v72_v50  ;;  %v86_v53 = vmul.f32 0.0625, %v78_v51 }
 0x12b   :  { %v89_v54 = vadd.f32 1e-05, %v83_v52  ;;  %v92_v55 = vadd.f32 1e-05, %v86_v53 }
 0x12c   :  { %v80_v56 = vpop.xlane.xlu0 %79  ;;  %v74_v57 = vpop.xlane.xlu1 %73 }
 0x12d   :  { %358 = vrsqrt.f32 %v89_v54  ;;  %v87_v58 = vmul.f32 0.0625, %v80_v56  ;;  %v84_v59 = vmul.f32 0.0625, %v74_v57 }
 0x12e   :  { %360 = vrsqrt.f32 %v92_v55 }
 0x12f   :  { %v93_v60 = vadd.f32 1e-05, %v87_v58  ;;  %v90_v61 = vadd.f32 1e-05, %v84_v59 }
 0x130   :  { %v82_v62 = vpop.xlane.xlu1 %81 }
 0x131   :  { %362 = vrsqrt.f32 %v93_v60  ;;  %v88_v63 = vmul.f32 0.0625, %v82_v62 }
 0x132   :  { %364 = vrsqrt.f32 %v90_v61 }
 0x133   :  { %v357_v0 = vpop.eup %356  ;;  %v94_v1 = vadd.f32 1e-05, %v88_v63 }
 0x134   :  { %v103_v2 = vmul.f32 %v357_v0, %v460_v23 }
 0x135   :  { %366 = vrsqrt.f32 %v94_v1 }
 0x136   :  { %v116_v8 = vmul.f32 %v280_v3, %v103_v2 }
 0x137   :  { %v359_v4 = vpop.eup %358 }
 0x138   :  { %v361_v5 = vpop.eup %360  ;;  %v101_v9 = vmul.f32 %v359_v4, %v463_v25  ;;  %v129_v15 = vadd.f32 %v281_v10, %v116_v8 }
 0x139   :  { %v104_v7 = vmul.f32 %v361_v5, %v471_v33 }
 0x13a   :  { %v114_v18 = vmul.f32 %v280_v3, %v101_v9 }
 0x13b   :  { %v363_v11 = vpop.eup %362  ;;  %v117_v12 = vmul.f32 %v280_v3, %v104_v7 }
 0x13c   :  { %v365_v13 = vpop.eup %364  ;;  %v105_v14 = vmul.f32 %v363_v11, %v63_v40  ;;  %v127_v24 = vadd.f32 %v281_v10, %v114_v18 }
 0x13d   :  { %v130_v16 = vadd.f32 %v281_v10, %v117_v12  ;;  %v102_v17 = vmul.f32 %v365_v13, %v474_v35 }
 0x13e   :  { %v118_v23 = vmul.f32 %v280_v3, %v105_v14 }
 0x13f   :  { %v367_v19 = vpop.eup %366  ;;  %v134_v20 = vpack.c.bf16 %v130_v16, %v129_v15  ;;  %v115_v21 = vmul.f32 %v280_v3, %v102_v17 }
 0x140   :  { %v106_v22 = vmul.f32 %v367_v19, %v484_v41  ;;  %v131_v28 = vadd.f32 %v281_v10, %v118_v23 }
 0x141   :  { %323 = vmatmul.mubr.bf16.vlgmr.msra.gmra.mrb[0].mxu1 %v134_v20  ;;  %v128_v25 = vadd.f32 %v281_v10, %v115_v21 }
 0x142   :  { %326 = vmatprep.mubr.msk.bf16.mxu1 %vm369_vm1, %v368_v6  ;;  %v119_v26 = vmul.f32 %v280_v3, %v106_v22 }
 0x143   :  { %v133_v27 = vpack.c.bf16 %v128_v25, %v127_v24 }
 0x144   :  { %v132_v29 = vadd.f32 %v281_v10, %v119_v26 }
 0x145   :  { %319 = vmatmul.mubr.bf16.vlgmr.msra.gmra.mrb[0].mxu0 %v133_v27 }
 0x146   :  { %v135_v30 = vpack.c.bf16 %v132_v29, %v131_v28 }
 0x149   :  { %327 = vmatmul.mubr.bf16.gmra.mrb[4].mxu1 %v135_v30 }
 0x214   :  { %v249_v32 = vpop.f32.mrb[0].mxu1 }
 0x215   :  { %v250_v33 = vadd.f32 %v282_v31, %v249_v32  ;;  %v324_v34 = vpop.f32.mrb[1].mxu1 }
 0x216   :  { %v252_v35 = vpop.f32.mrb[2].mxu1 }
 0x217   :  { %v266_v36 = vmax.f32 %v250_v33, 0.0  ;;  %v253_v37 = vadd.f32 %v282_v31, %v252_v35  ;;  %v325_v38 = vpop.f32.mrb[3].mxu1 }
 0x218   :  { %v241_v39 = vpop.f32.mrb[0].mxu0 }
 0x219   :  { %272 = vst [vmem:[%s545_s6 + $0x10] sm:$0xff] %v266_v36  ;;  %v267_v6 = vmax.f32 %v253_v37, 0.0  ;;  %v242_v40 = vadd.f32 %v282_v31, %v241_v39  ;;  %v320_v41 = vpop.f32.mrb[1].mxu0 }
 0x21a   :  { %v244_v42 = vpop.f32.mrb[2].mxu0 }
 0x21b   :  { %273 = vst [vmem:[%s545_s6 + $0x18] sm:$0xff] %v267_v6  ;;  %v264_v43 = vmax.f32 %v242_v40, 0.0  ;;  %v245_v44 = vadd.f32 %v282_v31, %v244_v42  ;;  %v321_v45 = vpop.f32.mrb[3].mxu0 }
 0x21c   :  { %v257_v46 = vpop.f32.mrb[4].mxu1 }
 0x21d   :  { %270 = vst [vmem:[%s545_s6] sm:$0xff] %v264_v43  ;;  %v265_v47 = vmax.f32 %v245_v44, 0.0  ;;  %v258_v48 = vadd.f32 %v282_v31, %v257_v46  ;;  %v328_v49 = vpop.f32.mrb[5].mxu1 }
 0x21e   :  { %v260_v50 = vpop.f32.mrb[6].mxu1 }
 0x21f   :  { %271 = vst [vmem:[%s545_s6 + $0x8] sm:$0xff] %v265_v47  ;;  %v268_v51 = vmax.f32 %v258_v48, 0.0  ;;  %v261_v52 = vadd.f32 %v282_v31, %v260_v50  ;;  %v329_v53 = vpop.f32.mrb[7].mxu1 }
 0x221   :  { %274 = vst [vmem:[%s545_s6 + $0x20] sm:$0xff] %v268_v51  ;;  %v269_v54 = vmax.f32 %v261_v52, 0.0 }
 0x223   :  { %275 = vst [vmem:[%s545_s6 + $0x28] sm:$0xff] %v269_v54 }

// kernel: separator_forward.19
= control target key start
LH: loop header
LB: loop body
LE: loop exit
PB: predicated region body
PF: predicated region fallthrough
CT: control target
= control target key end

     0   :  { %v3397_v3 = vmov 0.0   ;;  %vm3398_vm0 = vmmov 0   ;;  %s3399_s14 = smov 112   ;;  %s3400_s19 = smov 96   ;;  %vm20_vm1 = vcmask 31744   ;;  %vm406_vm2 = vcmask 1043456   ;;  %s4003_s0 = inlined_call_operand.vmem [shape: bf16[6,8,48], index: 0, kind: input, shape index: {}]   ;;  %s4004_s1 = inlined_call_operand.vmem [shape: bf16[6,8,16], index: 1, kind: output, shape index: {}]  }
   0x1   :  { %v9_v0 = vld [vmem:[%s4003_s0] sm:$0xf]  ;;  %v10_v1 = vld [vmem:[%s4003_s0 + $0x4] sm:$0xf]  ;;  %v11_v2 = vld [vmem:[%s4003_s0 + $0x8] sm:$0xf]  ;;  %2946 = vmatprep.subr.bf16.mxu0 %v3397_v3  ;;  %2952 = vmatprep.subr.bf16.mxu1 %v3397_v3 }
   0x2   :  { %v3434_v4 = vcombine.low %v9_v0, %v9_v0  ;;  %v3436_v5 = vcombine.low %v11_v2, %v11_v2  ;;  %v12_v6 = vld [vmem:[%s4003_s0 + $0xc] sm:$0xf]  ;;  %2948 = vmatprep.mubr.msk.bf16.mxu0 %vm3398_vm0, %v3397_v3  ;;  %2954 = vmatprep.mubr.msk.bf16.mxu1 %vm3398_vm0, %v3397_v3  ;;  %v3446_v7 = vcombine.low %v10_v1, %v10_v1  ;;  %v13_v9 = vld [vmem:[%s4003_s0 + $0x10] sm:$0xf]  ;;  %v14_v10 = vld [vmem:[%s4003_s0 + $0x14] sm:$0xf] }
   0x3   :  { %v3449_v8 = vcombine.low %v12_v6, %v12_v6  ;;  %v3459_v11 = vcombine.low %v13_v9, %v13_v9  ;;  %v3461_v12 = vcombine.low %v14_v10, %v14_v10  ;;  %vm328_vm3 = vcmask 64512   ;;  %s3401_s0 = smov 108   ;;  %s3402_s20 = smov 124  }
   0x4   :  { %18 = vrot.lane.b32.xlu0 %v3434_v4, %s3399_s14  ;;  %121 = vrot.lane.b32.xlu1 %v3436_v5, %s3399_s14  ;;  %s3403_s21 = smov 92   ;;  %s3404_s22 = smov 104   ;;  %vm2772_vm4 = vcmask 97280   ;;  %vm2785_vm5 = vcmask 125952  }
   0x5   :  { %s3405_s23 = smov 120   ;;  %s3406_s24 = smov 88  }
   0x6   :  { %s3407_s25 = smov 100   ;;  %s3408_s26 = smov 116  }
   0x7   :  { %s3409_s27 = smov 84   ;;  %s3410_s28 = smov 4  }
   0x8   :  { %70 = vrot.lane.b32.xlu0 %v3446_v7, %s3399_s14  ;;  %172 = vrot.lane.b32.xlu1 %v3449_v8, %s3399_s14  ;;  %s3411_s29 = smov 8   ;;  %s3412_s30 = smov 12  }
   0xc   :  { %223 = vrot.lane.b32.xlu0 %v3459_v11, %s3399_s14  ;;  %274 = vrot.lane.b32.xlu1 %v3461_v12, %s3399_s14 }
  0x10   :  { %401 = vrot.lane.b32.xlu1 %v3434_v4, %s3400_s19 }
  0x76   :  { %v19_v13 = vpop.permute.xlu0 %18  ;;  %v122_v15 = vpop.permute.xlu1 %121 }
  0x77   :  { %v25_v14 = vsel %vm20_vm1, %v19_v13, 0  ;;  %v127_v18 = vsel %vm20_vm1, %v122_v15, 0 }
  0x78   :  { %2947 = vmatpush3.bf16.xpose.msra.mxu0 %v25_v14 }
  0x79   :  { %2958 = vmatprep.subr.bf16.mxu0 %v3397_v3 }
  0x7a   :  { %v71_v16 = vpop.permute.xlu0 %70  ;;  %v173_v19 = vpop.permute.xlu1 %172 }
  0x7b   :  { %v76_v17 = vsel %vm20_vm1, %v71_v16, 0  ;;  %v178_v20 = vsel %vm20_vm1, %v173_v19, 0 }
  0x7c   :  { %2953 = vmatpush3.bf16.xpose.msra.mxu1 %v76_v17 }
  0x7d   :  { %2964 = vmatprep.subr.bf16.mxu1 %v3397_v3 }
  0x7e   :  { %v224_v21 = vpop.permute.xlu0 %223  ;;  %v275_v23 = vpop.permute.xlu1 %274 }
  0x7f   :  { %2949 = vmatmul.mubr.msk.bf16.vlgmr.msra.gmra.mrb[0].mxu0 %vm20_vm1, %v9_v0  ;;  %v229_v22 = vsel %vm20_vm1, %v224_v21, 0  ;;  %v280_v24 = vsel %vm20_vm1, %v275_v23, 0 }
  0x80   :  { %2959 = vmatpush3.bf16.xpose.msra.mxu0 %v127_v18  ;;  %2960 = vmatprep.mubr.msk.bf16.mxu0 %vm3398_vm0, %v3397_v3 }
  0x81   :  { %2970 = vmatprep.subr.bf16.mxu0 %v3397_v3 }
  0x82   :  { %v402_v25 = vpop.permute.xlu1 %401 }
  0x83   :  { %2955 = vmatmul.mubr.msk.bf16.vlgmr.msra.gmra.mrb[0].mxu1 %vm20_vm1, %v10_v1  ;;  %v408_v26 = vsel %vm406_vm2, %v402_v25, 0 }
  0x84   :  { %2965 = vmatpush3.bf16.xpose.msra.mxu1 %v178_v20  ;;  %2966 = vmatprep.mubr.msk.bf16.mxu1 %vm3398_vm0, %v3397_v3 }
  0x85   :  { %2976 = vmatprep.subr.bf16.mxu1 %v3397_v3 }
  0x87   :  { %2961 = vmatmul.mubr.msk.bf16.vlgmr.msra.gmra.mrb[4].mxu0 %vm20_vm1, %v11_v2 }
  0x88   :  { %2971 = vmatpush3.bf16.xpose.msra.mxu0 %v229_v22  ;;  %2972 = vmatprep.mubr.msk.bf16.mxu0 %vm3398_vm0, %v3397_v3 }
  0x89   :  { %2982 = vmatprep.subr.bf16.mxu0 %v3397_v3 }
  0x8b   :  { %2967 = vmatmul.mubr.msk.bf16.vlgmr.msra.gmra.mrb[4].mxu1 %vm20_vm1, %v12_v6 }
  0x8c   :  { %2977 = vmatpush3.bf16.xpose.msra.mxu1 %v280_v24  ;;  %2978 = vmatprep.mubr.msk.bf16.mxu1 %vm3398_vm0, %v3397_v3 }
  0x8d   :  { %2988 = vmatprep.subr.bf16.mxu1 %v3397_v3 }
  0x8f   :  { %2973 = vmatmul.mubr.msk.bf16.vlgmr.msra.gmra.mrb[8].mxu0 %vm20_vm1, %v13_v9 }
  0x90   :  { %2984 = vmatprep.mubr.msk.bf16.mxu0 %vm3398_vm0, %v3397_v3  ;;  %2983 = vmatpush3.bf16.msra.mxu0 %v408_v26 }
  0x91   :  { %2994 = vmatprep.subr.bf16.mxu0 %v3397_v3 }
  0x93   :  { %2979 = vmatmul.mubr.msk.bf16.vlgmr.msra.gmra.mrb[8].mxu1 %vm20_vm1, %v14_v10 }
  0x94   :  { %2990 = vmatprep.mubr.msk.bf16.mxu1 %vm3398_vm0, %v3397_v3 }
 0x152   :  { %v61_v27 = vpop.f32.mrb[0].mxu0 }
 0x153   :  { %v322_v28 = vmul.f32 0.5, %v61_v27  ;;  %v2950_v29 = vpop.f32.mrb[1].mxu0 }
 0x154   :  { %v64_v30 = vpop.f32.mrb[2].mxu0 }
 0x155   :  { %v2951_v31 = vpop.f32.mrb[3].mxu0  ;;  %v329_v32 = vsel %vm328_vm3, %v322_v28, -inf }
 0x156   :  { %330 = vmax.xlane.f32.xlu0 %v329_v32  ;;  %v112_v33 = vpop.f32.mrb[0].mxu1 }
 0x157   :  { %v323_v34 = vmul.f32 0.5, %v112_v33  ;;  %v2956_v35 = vpop.f32.mrb[1].mxu1 }
 0x158   :  { %v115_v36 = vpop.f32.mrb[2].mxu1 }
 0x159   :  { %v2957_v37 = vpop.f32.mrb[3].mxu1  ;;  %v332_v38 = vsel %vm328_vm3, %v323_v34, -inf }
 0x15a   :  { %v163_v39 = vpop.f32.mrb[4].mxu0  ;;  %333 = vmax.xlane.f32.xlu1 %v332_v38 }
 0x15b   :  { %v324_v40 = vmul.f32 0.5, %v163_v39  ;;  %v2962_v41 = vpop.f32.mrb[5].mxu0 }
 0x15c   :  { %v166_v42 = vpop.f32.mrb[6].mxu0 }
 0x15d   :  { %v2963_v43 = vpop.f32.mrb[7].mxu0  ;;  %v335_v44 = vsel %vm328_vm3, %v324_v40, -inf }
 0x15e   :  { %336 = vmax.xlane.f32.xlu0 %v335_v44  ;;  %v214_v45 = vpop.f32.mrb[4].mxu1 }
 0x15f   :  { %v325_v46 = vmul.f32 0.5, %v214_v45  ;;  %v2968_v47 = vpop.f32.mrb[5].mxu1 }
 0x160   :  { %v217_v48 = vpop.f32.mrb[6].mxu1 }
 0x161   :  { %v2969_v49 = vpop.f32.mrb[7].mxu1  ;;  %v338_v50 = vsel %vm328_vm3, %v325_v46, -inf }
 0x162   :  { %339 = vmax.xlane.f32.xlu0 %v338_v50  ;;  %v265_v51 = vpop.f32.mrb[8].mxu0 }
 0x163   :  { %v326_v52 = vmul.f32 0.5, %v265_v51  ;;  %v2974_v53 = vpop.f32.mrb[9].mxu0 }
 0x164   :  { %v268_v54 = vpop.f32.mrb[10].mxu0 }
 0x165   :  { %v341_v55 = vsel %vm328_vm3, %v326_v52, -inf  ;;  %v2975_v56 = vpop.f32.mrb[11].mxu0 }
 0x166   :  { %v316_v57 = vpop.f32.mrb[8].mxu1  ;;  %342 = vmax.xlane.f32.xlu1 %v341_v55 }
 0x167   :  { %v327_v58 = vmul.f32 0.5, %v316_v57  ;;  %v2980_v59 = vpop.f32.mrb[9].mxu1 }
 0x168   :  { %v319_v60 = vpop.f32.mrb[10].mxu1 }
 0x169   :  { %v344_v61 = vsel %vm328_vm3, %v327_v58, -inf  ;;  %v2981_v62 = vpop.f32.mrb[11].mxu1 }
 0x16a   :  { %345 = vmax.xlane.f32.xlu0 %v344_v61 }
 0x177   :  { %498 = vrot.lane.b32.xlu1 %v3436_v5, %s3400_s19 }
 0x17b   :  { %546 = vrot.lane.b32.xlu1 %v3449_v8, %s3400_s19 }
 0x180   :  { %450 = vrot.lane.b32.xlu0 %v3446_v7, %s3400_s19 }
 0x1e3   :  { %v331_v63 = vpop.xlane.xlu0 %330 }
 0x1e4   :  { %v347_v0 = vsub.f32 %v322_v28, %v331_v63 }
 0x1e6   :  { %v353_v1 = vmul.f32 1.442695, %v347_v0 }
 0x1e7   :  { %v334_v2 = vpop.xlane.xlu1 %333 }
 0x1e8   :  { %3301 = vpow2.f32 %v353_v1  ;;  %v348_v6 = vsub.f32 %v323_v34, %v334_v2 }
 0x1ea   :  { %v355_v9 = vmul.f32 1.442695, %v348_v6 }
 0x1eb   :  { %v337_v10 = vpop.xlane.xlu0 %336 }
 0x1ec   :  { %3303 = vpow2.f32 %v355_v9  ;;  %v349_v13 = vsub.f32 %v324_v40, %v337_v10 }
 0x1ee   :  { %v357_v14 = vmul.f32 1.442695, %v349_v13 }
 0x1ef   :  { %v340_v15 = vpop.xlane.xlu0 %339 }
 0x1f0   :  { %3305 = vpow2.f32 %v357_v14  ;;  %v350_v16 = vsub.f32 %v325_v46, %v340_v15 }
 0x1f2   :  { %v3302_v17 = vpop.eup %3301  ;;  %v359_v18 = vmul.f32 1.442695, %v350_v16 }
 0x1f3   :  { %v365_v19 = vsel %vm328_vm3, %v3302_v17, 0.0  ;;  %v343_v29 = vpop.xlane.xlu1 %342 }
 0x1f4   :  { %3307 = vpow2.f32 %v359_v18  ;;  %366 = vadd.xlane.f32.xlu1 %v365_v19  ;;  %v351_v30 = vsub.f32 %v326_v52, %v343_v29 }
 0x1f6   :  { %v3304_v20 = vpop.eup %3303  ;;  %v361_v31 = vmul.f32 1.442695, %v351_v30 }
 0x1f7   :  { %v346_v21 = vpop.xlane.xlu0 %345  ;;  %v368_v22 = vsel %vm328_vm3, %v3304_v20, 0.0  ;;  %v499_v38 = vpop.permute.xlu1 %498 }
 0x1f8   :  { %369 = vadd.xlane.f32.xlu0 %v368_v22  ;;  %v352_v32 = vsub.f32 %v327_v58, %v346_v21  ;;  %3309 = vpow2.f32 %v361_v31  ;;  %v504_v48 = vsel %vm406_vm2, %v499_v38, 0 }
 0x1fa   :  { %v3513_v23 = vpop.eup %3305  ;;  %v363_v33 = vmul.f32 1.442695, %v352_v32 }
 0x1fb   :  { %v371_v24 = vsel %vm328_vm3, %v3513_v23, 0.0  ;;  %v451_v25 = vpop.permute.xlu0 %450  ;;  %v547_v39 = vpop.permute.xlu1 %546 }
 0x1fc   :  { %372 = vadd.xlane.f32.xlu1 %v371_v24  ;;  %v456_v26 = vsel %vm406_vm2, %v451_v25, 0  ;;  %3311 = vpow2.f32 %v363_v33  ;;  %v552_v52 = vsel %vm406_vm2, %v547_v39, 0 }
 0x1fd   :  { %2989 = vmatpush3.bf16.msra.mxu1 %v456_v26 }
 0x1fe   :  { %v3518_v27 = vpop.eup %3307  ;;  %3000 = vmatprep.subr.bf16.mxu1 %v3397_v3 }
 0x1ff   :  { %v374_v28 = vsel %vm328_vm3, %v3518_v27, 0.0 }
 0x200   :  { %375 = vadd.xlane.f32.xlu0 %v374_v28 }
 0x202   :  { %v3527_v34 = vpop.eup %3309 }
 0x203   :  { %v377_v35 = vsel %vm328_vm3, %v3527_v34, 0.0 }
 0x206   :  { %v3531_v36 = vpop.eup %3311 }
 0x207   :  { %v380_v37 = vsel %vm328_vm3, %v3531_v36, 0.0 }
 0x20d   :  { %642 = vrot.lane.b32.xlu1 %v3461_v12, %s3400_s19 }
 0x216   :  { %594 = vrot.lane.b32.xlu0 %v3459_v11, %s3400_s19 }
 0x231   :  { %378 = vadd.xlane.f32.xlu1 %v377_v35 }
 0x235   :  { %381 = vadd.xlane.f32.xlu0 %v380_v37 }
 0x242   :  { %742 = vrot.lane.b32.xlu1 %v3446_v7, %s3401_s0 }
 0x246   :  { %740 = vrot.lane.b32.xlu1 %v3446_v7, %s3402_s20 }
 0x24a   :  { %842 = vrot.lane.b32.xlu1 %v3449_v8, %s3401_s0 }
 0x24b   :  { %692 = vrot.lane.b32.xlu0 %v3434_v4, %s3401_s0 }
 0x24e   :  { %840 = vrot.lane.b32.xlu1 %v3449_v8, %s3402_s20 }
 0x24f   :  { %690 = vrot.lane.b32.xlu0 %v3434_v4, %s3402_s20 }
 0x252   :  { %942 = vrot.lane.b32.xlu1 %v3461_v12, %s3401_s0 }
 0x253   :  { %792 = vrot.lane.b32.xlu0 %v3436_v5, %s3401_s0 }
 0x256   :  { %940 = vrot.lane.b32.xlu1 %v3461_v12, %s3402_s20 }
 0x257   :  { %790 = vrot.lane.b32.xlu0 %v3436_v5, %s3402_s20 }
 0x25a   :  { %1068 = vrot.lane.b32.xlu1 %v3434_v4, %s3403_s21 }
 0x25b   :  { %892 = vrot.lane.b32.xlu0 %v3459_v11, %s3401_s0 }
 0x25f   :  { %890 = vrot.lane.b32.xlu0 %v3459_v11, %s3402_s20 }
 0x281   :  { %v367_v40 = vpop.xlane.xlu1 %366 }
 0x282   :  { %3313 = vrcp.f32 %v367_v40 }
 0x285   :  { %v370_v41 = vpop.xlane.xlu0 %369 }
 0x286   :  { %3315 = vrcp.f32 %v370_v41 }
 0x289   :  { %v373_v42 = vpop.xlane.xlu1 %372 }
 0x28a   :  { %3317 = vrcp.f32 %v373_v42 }
 0x28c   :  { %v3314_v43 = vpop.eup %3313 }
 0x28d   :  { %v376_v44 = vpop.xlane.xlu0 %375  ;;  %v384_v45 = vmul.f32 %v3314_v43, %v3302_v17  ;;  %v643_v59 = vpop.permute.xlu1 %642 }
 0x28e   :  { %3319 = vrcp.f32 %v376_v44  ;;  %v648_v61 = vsel %vm406_vm2, %v643_v59, 0 }
 0x28f   :  { %v395_v46 = vpack.c.bf16 %v384_v45, %v384_v45 }
 0x290   :  { %v3316_v47 = vpop.eup %3315 }
 0x291   :  { %2985 = vmatmul.mubr.msk.bf16.vlgmr.msra.gmra.mrb[12].mxu0 %vm328_vm3, %v395_v46  ;;  %v386_v49 = vmul.f32 %v3316_v47, %v3304_v20  ;;  %v595_v54 = vpop.permute.xlu0 %594 }
 0x292   :  { %2995 = vmatpush3.bf16.msra.mxu0 %v504_v48  ;;  %2996 = vmatprep.mubr.msk.bf16.mxu0 %vm3398_vm0, %v3397_v3  ;;  %v600_v57 = vsel %vm406_vm2, %v595_v54, 0 }
 0x293   :  { %v396_v50 = vpack.c.bf16 %v386_v49, %v386_v49  ;;  %3006 = vmatprep.subr.bf16.mxu0 %v3397_v3 }
 0x294   :  { %v3318_v51 = vpop.eup %3317 }
 0x295   :  { %2991 = vmatmul.mubr.msk.bf16.vlgmr.msra.gmra.mrb[12].mxu1 %vm328_vm3, %v396_v50  ;;  %v388_v53 = vmul.f32 %v3318_v51, %v3513_v23 }
 0x296   :  { %3001 = vmatpush3.bf16.msra.mxu1 %v552_v52  ;;  %3002 = vmatprep.mubr.msk.bf16.mxu1 %vm3398_vm0, %v3397_v3 }
 0x297   :  { %v397_v55 = vpack.c.bf16 %v388_v53, %v388_v53  ;;  %3012 = vmatprep.subr.bf16.mxu1 %v3397_v3 }
 0x298   :  { %v3320_v56 = vpop.eup %3319 }
 0x299   :  { %2997 = vmatmul.mubr.msk.bf16.vlgmr.msra.gmra.mrb[16].mxu0 %vm328_vm3, %v397_v55  ;;  %v390_v58 = vmul.f32 %v3320_v56, %v3518_v27 }
 0x29a   :  { %3007 = vmatpush3.bf16.msra.mxu0 %v600_v57  ;;  %3008 = vmatprep.mubr.msk.bf16.mxu0 %vm3398_vm0, %v3397_v3 }
 0x29b   :  { %v398_v60 = vpack.c.bf16 %v390_v58, %v390_v58  ;;  %3018 = vmatprep.subr.bf16.mxu0 %v3397_v3 }
 0x29d   :  { %3003 = vmatmul.mubr.msk.bf16.vlgmr.msra.gmra.mrb[16].mxu1 %vm328_vm3, %v398_v60 }
 0x29e   :  { %3013 = vmatpush3.bf16.msra.mxu1 %v648_v61  ;;  %3014 = vmatprep.mubr.msk.bf16.mxu1 %vm3398_vm0, %v3397_v3 }
 0x29f   :  { %3024 = vmatprep.subr.bf16.mxu1 %v3397_v3 }
 0x2be   :  { %v379_v62 = vpop.xlane.xlu1 %378 }
 0x2bf   :  { %3321 = vrcp.f32 %v379_v62 }
 0x2c2   :  { %v382_v63 = vpop.xlane.xlu0 %381  ;;  %v743_v0 = vpop.permute.xlu1 %742 }
 0x2c3   :  { %3323 = vrcp.f32 %v382_v63  ;;  %v748_v18 = vsel %vm20_vm1, %v743_v0, 0 }
 0x2c6   :  { %v693_v1 = vpop.permute.xlu0 %692  ;;  %v741_v10 = vpop.permute.xlu1 %740 }
 0x2c7   :  { %v698_v13 = vsel %vm20_vm1, %v693_v1, 0 }
 0x2c9   :  { %v3322_v2 = vpop.eup %3321 }
 0x2ca   :  { %v392_v6 = vmul.f32 %v3322_v2, %v3527_v34  ;;  %v691_v9 = vpop.permute.xlu0 %690  ;;  %v843_v20 = vpop.permute.xlu1 %842 }
 0x2cb   :  { %v848_v24 = vsel %vm20_vm1, %v843_v20, 0 }
 0x2cc   :  { %v399_v14 = vpack.c.bf16 %v392_v6, %v392_v6 }
 0x2cd   :  { %v3324_v15 = vpop.eup %3323 }
 0x2ce   :  { %3009 = vmatmul.mubr.msk.bf16.vlgmr.msra.gmra.mrb[20].mxu0 %vm328_vm3, %v399_v14  ;;  %v394_v16 = vmul.f32 %v3324_v15, %v3531_v36  ;;  %v793_v17 = vpop.permute.xlu0 %792  ;;  %v841_v23 = vpop.permute.xlu1 %840 }
 0x2cf   :  { %3019 = vmatpush3.bf16.xpose.msra.mxu0 %v698_v13  ;;  %3020 = vmatprep.mubr.msk.bf16.mxu0 %vm3398_vm0, %v3397_v3  ;;  %v798_v22 = vsel %vm20_vm1, %v793_v17, 0 }
 0x2d0   :  { %v400_v19 = vpack.c.bf16 %v394_v16, %v394_v16  ;;  %3030 = vmatprep.subr.bf16.mxu0 %v3397_v3 }
 0x2d2   :  { %3015 = vmatmul.mubr.msk.bf16.vlgmr.msra.gmra.mrb[20].mxu1 %vm328_vm3, %v400_v19  ;;  %v791_v21 = vpop.permute.xlu0 %790  ;;  %v943_v27 = vpop.permute.xlu1 %942 }
 0x2d3   :  { %3025 = vmatpush3.bf16.xpose.msra.mxu1 %v748_v18  ;;  %3026 = vmatprep.mubr.msk.bf16.mxu1 %vm3398_vm0, %v3397_v3  ;;  %v948_v28 = vsel %vm20_vm1, %v943_v27, 0 }
 0x2d4   :  { %3036 = vmatprep.subr.bf16.mxu1 %v3397_v3 }
 0x2d6   :  { %3021 = vmatmul.mubr.msk.bf16.vlgmr.msra.gmra.mrb[24].mxu0 %vm20_vm1, %v691_v9  ;;  %v893_v25 = vpop.permute.xlu0 %892  ;;  %v941_v30 = vpop.permute.xlu1 %940 }
 0x2d7   :  { %3031 = vmatpush3.bf16.xpose.msra.mxu0 %v798_v22  ;;  %3032 = vmatprep.mubr.msk.bf16.mxu0 %vm3398_vm0, %v3397_v3  ;;  %v898_v26 = vsel %vm20_vm1, %v893_v25, 0 }
 0x2d8   :  { %3042 = vmatprep.subr.bf16.mxu0 %v3397_v3 }
 0x2da   :  { %3027 = vmatmul.mubr.msk.bf16.vlgmr.msra.gmra.mrb[24].mxu1 %vm20_vm1, %v741_v10  ;;  %v891_v29 = vpop.permute.xlu0 %890  ;;  %v1069_v34 = vpop.permute.xlu1 %1068 }
 0x2db   :  { %3037 = vmatpush3.bf16.xpose.msra.mxu1 %v848_v24  ;;  %3038 = vmatprep.mubr.msk.bf16.mxu1 %vm3398_vm0, %v3397_v3  ;;  %v1074_v36 = vsel %vm406_vm2, %v1069_v34, 0 }
 0x2dc   :  { %3048 = vmatprep.subr.bf16.mxu1 %v3397_v3 }
 0x2de   :  { %3033 = vmatmul.mubr.msk.bf16.vlgmr.msra.gmra.mrb[28].mxu0 %vm20_vm1, %v791_v21 }
 0x2df   :  { %3043 = vmatpush3.bf16.xpose.msra.mxu0 %v898_v26  ;;  %3044 = vmatprep.mubr.msk.bf16.mxu0 %vm3398_vm0, %v3397_v3 }
 0x2e0   :  { %3054 = vmatprep.subr.bf16.mxu0 %v3397_v3 }
 0x2e2   :  { %3039 = vmatmul.mubr.msk.bf16.vlgmr.msra.gmra.mrb[28].mxu1 %vm20_vm1, %v841_v23 }
 0x2e3   :  { %3049 = vmatpush3.bf16.xpose.msra.mxu1 %v948_v28  ;;  %3050 = vmatprep.mubr.msk.bf16.mxu1 %vm3398_vm0, %v3397_v3 }
 0x2e4   :  { %3060 = vmatprep.subr.bf16.mxu1 %v3397_v3 }
 0x2e6   :  { %3045 = vmatmul.mubr.msk.bf16.vlgmr.msra.gmra.mrb[32].mxu0 %vm20_vm1, %v891_v29 }
 0x2e7   :  { %3056 = vmatprep.mubr.msk.bf16.mxu0 %vm3398_vm0, %v3397_v3  ;;  %3055 = vmatpush3.bf16.msra.mxu0 %v1074_v36 }
 0x2e8   :  { %3066 = vmatprep.subr.bf16.mxu0 %v3397_v3 }
 0x2ea   :  { %3051 = vmatmul.mubr.msk.bf16.vlgmr.msra.gmra.mrb[32].mxu1 %vm20_vm1, %v941_v30 }
 0x2eb   :  { %3062 = vmatprep.mubr.msk.bf16.mxu1 %vm3398_vm0, %v3397_v3 }
 0x364   :  { %v3609_v31 = vpop.f32.mrb[12].mxu0 }
 0x365   :  { %v2986_v32 = vpop.f32.mrb[13].mxu0 }
 0x366   :  { %v447_v33 = vpop.f32.mrb[14].mxu0 }
 0x367   :  { %v2987_v35 = vpop.f32.mrb[15].mxu0 }
 0x368   :  { %v3612_v37 = vpop.f32.mrb[12].mxu1 }
 0x369   :  { %v2992_v38 = vpop.f32.mrb[13].mxu1 }
 0x36a   :  { %v495_v39 = vpop.f32.mrb[14].mxu1 }
 0x36b   :  { %v2993_v40 = vpop.f32.mrb[15].mxu1 }
 0x36c   :  { %v3615_v41 = vpop.f32.mrb[16].mxu0 }
 0x36d   :  { %v2998_v42 = vpop.f32.mrb[17].mxu0 }
 0x36e   :  { %v543_v43 = vpop.f32.mrb[18].mxu0 }
 0x36f   :  { %v2999_v44 = vpop.f32.mrb[19].mxu0 }
 0x370   :  { %v3617_v45 = vpop.f32.mrb[16].mxu1 }
 0x371   :  { %v3004_v46 = vpop.f32.mrb[17].mxu1 }
 0x372   :  { %v591_v47 = vpop.f32.mrb[18].mxu1 }
 0x373   :  { %v3005_v48 = vpop.f32.mrb[19].mxu1 }
 0x3a1   :  { %v3619_v49 = vpop.f32.mrb[20].mxu0 }
 0x3a2   :  { %v3010_v50 = vpop.f32.mrb[21].mxu0 }
 0x3a3   :  { %v639_v51 = vpop.f32.mrb[22].mxu0 }
 0x3a4   :  { %v3011_v52 = vpop.f32.mrb[23].mxu0 }
 0x3a5   :  { %v3621_v53 = vpop.f32.mrb[20].mxu1 }
 0x3a6   :  { %v3016_v54 = vpop.f32.mrb[21].mxu1 }
 0x3a7   :  { %v687_v55 = vpop.f32.mrb[22].mxu1 }
 0x3a8   :  { %v3017_v56 = vpop.f32.mrb[23].mxu1 }
 0x3a9   :  { %v734_v57 = vpop.f32.mrb[24].mxu0 }
 0x3aa   :  { %v990_v58 = vmul.f32 0.5, %v734_v57  ;;  %v3022_v59 = vpop.f32.mrb[25].mxu0 }
 0x3ab   :  { %v737_v60 = vpop.f32.mrb[26].mxu0 }
 0x3ac   :  { %v3023_v61 = vpop.f32.mrb[27].mxu0  ;;  %v996_v62 = vsel %vm328_vm3, %v990_v58, -inf }
 0x3ad   :  { %v784_v63 = vpop.f32.mrb[24].mxu1  ;;  %997 = vmax.xlane.f32.xlu0 %v996_v62 }
 0x3ae   :  { %v991_v0 = vmul.f32 0.5, %v784_v63  ;;  %v3028_v1 = vpop.f32.mrb[25].mxu1 }
 0x3af   :  { %v787_v2 = vpop.f32.mrb[26].mxu1 }
 0x3b0   :  { %v3029_v6 = vpop.f32.mrb[27].mxu1  ;;  %v999_v9 = vsel %vm328_vm3, %v991_v0, -inf }
 0x3b1   :  { %1000 = vmax.xlane.f32.xlu1 %v999_v9  ;;  %v834_v10 = vpop.f32.mrb[28].mxu0 }
 0x3b2   :  { %v992_v13 = vmul.f32 0.5, %v834_v10  ;;  %v3034_v14 = vpop.f32.mrb[29].mxu0 }
 0x3b3   :  { %v837_v15 = vpop.f32.mrb[30].mxu0 }
 0x3b4   :  { %v3035_v16 = vpop.f32.mrb[31].mxu0  ;;  %v1002_v17 = vsel %vm328_vm3, %v992_v13, -inf }
 0x3b5   :  { %v884_v18 = vpop.f32.mrb[28].mxu1  ;;  %1003 = vmax.xlane.f32.xlu0 %v1002_v17 }
 0x3b6   :  { %v993_v19 = vmul.f32 0.5, %v884_v18  ;;  %v3040_v20 = vpop.f32.mrb[29].mxu1 }
 0x3b7   :  { %v887_v21 = vpop.f32.mrb[30].mxu1 }
 0x3b8   :  { %v3041_v22 = vpop.f32.mrb[31].mxu1  ;;  %v1005_v23 = vsel %vm328_vm3, %v993_v19, -inf }
 0x3b9   :  { %1006 = vmax.xlane.f32.xlu0 %v1005_v23  ;;  %v934_v24 = vpop.f32.mrb[32].mxu0 }
 0x3ba   :  { %v994_v25 = vmul.f32 0.5, %v934_v24  ;;  %v3046_v26 = vpop.f32.mrb[33].mxu0 }
 0x3bb   :  { %v937_v27 = vpop.f32.mrb[34].mxu0 }
 0x3bc   :  { %v1008_v28 = vsel %vm328_vm3, %v994_v25, -inf  ;;  %v3047_v29 = vpop.f32.mrb[35].mxu0 }
 0x3bd   :  { %v984_v30 = vpop.f32.mrb[32].mxu1  ;;  %1009 = vmax.xlane.f32.xlu1 %v1008_v28 }
 0x3be   :  { %v995_v32 = vmul.f32 0.5, %v984_v30  ;;  %v3052_v33 = vpop.f32.mrb[33].mxu1 }
 0x3bf   :  { %v987_v34 = vpop.f32.mrb[34].mxu1 }
 0x3c0   :  { %v1011_v35 = vsel %vm328_vm3, %v995_v32, -inf  ;;  %v3053_v36 = vpop.f32.mrb[35].mxu1 }
 0x3c1   :  { %1012 = vmax.xlane.f32.xlu0 %v1011_v35 }
 0x3ce   :  { %1164 = vrot.lane.b32.xlu1 %v3436_v5, %s3403_s21 }
 0x3d2   :  { %1212 = vrot.lane.b32.xlu1 %v3449_v8, %s3403_s21 }
 0x3d7   :  { %1116 = vrot.lane.b32.xlu0 %v3446_v7, %s3403_s21 }
 0x43a   :  { %v998_v38 = vpop.xlane.xlu0 %997 }
 0x43b   :  { %v1014_v39 = vsub.f32 %v990_v58, %v998_v38 }
 0x43d   :  { %v1020_v40 = vmul.f32 1.442695, %v1014_v39 }
 0x43e   :  { %v1001_v42 = vpop.xlane.xlu1 %1000 }
 0x43f   :  { %3325 = vpow2.f32 %v1020_v40  ;;  %v1015_v43 = vsub.f32 %v991_v0, %v1001_v42 }
 0x441   :  { %v1022_v44 = vmul.f32 1.442695, %v1015_v43 }
 0x442   :  { %v1004_v46 = vpop.xlane.xlu0 %1003 }
 0x443   :  { %3327 = vpow2.f32 %v1022_v44  ;;  %v1016_v47 = vsub.f32 %v992_v13, %v1004_v46 }
 0x445   :  { %v1024_v48 = vmul.f32 1.442695, %v1016_v47 }
 0x446   :  { %v1007_v50 = vpop.xlane.xlu0 %1006 }
 0x447   :  { %3329 = vpow2.f32 %v1024_v48  ;;  %v1017_v51 = vsub.f32 %v993_v19, %v1007_v50 }
 0x449   :  { %v3326_v52 = vpop.eup %3325  ;;  %v1026_v54 = vmul.f32 1.442695, %v1017_v51 }
 0x44a   :  { %v1032_v55 = vsel %vm328_vm3, %v3326_v52, 0.0  ;;  %v1010_v1 = vpop.xlane.xlu1 %1009 }
 0x44b   :  { %3331 = vpow2.f32 %v1026_v54  ;;  %1033 = vadd.xlane.f32.xlu1 %v1032_v55  ;;  %v1018_v2 = vsub.f32 %v994_v25, %v1010_v1 }
 0x44d   :  { %v3328_v56 = vpop.eup %3327  ;;  %v1028_v6 = vmul.f32 1.442695, %v1018_v2 }
 0x44e   :  { %v1013_v57 = vpop.xlane.xlu0 %1012  ;;  %v1035_v58 = vsel %vm328_vm3, %v3328_v56, 0.0  ;;  %v1165_v17 = vpop.permute.xlu1 %1164 }
 0x44f   :  { %1036 = vadd.xlane.f32.xlu0 %v1035_v58  ;;  %v1019_v9 = vsub.f32 %v995_v32, %v1013_v57  ;;  %3333 = vpow2.f32 %v1028_v6  ;;  %v1170_v27 = vsel %vm406_vm2, %v1165_v17, 0 }
 0x451   :  { %v3330_v59 = vpop.eup %3329  ;;  %v1030_v10 = vmul.f32 1.442695, %v1019_v9 }
 0x452   :  { %v1038_v60 = vsel %vm328_vm3, %v3330_v59, 0.0  ;;  %v1117_v61 = vpop.permute.xlu0 %1116  ;;  %v1213_v18 = vpop.permute.xlu1 %1212 }
 0x453   :  { %1039 = vadd.xlane.f32.xlu1 %v1038_v60  ;;  %v1122_v62 = vsel %vm406_vm2, %v1117_v61, 0  ;;  %3335 = vpow2.f32 %v1030_v10  ;;  %v1218_v32 = vsel %vm406_vm2, %v1213_v18, 0 }
 0x454   :  { %3061 = vmatpush3.bf16.msra.mxu1 %v1122_v62 }
 0x455   :  { %v3639_v63 = vpop.eup %3331  ;;  %3072 = vmatprep.subr.bf16.mxu1 %v3397_v3 }
 0x456   :  { %v1041_v0 = vsel %vm328_vm3, %v3639_v63, 0.0 }
 0x457   :  { %1042 = vadd.xlane.f32.xlu0 %v1041_v0 }
 0x459   :  { %v3648_v13 = vpop.eup %3333 }
 0x45a   :  { %v1044_v14 = vsel %vm328_vm3, %v3648_v13, 0.0 }
 0x45d   :  { %v3652_v15 = vpop.eup %3335 }
 0x45e   :  { %v1047_v16 = vsel %vm328_vm3, %v3652_v15, 0.0 }
 0x464   :  { %1308 = vrot.lane.b32.xlu1 %v3461_v12, %s3403_s21 }
 0x46d   :  { %1260 = vrot.lane.b32.xlu0 %v3459_v11, %s3403_s21 }
 0x488   :  { %1045 = vadd.xlane.f32.xlu1 %v1044_v14 }
 0x48c   :  { %1048 = vadd.xlane.f32.xlu0 %v1047_v16 }
 0x499   :  { %1408 = vrot.lane.b32.xlu1 %v3446_v7, %s3404_s22 }
 0x49d   :  { %1406 = vrot.lane.b32.xlu1 %v3446_v7, %s3405_s23 }
 0x4a1   :  { %1508 = vrot.lane.b32.xlu1 %v3449_v8, %s3404_s22 }
 0x4a2   :  { %1358 = vrot.lane.b32.xlu0 %v3434_v4, %s3404_s22 }
 0x4a5   :  { %1506 = vrot.lane.b32.xlu1 %v3449_v8, %s3405_s23 }
 0x4a6   :  { %1356 = vrot.lane.b32.xlu0 %v3434_v4, %s3405_s23 }
 0x4a9   :  { %1608 = vrot.lane.b32.xlu1 %v3461_v12, %s3404_s22 }
 0x4aa   :  { %1458 = vrot.lane.b32.xlu0 %v3436_v5, %s3404_s22 }
 0x4ad   :  { %1606 = vrot.lane.b32.xlu1 %v3461_v12, %s3405_s23 }
 0x4ae   :  { %1456 = vrot.lane.b32.xlu0 %v3436_v5, %s3405_s23 }
 0x4b1   :  { %1734 = vrot.lane.b32.xlu1 %v3434_v4, %s3406_s24 }
 0x4b2   :  { %1558 = vrot.lane.b32.xlu0 %v3459_v11, %s3404_s22 }
 0x4b6   :  { %1556 = vrot.lane.b32.xlu0 %v3459_v11, %s3405_s23 }
 0x4d8   :  { %v1034_v19 = vpop.xlane.xlu1 %1033 }
 0x4d9   :  { %3337 = vrcp.f32 %v1034_v19 }
 0x4dc   :  { %v1037_v20 = vpop.xlane.xlu0 %1036 }
 0x4dd   :  { %3339 = vrcp.f32 %v1037_v20 }
 0x4e0   :  { %v1040_v21 = vpop.xlane.xlu1 %1039 }
 0x4e1   :  { %3341 = vrcp.f32 %v1040_v21 }
 0x4e3   :  { %v3338_v22 = vpop.eup %3337 }
 0x4e4   :  { %v1051_v23 = vmul.f32 %v3338_v22, %v3326_v52  ;;  %v1043_v24 = vpop.xlane.xlu0 %1042  ;;  %v1309_v40 = vpop.permute.xlu1 %1308 }
 0x4e5   :  { %3343 = vrcp.f32 %v1043_v24  ;;  %v1314_v43 = vsel %vm406_vm2, %v1309_v40, 0 }
 0x4e6   :  { %v1062_v25 = vpack.c.bf16 %v1051_v23, %v1051_v23 }
 0x4e7   :  { %v3340_v26 = vpop.eup %3339 }
 0x4e8   :  { %v1053_v28 = vmul.f32 %v3340_v26, %v3328_v56  ;;  %3057 = vmatmul.mubr.msk.bf16.vlgmr.msra.gmra.mrb[36].mxu0 %vm328_vm3, %v1062_v25  ;;  %v1261_v34 = vpop.permute.xlu0 %1260 }
 0x4e9   :  { %3067 = vmatpush3.bf16.msra.mxu0 %v1170_v27  ;;  %3068 = vmatprep.mubr.msk.bf16.mxu0 %vm3398_vm0, %v3397_v3  ;;  %v1266_v39 = vsel %vm406_vm2, %v1261_v34, 0 }
 0x4ea   :  { %v1063_v29 = vpack.c.bf16 %v1053_v28, %v1053_v28  ;;  %3078 = vmatprep.subr.bf16.mxu0 %v3397_v3 }
 0x4eb   :  { %v3342_v30 = vpop.eup %3341 }
 0x4ec   :  { %v1055_v33 = vmul.f32 %v3342_v30, %v3330_v59  ;;  %3063 = vmatmul.mubr.msk.bf16.vlgmr.msra.gmra.mrb[36].mxu1 %vm328_vm3, %v1063_v29 }
 0x4ed   :  { %3073 = vmatpush3.bf16.msra.mxu1 %v1218_v32  ;;  %3074 = vmatprep.mubr.msk.bf16.mxu1 %vm3398_vm0, %v3397_v3 }
 0x4ee   :  { %v1064_v35 = vpack.c.bf16 %v1055_v33, %v1055_v33  ;;  %3084 = vmatprep.subr.bf16.mxu1 %v3397_v3 }
 0x4ef   :  { %v3344_v36 = vpop.eup %3343 }
 0x4f0   :  { %v1057_v38 = vmul.f32 %v3344_v36, %v3639_v63  ;;  %3069 = vmatmul.mubr.msk.bf16.vlgmr.msra.gmra.mrb[40].mxu0 %vm328_vm3, %v1064_v35 }
 0x4f1   :  { %3079 = vmatpush3.bf16.msra.mxu0 %v1266_v39  ;;  %3080 = vmatprep.mubr.msk.bf16.mxu0 %vm3398_vm0, %v3397_v3 }
 0x4f2   :  { %v1065_v42 = vpack.c.bf16 %v1057_v38, %v1057_v38  ;;  %3090 = vmatprep.subr.bf16.mxu0 %v3397_v3 }
 0x4f4   :  { %3075 = vmatmul.mubr.msk.bf16.vlgmr.msra.gmra.mrb[40].mxu1 %vm328_vm3, %v1065_v42 }
 0x4f5   :  { %3085 = vmatpush3.bf16.msra.mxu1 %v1314_v43  ;;  %3086 = vmatprep.mubr.msk.bf16.mxu1 %vm3398_vm0, %v3397_v3 }
 0x4f6   :  { %3096 = vmatprep.subr.bf16.mxu1 %v3397_v3 }
 0x515   :  { %v1046_v44 = vpop.xlane.xlu1 %1045 }
 0x516   :  { %3345 = vrcp.f32 %v1046_v44 }
 0x519   :  { %v1049_v46 = vpop.xlane.xlu0 %1048  ;;  %v1409_v47 = vpop.permute.xlu1 %1408 }
 0x51a   :  { %3347 = vrcp.f32 %v1049_v46  ;;  %v1414_v60 = vsel %vm20_vm1, %v1409_v47, 0 }
 0x51d   :  { %v1359_v48 = vpop.permute.xlu0 %1358  ;;  %v1407_v54 = vpop.permute.xlu1 %1406 }
 0x51e   :  { %v1364_v55 = vsel %vm20_vm1, %v1359_v48, 0 }
 0x520   :  { %v3346_v50 = vpop.eup %3345 }
 0x521   :  { %v1059_v51 = vmul.f32 %v3346_v50, %v3648_v13  ;;  %v1357_v52 = vpop.permute.xlu0 %1356  ;;  %v1509_v62 = vpop.permute.xlu1 %1508 }
 0x522   :  { %v1514_v2 = vsel %vm20_vm1, %v1509_v62, 0 }
 0x523   :  { %v1066_v56 = vpack.c.bf16 %v1059_v51, %v1059_v51 }
 0x524   :  { %v3348_v57 = vpop.eup %3347 }
 0x525   :  { %v1061_v58 = vmul.f32 %v3348_v57, %v3652_v15  ;;  %3081 = vmatmul.mubr.msk.bf16.vlgmr.msra.gmra.mrb[44].mxu0 %vm328_vm3, %v1066_v56  ;;  %v1459_v59 = vpop.permute.xlu0 %1458  ;;  %v1507_v1 = vpop.permute.xlu1 %1506 }
 0x526   :  { %3091 = vmatpush3.bf16.xpose.msra.mxu0 %v1364_v55  ;;  %3092 = vmatprep.mubr.msk.bf16.mxu0 %vm3398_vm0, %v3397_v3  ;;  %v1464_v0 = vsel %vm20_vm1, %v1459_v59, 0 }
 0x527   :  { %v1067_v61 = vpack.c.bf16 %v1061_v58, %v1061_v58  ;;  %3102 = vmatprep.subr.bf16.mxu0 %v3397_v3 }
 0x529   :  { %3087 = vmatmul.mubr.msk.bf16.vlgmr.msra.gmra.mrb[44].mxu1 %vm328_vm3, %v1067_v61  ;;  %v1457_v63 = vpop.permute.xlu0 %1456  ;;  %v1609_v10 = vpop.permute.xlu1 %1608 }
 0x52a   :  { %3097 = vmatpush3.bf16.xpose.msra.mxu1 %v1414_v60  ;;  %3098 = vmatprep.mubr.msk.bf16.mxu1 %vm3398_vm0, %v3397_v3  ;;  %v1614_v13 = vsel %vm20_vm1, %v1609_v10, 0 }
 0x52b   :  { %3108 = vmatprep.subr.bf16.mxu1 %v3397_v3 }
 0x52d   :  { %3093 = vmatmul.mubr.msk.bf16.vlgmr.msra.gmra.mrb[48].mxu0 %vm20_vm1, %v1357_v52  ;;  %v1559_v6 = vpop.permute.xlu0 %1558  ;;  %v1607_v15 = vpop.permute.xlu1 %1606 }
 0x52e   :  { %3103 = vmatpush3.bf16.xpose.msra.mxu0 %v1464_v0  ;;  %3104 = vmatprep.mubr.msk.bf16.mxu0 %vm3398_vm0, %v3397_v3  ;;  %v1564_v9 = vsel %vm20_vm1, %v1559_v6, 0 }
 0x52f   :  { %3114 = vmatprep.subr.bf16.mxu0 %v3397_v3 }
 0x531   :  { %3099 = vmatmul.mubr.msk.bf16.vlgmr.msra.gmra.mrb[48].mxu1 %vm20_vm1, %v1407_v54  ;;  %v1557_v14 = vpop.permute.xlu0 %1556  ;;  %v1735_v19 = vpop.permute.xlu1 %1734 }
 0x532   :  { %3109 = vmatpush3.bf16.xpose.msra.mxu1 %v1514_v2  ;;  %3110 = vmatprep.mubr.msk.bf16.mxu1 %vm3398_vm0, %v3397_v3  ;;  %v1740_v21 = vsel %vm406_vm2, %v1735_v19, 0 }
 0x533   :  { %3120 = vmatprep.subr.bf16.mxu1 %v3397_v3 }
 0x535   :  { %3105 = vmatmul.mubr.msk.bf16.vlgmr.msra.gmra.mrb[52].mxu0 %vm20_vm1, %v1457_v63 }
 0x536   :  { %3115 = vmatpush3.bf16.xpose.msra.mxu0 %v1564_v9  ;;  %3116 = vmatprep.mubr.msk.bf16.mxu0 %vm3398_vm0, %v3397_v3 }
 0x537   :  { %3126 = vmatprep.subr.bf16.mxu0 %v3397_v3 }
 0x539   :  { %3111 = vmatmul.mubr.msk.bf16.vlgmr.msra.gmra.mrb[52].mxu1 %vm20_vm1, %v1507_v1 }
 0x53a   :  { %3121 = vmatpush3.bf16.xpose.msra.mxu1 %v1614_v13  ;;  %3122 = vmatprep.mubr.msk.bf16.mxu1 %vm3398_vm0, %v3397_v3 }
 0x53b   :  { %3132 = vmatprep.subr.bf16.mxu1 %v3397_v3 }
 0x53d   :  { %3117 = vmatmul.mubr.msk.bf16.vlgmr.msra.gmra.mrb[56].mxu0 %vm20_vm1, %v1557_v14 }
 0x53e   :  { %3128 = vmatprep.mubr.msk.bf16.mxu0 %vm3398_vm0, %v3397_v3  ;;  %3127 = vmatpush3.bf16.msra.mxu0 %v1740_v21 }
 0x53f   :  { %3138 = vmatprep.subr.bf16.mxu0 %v3397_v3 }
 0x541   :  { %3123 = vmatmul.mubr.msk.bf16.vlgmr.msra.gmra.mrb[56].mxu1 %vm20_vm1, %v1607_v15 }
 0x542   :  { %3134 = vmatprep.mubr.msk.bf16.mxu1 %vm3398_vm0, %v3397_v3 }
 0x5bb   :  { %v3729_v16 = vpop.f32.mrb[36].mxu0 }
 0x5bc   :  { %v3058_v17 = vpop.f32.mrb[37].mxu0 }
 0x5bd   :  { %v1113_v18 = vpop.f32.mrb[38].mxu0 }
 0x5be   :  { %v3059_v20 = vpop.f32.mrb[39].mxu0 }
 0x5bf   :  { %v3732_v22 = vpop.f32.mrb[36].mxu1 }
 0x5c0   :  { %v3250_v23 = vpack.i.bf16 %v3732_v22, %v3729_v16  ;;  %v3064_v24 = vpop.f32.mrb[37].mxu1 }
 0x5c1   :  { %v1161_v25 = vpop.f32.mrb[38].mxu1 }
 0x5c2   :  { %v3065_v26 = vpop.f32.mrb[39].mxu1 }
 0x5c3   :  { %v3737_v27 = vpop.f32.mrb[40].mxu0 }
 0x5c4   :  { %v3070_v28 = vpop.f32.mrb[41].mxu0 }
 0x5c5   :  { %v1209_v29 = vpop.f32.mrb[42].mxu0 }
 0x5c6   :  { %v3071_v30 = vpop.f32.mrb[43].mxu0 }
 0x5c7   :  { %v3739_v32 = vpop.f32.mrb[40].mxu1 }
 0x5c8   :  { %v3255_v33 = vpack.i.bf16 %v3739_v32, %v3737_v27  ;;  %v3076_v34 = vpop.f32.mrb[41].mxu1 }
 0x5c9   :  { %v1257_v35 = vpop.f32.mrb[42].mxu1 }
 0x5ca   :  { %v3077_v36 = vpop.f32.mrb[43].mxu1 }
 0x5f8   :  { %v3743_v38 = vpop.f32.mrb[44].mxu0 }
 0x5f9   :  { %v3082_v39 = vpop.f32.mrb[45].mxu0 }
 0x5fa   :  { %v1305_v40 = vpop.f32.mrb[46].mxu0 }
 0x5fb   :  { %v3083_v42 = vpop.f32.mrb[47].mxu0 }
 0x5fc   :  { %v3745_v43 = vpop.f32.mrb[44].mxu1 }
 0x5fd   :  { %v3260_v44 = vpack.i.bf16 %v3745_v43, %v3743_v38  ;;  %v3088_v46 = vpop.f32.mrb[45].mxu1 }
 0x5fe   :  { %v1353_v47 = vpop.f32.mrb[46].mxu1 }
 0x5ff   :  { %v3089_v48 = vpop.f32.mrb[47].mxu1 }
 0x600   :  { %v1400_v50 = vpop.f32.mrb[48].mxu0 }
 0x601   :  { %v1656_v51 = vmul.f32 0.5, %v1400_v50  ;;  %v3094_v52 = vpop.f32.mrb[49].mxu0 }
 0x602   :  { %v1403_v54 = vpop.f32.mrb[50].mxu0 }
 0x603   :  { %v3095_v55 = vpop.f32.mrb[51].mxu0  ;;  %v1662_v56 = vsel %vm328_vm3, %v1656_v51, -inf }
 0x604   :  { %v1450_v57 = vpop.f32.mrb[48].mxu1  ;;  %1663 = vmax.xlane.f32.xlu0 %v1662_v56 }
 0x605   :  { %v1657_v58 = vmul.f32 0.5, %v1450_v57  ;;  %v3100_v59 = vpop.f32.mrb[49].mxu1 }
 0x606   :  { %v1453_v60 = vpop.f32.mrb[50].mxu1 }
 0x607   :  { %v3101_v61 = vpop.f32.mrb[51].mxu1  ;;  %v1665_v62 = vsel %vm328_vm3, %v1657_v58, -inf }
 0x608   :  { %1666 = vmax.xlane.f32.xlu1 %v1665_v62  ;;  %v1500_v63 = vpop.f32.mrb[52].mxu0 }
 0x609   :  { %v1658_v0 = vmul.f32 0.5, %v1500_v63  ;;  %v3106_v1 = vpop.f32.mrb[53].mxu0 }
 0x60a   :  { %v1503_v2 = vpop.f32.mrb[54].mxu0 }
 0x60b   :  { %v3107_v6 = vpop.f32.mrb[55].mxu0  ;;  %v1668_v9 = vsel %vm328_vm3, %v1658_v0, -inf }
 0x60c   :  { %v1550_v10 = vpop.f32.mrb[52].mxu1  ;;  %1669 = vmax.xlane.f32.xlu0 %v1668_v9 }
 0x60d   :  { %v1659_v13 = vmul.f32 0.5, %v1550_v10  ;;  %v3112_v14 = vpop.f32.mrb[53].mxu1 }
 0x60e   :  { %v1553_v15 = vpop.f32.mrb[54].mxu1 }
 0x60f   :  { %v3113_v17 = vpop.f32.mrb[55].mxu1  ;;  %v1671_v18 = vsel %vm328_vm3, %v1659_v13, -inf }
 0x610   :  { %1672 = vmax.xlane.f32.xlu0 %v1671_v18  ;;  %v1600_v19 = vpop.f32.mrb[56].mxu0 }
 0x611   :  { %v1660_v20 = vmul.f32 0.5, %v1600_v19  ;;  %v3118_v21 = vpop.f32.mrb[57].mxu0 }
 0x612   :  { %v1603_v24 = vpop.f32.mrb[58].mxu0 }
 0x613   :  { %v1674_v25 = vsel %vm328_vm3, %v1660_v20, -inf  ;;  %v3119_v26 = vpop.f32.mrb[59].mxu0 }
 0x614   :  { %v1650_v28 = vpop.f32.mrb[56].mxu1  ;;  %1675 = vmax.xlane.f32.xlu1 %v1674_v25 }
 0x615   :  { %v1661_v29 = vmul.f32 0.5, %v1650_v28  ;;  %v3124_v30 = vpop.f32.mrb[57].mxu1 }
 0x616   :  { %v1653_v34 = vpop.f32.mrb[58].mxu1 }
 0x617   :  { %v1677_v35 = vsel %vm328_vm3, %v1661_v29, -inf  ;;  %v3125_v36 = vpop.f32.mrb[59].mxu1 }
 0x618   :  { %1678 = vmax.xlane.f32.xlu0 %v1677_v35 }
 0x625   :  { %1830 = vrot.lane.b32.xlu1 %v3436_v5, %s3406_s24 }
 0x629   :  { %1878 = vrot.lane.b32.xlu1 %v3449_v8, %s3406_s24 }
 0x62e   :  { %1782 = vrot.lane.b32.xlu0 %v3446_v7, %s3406_s24 }
 0x691   :  { %v1664_v39 = vpop.xlane.xlu0 %1663 }
 0x692   :  { %v1680_v40 = vsub.f32 %v1656_v51, %v1664_v39 }
 0x694   :  { %v1686_v42 = vmul.f32 1.442695, %v1680_v40 }
 0x695   :  { %v1667_v46 = vpop.xlane.xlu1 %1666 }
 0x696   :  { %3349 = vpow2.f32 %v1686_v42  ;;  %v1681_v47 = vsub.f32 %v1657_v58, %v1667_v46 }
 0x698   :  { %v1688_v48 = vmul.f32 1.442695, %v1681_v47 }
 0x699   :  { %v1670_v50 = vpop.xlane.xlu0 %1669 }
 0x69a   :  { %3351 = vpow2.f32 %v1688_v48  ;;  %v1682_v52 = vsub.f32 %v1658_v0, %v1670_v50 }
 0x69c   :  { %v1690_v54 = vmul.f32 1.442695, %v1682_v52 }
 0x69d   :  { %v1673_v55 = vpop.xlane.xlu0 %1672 }
 0x69e   :  { %3353 = vpow2.f32 %v1690_v54  ;;  %v1683_v56 = vsub.f32 %v1659_v13, %v1673_v55 }
 0x6a0   :  { %v3350_v57 = vpop.eup %3349  ;;  %v1692_v59 = vmul.f32 1.442695, %v1683_v56 }
 0x6a1   :  { %v1698_v60 = vsel %vm328_vm3, %v3350_v57, 0.0  ;;  %v1676_v9 = vpop.xlane.xlu1 %1675 }
 0x6a2   :  { %3355 = vpow2.f32 %v1692_v59  ;;  %1699 = vadd.xlane.f32.xlu1 %v1698_v60  ;;  %v1684_v10 = vsub.f32 %v1660_v20, %v1676_v9 }
 0x6a4   :  { %v3352_v61 = vpop.eup %3351  ;;  %v1694_v13 = vmul.f32 1.442695, %v1684_v10 }
 0x6a5   :  { %v1679_v51 = vpop.xlane.xlu0 %1678  ;;  %v1701_v62 = vsel %vm328_vm3, %v3352_v61, 0.0  ;;  %v1831_v20 = vpop.permute.xlu1 %1830 }
 0x6a6   :  { %1702 = vadd.xlane.f32.xlu0 %v1701_v62  ;;  %v1685_v14 = vsub.f32 %v1661_v29, %v1679_v51  ;;  %3357 = vpow2.f32 %v1694_v13  ;;  %v1836_v39 = vsel %vm406_vm2, %v1831_v20, 0 }
 0x6a8   :  { %v3354_v58 = vpop.eup %3353  ;;  %v1696_v15 = vmul.f32 1.442695, %v1685_v14 }
 0x6a9   :  { %v1704_v63 = vsel %vm328_vm3, %v3354_v58, 0.0  ;;  %v1783_v1 = vpop.permute.xlu0 %1782  ;;  %v1879_v24 = vpop.permute.xlu1 %1878 }
 0x6aa   :  { %1705 = vadd.xlane.f32.xlu1 %v1704_v63  ;;  %v1788_v0 = vsel %vm406_vm2, %v1783_v1, 0  ;;  %3359 = vpow2.f32 %v1696_v15  ;;  %v1884_v47 = vsel %vm406_vm2, %v1879_v24, 0 }
 0x6ab   :  { %3133 = vmatpush3.bf16.msra.mxu1 %v1788_v0 }
 0x6ac   :  { %v3765_v2 = vpop.eup %3355  ;;  %3144 = vmatprep.subr.bf16.mxu1 %v3397_v3 }
 0x6ad   :  { %v1707_v6 = vsel %vm328_vm3, %v3765_v2, 0.0 }
 0x6ae   :  { %1708 = vadd.xlane.f32.xlu0 %v1707_v6 }
 0x6b0   :  { %v3774_v17 = vpop.eup %3357 }
 0x6b1   :  { %v1710_v18 = vsel %vm328_vm3, %v3774_v17, 0.0 }
 0x6b4   :  { %v3778_v19 = vpop.eup %3359 }
 0x6b5   :  { %v1713_v21 = vsel %vm328_vm3, %v3778_v19, 0.0 }
 0x6bb   :  { %1974 = vrot.lane.b32.xlu1 %v3461_v12, %s3406_s24 }
 0x6c4   :  { %1926 = vrot.lane.b32.xlu0 %v3459_v11, %s3406_s24 }
 0x6df   :  { %1711 = vadd.xlane.f32.xlu1 %v1710_v18 }
 0x6e3   :  { %1714 = vadd.xlane.f32.xlu0 %v1713_v21 }
 0x6f0   :  { %2074 = vrot.lane.b32.xlu1 %v3446_v7, %s3407_s25 }
 0x6f4   :  { %2072 = vrot.lane.b32.xlu1 %v3446_v7, %s3408_s26 }
 0x6f8   :  { %2174 = vrot.lane.b32.xlu1 %v3449_v8, %s3407_s25 }
 0x6f9   :  { %2024 = vrot.lane.b32.xlu0 %v3434_v4, %s3407_s25 }
 0x6fc   :  { %2172 = vrot.lane.b32.xlu1 %v3449_v8, %s3408_s26 }
 0x6fd   :  { %2022 = vrot.lane.b32.xlu0 %v3434_v4, %s3408_s26 }
 0x700   :  { %2274 = vrot.lane.b32.xlu1 %v3461_v12, %s3407_s25 }
 0x701   :  { %2124 = vrot.lane.b32.xlu0 %v3436_v5, %s3407_s25 }
 0x704   :  { %2272 = vrot.lane.b32.xlu1 %v3461_v12, %s3408_s26 }
 0x705   :  { %2122 = vrot.lane.b32.xlu0 %v3436_v5, %s3408_s26 }
 0x709   :  { %2224 = vrot.lane.b32.xlu0 %v3459_v11, %s3407_s25 }
 0x70d   :  { %2222 = vrot.lane.b32.xlu0 %v3459_v11, %s3408_s26 }
 0x72f   :  { %v1700_v25 = vpop.xlane.xlu1 %1699 }
 0x730   :  { %3361 = vrcp.f32 %v1700_v25 }
 0x733   :  { %v1703_v26 = vpop.xlane.xlu0 %1702 }
 0x734   :  { %3363 = vrcp.f32 %v1703_v26 }
 0x737   :  { %v1706_v28 = vpop.xlane.xlu1 %1705 }
 0x738   :  { %3365 = vrcp.f32 %v1706_v28 }
 0x73a   :  { %v3362_v29 = vpop.eup %3361 }
 0x73b   :  { %v1717_v30 = vmul.f32 %v3362_v29, %v3350_v57  ;;  %v1709_v34 = vpop.xlane.xlu0 %1708  ;;  %v1975_v57 = vpop.permute.xlu1 %1974 }
 0x73c   :  { %3367 = vrcp.f32 %v1709_v34  ;;  %v1980_v60 = vsel %vm406_vm2, %v1975_v57, 0 }
 0x73d   :  { %v1728_v35 = vpack.c.bf16 %v1717_v30, %v1717_v30 }
 0x73e   :  { %v3364_v36 = vpop.eup %3363 }
 0x73f   :  { %v1719_v40 = vmul.f32 %v3364_v36, %v3352_v61  ;;  %3129 = vmatmul.mubr.msk.bf16.vlgmr.msra.gmra.mrb[60].mxu0 %vm328_vm3, %v1728_v35  ;;  %v1927_v50 = vpop.permute.xlu0 %1926 }
 0x740   :  { %3139 = vmatpush3.bf16.msra.mxu0 %v1836_v39  ;;  %3140 = vmatprep.mubr.msk.bf16.mxu0 %vm3398_vm0, %v3397_v3  ;;  %v1932_v56 = vsel %vm406_vm2, %v1927_v50, 0 }
 0x741   :  { %v1729_v42 = vpack.c.bf16 %v1719_v40, %v1719_v40  ;;  %3150 = vmatprep.subr.bf16.mxu0 %v3397_v3 }
 0x742   :  { %v3366_v46 = vpop.eup %3365 }
 0x743   :  { %v1721_v48 = vmul.f32 %v3366_v46, %v3354_v58  ;;  %3135 = vmatmul.mubr.msk.bf16.vlgmr.msra.gmra.mrb[60].mxu1 %vm328_vm3, %v1729_v42 }
 0x744   :  { %3145 = vmatpush3.bf16.msra.mxu1 %v1884_v47  ;;  %3146 = vmatprep.mubr.msk.bf16.mxu1 %vm3398_vm0, %v3397_v3 }
 0x745   :  { %v1730_v52 = vpack.c.bf16 %v1721_v48, %v1721_v48  ;;  %3156 = vmatprep.subr.bf16.mxu1 %v3397_v3 }
 0x746   :  { %v3368_v54 = vpop.eup %3367 }
 0x747   :  { %v1723_v55 = vmul.f32 %v3368_v54, %v3765_v2  ;;  %3141 = vmatmul.mubr.msk.bf16.vlgmr.msra.gmra.mrb[64].mxu0 %vm328_vm3, %v1730_v52 }
 0x748   :  { %3151 = vmatpush3.bf16.msra.mxu0 %v1932_v56  ;;  %3152 = vmatprep.mubr.msk.bf16.mxu0 %vm3398_vm0, %v3397_v3 }
 0x749   :  { %v1731_v59 = vpack.c.bf16 %v1723_v55, %v1723_v55  ;;  %3162 = vmatprep.subr.bf16.mxu0 %v3397_v3 }
 0x74b   :  { %3147 = vmatmul.mubr.msk.bf16.vlgmr.msra.gmra.mrb[64].mxu1 %vm328_vm3, %v1731_v59 }
 0x74c   :  { %3157 = vmatpush3.bf16.msra.mxu1 %v1980_v60  ;;  %3158 = vmatprep.mubr.msk.bf16.mxu1 %vm3398_vm0, %v3397_v3 }
 0x74d   :  { %3168 = vmatprep.subr.bf16.mxu1 %v3397_v3 }
 0x76c   :  { %v1712_v61 = vpop.xlane.xlu1 %1711 }
 0x76d   :  { %3369 = vrcp.f32 %v1712_v61 }
 0x770   :  { %v1715_v51 = vpop.xlane.xlu0 %1714  ;;  %v2075_v62 = vpop.permute.xlu1 %2074 }
 0x771   :  { %3371 = vrcp.f32 %v1715_v51  ;;  %v2080_v15 = vsel %vm20_vm1, %v2075_v62, 0 }
 0x774   :  { %v2025_v58 = vpop.permute.xlu0 %2024  ;;  %v2073_v2 = vpop.permute.xlu1 %2072 }
 0x775   :  { %v2030_v6 = vsel %vm20_vm1, %v2025_v58, 0 }
 0x777   :  { %v3370_v63 = vpop.eup %3369 }
 0x778   :  { %v1725_v1 = vmul.f32 %v3370_v63, %v3774_v17  ;;  %v2023_v0 = vpop.permute.xlu0 %2022  ;;  %v2175_v17 = vpop.permute.xlu1 %2174 }
 0x779   :  { %v2180_v24 = vsel %vm20_vm1, %v2175_v17, 0 }
 0x77a   :  { %v1732_v9 = vpack.c.bf16 %v1725_v1, %v1725_v1 }
 0x77b   :  { %v3372_v10 = vpop.eup %3371 }
 0x77c   :  { %v1727_v13 = vmul.f32 %v3372_v10, %v3778_v19  ;;  %3153 = vmatmul.mubr.msk.bf16.vlgmr.msra.gmra.mrb[68].mxu0 %vm328_vm3, %v1732_v9  ;;  %v2125_v14 = vpop.permute.xlu0 %2124  ;;  %v2173_v20 = vpop.permute.xlu1 %2172 }
 0x77d   :  { %3163 = vmatpush3.bf16.xpose.msra.mxu0 %v2030_v6  ;;  %3164 = vmatprep.mubr.msk.bf16.mxu0 %vm3398_vm0, %v3397_v3  ;;  %v2130_v21 = vsel %vm20_vm1, %v2125_v14, 0 }
 0x77e   :  { %v1733_v18 = vpack.c.bf16 %v1727_v13, %v1727_v13  ;;  %3174 = vmatprep.subr.bf16.mxu0 %v3397_v3 }
 0x780   :  { %3159 = vmatmul.mubr.msk.bf16.vlgmr.msra.gmra.mrb[68].mxu1 %vm328_vm3, %v1733_v18  ;;  %v2123_v19 = vpop.permute.xlu0 %2122  ;;  %v2275_v28 = vpop.permute.xlu1 %2274 }
 0x781   :  { %3169 = vmatpush3.bf16.xpose.msra.mxu1 %v2080_v15  ;;  %3170 = vmatprep.mubr.msk.bf16.mxu1 %vm3398_vm0, %v3397_v3  ;;  %v2280_v29 = vsel %vm20_vm1, %v2275_v28, 0 }
 0x782   :  { %3180 = vmatprep.subr.bf16.mxu1 %v3397_v3 }
 0x784   :  { %3165 = vmatmul.mubr.msk.bf16.vlgmr.msra.gmra.mrb[72].mxu0 %vm20_vm1, %v2023_v0  ;;  %v2225_v25 = vpop.permute.xlu0 %2224  ;;  %v2273_v34 = vpop.permute.xlu1 %2272 }
 0x785   :  { %3175 = vmatpush3.bf16.xpose.msra.mxu0 %v2130_v21  ;;  %3176 = vmatprep.mubr.msk.bf16.mxu0 %vm3398_vm0, %v3397_v3  ;;  %v2230_v26 = vsel %vm20_vm1, %v2225_v25, 0 }
 0x786   :  { %3186 = vmatprep.subr.bf16.mxu0 %v3397_v3 }
 0x788   :  { %3171 = vmatmul.mubr.msk.bf16.vlgmr.msra.gmra.mrb[72].mxu1 %vm20_vm1, %v2073_v2  ;;  %v2223_v30 = vpop.permute.xlu0 %2222 }
 0x789   :  { %3181 = vmatpush3.bf16.xpose.msra.mxu1 %v2180_v24  ;;  %3182 = vmatprep.mubr.msk.bf16.mxu1 %vm3398_vm0, %v3397_v3 }
 0x78a   :  { %3192 = vmatprep.subr.bf16.mxu1 %v3397_v3 }
 0x78c   :  { %3177 = vmatmul.mubr.msk.bf16.vlgmr.msra.gmra.mrb[76].mxu0 %vm20_vm1, %v2123_v19 }
 0x78d   :  { %3187 = vmatpush3.bf16.xpose.msra.mxu0 %v2230_v26  ;;  %3188 = vmatprep.mubr.msk.bf16.mxu0 %vm3398_vm0, %v3397_v3 }
 0x78e   :  { %3198 = vmatprep.subr.bf16.mxu0 %v3397_v3 }
 0x790   :  { %3183 = vmatmul.mubr.msk.bf16.vlgmr.msra.gmra.mrb[76].mxu1 %vm20_vm1, %v2173_v20 }
 0x791   :  { %3193 = vmatpush3.bf16.xpose.msra.mxu1 %v2280_v29  ;;  %3194 = vmatprep.mubr.msk.bf16.mxu1 %vm3398_vm0, %v3397_v3 }
 0x792   :  { %3204 = vmatprep.subr.bf16.mxu1 %v3397_v3 }
 0x794   :  { %3189 = vmatmul.mubr.msk.bf16.vlgmr.msra.gmra.mrb[80].mxu0 %vm20_vm1, %v2223_v30 }
 0x795   :  { %3200 = vmatprep.mubr.msk.bf16.mxu0 %vm3398_vm0, %v3397_v3 }
 0x798   :  { %3195 = vmatmul.mubr.msk.bf16.vlgmr.msra.gmra.mrb[80].mxu1 %vm20_vm1, %v2273_v34 }
 0x799   :  { %3206 = vmatprep.mubr.msk.bf16.mxu1 %vm3398_vm0, %v3397_v3 }
 0x812   :  { %v3853_v35 = vpop.f32.mrb[60].mxu0 }
 0x813   :  { %v3130_v36 = vpop.f32.mrb[61].mxu0 }
 0x814   :  { %v1779_v39 = vpop.f32.mrb[62].mxu0 }
 0x815   :  { %v3131_v40 = vpop.f32.mrb[63].mxu0 }
 0x816   :  { %v3855_v42 = vpop.f32.mrb[60].mxu1 }
 0x817   :  { %v3265_v46 = vpack.i.bf16 %v3855_v42, %v3853_v35  ;;  %v3136_v47 = vpop.f32.mrb[61].mxu1 }
 0x818   :  { %v1827_v48 = vpop.f32.mrb[62].mxu1 }
 0x819   :  { %v3137_v50 = vpop.f32.mrb[63].mxu1 }
 0x81a   :  { %v3859_v52 = vpop.f32.mrb[64].mxu0 }
 0x81b   :  { %v3142_v54 = vpop.f32.mrb[65].mxu0 }
 0x81c   :  { %v1875_v55 = vpop.f32.mrb[66].mxu0 }
 0x81d   :  { %v3143_v56 = vpop.f32.mrb[67].mxu0 }
 0x81e   :  { %v3861_v57 = vpop.f32.mrb[64].mxu1 }
 0x81f   :  { %v3270_v59 = vpack.i.bf16 %v3861_v57, %v3859_v52  ;;  %v3148_v60 = vpop.f32.mrb[65].mxu1 }
 0x820   :  { %v1923_v61 = vpop.f32.mrb[66].mxu1 }
 0x821   :  { %v3149_v51 = vpop.f32.mrb[67].mxu1 }
 0x84f   :  { %v3865_v62 = vpop.f32.mrb[68].mxu0 }
 0x850   :  { %v3154_v58 = vpop.f32.mrb[69].mxu0 }
 0x851   :  { %v1971_v63 = vpop.f32.mrb[70].mxu0 }
 0x852   :  { %v3155_v1 = vpop.f32.mrb[71].mxu0 }
 0x853   :  { %v3867_v0 = vpop.f32.mrb[68].mxu1 }
 0x854   :  { %v3275_v2 = vpack.i.bf16 %v3867_v0, %v3865_v62  ;;  %v3160_v6 = vpop.f32.mrb[69].mxu1 }
 0x855   :  { %v2019_v9 = vpop.f32.mrb[70].mxu1 }
 0x856   :  { %v3161_v10 = vpop.f32.mrb[71].mxu1 }
 0x857   :  { %v2066_v13 = vpop.f32.mrb[72].mxu0 }
 0x858   :  { %v2322_v14 = vmul.f32 0.5, %v2066_v13  ;;  %v3166_v15 = vpop.f32.mrb[73].mxu0 }
 0x859   :  { %v2069_v18 = vpop.f32.mrb[74].mxu0 }
 0x85a   :  { %v3167_v17 = vpop.f32.mrb[75].mxu0  ;;  %v2328_v19 = vsel %vm328_vm3, %v2322_v14, -inf }
 0x85b   :  { %v2116_v21 = vpop.f32.mrb[72].mxu1  ;;  %2329 = vmax.xlane.f32.xlu0 %v2328_v19 }
 0x85c   :  { %v2323_v20 = vmul.f32 0.5, %v2116_v21  ;;  %v3172_v24 = vpop.f32.mrb[73].mxu1 }
 0x85d   :  { %v2119_v25 = vpop.f32.mrb[74].mxu1 }
 0x85e   :  { %v3173_v26 = vpop.f32.mrb[75].mxu1  ;;  %v2331_v28 = vsel %vm328_vm3, %v2323_v20, -inf }
 0x85f   :  { %2332 = vmax.xlane.f32.xlu1 %v2331_v28  ;;  %v2166_v29 = vpop.f32.mrb[76].mxu0 }
 0x860   :  { %v2324_v30 = vmul.f32 0.5, %v2166_v29  ;;  %v3178_v34 = vpop.f32.mrb[77].mxu0 }
 0x861   :  { %v2169_v36 = vpop.f32.mrb[78].mxu0 }
 0x862   :  { %v2334_v39 = vsel %vm328_vm3, %v2324_v30, -inf  ;;  %v3179_v40 = vpop.f32.mrb[79].mxu0 }
 0x863   :  { %v2216_v47 = vpop.f32.mrb[76].mxu1  ;;  %2335 = vmax.xlane.f32.xlu0 %v2334_v39 }
 0x864   :  { %v2325_v48 = vmul.f32 0.5, %v2216_v47  ;;  %v3184_v50 = vpop.f32.mrb[77].mxu1 }
 0x865   :  { %v2219_v54 = vpop.f32.mrb[78].mxu1 }
 0x866   :  { %v2337_v55 = vsel %vm328_vm3, %v2325_v48, -inf  ;;  %v3185_v56 = vpop.f32.mrb[79].mxu1 }
 0x867   :  { %2338 = vmax.xlane.f32.xlu0 %v2337_v55  ;;  %v2266_v60 = vpop.f32.mrb[80].mxu0 }
 0x868   :  { %v2326_v61 = vmul.f32 0.5, %v2266_v60  ;;  %v3190_v51 = vpop.f32.mrb[81].mxu0 }
 0x869   :  { %v2269_v58 = vpop.f32.mrb[82].mxu0 }
 0x86a   :  { %v2340_v63 = vsel %vm328_vm3, %v2326_v61, -inf  ;;  %v3191_v1 = vpop.f32.mrb[83].mxu0 }
 0x86b   :  { %v2316_v6 = vpop.f32.mrb[80].mxu1  ;;  %2341 = vmax.xlane.f32.xlu1 %v2340_v63 }
 0x86c   :  { %v2327_v9 = vmul.f32 0.5, %v2316_v6  ;;  %v3196_v10 = vpop.f32.mrb[81].mxu1 }
 0x86d   :  { %v2319_v13 = vpop.f32.mrb[82].mxu1 }
 0x86e   :  { %v2343_v15 = vsel %vm328_vm3, %v2327_v9, -inf  ;;  %v3197_v18 = vpop.f32.mrb[83].mxu1 }
 0x86f   :  { %2344 = vmax.xlane.f32.xlu0 %v2343_v15 }
 0x87c   :  { %2400 = vrot.lane.b32.xlu1 %v3434_v4, %s3409_s27 }
 0x8e8   :  { %v2330_v17 = vpop.xlane.xlu0 %2329 }
 0x8e9   :  { %v2346_v19 = vsub.f32 %v2322_v14, %v2330_v17 }
 0x8eb   :  { %v2352_v21 = vmul.f32 1.442695, %v2346_v19 }
 0x8ec   :  { %v2333_v24 = vpop.xlane.xlu1 %2332 }
 0x8ed   :  { %3373 = vpow2.f32 %v2352_v21  ;;  %v2347_v25 = vsub.f32 %v2323_v20, %v2333_v24 }
 0x8ef   :  { %v2354_v26 = vmul.f32 1.442695, %v2347_v25 }
 0x8f0   :  { %v2336_v14 = vpop.xlane.xlu0 %2335 }
 0x8f1   :  { %3375 = vpow2.f32 %v2354_v26  ;;  %v2348_v47 = vsub.f32 %v2324_v30, %v2336_v14 }
 0x8f3   :  { %v2356_v55 = vmul.f32 1.442695, %v2348_v47 }
 0x8f4   :  { %v2339_v20 = vpop.xlane.xlu0 %2338 }
 0x8f5   :  { %v2349_v50 = vsub.f32 %v2325_v48, %v2339_v20  ;;  %3377 = vpow2.f32 %v2356_v55 }
 0x8f7   :  { %v3374_v28 = vpop.eup %3373  ;;  %v2358_v60 = vmul.f32 1.442695, %v2349_v50 }
 0x8f8   :  { %v2342_v29 = vpop.xlane.xlu1 %2341  ;;  %v2364_v34 = vsel %vm328_vm3, %v3374_v28, 0.0 }
 0x8f9   :  { %2365 = vadd.xlane.f32.xlu1 %v2364_v34  ;;  %v2350_v56 = vsub.f32 %v2326_v61, %v2342_v29  ;;  %3379 = vpow2.f32 %v2358_v60 }
 0x8fb   :  { %v3376_v36 = vpop.eup %3375  ;;  %v2360_v58 = vmul.f32 1.442695, %v2350_v56 }
 0x8fc   :  { %v2367_v39 = vsel %vm328_vm3, %v3376_v36, 0.0  ;;  %v2401_v40 = vpop.permute.xlu1 %2400  ;;  %v2345_v54 = vpop.xlane.xlu0 %2344 }
 0x8fd   :  { %2368 = vadd.xlane.f32.xlu0 %v2367_v39  ;;  %v2406_v4 = vsel %vm406_vm2, %v2401_v40, 0  ;;  %v2351_v51 = vsub.f32 %v2327_v9, %v2345_v54  ;;  %3381 = vpow2.f32 %v2360_v58 }
 0x8fe   :  { %3199 = vmatpush3.bf16.msra.mxu0 %v2406_v4 }
 0x8ff   :  { %3210 = vmatprep.subr.bf16.mxu0 %v3397_v3  ;;  %v2362_v63 = vmul.f32 1.442695, %v2351_v51 }
 0x901   :  { %3383 = vpow2.f32 %v2362_v63 }
 0x90a   :  { %2496 = vrot.lane.b32.xlu1 %v3436_v5, %s3409_s27  ;;  %v3378_v5 = vpop.eup %3377 }
 0x90e   :  { %2544 = vrot.lane.b32.xlu1 %v3449_v8, %s3409_s27  ;;  %v3380_v8 = vpop.eup %3379 }
 0x90f   :  { %v3889_v1 = vpop.eup %3381  ;;  %v2373_v30 = vsel %vm328_vm3, %v3380_v8, 0.0 }
 0x910   :  { %v3893_v48 = vpop.eup %3383  ;;  %v2376_v61 = vsel %vm328_vm3, %v3889_v1, 0.0 }
 0x911   :  { %v2379_v6 = vsel %vm328_vm3, %v3893_v48, 0.0 }
 0x913   :  { %2448 = vrot.lane.b32.xlu0 %v3446_v7, %s3409_s27  ;;  %v2370_v7 = vsel %vm328_vm3, %v3378_v5, 0.0 }
 0x932   :  { %2371 = vadd.xlane.f32.xlu1 %v2370_v7  ;;  %2374 = vadd.xlane.f32.xlu0 %v2373_v30 }
 0x936   :  { %2377 = vadd.xlane.f32.xlu1 %v2376_v61  ;;  %2380 = vadd.xlane.f32.xlu0 %v2379_v6 }
 0x947   :  { %2640 = vrot.lane.b32.xlu1 %v3461_v12, %s3409_s27 }
 0x94b   :  { %3256 = vrot.lane.b32.xlu1 %v3255_v33, %s3410_s28 }
 0x94c   :  { %2592 = vrot.lane.b32.xlu0 %v3459_v11, %s3409_s27 }
 0x94f   :  { %3266 = vrot.lane.b32.xlu1 %v3265_v46, %s3411_s29 }
 0x950   :  { %3251 = vrot.lane.b32.xlu0 %v3250_v23, %s3410_s28 }
 0x953   :  { %3276 = vrot.lane.b32.xlu1 %v3275_v2, %s3411_s29 }
 0x954   :  { %3261 = vrot.lane.b32.xlu0 %v3260_v44, %s3410_s28 }
 0x958   :  { %3271 = vrot.lane.b32.xlu0 %v3270_v59, %s3411_s29 }
 0x986   :  { %v2366_v11 = vpop.xlane.xlu1 %2365 }
 0x987   :  { %3385 = vrcp.f32 %v2366_v11 }
 0x98a   :  { %v2369_v12 = vpop.xlane.xlu0 %2368  ;;  %v2497_v23 = vpop.permute.xlu1 %2496 }
 0x98b   :  { %3387 = vrcp.f32 %v2369_v12  ;;  %v2502_v43 = vsel %vm406_vm2, %v2497_v23, 0 }
 0x98e   :  { %v2449_v27 = vpop.permute.xlu0 %2448  ;;  %v2545_v35 = vpop.permute.xlu1 %2544 }
 0x98f   :  { %v2454_v16 = vsel %vm406_vm2, %v2449_v27, 0  ;;  %v2550_v46 = vsel %vm406_vm2, %v2545_v35, 0 }
 0x990   :  { %3205 = vmatpush3.bf16.msra.mxu1 %v2454_v16 }
 0x991   :  { %v3386_v22 = vpop.eup %3385  ;;  %3216 = vmatprep.subr.bf16.mxu1 %v3397_v3 }
 0x992   :  { %v2383_v32 = vmul.f32 %v3386_v22, %v3374_v28 }
 0x994   :  { %v2394_v33 = vpack.c.bf16 %v2383_v32, %v2383_v32 }
 0x995   :  { %v3388_v38 = vpop.eup %3387 }
 0x996   :  { %v2385_v44 = vmul.f32 %v3388_v38, %v3376_v36  ;;  %3201 = vmatmul.mubr.msk.bf16.vlgmr.msra.gmra.mrb[84].mxu0 %vm328_vm3, %v2394_v33 }
 0x997   :  { %3211 = vmatpush3.bf16.msra.mxu0 %v2502_v43  ;;  %3212 = vmatprep.mubr.msk.bf16.mxu0 %vm3398_vm0, %v3397_v3 }
 0x998   :  { %v2395_v42 = vpack.c.bf16 %v2385_v44, %v2385_v44  ;;  %3222 = vmatprep.subr.bf16.mxu0 %v3397_v3 }
 0x99a   :  { %3207 = vmatmul.mubr.msk.bf16.vlgmr.msra.gmra.mrb[84].mxu1 %vm328_vm3, %v2395_v42 }
 0x99b   :  { %3217 = vmatpush3.bf16.msra.mxu1 %v2550_v46  ;;  %3218 = vmatprep.mubr.msk.bf16.mxu1 %vm3398_vm0, %v3397_v3 }
 0x99c   :  { %3228 = vmatprep.subr.bf16.mxu1 %v3397_v3 }
 0x9bf   :  { %v2372_v52 = vpop.xlane.xlu1 %2371  ;;  %v2375_v57 = vpop.xlane.xlu0 %2374 }
 0x9c0   :  { %3389 = vrcp.f32 %v2372_v52 }
 0x9c1   :  { %3391 = vrcp.f32 %v2375_v57 }
 0x9c3   :  { %v2378_v59 = vpop.xlane.xlu1 %2377  ;;  %v2381_v62 = vpop.xlane.xlu0 %2380 }
 0x9c4   :  { %3393 = vrcp.f32 %v2378_v59 }
 0x9c5   :  { %3395 = vrcp.f32 %v2381_v62 }
 0x9c7   :  { %v2593_v0 = vpop.permute.xlu0 %2592  ;;  %v2641_v18 = vpop.permute.xlu1 %2640 }
 0x9c8   :  { %v2598_v17 = vsel %vm406_vm2, %v2593_v0, 0  ;;  %v2646_v24 = vsel %vm406_vm2, %v2641_v18, 0 }
 0x9ca   :  { %v3390_v2 = vpop.eup %3389 }
 0x9cb   :  { %v3392_v9 = vpop.eup %3391  ;;  %v2387_v10 = vmul.f32 %v3390_v2, %v3378_v5  ;;  %v3933_v13 = vpop.permute.xlu0 %3251 }
 0x9cc   :  { %v2389_v15 = vmul.f32 %v3392_v9, %v3380_v8  ;;  %v3257_v33 = vpop.permute.xlu1 %3256  ;;  %v3254_v44 = vunpack.i.h.bf16 %v3933_v13  ;;  %v3253_v35 = vunpack.i.l.bf16 %v3933_v13 }
 0x9cd   :  { %v2396_v19 = vpack.c.bf16 %v2387_v10, %v2387_v10 }
 0x9ce   :  { %v3394_v21 = vpop.eup %3393  ;;  %v2397_v25 = vpack.c.bf16 %v2389_v15, %v2389_v15  ;;  %v2761_v57 = vsel %vm20_vm1, %v3612_v37, %v3254_v44  ;;  %v2760_v59 = vsel %vm20_vm1, %v3609_v31, %v3253_v35  ;;  %v3259_v37 = vunpack.i.h.bf16 %v3257_v33 }
 0x9cf   :  { %v3396_v26 = vpop.eup %3395  ;;  %3213 = vmatmul.mubr.msk.bf16.vlgmr.msra.gmra.mrb[88].mxu0 %vm328_vm3, %v2396_v19  ;;  %v3262_v28 = vpop.permute.xlu0 %3261  ;;  %v2391_v34 = vmul.f32 %v3394_v21, %v3889_v1 }
 0x9d0   :  { %3219 = vmatmul.mubr.msk.bf16.vlgmr.msra.gmra.mrb[88].mxu1 %vm328_vm3, %v2397_v25  ;;  %v3264_v29 = vunpack.i.h.bf16 %v3262_v28  ;;  %3223 = vmatpush3.bf16.msra.mxu0 %v2598_v17  ;;  %v3263_v36 = vunpack.i.l.bf16 %v3262_v28  ;;  %v2393_v39 = vmul.f32 %v3396_v26, %v3893_v48  ;;  %v3267_v38 = vpop.permute.xlu1 %3266  ;;  %v3258_v17 = vunpack.i.l.bf16 %v3257_v33 }
 0x9d1   :  { %3229 = vmatpush3.bf16.msra.mxu1 %v2646_v24  ;;  %3224 = vmatprep.mubr.msk.bf16.mxu0 %vm3398_vm0, %v3397_v3  ;;  %v2398_v14 = vpack.c.bf16 %v2391_v34, %v2391_v34  ;;  %v3269_v42 = vunpack.i.h.bf16 %v3267_v38  ;;  %v3268_v46 = vunpack.i.l.bf16 %v3267_v38  ;;  %v2763_v25 = vsel %vm20_vm1, %v3617_v45, %v3259_v37 }
 0x9d2   :  { %v3945_v40 = vsel %vm20_vm1, %v3621_v53, %v3264_v29  ;;  %3230 = vmatprep.mubr.msk.bf16.mxu1 %vm3398_vm0, %v3397_v3  ;;  %v3951_v4 = vsel %vm20_vm1, %v3619_v49, %v3263_v36  ;;  %v2399_v20 = vpack.c.bf16 %v2393_v39, %v2393_v39  ;;  %v2762_v26 = vsel %vm20_vm1, %v3615_v41, %v3258_v17 }
 0x9d3   :  { %v3272_v43 = vpop.permute.xlu0 %3271  ;;  %v2766_v2 = vsel %vm328_vm3, %v2760_v59, %v3268_v46  ;;  %v2767_v9 = vsel %vm328_vm3, %v2761_v57, %v3269_v42 }
 0x9d4   :  { %v3277_v31 = vpop.permute.xlu1 %3276  ;;  %v3274_v19 = vunpack.i.h.bf16 %v3272_v43  ;;  %v3273_v21 = vunpack.i.l.bf16 %v3272_v43 }
 0x9d6   :  { %v2769_v34 = vsel %vm328_vm3, %v2763_v25, %v3274_v19  ;;  %v2768_v36 = vsel %vm328_vm3, %v2762_v26, %v3273_v21 }
 0x9d7   :  { %3225 = vmatmul.mubr.msk.bf16.vlgmr.msra.gmra.mrb[92].mxu0 %vm328_vm3, %v2398_v14 }
 0x9d8   :  { %3231 = vmatmul.mubr.msk.bf16.vlgmr.msra.gmra.mrb[92].mxu1 %vm328_vm3, %v2399_v20 }
 0xa69   :  { %v2442_v47 = vpop.f32.mrb[84].mxu0 }
 0xa6a   :  { %v3202_v50 = vpop.f32.mrb[85].mxu0 }
 0xa6b   :  { %v2445_v54 = vpop.f32.mrb[86].mxu0  ;;  %v3279_v50 = vunpack.i.h.bf16 %v3277_v31 }
 0xa6c   :  { %v3203_v55 = vpop.f32.mrb[87].mxu0  ;;  %v3278_v54 = vunpack.i.l.bf16 %v3277_v31 }
 0xa6d   :  { %v2490_v56 = vpop.f32.mrb[84].mxu1 }
 0xa6e   :  { %v3280_v53 = vpack.i.bf16 %v2490_v56, %v2442_v47  ;;  %v3208_v60 = vpop.f32.mrb[85].mxu1  ;;  %v2770_v56 = vsel %vm328_vm3, %v3951_v4, %v3278_v54 }
 0xa6f   :  { %v2493_v51 = vpop.f32.mrb[86].mxu1 }
 0xa70   :  { %3281 = vrot.lane.b32.xlu0 %v3280_v53, %s3412_s30  ;;  %v3209_v3 = vpop.f32.mrb[87].mxu1  ;;  %v2771_v53 = vsel %vm328_vm3, %v3945_v40, %v3279_v50 }
 0xaa2   :  { %v2538_v58 = vpop.f32.mrb[88].mxu0 }
 0xaa3   :  { %v2586_v49 = vpop.f32.mrb[88].mxu1  ;;  %v3214_v63 = vpop.f32.mrb[89].mxu0 }
 0xaa4   :  { %v3285_v5 = vpack.i.bf16 %v2586_v49, %v2538_v58  ;;  %v3220_v8 = vpop.f32.mrb[89].mxu1  ;;  %v2541_v1 = vpop.f32.mrb[90].mxu0 }
 0xaa5   :  { %v2589_v7 = vpop.f32.mrb[90].mxu1  ;;  %v3215_v30 = vpop.f32.mrb[91].mxu0 }
 0xaa6   :  { %3286 = vrot.lane.b32.xlu1 %v3285_v5, %s3412_s30  ;;  %v3221_v48 = vpop.f32.mrb[91].mxu1 }
 0xaaa   :  { %v2634_v61 = vpop.f32.mrb[92].mxu0 }
 0xaab   :  { %v2682_v6 = vpop.f32.mrb[92].mxu1  ;;  %v3226_v11 = vpop.f32.mrb[93].mxu0 }
 0xaac   :  { %v3290_v12 = vpack.i.bf16 %v2682_v6, %v2634_v61  ;;  %v3232_v27 = vpop.f32.mrb[93].mxu1  ;;  %v2637_v16 = vpop.f32.mrb[94].mxu0 }
 0xaad   :  { %v2685_v22 = vpop.f32.mrb[94].mxu1  ;;  %v3227_v23 = vpop.f32.mrb[95].mxu0 }
 0xaae   :  { %v3233_v32 = vpop.f32.mrb[95].mxu1  ;;  %3291 = vrot.lane.b32.xlu0 %v3290_v12, %s3412_s30 }
 0xae2   :  { %v3282_v52 = vpop.permute.xlu0 %3281 }
 0xae3   :  { %v3284_v62 = vunpack.i.h.bf16 %v3282_v52  ;;  %v3283_v0 = vunpack.i.l.bf16 %v3282_v52 }
 0xae5   :  { %v2773_v10 = vsel %vm2772_vm4, %v2766_v2, %v3283_v0  ;;  %v2774_v13 = vsel %vm2772_vm4, %v2767_v9, %v3284_v62 }
 0xae6   :  { %v2779_v15 = vpack.c.bf16 %v2773_v10, %v2773_v10  ;;  %v2780_v18 = vpack.c.bf16 %v2774_v13, %v2774_v13 }
 0xae8   :  { %2786 = vst.msk [vmem:[%s4004_s1] sm:$0xf] %vm2785_vm5, %v2779_v15  ;;  %2787 = vst.msk [vmem:[%s4004_s1 + $0x4] sm:$0xf] %vm2785_vm5, %v2780_v18 }
 0xb18   :  { %v3287_v24 = vpop.permute.xlu1 %3286 }
 0xb19   :  { %v3289_v28 = vunpack.i.h.bf16 %v3287_v24  ;;  %v3288_v29 = vunpack.i.l.bf16 %v3287_v24 }
 0xb1b   :  { %v2775_v39 = vsel %vm2772_vm4, %v2768_v36, %v3288_v29  ;;  %v2776_v14 = vsel %vm2772_vm4, %v2769_v34, %v3289_v28 }
 0xb1c   :  { %v2781_v20 = vpack.c.bf16 %v2775_v39, %v2775_v39  ;;  %v2782_v47 = vpack.c.bf16 %v2776_v14, %v2776_v14 }
 0xb1e   :  { %2788 = vst.msk [vmem:[%s4004_s1 + $0x8] sm:$0xf] %vm2785_vm5, %v2781_v20  ;;  %2789 = vst.msk [vmem:[%s4004_s1 + $0xc] sm:$0xf] %vm2785_vm5, %v2782_v47 }
 0xb20   :  { %v3292_v41 = vpop.permute.xlu0 %3291 }
 0xb21   :  { %v3294_v45 = vunpack.i.h.bf16 %v3292_v41  ;;  %v3293_v55 = vunpack.i.l.bf16 %v3292_v41 }
 0xb23   :  { %v2777_v60 = vsel %vm2772_vm4, %v2770_v56, %v3293_v55  ;;  %v2778_v51 = vsel %vm2772_vm4, %v2771_v53, %v3294_v45 }
 0xb24   :  { %v2783_v3 = vpack.c.bf16 %v2777_v60, %v2777_v60  ;;  %v2784_v58 = vpack.c.bf16 %v2778_v51, %v2778_v51 }
 0xb26   :  { %2790 = vst.msk [vmem:[%s4004_s1 + $0x10] sm:$0xf] %vm2785_vm5, %v2783_v3  ;;  %2791 = vst.msk [vmem:[%s4004_s1 + $0x14] sm:$0xf] %vm2785_vm5, %v2784_v58 }

// kernel: separator_forward.22
= control target key start
LH: loop header
LB: loop body
LE: loop exit
PB: predicated region body
PF: predicated region fallthrough
CT: control target
= control target key end

     0   :  { %vm73_vm0 = vcmask 261120   ;;  %vm1554_vm1 = vcmask 130048   ;;  %s2564_s1 = inlined_call_operand.vmem [shape: bf16[9,16,32], index: 1, kind: input, shape index: {}]   ;;  %s2565_s0 = inlined_call_operand.vmem [shape: f32[1,176,32], index: 0, kind: input, shape index: {}]   ;;  %s2566_s2 = inlined_call_operand.vmem [shape: f32[1,16], index: 2, kind: input, shape index: {}]   ;;  %s2567_s3 = inlined_call_operand.vmem [shape: f32[1,128,16], index: 3, kind: output, shape index: {}]  }
   0x1   :  { %v2056_v0 = vld [vmem:[%s2564_s1 + $0x8] sm:$0xff]   ;;  %v2091_v1 = vld [vmem:[%s2564_s1 + $0x20] sm:$0xff]   ;;  %v42_v4 = vld [vmem:[%s2565_s0 + $0x10] sm:$0xff] }
   0x2   :  { %2046 = vmatprep.subr.msk.bf16.mxu1 %vm73_vm0, %v2056_v0  ;;  %v99_v2 = vsel %vm73_vm0, %v2056_v0, 0  ;;  %v41_v3 = vld [vmem:[%s2565_s0 + $0x8] sm:$0xff]  ;;  %v671_v5 = vld [vmem:[%s2565_s0 + $0x18] sm:$0xff]  ;;  %2050 = vmatprep.subr.msk.bf16.mxu0 %vm73_vm0, %v2091_v1  ;;  %v2108_v6 = vsel %vm73_vm0, %v2091_v1, 0  ;;  %v672_v8 = vld [vmem:[%s2565_s0 + $0x20] sm:$0xff] }
   0x3   :  { %1755 = vmatpush3.bf16.xpose.msra.mxu1 %v99_v2  ;;  %v57_v7 = vpack.c.bf16 %v42_v4, %v41_v3  ;;  %1827 = vmatpush3.bf16.xpose.msra.mxu0 %v2108_v6  ;;  %v687_v9 = vpack.c.bf16 %v672_v8, %v671_v5  ;;  %v2058_v10 = vld [vmem:[%s2564_s1] sm:$0xff]   ;;  %v673_v11 = vld [vmem:[%s2565_s0 + $0x28] sm:$0xff]  ;;  %v674_v12 = vld [vmem:[%s2565_s0 + $0x30] sm:$0xff] }
   0x4   :  { %v2059_v13 = vld [vmem:[%s2564_s1 + $0x28] sm:$0xff]   ;;  %2047 = vmatprep.subr.msk.bf16.mxu1 %vm73_vm0, %v2058_v10  ;;  %v675_v14 = vld [vmem:[%s2565_s0 + $0x38] sm:$0xff]  ;;  %v676_v15 = vld [vmem:[%s2565_s0 + $0x40] sm:$0xff]  ;;  %v2135_v16 = vpack.c.bf16 %v674_v12, %v673_v11  ;;  %v228_v17 = vsel %vm73_vm0, %v2058_v10, 0 }
   0x5   :  { %1756 = vmatprep.mubr.msk.bf16.mxu1 %vm73_vm0, %v57_v7  ;;  %1828 = vmatprep.mubr.msk.bf16.mxu0 %vm73_vm0, %v687_v9  ;;  %v900_v18 = vsel %vm73_vm0, %v2059_v13, 0  ;;  %v2140_v19 = vpack.c.bf16 %v676_v15, %v675_v14  ;;  %v2060_v20 = vld [vmem:[%s2564_s1 + $0x30] sm:$0xff]   ;;  %v677_v21 = vld [vmem:[%s2565_s0 + $0x48] sm:$0xff]  ;;  %v843_v23 = vld [vmem:[%s2565_s0 + $0x19] sm:$0xff] }
   0x6   :  { %2052 = vmatprep.subr.msk.bf16.mxu0 %vm73_vm0, %v2059_v13  ;;  %v678_v22 = vld [vmem:[%s2565_s0 + $0x50] sm:$0xff]  ;;  %v844_v24 = vld [vmem:[%s2565_s0 + $0x21] sm:$0xff]  ;;  %v51_v28 = vld [vmem:[%s2565_s0 + $0x58] sm:$0xff]  ;;  %v1072_v40 = vsel %vm73_vm0, %v2060_v20, 0 }
   0x7   :  { %v2165_v25 = vpack.c.bf16 %v678_v22, %v677_v21  ;;  %v2061_v26 = vld [vmem:[%s2564_s1 + $0x10] sm:$0xff]   ;;  %v2170_v27 = vpack.c.bf16 %v844_v24, %v843_v23  ;;  %v52_v29 = vld [vmem:[%s2565_s0 + $0x60] sm:$0xff]  ;;  %v53_v32 = vld [vmem:[%s2565_s0 + $0x68] sm:$0xff] }
   0x8   :  { %v845_v30 = vld [vmem:[%s2565_s0 + $0x29] sm:$0xff]  ;;  %v846_v31 = vld [vmem:[%s2565_s0 + $0x31] sm:$0xff]  ;;  %v847_v34 = vld [vmem:[%s2565_s0 + $0x39] sm:$0xff]  ;;  %v2205_v36 = vpack.c.bf16 %v52_v29, %v51_v28  ;;  %v384_v0 = vsel %vm73_vm0, %v2061_v26, 0 }
   0x9   :  { %v54_v33 = vld [vmem:[%s2565_s0 + $0x70] sm:$0xff]  ;;  %v848_v35 = vld [vmem:[%s2565_s0 + $0x41] sm:$0xff]  ;;  %v2207_v37 = vpack.c.bf16 %v846_v31, %v845_v30  ;;  %v2062_v41 = vld [vmem:[%s2564_s1 + $0x38] sm:$0xff]  }
   0xa   :  { %1757 = vmatmul.mubr.msk.bf16.vlgmr.msra.gmra.mrb[0].mxu1 %vm73_vm0, %v687_v9  ;;  %1829 = vmatmul.mubr.msk.bf16.vlgmr.msra.gmra.mrb[0].mxu0 %vm73_vm0, %v2135_v16  ;;  %v2209_v38 = vpack.c.bf16 %v54_v33, %v53_v32  ;;  %v2211_v39 = vpack.c.bf16 %v848_v35, %v847_v34  ;;  %v55_v42 = vld [vmem:[%s2565_s0 + $0x78] sm:$0xff]  ;;  %v56_v43 = vld [vmem:[%s2565_s0 + $0x80] sm:$0xff]  ;;  %v849_v44 = vld [vmem:[%s2565_s0 + $0x49] sm:$0xff]  ;;  %v1244_v23 = vsel %vm73_vm0, %v2062_v41, 0 }
   0xb   :  { %1773 = vmatpush3.bf16.xpose.msra.mxu1 %v228_v17  ;;  %1845 = vmatpush3.bf16.xpose.msra.mxu0 %v900_v18  ;;  %v850_v45 = vld [vmem:[%s2565_s0 + $0x51] sm:$0xff]  ;;  %v15_v46 = vld [vmem:[%s2565_s0 + $0x7] sm:$0xff]  ;;  %v851_v48 = vld [vmem:[%s2565_s0 + $0x59] sm:$0xff]  ;;  %v2250_v50 = vpack.c.bf16 %v56_v43, %v55_v42 }
   0xc   :  { %1760 = vmatprep.mubr.msk.bf16.mxu1 %vm73_vm0, %v2135_v16  ;;  %1832 = vmatprep.mubr.msk.bf16.mxu0 %vm73_vm0, %v2140_v19  ;;  %v16_v47 = vld [vmem:[%s2565_s0 + $0xf] sm:$0xff]  ;;  %v852_v49 = vld [vmem:[%s2565_s0 + $0x61] sm:$0xff]  ;;  %v2252_v51 = vpack.c.bf16 %v850_v45, %v849_v44  ;;  %v17_v54 = vld [vmem:[%s2565_s0 + $0x17] sm:$0xff] }
   0xd   :  { %2053 = vmatprep.subr.msk.bf16.mxu0 %vm73_vm0, %v2060_v20  ;;  %2048 = vmatprep.subr.msk.bf16.mxu1 %vm73_vm0, %v2061_v26  ;;  %v31_v52 = vpack.c.bf16 %v16_v47, %v15_v46  ;;  %v2254_v53 = vpack.c.bf16 %v852_v49, %v851_v48  ;;  %v18_v55 = vld [vmem:[%s2565_s0 + $0x1f] sm:$0xff]  ;;  %v853_v56 = vld [vmem:[%s2565_s0 + $0x69] sm:$0xff]  ;;  %v854_v57 = vld [vmem:[%s2565_s0 + $0x71] sm:$0xff] }
   0xe   :  { %v19_v58 = vld [vmem:[%s2565_s0 + $0x27] sm:$0xff]  ;;  %v20_v59 = vld [vmem:[%s2565_s0 + $0x2f] sm:$0xff]  ;;  %v855_v60 = vld [vmem:[%s2565_s0 + $0x79] sm:$0xff]  ;;  %v2287_v62 = vpack.c.bf16 %v18_v55, %v17_v54  ;;  %v2289_v63 = vpack.c.bf16 %v854_v57, %v853_v56 }
   0xf   :  { %v856_v61 = vld [vmem:[%s2565_s0 + $0x81] sm:$0xff]  ;;  %v2292_v2 = vpack.c.bf16 %v20_v59, %v19_v58  ;;  %v2063_v4 = vld [vmem:[%s2564_s1 + $0x18] sm:$0xff]   ;;  %v857_v8 = vld [vmem:[%s2565_s0 + $0x89] sm:$0xff] }
  0x10   :  { %v2294_v3 = vpack.c.bf16 %v856_v61, %v855_v60  ;;  %v21_v5 = vld [vmem:[%s2565_s0 + $0x37] sm:$0xff]  ;;  %v22_v7 = vld [vmem:[%s2565_s0 + $0x3f] sm:$0xff]  ;;  %v23_v10 = vld [vmem:[%s2565_s0 + $0x47] sm:$0xff]  ;;  %v556_v35 = vsel %vm73_vm0, %v2063_v4, 0 }
  0x11   :  { %v858_v9 = vld [vmem:[%s2565_s0 + $0x91] sm:$0xff]  ;;  %v2326_v12 = vpack.c.bf16 %v22_v7, %v21_v5  ;;  %v26_v17 = vld [vmem:[%s2565_s0 + $0x5f] sm:$0xff]  ;;  %v27_v18 = vld [vmem:[%s2565_s0 + $0x67] sm:$0xff] }
  0x12   :  { %1761 = vmatmul.mubr.msk.bf16.gmra.mrb[4].mxu1 %vm73_vm0, %v2140_v19  ;;  %1833 = vmatmul.mubr.msk.bf16.gmra.mrb[4].mxu0 %vm73_vm0, %v2165_v25  ;;  %v24_v11 = vld [vmem:[%s2565_s0 + $0x4f] sm:$0xff]  ;;  %v2328_v13 = vpack.c.bf16 %v858_v9, %v857_v8  ;;  %v25_v15 = vld [vmem:[%s2565_s0 + $0x57] sm:$0xff]  ;;  %v2064_v24 = vld [vmem:[%s2564_s1 + $0x40] sm:$0xff]  }
  0x13   :  { %1764 = vmatprep.mubr.msk.bf16.mxu1 %vm73_vm0, %v2165_v25  ;;  %1846 = vmatprep.mubr.msk.bf16.mxu0 %vm73_vm0, %v2170_v27  ;;  %v2330_v14 = vpack.c.bf16 %v24_v11, %v23_v10  ;;  %v28_v20 = vld [vmem:[%s2565_s0 + $0x6f] sm:$0xff]  ;;  %v36_v21 = vpack.c.bf16 %v26_v17, %v25_v15  ;;  %v29_v26 = vld [vmem:[%s2565_s0 + $0x77] sm:$0xff]  ;;  %v30_v28 = vld [vmem:[%s2565_s0 + $0x7f] sm:$0xff]  ;;  %v1416_v43 = vsel %vm73_vm0, %v2064_v24, 0 }
  0x14   :  { %v37_v22 = vpack.c.bf16 %v28_v20, %v27_v18  ;;  %v327_v29 = vld [vmem:[%s2565_s0 + $0x9] sm:$0xff]  ;;  %v328_v30 = vld [vmem:[%s2565_s0 + $0x11] sm:$0xff]  ;;  %v38_v31 = vpack.c.bf16 %v30_v28, %v29_v26  ;;  %v1030_v42 = vld [vmem:[%s2565_s0 + $0x9f] sm:$0xff] }
  0x15   :  { %v343_v32 = vpack.c.bf16 %v328_v30, %v327_v29  ;;  %v1027_v33 = vld [vmem:[%s2565_s0 + $0x87] sm:$0xff]  ;;  %v1028_v34 = vld [vmem:[%s2565_s0 + $0x8f] sm:$0xff] }
  0x16   :  { %v1202_v44 = vld [vmem:[%s2565_s0 + $0xa0] sm:$0xff] }
  0x1a   :  { %1765 = vmatmul.mubr.msk.bf16.gmra.mrb[8].mxu1 %vm73_vm0, %v2205_v36  ;;  %1847 = vmatmul.mubr.msk.bf16.vlgmr.msra.gmra.mrb[0].mxu0 %vm73_vm0, %v2207_v37 }
  0x1b   :  { %1768 = vmatprep.mubr.msk.bf16.mxu1 %vm73_vm0, %v2209_v38  ;;  %1863 = vmatpush3.bf16.xpose.msra.mxu0 %v1072_v40  ;;  %v1037_v40 = vpack.c.bf16 %v1028_v34, %v1027_v33 }
  0x1c   :  { %1850 = vmatprep.mubr.msk.bf16.mxu0 %vm73_vm0, %v2211_v39  ;;  %2054 = vmatprep.subr.msk.bf16.mxu0 %vm73_vm0, %v2062_v41  ;;  %v1029_v41 = vld [vmem:[%s2565_s0 + $0x97] sm:$0xff] }
  0x22   :  { %1769 = vmatmul.mubr.msk.bf16.gmra.mrb[12].mxu1 %vm73_vm0, %v2250_v50  ;;  %1851 = vmatmul.mubr.msk.bf16.gmra.mrb[4].mxu0 %vm73_vm0, %v2252_v51 }
  0x23   :  { %1774 = vmatprep.mubr.msk.bf16.mxu1 %vm73_vm0, %v31_v52  ;;  %1854 = vmatprep.mubr.msk.bf16.mxu0 %vm73_vm0, %v2254_v53 }
  0x2a   :  { %1775 = vmatmul.mubr.msk.bf16.vlgmr.msra.gmra.mrb[0].mxu1 %vm73_vm0, %v2287_v62  ;;  %1855 = vmatmul.mubr.msk.bf16.gmra.mrb[8].mxu0 %vm73_vm0, %v2289_v63 }
  0x2b   :  { %1791 = vmatpush3.bf16.xpose.msra.mxu1 %v384_v0  ;;  %1778 = vmatprep.mubr.msk.bf16.mxu1 %vm73_vm0, %v2292_v2 }
  0x2c   :  { %1858 = vmatprep.mubr.msk.bf16.mxu0 %vm73_vm0, %v2294_v3  ;;  %2049 = vmatprep.subr.msk.bf16.mxu1 %vm73_vm0, %v2063_v4 }
  0x32   :  { %1779 = vmatmul.mubr.msk.bf16.gmra.mrb[4].mxu1 %vm73_vm0, %v2326_v12  ;;  %1859 = vmatmul.mubr.msk.bf16.gmra.mrb[12].mxu0 %vm73_vm0, %v2328_v13 }
  0x33   :  { %1782 = vmatprep.mubr.msk.bf16.mxu1 %vm73_vm0, %v2330_v14  ;;  %1864 = vmatprep.mubr.msk.bf16.mxu0 %vm73_vm0, %v2292_v2 }
  0x3a   :  { %1783 = vmatmul.mubr.msk.bf16.gmra.mrb[8].mxu1 %vm73_vm0, %v36_v21  ;;  %1865 = vmatmul.mubr.msk.bf16.vlgmr.msra.gmra.mrb[0].mxu0 %vm73_vm0, %v2326_v12 }
  0x3b   :  { %1786 = vmatprep.mubr.msk.bf16.mxu1 %vm73_vm0, %v37_v22  ;;  %1881 = vmatpush3.bf16.xpose.msra.mxu0 %v1244_v23 }
  0x3c   :  { %1868 = vmatprep.mubr.msk.bf16.mxu0 %vm73_vm0, %v2330_v14  ;;  %2055 = vmatprep.subr.msk.bf16.mxu0 %vm73_vm0, %v2064_v24 }
  0x42   :  { %1787 = vmatmul.mubr.msk.bf16.gmra.mrb[12].mxu1 %vm73_vm0, %v38_v31  ;;  %1869 = vmatmul.mubr.msk.bf16.gmra.mrb[4].mxu0 %vm73_vm0, %v36_v21 }
  0x43   :  { %1792 = vmatprep.mubr.msk.bf16.mxu1 %vm73_vm0, %v343_v32  ;;  %1872 = vmatprep.mubr.msk.bf16.mxu0 %vm73_vm0, %v37_v22 }
  0x4a   :  { %1793 = vmatmul.mubr.msk.bf16.vlgmr.msra.gmra.mrb[0].mxu1 %vm73_vm0, %v2170_v27  ;;  %1873 = vmatmul.mubr.msk.bf16.gmra.mrb[8].mxu0 %vm73_vm0, %v38_v31  ;;  %v1038_v27 = vpack.c.bf16 %v1030_v42, %v1029_v41 }
  0x4b   :  { %1809 = vmatpush3.bf16.xpose.msra.mxu1 %v556_v35  ;;  %1796 = vmatprep.mubr.msk.bf16.mxu1 %vm73_vm0, %v2207_v37 }
  0x4c   :  { %1876 = vmatprep.mubr.msk.bf16.mxu0 %vm73_vm0, %v1037_v40  ;;  %2051 = vmatprep.subr.msk.bf16.mxu1 %vm73_vm0, %v2091_v1  ;;  %v1199_v1 = vld [vmem:[%s2565_s0 + $0x88] sm:$0xff] }
  0x52   :  { %1797 = vmatmul.mubr.msk.bf16.gmra.mrb[4].mxu1 %vm73_vm0, %v2211_v39  ;;  %1877 = vmatmul.mubr.msk.bf16.gmra.mrb[12].mxu0 %vm73_vm0, %v1038_v27 }
  0x53   :  { %1800 = vmatprep.mubr.msk.bf16.mxu1 %vm73_vm0, %v2252_v51  ;;  %1882 = vmatprep.mubr.msk.bf16.mxu0 %vm73_vm0, %v2135_v16  ;;  %v1200_v16 = vld [vmem:[%s2565_s0 + $0x90] sm:$0xff] }
  0x5a   :  { %1801 = vmatmul.mubr.msk.bf16.gmra.mrb[8].mxu1 %vm73_vm0, %v2254_v53  ;;  %1883 = vmatmul.mubr.msk.bf16.vlgmr.msra.gmra.mrb[0].mxu0 %vm73_vm0, %v2140_v19  ;;  %v1209_v19 = vpack.c.bf16 %v1200_v16, %v1199_v1 }
  0x5b   :  { %1804 = vmatprep.mubr.msk.bf16.mxu1 %vm73_vm0, %v2289_v63  ;;  %1899 = vmatpush3.bf16.xpose.msra.mxu0 %v1416_v43 }
  0x5c   :  { %1886 = vmatprep.mubr.msk.bf16.mxu0 %vm73_vm0, %v2165_v25  ;;  %v1201_v25 = vld [vmem:[%s2565_s0 + $0x98] sm:$0xff] }
  0x5d   :  { %v1210_v45 = vpack.c.bf16 %v1202_v44, %v1201_v25 }
  0x62   :  { %1805 = vmatmul.mubr.msk.bf16.gmra.mrb[12].mxu1 %vm73_vm0, %v2294_v3  ;;  %1887 = vmatmul.mubr.msk.bf16.gmra.mrb[4].mxu0 %vm73_vm0, %v2205_v36 }
  0x63   :  { %1810 = vmatprep.mubr.msk.bf16.mxu1 %vm73_vm0, %v2287_v62  ;;  %1890 = vmatprep.mubr.msk.bf16.mxu0 %vm73_vm0, %v2209_v38 }
  0x6a   :  { %1811 = vmatmul.mubr.msk.bf16.vlgmr.msra.gmra.mrb[0].mxu1 %vm73_vm0, %v2292_v2  ;;  %1891 = vmatmul.mubr.msk.bf16.gmra.mrb[8].mxu0 %vm73_vm0, %v2250_v50 }
  0x6b   :  { %1917 = vmatpush3.bf16.xpose.msra.mxu1 %v2108_v6  ;;  %1814 = vmatprep.mubr.msk.bf16.mxu1 %vm73_vm0, %v2326_v12  ;;  %v1373_v6 = vld [vmem:[%s2565_s0 + $0x99] sm:$0xff] }
  0x6c   :  { %1894 = vmatprep.mubr.msk.bf16.mxu0 %vm73_vm0, %v1209_v19 }
  0x72   :  { %1815 = vmatmul.mubr.msk.bf16.gmra.mrb[4].mxu1 %vm73_vm0, %v2330_v14  ;;  %1895 = vmatmul.mubr.msk.bf16.gmra.mrb[12].mxu0 %vm73_vm0, %v1210_v45 }
  0x73   :  { %1818 = vmatprep.mubr.msk.bf16.mxu1 %vm73_vm0, %v36_v21  ;;  %1900 = vmatprep.mubr.msk.bf16.mxu0 %vm73_vm0, %v2207_v37 }
  0x7a   :  { %1819 = vmatmul.mubr.msk.bf16.gmra.mrb[8].mxu1 %vm73_vm0, %v37_v22  ;;  %1901 = vmatmul.mubr.msk.bf16.vlgmr.msra.gmra.mrb[0].mxu0 %vm73_vm0, %v2211_v39 }
  0x7b   :  { %1822 = vmatprep.mubr.msk.bf16.mxu1 %vm73_vm0, %v38_v31  ;;  %1904 = vmatprep.mubr.msk.bf16.mxu0 %vm73_vm0, %v2252_v51 }
  0x82   :  { %1823 = vmatmul.mubr.msk.bf16.gmra.mrb[12].mxu1 %vm73_vm0, %v1037_v40  ;;  %1905 = vmatmul.mubr.msk.bf16.gmra.mrb[4].mxu0 %vm73_vm0, %v2254_v53  ;;  %v2482_v53 = vld [vmem:[%s2566_s2] ss:$0 sm:$0xff] }
  0x83   :  { %1836 = vmatprep.mubr.msk.bf16.mxu1 %vm73_vm0, %v2205_v36  ;;  %1908 = vmatprep.mubr.msk.bf16.mxu0 %vm73_vm0, %v2289_v63  ;;  %v1374_v36 = vld [vmem:[%s2565_s0 + $0xa1] sm:$0xff] }
  0x84   :  { %v1382_v37 = vpack.c.bf16 %v1374_v36, %v1373_v6 }
  0x8a   :  { %1837 = vmatmul.mubr.msk.bf16.vlgmr.msra.gmra.mrb[8].mxu1 %vm73_vm0, %v2209_v38  ;;  %1909 = vmatmul.mubr.msk.bf16.gmra.mrb[8].mxu0 %vm73_vm0, %v2294_v3 }
  0x8b   :  { %1840 = vmatprep.mubr.msk.bf16.mxu1 %vm73_vm0, %v2250_v50  ;;  %1912 = vmatprep.mubr.msk.bf16.mxu0 %vm73_vm0, %v2328_v13 }
  0x92   :  { %1841 = vmatmul.mubr.msk.bf16.gmra.mrb[12].mxu1 %vm73_vm0, %v1209_v19  ;;  %1913 = vmatmul.mubr.msk.bf16.gmra.mrb[12].mxu0 %vm73_vm0, %v1382_v37 }
 0x13d   :  { %v1812_v38 = vpop.f32.mrb[0].mxu1 }
 0x13e   :  { %v592_v39 = vpop.f32.mrb[1].mxu1 }
 0x13f   :  { %v1813_v46 = vpop.f32.mrb[2].mxu1 }
 0x140   :  { %v595_v47 = vpop.f32.mrb[3].mxu1 }
 0x145   :  { %v1816_v48 = vpop.f32.mrb[4].mxu1 }
 0x146   :  { %v608_v49 = vpop.f32.mrb[5].mxu1 }
 0x147   :  { %v1817_v50 = vpop.f32.mrb[6].mxu1 }
 0x148   :  { %v611_v51 = vpop.f32.mrb[7].mxu1 }
 0x14d   :  { %v1902_v52 = vpop.f32.mrb[0].mxu0 }
 0x14e   :  { %v1918_v54 = vadd.f32 %v1902_v52, %v1812_v38  ;;  %v1452_v55 = vpop.f32.mrb[1].mxu0 }
 0x14f   :  { %v1919_v56 = vadd.f32 %v1452_v55, %v592_v39  ;;  %v1903_v57 = vpop.f32.mrb[2].mxu0 }
 0x150   :  { %v1540_v58 = vadd.f32 %v1918_v54, %v2482_v53  ;;  %v1920_v59 = vadd.f32 %v1903_v57, %v1813_v46  ;;  %v1455_v60 = vpop.f32.mrb[3].mxu0 }
 0x151   :  { %v1538_v61 = vadd.f32 %v1919_v56, %v2482_v53  ;;  %v1921_v62 = vadd.f32 %v1455_v60, %v595_v47 }
 0x152   :  { %1557 = vst.msk [vmem:[%s2567_s3 + $0x10] sm:$0xff] %vm1554_vm1, %v1540_v58  ;;  %v1541_v63 = vadd.f32 %v1920_v59, %v2482_v53 }
 0x153   :  { %1555 = vst.msk [vmem:[%s2567_s3] sm:$0xff] %vm1554_vm1, %v1538_v61  ;;  %v1539_v0 = vadd.f32 %v1921_v62, %v2482_v53 }
 0x154   :  { %1558 = vst.msk [vmem:[%s2567_s3 + $0x18] sm:$0xff] %vm1554_vm1, %v1541_v63 }
 0x155   :  { %1556 = vst.msk [vmem:[%s2567_s3 + $0x8] sm:$0xff] %vm1554_vm1, %v1539_v0  ;;  %v1906_v2 = vpop.f32.mrb[4].mxu0 }
 0x156   :  { %v1922_v3 = vadd.f32 %v1906_v2, %v1816_v48  ;;  %v1468_v4 = vpop.f32.mrb[5].mxu0 }
 0x157   :  { %v1923_v5 = vadd.f32 %v1468_v4, %v608_v49  ;;  %v1907_v7 = vpop.f32.mrb[6].mxu0 }
 0x158   :  { %v1544_v8 = vadd.f32 %v1922_v3, %v2482_v53  ;;  %v1924_v9 = vadd.f32 %v1907_v7, %v1817_v50  ;;  %v1471_v10 = vpop.f32.mrb[7].mxu0 }
 0x159   :  { %v1542_v11 = vadd.f32 %v1923_v5, %v2482_v53  ;;  %v1925_v12 = vadd.f32 %v1471_v10, %v611_v51 }
 0x15a   :  { %1561 = vst.msk [vmem:[%s2567_s3 + $0x30] sm:$0xff] %vm1554_vm1, %v1544_v8  ;;  %v1545_v13 = vadd.f32 %v1924_v9, %v2482_v53 }
 0x15b   :  { %1559 = vst.msk [vmem:[%s2567_s3 + $0x20] sm:$0xff] %vm1554_vm1, %v1542_v11  ;;  %v1543_v14 = vadd.f32 %v1925_v12, %v2482_v53 }
 0x15c   :  { %1562 = vst.msk [vmem:[%s2567_s3 + $0x38] sm:$0xff] %vm1554_vm1, %v1545_v13 }
 0x15d   :  { %v1838_v15 = vpop.f32.mrb[8].mxu1  ;;  %1560 = vst.msk [vmem:[%s2567_s3 + $0x28] sm:$0xff] %vm1554_vm1, %v1543_v14  ;;  %v1910_v17 = vpop.f32.mrb[8].mxu0 }
 0x15e   :  { %v796_v18 = vpop.f32.mrb[9].mxu1  ;;  %v1926_v20 = vadd.f32 %v1910_v17, %v1838_v15  ;;  %v1484_v21 = vpop.f32.mrb[9].mxu0 }
 0x15f   :  { %v1839_v22 = vpop.f32.mrb[10].mxu1  ;;  %v1927_v23 = vadd.f32 %v1484_v21, %v796_v18  ;;  %v1911_v24 = vpop.f32.mrb[10].mxu0 }
 0x160   :  { %v799_v26 = vpop.f32.mrb[11].mxu1  ;;  %v1548_v28 = vadd.f32 %v1926_v20, %v2482_v53  ;;  %v1928_v29 = vadd.f32 %v1911_v24, %v1839_v22  ;;  %v1487_v30 = vpop.f32.mrb[11].mxu0 }
 0x161   :  { %v1546_v31 = vadd.f32 %v1927_v23, %v2482_v53  ;;  %v1929_v32 = vadd.f32 %v1487_v30, %v799_v26 }
 0x162   :  { %1565 = vst.msk [vmem:[%s2567_s3 + $0x50] sm:$0xff] %vm1554_vm1, %v1548_v28  ;;  %v1549_v33 = vadd.f32 %v1928_v29, %v2482_v53 }
 0x163   :  { %1563 = vst.msk [vmem:[%s2567_s3 + $0x40] sm:$0xff] %vm1554_vm1, %v1546_v31  ;;  %v1547_v34 = vadd.f32 %v1929_v32, %v2482_v53 }
 0x164   :  { %1566 = vst.msk [vmem:[%s2567_s3 + $0x58] sm:$0xff] %vm1554_vm1, %v1549_v33 }
 0x165   :  { %v1842_v35 = vpop.f32.mrb[12].mxu1  ;;  %1564 = vst.msk [vmem:[%s2567_s3 + $0x48] sm:$0xff] %vm1554_vm1, %v1547_v34  ;;  %v1914_v40 = vpop.f32.mrb[12].mxu0 }
 0x166   :  { %v812_v41 = vpop.f32.mrb[13].mxu1  ;;  %v1930_v42 = vadd.f32 %v1914_v40, %v1842_v35  ;;  %v1500_v27 = vpop.f32.mrb[13].mxu0 }
 0x167   :  { %v1843_v43 = vpop.f32.mrb[14].mxu1  ;;  %v1931_v1 = vadd.f32 %v1500_v27, %v812_v41  ;;  %v1915_v16 = vpop.f32.mrb[14].mxu0 }
 0x168   :  { %v815_v19 = vpop.f32.mrb[15].mxu1  ;;  %v1552_v25 = vadd.f32 %v1930_v42, %v2482_v53  ;;  %v1932_v44 = vadd.f32 %v1915_v16, %v1843_v43  ;;  %v1503_v45 = vpop.f32.mrb[15].mxu0 }
 0x169   :  { %v1550_v6 = vadd.f32 %v1931_v1, %v2482_v53  ;;  %v1933_v36 = vadd.f32 %v1503_v45, %v815_v19 }
 0x16a   :  { %1569 = vst.msk [vmem:[%s2567_s3 + $0x70] sm:$0xff] %vm1554_vm1, %v1552_v25  ;;  %v1553_v37 = vadd.f32 %v1932_v44, %v2482_v53 }
 0x16b   :  { %1567 = vst.msk [vmem:[%s2567_s3 + $0x60] sm:$0xff] %vm1554_vm1, %v1550_v6  ;;  %v1551_v38 = vadd.f32 %v1933_v36, %v2482_v53 }
 0x16c   :  { %1570 = vst.msk [vmem:[%s2567_s3 + $0x78] sm:$0xff] %vm1554_vm1, %v1553_v37 }
 0x16d   :  { %1568 = vst.msk [vmem:[%s2567_s3 + $0x68] sm:$0xff] %vm1554_vm1, %v1551_v38 }

// kernel: separator_forward.28
= control target key start
LH: loop header
LB: loop body
LE: loop exit
PB: predicated region body
PF: predicated region fallthrough
CT: control target
= control target key end

     0   :  { %v278_v0 = vmov 0   ;;  %v279_v2 = vmov 0.0   ;;  %vm280_vm0 = vmmov 0   ;;  %s404_s5 = inlined_call_operand.<no memory space> [shape: f32[1,1], index: 5, kind: input, shape index: {}]   ;;  %s405_s3 = inlined_call_operand.vmem [shape: f32[1,128], index: 3, kind: input, shape index: {}, may-alias: {3,4}]   ;;  %s406_s4 = inlined_call_operand.vmem [shape: f32[1,128], index: 4, kind: input, shape index: {}, may-alias: {3,4}]   ;;  %s407_s1 = inlined_call_operand.vmem [shape: bf16[128,128], index: 1, kind: input, shape index: {}]   ;;  %s408_s0 = inlined_call_operand.vmem [shape: f32[48,128], index: 0, kind: input, shape index: {}]   ;;  %s409_s2 = inlined_call_operand.vmem [shape: f32[1,128], index: 2, kind: input, shape index: {}]   ;;  %s410_s6 = inlined_call_operand.vmem [shape: f32[48,128], index: 6, kind: output, shape index: {}]  }
   0x1   :  { %269 = vset.pattern.permute.xlu0 %v278_v0  ;;  %v11_v1 = vstv %s404_s5  ;;  %222 = vmatprep.subr.bf16.mxu0 %v279_v2  ;;  %v270_v3 = vld [vmem:[%s407_s1] sm:$0xff]   ;;  %v271_v4 = vld [vmem:[%s407_s1 + $0x8] sm:$0xff]   ;;  %v272_v6 = vld [vmem:[%s407_s1 + $0x10] sm:$0xff]  }
   0x2   :  { %12 = vst [vmem:[#allocation2] sm:$0x1] %v11_v1  ;;  %250 = vmatprep.subr.bf16.mxu1 %v279_v2  ;;  %223 = vmatpush3.bf16.xpose.msra.mxu0 %v270_v3  ;;  %v273_v7 = vld [vmem:[%s407_s1 + $0x18] sm:$0xff]   ;;  %v274_v8 = vld [vmem:[%s407_s1 + $0x20] sm:$0xff]   ;;  %v275_v9 = vld [vmem:[%s407_s1 + $0x28] sm:$0xff]  }
   0x3   :  { %258 = vmatpush3.bf16.xpose.msra.mxu1 %v270_v3  ;;  %224 = vmatprep.subr.bf16.mxu0 %v279_v2  ;;  %v276_v10 = vld [vmem:[%s407_s1 + $0x30] sm:$0xff]   ;;  %v277_v11 = vld [vmem:[%s407_s1 + $0x38] sm:$0xff]   ;;  %v26_v12 = vld [vmem:[%s408_s0] sm:$0xff] }
   0x4   :  { %251 = vmatprep.subr.bf16.mxu1 %v279_v2  ;;  %238 = vmatprep.mubr.msk.bf16.mxu0 %vm280_vm0, %v279_v2  ;;  %v27_v13 = vld [vmem:[%s408_s0 + $0x8] sm:$0xff]  ;;  %v28_v14 = vld [vmem:[%s408_s0 + $0x10] sm:$0xff]  ;;  %v29_v15 = vld [vmem:[%s408_s0 + $0x18] sm:$0xff]  ;;  %vm32_vm1 = vcmp.ge.f32.partialorder %v26_v12, 0.0 }
   0x5   :  { %242 = vmatprep.mubr.msk.bf16.mxu1 %vm280_vm0, %v279_v2  ;;  %vm33_vm2 = vcmp.ge.f32.partialorder %v27_v13, 0.0  ;;  %vm34_vm3 = vcmp.ge.f32.partialorder %v28_v14, 0.0  ;;  %vm35_vm4 = vcmp.ge.f32.partialorder %v29_v15, 0.0  ;;  %v30_v21 = vld [vmem:[%s408_s0 + $0x20] sm:$0xff]  ;;  %v31_v22 = vld [vmem:[%s408_s0 + $0x28] sm:$0xff] }
   0x6   :  { %vm36_vm5 = vcmp.ge.f32.partialorder %v30_v21, 0.0  ;;  %vm37_vm6 = vcmp.ge.f32.partialorder %v31_v22, 0.0  ;;  %v202_v34 = vld [vmem:[%s409_s2] ss:$0 sm:$0xff] }
   0x9   :  { %v201_v5 = vld [vmem:[#allocation2] ss:$0 sm:$0xff] }
   0xa   :  { %45 = vperm.xlu0 %269, %v201_v5   ;;  %225 = vmatpush3.bf16.xpose.msra.mxu0 %v271_v4 }
   0xb   :  { %259 = vmatpush3.bf16.xpose.msra.mxu1 %v271_v4  ;;  %226 = vmatprep.subr.bf16.mxu0 %v279_v2 }
   0xc   :  { %252 = vmatprep.subr.bf16.mxu1 %v279_v2 }
  0x12   :  { %227 = vmatpush3.bf16.xpose.msra.mxu0 %v272_v6 }
  0x13   :  { %260 = vmatpush3.bf16.xpose.msra.mxu1 %v272_v6  ;;  %228 = vmatprep.subr.bf16.mxu0 %v279_v2 }
  0x14   :  { %253 = vmatprep.subr.bf16.mxu1 %v279_v2 }
  0x1a   :  { %229 = vmatpush3.bf16.xpose.msra.mxu0 %v273_v7 }
  0x1b   :  { %261 = vmatpush3.bf16.xpose.msra.mxu1 %v273_v7  ;;  %230 = vmatprep.subr.bf16.mxu0 %v279_v2 }
  0x1c   :  { %254 = vmatprep.subr.bf16.mxu1 %v279_v2 }
  0x22   :  { %231 = vmatpush3.bf16.xpose.msra.mxu0 %v274_v8 }
  0x23   :  { %262 = vmatpush3.bf16.xpose.msra.mxu1 %v274_v8  ;;  %232 = vmatprep.subr.bf16.mxu0 %v279_v2 }
  0x24   :  { %255 = vmatprep.subr.bf16.mxu1 %v279_v2 }
  0x2a   :  { %233 = vmatpush3.bf16.xpose.msra.mxu0 %v275_v9 }
  0x2b   :  { %263 = vmatpush3.bf16.xpose.msra.mxu1 %v275_v9  ;;  %234 = vmatprep.subr.bf16.mxu0 %v279_v2 }
  0x2c   :  { %256 = vmatprep.subr.bf16.mxu1 %v279_v2 }
  0x32   :  { %235 = vmatpush3.bf16.xpose.msra.mxu0 %v276_v10 }
  0x33   :  { %264 = vmatpush3.bf16.xpose.msra.mxu1 %v276_v10  ;;  %236 = vmatprep.subr.bf16.mxu0 %v279_v2 }
  0x34   :  { %257 = vmatprep.subr.bf16.mxu1 %v279_v2 }
  0x3a   :  { %237 = vmatpush3.bf16.xpose.msra.mxu0 %v277_v11 }
  0x3b   :  { %265 = vmatpush3.bf16.xpose.msra.mxu1 %v277_v11 }
  0x89   :  { %v46_v16 = vpop.permute.xlu0 %45 }
  0x8a   :  { %v48_v17 = vmul.f32 %v46_v16, %v26_v12  ;;  %v49_v18 = vmul.f32 %v46_v16, %v27_v13  ;;  %v50_v19 = vmul.f32 %v46_v16, %v28_v14  ;;  %v51_v20 = vmul.f32 %v46_v16, %v29_v15 }
  0x8b   :  { %v52_v29 = vmul.f32 %v46_v16, %v30_v21  ;;  %v53_v30 = vmul.f32 %v46_v16, %v31_v22 }
  0x8c   :  { %v54_v23 = vsel %vm32_vm1, %v26_v12, %v48_v17  ;;  %v55_v24 = vsel %vm33_vm2, %v27_v13, %v49_v18  ;;  %v56_v25 = vsel %vm34_vm3, %v28_v14, %v50_v19  ;;  %v57_v26 = vsel %vm35_vm4, %v29_v15, %v51_v20 }
  0x8d   :  { %v60_v27 = vpack.c.bf16 %v55_v24, %v54_v23  ;;  %v61_v28 = vpack.c.bf16 %v57_v26, %v56_v25  ;;  %v58_v31 = vsel %vm36_vm5, %v30_v21, %v52_v29  ;;  %v59_v32 = vsel %vm37_vm6, %v31_v22, %v53_v30 }
  0x8e   :  { %v62_v33 = vpack.c.bf16 %v59_v32, %v58_v31 }
  0x8f   :  { %239 = vmatmul.mubr.bf16.vlgmr.msra.gmra.mrb[0].mxu0 %v60_v27  ;;  %243 = vmatmul.mubr.bf16.vlgmr.msra.gmra.mrb[0].mxu1 %v61_v28 }
  0x90   :  { %246 = vmatprep.mubr.msk.bf16.mxu1 %vm280_vm0, %v279_v2 }
  0x97   :  { %247 = vmatmul.mubr.bf16.gmra.mrb[4].mxu1 %v62_v33 }
 0x162   :  { %v168_v35 = vpop.f32.mrb[0].mxu0  ;;  %v176_v36 = vpop.f32.mrb[0].mxu1 }
 0x163   :  { %v169_v37 = vadd.f32 %v202_v34, %v168_v35  ;;  %v177_v38 = vadd.f32 %v202_v34, %v176_v36  ;;  %v240_v39 = vpop.f32.mrb[1].mxu0  ;;  %v244_v40 = vpop.f32.mrb[1].mxu1 }
 0x164   :  { %v171_v41 = vpop.f32.mrb[2].mxu0  ;;  %v179_v42 = vpop.f32.mrb[2].mxu1 }
 0x165   :  { %191 = vst [vmem:[%s410_s6] sm:$0xff] %v169_v37  ;;  %193 = vst [vmem:[%s410_s6 + $0x10] sm:$0xff] %v177_v38  ;;  %v172_v43 = vadd.f32 %v202_v34, %v171_v41  ;;  %v180_v44 = vadd.f32 %v202_v34, %v179_v42  ;;  %v241_v45 = vpop.f32.mrb[3].mxu0  ;;  %v245_v46 = vpop.f32.mrb[3].mxu1 }
 0x167   :  { %192 = vst [vmem:[%s410_s6 + $0x8] sm:$0xff] %v172_v43  ;;  %194 = vst [vmem:[%s410_s6 + $0x18] sm:$0xff] %v180_v44 }
 0x16a   :  { %v184_v47 = vpop.f32.mrb[4].mxu1 }
 0x16b   :  { %v185_v48 = vadd.f32 %v202_v34, %v184_v47  ;;  %v248_v49 = vpop.f32.mrb[5].mxu1 }
 0x16c   :  { %v187_v50 = vpop.f32.mrb[6].mxu1 }
 0x16d   :  { %195 = vst [vmem:[%s410_s6 + $0x20] sm:$0xff] %v185_v48  ;;  %v188_v51 = vadd.f32 %v202_v34, %v187_v50  ;;  %v249_v52 = vpop.f32.mrb[7].mxu1 }
 0x16f   :  { %196 = vst [vmem:[%s410_s6 + $0x28] sm:$0xff] %v188_v51 }

// kernel: separator_forward.27
= control target key start
LH: loop header
LB: loop body
LE: loop exit
PB: predicated region body
PF: predicated region fallthrough
CT: control target
= control target key end

     0   :  { %vm49_vm0 = vcmask 261120   ;;  %vm986_vm1 = vcmask 130048   ;;  %s1549_s1 = inlined_call_operand.vmem [shape: bf16[9,16,32], index: 1, kind: input, shape index: {}]   ;;  %s1550_s0 = inlined_call_operand.vmem [shape: f32[1,96,32], index: 0, kind: input, shape index: {}]   ;;  %s1551_s2 = inlined_call_operand.vmem [shape: f32[1,16], index: 2, kind: input, shape index: {}]   ;;  %s1552_s3 = inlined_call_operand.vmem [shape: f32[1,64,16], index: 3, kind: output, shape index: {}]  }
   0x1   :  { %v1272_v0 = vld [vmem:[%s1549_s1 + $0x8] sm:$0xff]   ;;  %v1307_v1 = vld [vmem:[%s1549_s1 + $0x20] sm:$0xff]   ;;  %v30_v4 = vld [vmem:[%s1550_s0 + $0x10] sm:$0xff] }
   0x2   :  { %1262 = vmatprep.subr.msk.bf16.mxu1 %vm49_vm0, %v1272_v0  ;;  %v63_v2 = vsel %vm49_vm0, %v1272_v0, 0  ;;  %v29_v3 = vld [vmem:[%s1550_s0 + $0x8] sm:$0xff]  ;;  %v432_v5 = vld [vmem:[%s1550_s0 + $0x18] sm:$0xff]  ;;  %1266 = vmatprep.subr.msk.bf16.mxu0 %vm49_vm0, %v1307_v1  ;;  %v1324_v6 = vsel %vm49_vm0, %v1307_v1, 0  ;;  %v32_v9 = vld [vmem:[%s1550_s0 + $0x20] sm:$0xff] }
   0x3   :  { %1107 = vmatpush3.bf16.xpose.msra.mxu1 %v63_v2  ;;  %v37_v7 = vpack.c.bf16 %v30_v4, %v29_v3  ;;  %v439_v8 = vpack.c.bf16 %v432_v5, %v30_v4  ;;  %1147 = vmatpush3.bf16.xpose.msra.mxu0 %v1324_v6  ;;  %v1274_v10 = vld [vmem:[%s1549_s1] sm:$0xff]   ;;  %v434_v11 = vld [vmem:[%s1550_s0 + $0x28] sm:$0xff]  ;;  %v1344_v13 = vld [vmem:[%s1550_s0 + $0x30] sm:$0xff]  ;;  %v1346_v14 = vpack.c.bf16 %v32_v9, %v432_v5 }
   0x4   :  { %v1275_v12 = vld [vmem:[%s1549_s1 + $0x28] sm:$0xff]   ;;  %1263 = vmatprep.subr.msk.bf16.mxu1 %vm49_vm0, %v1274_v10  ;;  %v539_v15 = vld [vmem:[%s1550_s0 + $0x11] sm:$0xff]  ;;  %v440_v16 = vpack.c.bf16 %v434_v11, %v32_v9  ;;  %v540_v17 = vld [vmem:[%s1550_s0 + $0x19] sm:$0xff]  ;;  %v148_v18 = vsel %vm49_vm0, %v1274_v10, 0  ;;  %v1358_v19 = vpack.c.bf16 %v1344_v13, %v434_v11 }
   0x5   :  { %1108 = vmatprep.mubr.msk.bf16.mxu1 %vm49_vm0, %v37_v7  ;;  %1148 = vmatprep.mubr.msk.bf16.mxu0 %vm49_vm0, %v439_v8  ;;  %v572_v20 = vsel %vm49_vm0, %v1275_v12, 0  ;;  %v547_v21 = vpack.c.bf16 %v540_v17, %v539_v15  ;;  %v1276_v22 = vld [vmem:[%s1549_s1 + $0x30] sm:$0xff]   ;;  %v1370_v23 = vld [vmem:[%s1550_s0 + $0x38] sm:$0xff]  ;;  %v1375_v24 = vld [vmem:[%s1550_s0 + $0x40] sm:$0xff] }
   0x6   :  { %1268 = vmatprep.subr.msk.bf16.mxu0 %vm49_vm0, %v1275_v12  ;;  %v1277_v25 = vld [vmem:[%s1549_s1 + $0x10] sm:$0xff]   ;;  %v15_v26 = vld [vmem:[%s1550_s0 + $0x7] sm:$0xff]  ;;  %v1394_v28 = vpack.c.bf16 %v1375_v24, %v1370_v23  ;;  %v544_v33 = vld [vmem:[%s1550_s0 + $0x39] sm:$0xff]  ;;  %v680_v40 = vsel %vm49_vm0, %v1276_v22, 0  ;;  %v441_v8 = vpack.c.bf16 %v1370_v23, %v1344_v13 }
   0x7   :  { %v1388_v27 = vld [vmem:[%s1550_s0 + $0xf] sm:$0xff]  ;;  %v541_v30 = vld [vmem:[%s1550_s0 + $0x21] sm:$0xff]  ;;  %v17_v35 = vld [vmem:[%s1550_s0 + $0x17] sm:$0xff]  ;;  %v248_v44 = vsel %vm49_vm0, %v1277_v25, 0 }
   0x8   :  { %v23_v29 = vpack.c.bf16 %v1388_v27, %v15_v26  ;;  %v542_v31 = vld [vmem:[%s1550_s0 + $0x29] sm:$0xff]  ;;  %v543_v32 = vld [vmem:[%s1550_s0 + $0x31] sm:$0xff]  ;;  %v18_v36 = vld [vmem:[%s1550_s0 + $0x1f] sm:$0xff]  ;;  %v224_v56 = vpack.c.bf16 %v541_v30, %v540_v17  ;;  %v331_v63 = vpack.c.bf16 %v17_v35, %v1388_v27 }
   0x9   :  { %v548_v34 = vpack.c.bf16 %v542_v31, %v541_v30  ;;  %v549_v37 = vpack.c.bf16 %v544_v33, %v543_v32  ;;  %v19_v38 = vld [vmem:[%s1550_s0 + $0x27] sm:$0xff]  ;;  %v20_v39 = vld [vmem:[%s1550_s0 + $0x2f] sm:$0xff]  ;;  %v1278_v41 = vld [vmem:[%s1549_s1 + $0x38] sm:$0xff]   ;;  %v24_v42 = vpack.c.bf16 %v18_v36, %v17_v35  ;;  %v225_v57 = vpack.c.bf16 %v543_v32, %v542_v31 }
   0xa   :  { %1109 = vmatmul.mubr.msk.bf16.vlgmr.msra.gmra.mrb[0].mxu1 %vm49_vm0, %v1346_v14  ;;  %1149 = vmatmul.mubr.msk.bf16.vlgmr.msra.gmra.mrb[0].mxu0 %vm49_vm0, %v440_v16  ;;  %v25_v43 = vpack.c.bf16 %v20_v39, %v19_v38  ;;  %v545_v45 = vld [vmem:[%s1550_s0 + $0x41] sm:$0xff]  ;;  %v1438_v46 = vld [vmem:[%s1550_s0 + $0x49] sm:$0xff]  ;;  %v1279_v47 = vld [vmem:[%s1549_s1 + $0x18] sm:$0xff]   ;;  %v788_v54 = vsel %vm49_vm0, %v1278_v41, 0  ;;  %v332_v2 = vpack.c.bf16 %v19_v38, %v18_v36 }
   0xb   :  { %1117 = vmatpush3.bf16.xpose.msra.mxu1 %v148_v18  ;;  %1157 = vmatpush3.bf16.xpose.msra.mxu0 %v572_v20  ;;  %v550_v48 = vpack.c.bf16 %v1438_v46, %v545_v45  ;;  %v21_v49 = vld [vmem:[%s1550_s0 + $0x37] sm:$0xff]  ;;  %v22_v50 = vld [vmem:[%s1550_s0 + $0x3f] sm:$0xff]  ;;  %v215_v51 = vld [vmem:[%s1550_s0 + $0x9] sm:$0xff]  ;;  %v356_v58 = vsel %vm49_vm0, %v1279_v47, 0  ;;  %v226_v62 = vpack.c.bf16 %v545_v45, %v544_v33 }
   0xc   :  { %1112 = vmatprep.mubr.msk.bf16.mxu1 %vm49_vm0, %v1358_v19  ;;  %1158 = vmatprep.mubr.msk.bf16.mxu0 %vm49_vm0, %v547_v21  ;;  %v26_v52 = vpack.c.bf16 %v22_v50, %v21_v49  ;;  %v223_v53 = vpack.c.bf16 %v539_v15, %v215_v51  ;;  %v1280_v55 = vld [vmem:[%s1549_s1 + $0x40] sm:$0xff]   ;;  %v654_v60 = vld [vmem:[%s1550_s0 + $0x4f] sm:$0xff]  ;;  %v333_v3 = vpack.c.bf16 %v21_v49, %v20_v39 }
   0xd   :  { %1269 = vmatprep.subr.msk.bf16.mxu0 %vm49_vm0, %v1276_v22  ;;  %1264 = vmatprep.subr.msk.bf16.mxu1 %vm49_vm0, %v1277_v25  ;;  %v653_v59 = vld [vmem:[%s1550_s0 + $0x47] sm:$0xff]  ;;  %v896_v0 = vsel %vm49_vm0, %v1280_v55, 0  ;;  %v762_v4 = vld [vmem:[%s1550_s0 + $0x50] sm:$0xff]  ;;  %v1060_v16 = vld [vmem:[%s1551_s2] ss:$0 sm:$0xff] }
   0xe   :  { %v658_v61 = vpack.c.bf16 %v654_v60, %v653_v59  ;;  %v334_v7 = vpack.c.bf16 %v653_v59, %v22_v50 }
  0x12   :  { %1113 = vmatmul.mubr.msk.bf16.gmra.mrb[4].mxu1 %vm49_vm0, %v1394_v28 }
  0x13   :  { %1118 = vmatprep.mubr.msk.bf16.mxu1 %vm49_vm0, %v23_v29 }
  0x16   :  { %1159 = vmatmul.mubr.msk.bf16.vlgmr.msra.gmra.mrb[0].mxu0 %vm49_vm0, %v548_v34 }
  0x17   :  { %1167 = vmatpush3.bf16.xpose.msra.mxu0 %v680_v40  ;;  %1162 = vmatprep.mubr.msk.bf16.mxu0 %vm49_vm0, %v549_v37 }
  0x18   :  { %1270 = vmatprep.subr.msk.bf16.mxu0 %vm49_vm0, %v1278_v41 }
  0x1a   :  { %1119 = vmatmul.mubr.msk.bf16.vlgmr.msra.gmra.mrb[0].mxu1 %vm49_vm0, %v24_v42 }
  0x1b   :  { %1127 = vmatpush3.bf16.xpose.msra.mxu1 %v248_v44  ;;  %1122 = vmatprep.mubr.msk.bf16.mxu1 %vm49_vm0, %v25_v43 }
  0x1c   :  { %1265 = vmatprep.subr.msk.bf16.mxu1 %vm49_vm0, %v1279_v47 }
  0x1e   :  { %1163 = vmatmul.mubr.msk.bf16.gmra.mrb[4].mxu0 %vm49_vm0, %v550_v48 }
  0x1f   :  { %1168 = vmatprep.mubr.msk.bf16.mxu0 %vm49_vm0, %v24_v42 }
  0x22   :  { %1123 = vmatmul.mubr.msk.bf16.gmra.mrb[4].mxu1 %vm49_vm0, %v26_v52 }
  0x23   :  { %1128 = vmatprep.mubr.msk.bf16.mxu1 %vm49_vm0, %v223_v53 }
  0x26   :  { %1169 = vmatmul.mubr.msk.bf16.vlgmr.msra.gmra.mrb[0].mxu0 %vm49_vm0, %v25_v43 }
  0x27   :  { %1177 = vmatpush3.bf16.xpose.msra.mxu0 %v788_v54  ;;  %1172 = vmatprep.mubr.msk.bf16.mxu0 %vm49_vm0, %v26_v52 }
  0x28   :  { %1271 = vmatprep.subr.msk.bf16.mxu0 %vm49_vm0, %v1280_v55 }
  0x2a   :  { %1129 = vmatmul.mubr.msk.bf16.vlgmr.msra.gmra.mrb[0].mxu1 %vm49_vm0, %v224_v56 }
  0x2b   :  { %1137 = vmatpush3.bf16.xpose.msra.mxu1 %v356_v58  ;;  %1132 = vmatprep.mubr.msk.bf16.mxu1 %vm49_vm0, %v225_v57 }
  0x2c   :  { %1267 = vmatprep.subr.msk.bf16.mxu1 %vm49_vm0, %v1307_v1  ;;  %v761_v1 = vld [vmem:[%s1550_s0 + $0x48] sm:$0xff] }
  0x2d   :  { %v766_v5 = vpack.c.bf16 %v762_v4, %v761_v1  ;;  %v442_v9 = vpack.c.bf16 %v761_v1, %v1375_v24 }
  0x2e   :  { %1173 = vmatmul.mubr.msk.bf16.gmra.mrb[4].mxu0 %vm49_vm0, %v658_v61 }
  0x2f   :  { %1178 = vmatprep.mubr.msk.bf16.mxu0 %vm49_vm0, %v1346_v14 }
  0x32   :  { %1133 = vmatmul.mubr.msk.bf16.gmra.mrb[4].mxu1 %vm49_vm0, %v226_v62 }
  0x33   :  { %1138 = vmatprep.mubr.msk.bf16.mxu1 %vm49_vm0, %v331_v63 }
  0x36   :  { %1179 = vmatmul.mubr.msk.bf16.vlgmr.msra.gmra.mrb[0].mxu0 %vm49_vm0, %v1358_v19 }
  0x37   :  { %1187 = vmatpush3.bf16.xpose.msra.mxu0 %v896_v0  ;;  %1182 = vmatprep.mubr.msk.bf16.mxu0 %vm49_vm0, %v1394_v28 }
  0x3a   :  { %1139 = vmatmul.mubr.msk.bf16.vlgmr.msra.gmra.mrb[0].mxu1 %vm49_vm0, %v332_v2 }
  0x3b   :  { %1197 = vmatpush3.bf16.xpose.msra.mxu1 %v1324_v6  ;;  %1142 = vmatprep.mubr.msk.bf16.mxu1 %vm49_vm0, %v333_v3  ;;  %v870_v6 = vld [vmem:[%s1550_s0 + $0x51] sm:$0xff] }
  0x3c   :  { %v874_v10 = vpack.c.bf16 %v870_v6, %v1438_v46 }
  0x3e   :  { %1183 = vmatmul.mubr.msk.bf16.gmra.mrb[4].mxu0 %vm49_vm0, %v766_v5 }
  0x3f   :  { %1188 = vmatprep.mubr.msk.bf16.mxu0 %vm49_vm0, %v224_v56 }
  0x42   :  { %1143 = vmatmul.mubr.msk.bf16.gmra.mrb[4].mxu1 %vm49_vm0, %v334_v7 }
  0x43   :  { %1152 = vmatprep.mubr.msk.bf16.mxu1 %vm49_vm0, %v441_v8 }
  0x46   :  { %1189 = vmatmul.mubr.msk.bf16.vlgmr.msra.gmra.mrb[0].mxu0 %vm49_vm0, %v225_v57 }
  0x47   :  { %1192 = vmatprep.mubr.msk.bf16.mxu0 %vm49_vm0, %v226_v62 }
  0x4e   :  { %1153 = vmatmul.mubr.msk.bf16.vlgmr.msra.gmra.mrb[4].mxu1 %vm49_vm0, %v442_v9  ;;  %1193 = vmatmul.mubr.msk.bf16.gmra.mrb[4].mxu0 %vm49_vm0, %v874_v10 }
 0x10d   :  { %v1140_v11 = vpop.f32.mrb[0].mxu1 }
 0x10e   :  { %v392_v12 = vpop.f32.mrb[1].mxu1 }
 0x10f   :  { %v1141_v13 = vpop.f32.mrb[2].mxu1 }
 0x110   :  { %v395_v14 = vpop.f32.mrb[3].mxu1 }
 0x119   :  { %v1190_v15 = vpop.f32.mrb[0].mxu0 }
 0x11a   :  { %v1198_v17 = vadd.f32 %v1190_v15, %v1140_v11  ;;  %v932_v18 = vpop.f32.mrb[1].mxu0 }
 0x11b   :  { %v1199_v19 = vadd.f32 %v932_v18, %v392_v12  ;;  %v1191_v20 = vpop.f32.mrb[2].mxu0 }
 0x11c   :  { %v980_v21 = vadd.f32 %v1198_v17, %v1060_v16  ;;  %v1200_v22 = vadd.f32 %v1191_v20, %v1141_v13  ;;  %v935_v23 = vpop.f32.mrb[3].mxu0 }
 0x11d   :  { %v978_v24 = vadd.f32 %v1199_v19, %v1060_v16  ;;  %v1201_v25 = vadd.f32 %v935_v23, %v395_v14 }
 0x11e   :  { %989 = vst.msk [vmem:[%s1552_s3 + $0x10] sm:$0xff] %vm986_vm1, %v980_v21  ;;  %v981_v26 = vadd.f32 %v1200_v22, %v1060_v16 }
 0x11f   :  { %987 = vst.msk [vmem:[%s1552_s3] sm:$0xff] %vm986_vm1, %v978_v24  ;;  %v979_v27 = vadd.f32 %v1201_v25, %v1060_v16 }
 0x120   :  { %990 = vst.msk [vmem:[%s1552_s3 + $0x18] sm:$0xff] %vm986_vm1, %v981_v26 }
 0x121   :  { %v1154_v28 = vpop.f32.mrb[4].mxu1  ;;  %988 = vst.msk [vmem:[%s1552_s3 + $0x8] sm:$0xff] %vm986_vm1, %v979_v27  ;;  %v1194_v29 = vpop.f32.mrb[4].mxu0 }
 0x122   :  { %v516_v30 = vpop.f32.mrb[5].mxu1  ;;  %v1202_v31 = vadd.f32 %v1194_v29, %v1154_v28  ;;  %v948_v32 = vpop.f32.mrb[5].mxu0 }
 0x123   :  { %v1155_v33 = vpop.f32.mrb[6].mxu1  ;;  %v1203_v34 = vadd.f32 %v948_v32, %v516_v30  ;;  %v1195_v35 = vpop.f32.mrb[6].mxu0 }
 0x124   :  { %v519_v36 = vpop.f32.mrb[7].mxu1  ;;  %v984_v37 = vadd.f32 %v1202_v31, %v1060_v16  ;;  %v1204_v38 = vadd.f32 %v1195_v35, %v1155_v33  ;;  %v951_v39 = vpop.f32.mrb[7].mxu0 }
 0x125   :  { %v982_v40 = vadd.f32 %v1203_v34, %v1060_v16  ;;  %v1205_v41 = vadd.f32 %v951_v39, %v519_v36 }
 0x126   :  { %993 = vst.msk [vmem:[%s1552_s3 + $0x30] sm:$0xff] %vm986_vm1, %v984_v37  ;;  %v985_v42 = vadd.f32 %v1204_v38, %v1060_v16 }
 0x127   :  { %991 = vst.msk [vmem:[%s1552_s3 + $0x20] sm:$0xff] %vm986_vm1, %v982_v40  ;;  %v983_v43 = vadd.f32 %v1205_v41, %v1060_v16 }
 0x128   :  { %994 = vst.msk [vmem:[%s1552_s3 + $0x38] sm:$0xff] %vm986_vm1, %v985_v42 }
 0x129   :  { %992 = vst.msk [vmem:[%s1552_s3 + $0x28] sm:$0xff] %vm986_vm1, %v983_v43 }

// kernel: separator_forward.29
= control target key start
LH: loop header
LB: loop body
LE: loop exit
PB: predicated region body
PF: predicated region fallthrough
CT: control target
= control target key end

     0   :  { %s308_s1 = inlined_call_operand.vmem [shape: bf16[128,128], index: 1, kind: input, shape index: {}]   ;;  %s309_s3 = inlined_call_operand.vmem [shape: f32[1,128], index: 3, kind: input, shape index: {}, may-alias: {3,4}]   ;;  %s310_s4 = inlined_call_operand.vmem [shape: f32[1,128], index: 4, kind: input, shape index: {}, may-alias: {3,4}]   ;;  %s311_s5 = inlined_call_operand.<no memory space> [shape: f32[1,1], index: 5, kind: input, shape index: {}]   ;;  %s312_s0 = inlined_call_operand.vmem [shape: f32[24,128], index: 0, kind: input, shape index: {}]   ;;  %s313_s2 = inlined_call_operand.vmem [shape: f32[1,128], index: 2, kind: input, shape index: {}]   ;;  %s314_s6 = inlined_call_operand.vmem [shape: bf16[24,128], index: 6, kind: output, shape index: {}]  }
   0x1   :  { %v223_v0 = vld [vmem:[%s308_s1] sm:$0xff]   ;;  %v224_v1 = vld [vmem:[%s308_s1 + $0x8] sm:$0xff]   ;;  %v225_v2 = vld [vmem:[%s308_s1 + $0x10] sm:$0xff]  }
   0x2   :  { %203 = vmatprep.subr.bf16.mxu0 %v223_v0  ;;  %v26_v3 = vld [vmem:[%s312_s0] sm:$0xff]  ;;  %v27_v4 = vld [vmem:[%s312_s0 + $0x8] sm:$0xff]  ;;  %v226_v6 = vld [vmem:[%s308_s1 + $0x18] sm:$0xff]  }
   0x3   :  { %204 = vmatpush3.bf16.xpose.msra.mxu0 %v223_v0  ;;  %v29_v5 = vpack.c.bf16 %v27_v4, %v26_v3  ;;  %v227_v7 = vld [vmem:[%s308_s1 + $0x20] sm:$0xff]   ;;  %v228_v8 = vld [vmem:[%s308_s1 + $0x28] sm:$0xff]   ;;  %v229_v9 = vld [vmem:[%s308_s1 + $0x30] sm:$0xff]  }
   0x4   :  { %205 = vmatprep.subr.bf16.mxu0 %v224_v1  ;;  %v230_v10 = vld [vmem:[%s308_s1 + $0x38] sm:$0xff]   ;;  %v28_v11 = vld [vmem:[%s312_s0 + $0x10] sm:$0xff]  ;;  %v173_v13 = vld [vmem:[%s313_s2] ss:$0 sm:$0xff] }
   0x5   :  { %219 = vmatprep.mubr.bf16.mxu0 %v29_v5  ;;  %v30_v12 = vpack.c.bf16 %v28_v11, %v28_v11 }
   0xb   :  { %206 = vmatpush3.bf16.xpose.msra.mxu0 %v224_v1 }
   0xc   :  { %207 = vmatprep.subr.bf16.mxu0 %v225_v2 }
  0x13   :  { %208 = vmatpush3.bf16.xpose.msra.mxu0 %v225_v2 }
  0x14   :  { %209 = vmatprep.subr.bf16.mxu0 %v226_v6 }
  0x1b   :  { %210 = vmatpush3.bf16.xpose.msra.mxu0 %v226_v6 }
  0x1c   :  { %211 = vmatprep.subr.bf16.mxu0 %v227_v7 }
  0x23   :  { %212 = vmatpush3.bf16.xpose.msra.mxu0 %v227_v7 }
  0x24   :  { %213 = vmatprep.subr.bf16.mxu0 %v228_v8 }
  0x2b   :  { %214 = vmatpush3.bf16.xpose.msra.mxu0 %v228_v8 }
  0x2c   :  { %215 = vmatprep.subr.bf16.mxu0 %v229_v9 }
  0x33   :  { %216 = vmatpush3.bf16.xpose.msra.mxu0 %v229_v9 }
  0x34   :  { %217 = vmatprep.subr.bf16.mxu0 %v230_v10 }
  0x3b   :  { %218 = vmatpush3.bf16.xpose.msra.mxu0 %v230_v10 }
  0x42   :  { %220 = vmatmul.mubr.bf16.vlgmr.msra.gmra.mrb[0].mxu0 %v30_v12 }
 0x115   :  { %v221_v14 = vpop.f32.mrb[0].mxu0 }
 0x116   :  { %v145_v15 = vadd.f32 %v221_v14, %v173_v13  ;;  %v136_v16 = vpop.f32.mrb[1].mxu0 }
 0x117   :  { %v137_v17 = vadd.f32 %v173_v13, %v136_v16  ;;  %v222_v18 = vpop.f32.mrb[2].mxu0 }
 0x118   :  { %v152_v19 = vmax.f32 %v145_v15, 0.0  ;;  %v139_v20 = vpop.f32.mrb[3].mxu0 }
 0x119   :  { %v140_v21 = vadd.f32 %v173_v13, %v139_v20  ;;  %v150_v23 = vmax.f32 %v137_v17, 0.0 }
 0x11a   :  { %v187_v22 = vpack.c.bf16 %v152_v19, %v152_v19 }
 0x11b   :  { %v151_v24 = vmax.f32 %v140_v21, 0.0 }
 0x11c   :  { %168 = vst [vmem:[%s314_s6 + $0x8] sm:$0xf] %v187_v22 }
 0x11d   :  { %v191_v25 = vpack.c.bf16 %v151_v24, %v150_v23 }
 0x11f   :  { %192 = vst [vmem:[%s314_s6] sm:$0xff] %v191_v25  }

// kernel: separator_forward.30
= control target key start
LH: loop header
LB: loop body
LE: loop exit
PB: predicated region body
PF: predicated region fallthrough
CT: control target
= control target key end

     0   :  { %s314_s1 = inlined_call_operand.vmem [shape: bf16[128,128], index: 1, kind: input, shape index: {}]   ;;  %s315_s3 = inlined_call_operand.vmem [shape: f32[1,128], index: 3, kind: input, shape index: {}, may-alias: {3,4}]   ;;  %s316_s4 = inlined_call_operand.vmem [shape: f32[1,128], index: 4, kind: input, shape index: {}, may-alias: {3,4}]   ;;  %s317_s5 = inlined_call_operand.<no memory space> [shape: f32[1,1], index: 5, kind: input, shape index: {}]   ;;  %s318_s0 = inlined_call_operand.vmem [shape: bf16[24,128], index: 0, kind: input, shape index: {}]   ;;  %s319_s2 = inlined_call_operand.vmem [shape: f32[1,128], index: 2, kind: input, shape index: {}]   ;;  %s320_s6 = inlined_call_operand.vmem [shape: bf16[24,128], index: 6, kind: output, shape index: {}]  }
   0x1   :  { %v230_v0 = vld [vmem:[%s314_s1] sm:$0xff]   ;;  %v231_v1 = vld [vmem:[%s314_s1 + $0x8] sm:$0xff]   ;;  %v232_v2 = vld [vmem:[%s314_s1 + $0x10] sm:$0xff]  }
   0x2   :  { %210 = vmatprep.subr.bf16.mxu0 %v230_v0  ;;  %v238_v3 = vld [vmem:[%s318_s0] sm:$0xff]   ;;  %v233_v4 = vld [vmem:[%s314_s1 + $0x18] sm:$0xff]   ;;  %v235_v6 = vld [vmem:[%s314_s1 + $0x28] sm:$0xff]  }
   0x3   :  { %211 = vmatpush3.bf16.xpose.msra.mxu0 %v230_v0  ;;  %226 = vmatprep.mubr.bf16.mxu0 %v238_v3  ;;  %v234_v5 = vld [vmem:[%s314_s1 + $0x20] sm:$0xff]   ;;  %v236_v7 = vld [vmem:[%s314_s1 + $0x30] sm:$0xff]   ;;  %v237_v8 = vld [vmem:[%s314_s1 + $0x38] sm:$0xff]  }
   0x4   :  { %212 = vmatprep.subr.bf16.mxu0 %v231_v1  ;;  %v239_v9 = vld [vmem:[%s318_s0 + $0x8] ss:$0 sps:$4 sm:$0xff]   ;;  %v178_v10 = vld [vmem:[%s319_s2] ss:$0 sm:$0xff] }
   0xb   :  { %213 = vmatpush3.bf16.xpose.msra.mxu0 %v231_v1 }
   0xc   :  { %214 = vmatprep.subr.bf16.mxu0 %v232_v2 }
  0x13   :  { %215 = vmatpush3.bf16.xpose.msra.mxu0 %v232_v2 }
  0x14   :  { %216 = vmatprep.subr.bf16.mxu0 %v233_v4 }
  0x1b   :  { %217 = vmatpush3.bf16.xpose.msra.mxu0 %v233_v4 }
  0x1c   :  { %218 = vmatprep.subr.bf16.mxu0 %v234_v5 }
  0x23   :  { %219 = vmatpush3.bf16.xpose.msra.mxu0 %v234_v5 }
  0x24   :  { %220 = vmatprep.subr.bf16.mxu0 %v235_v6 }
  0x2b   :  { %221 = vmatpush3.bf16.xpose.msra.mxu0 %v235_v6 }
  0x2c   :  { %222 = vmatprep.subr.bf16.mxu0 %v236_v7 }
  0x33   :  { %223 = vmatpush3.bf16.xpose.msra.mxu0 %v236_v7 }
  0x34   :  { %224 = vmatprep.subr.bf16.mxu0 %v237_v8 }
  0x3b   :  { %225 = vmatpush3.bf16.xpose.msra.mxu0 %v237_v8 }
  0x42   :  { %227 = vmatmul.mubr.bf16.vlgmr.msra.gmra.mrb[0].mxu0 %v239_v9 }
 0x115   :  { %v228_v11 = vpop.f32.mrb[0].mxu0 }
 0x116   :  { %v153_v12 = vadd.f32 %v228_v11, %v178_v10  ;;  %v144_v13 = vpop.f32.mrb[1].mxu0 }
 0x117   :  { %v229_v14 = vpop.f32.mrb[2].mxu0  ;;  %v145_v17 = vadd.f32 %v178_v10, %v144_v13 }
 0x118   :  { %v194_v15 = vpack.c.bf16 %v153_v12, %v153_v12  ;;  %v147_v16 = vpop.f32.mrb[3].mxu0 }
 0x119   :  { %v148_v18 = vadd.f32 %v178_v10, %v147_v16 }
 0x11a   :  { %173 = vst [vmem:[%s320_s6 + $0x8] sm:$0xf] %v194_v15 }
 0x11b   :  { %v198_v19 = vpack.c.bf16 %v148_v18, %v145_v17 }
 0x11d   :  { %199 = vst [vmem:[%s320_s6] sm:$0xff] %v198_v19  }

// kernel: separator_forward.24
= control target key start
LH: loop header
LB: loop body
LE: loop exit
PB: predicated region body
PF: predicated region fallthrough
CT: control target
= control target key end

     0   :  { %v4520_v3 = vmov 0.0   ;;  %vm4521_vm0 = vmmov 0   ;;  %s4522_s14 = smov 112   ;;  %s4523_s23 = smov 96   ;;  %vm22_vm1 = vcmask 31744   ;;  %vm537_vm2 = vcmask 1042432   ;;  %s5440_s0 = inlined_call_operand.vmem [shape: bf16[8,6,48], index: 0, kind: input, shape index: {}]   ;;  %s5441_s1 = inlined_call_operand.vmem [shape: bf16[8,6,16], index: 1, kind: output, shape index: {}]  }
   0x1   :  { %v9_v0 = vld [vmem:[%s5440_s0] sm:$0x7]  ;;  %v10_v1 = vld [vmem:[%s5440_s0 + $0x4] sm:$0x7]  ;;  %v11_v2 = vld [vmem:[%s5440_s0 + $0x8] sm:$0x7]  ;;  %3924 = vmatprep.subr.bf16.mxu0 %v4520_v3  ;;  %3930 = vmatprep.subr.bf16.mxu1 %v4520_v3 }
   0x2   :  { %v4557_v4 = vcombine.low %v9_v0, %v9_v0  ;;  %v4559_v5 = vcombine.low %v11_v2, %v11_v2  ;;  %v12_v6 = vld [vmem:[%s5440_s0 + $0xc] sm:$0x7]  ;;  %3926 = vmatprep.mubr.msk.bf16.mxu0 %vm4521_vm0, %v4520_v3  ;;  %3932 = vmatprep.mubr.msk.bf16.mxu1 %vm4521_vm0, %v4520_v3  ;;  %v4569_v7 = vcombine.low %v10_v1, %v10_v1  ;;  %v13_v9 = vld [vmem:[%s5440_s0 + $0x10] sm:$0x7]  ;;  %v14_v10 = vld [vmem:[%s5440_s0 + $0x14] sm:$0x7] }
   0x3   :  { %v4572_v8 = vcombine.low %v12_v6, %v12_v6  ;;  %v4582_v11 = vcombine.low %v13_v9, %v13_v9  ;;  %v4584_v12 = vcombine.low %v14_v10, %v14_v10  ;;  %v15_v13 = vld [vmem:[%s5440_s0 + $0x18] sm:$0x7]  ;;  %v16_v14 = vld [vmem:[%s5440_s0 + $0x1c] sm:$0x7]  ;;  %vm434_vm3 = vcmask 46080   ;;  %s4524_s0 = smov 108  }
   0x4   :  { %20 = vrot.lane.b32.xlu0 %v4557_v4, %s4522_s14  ;;  %123 = vrot.lane.b32.xlu1 %v4559_v5, %s4522_s14  ;;  %v4594_v15 = vcombine.low %v15_v13, %v15_v13  ;;  %v4596_v16 = vcombine.low %v16_v14, %v16_v14  ;;  %s4525_s24 = smov 124   ;;  %vm533_vm4 = vcmask 48128   ;;  %s4526_s25 = smov 92   ;;  %vm3685_vm5 = vcmask 64512  }
   0x5   :  { %s4527_s26 = smov 104   ;;  %s4528_s27 = smov 120   ;;  %vm3694_vm6 = vcmask 97280   ;;  %vm3711_vm7 = vcmask 124928  }
   0x6   :  { %s4529_s28 = smov 88   ;;  %s4530_s29 = smov 100  }
   0x7   :  { %s4531_s30 = smov 116   ;;  %s4532_s2 = smov 84  }
   0x8   :  { %72 = vrot.lane.b32.xlu0 %v4569_v7, %s4522_s14  ;;  %174 = vrot.lane.b32.xlu1 %v4572_v8, %s4522_s14  ;;  %s4533_s3 = smov 4   ;;  %s4534_s4 = smov 8  }
   0x9   :  { %s4535_s5 = smov 12  }
   0xc   :  { %225 = vrot.lane.b32.xlu0 %v4582_v11, %s4522_s14  ;;  %276 = vrot.lane.b32.xlu1 %v4584_v12, %s4522_s14 }
  0x10   :  { %327 = vrot.lane.b32.xlu0 %v4594_v15, %s4522_s14  ;;  %378 = vrot.lane.b32.xlu1 %v4596_v16, %s4522_s14 }
  0x14   :  { %531 = vrot.lane.b32.xlu1 %v4557_v4, %s4523_s23  ;;  %581 = vrot.lane.b32.xlu0 %v4569_v7, %s4523_s23 }
  0x18   :  { %629 = vrot.lane.b32.xlu1 %v4559_v5, %s4523_s23 }
  0x1c   :  { %677 = vrot.lane.b32.xlu1 %v4572_v8, %s4523_s23 }
  0x76   :  { %v21_v17 = vpop.permute.xlu0 %20  ;;  %v124_v19 = vpop.permute.xlu1 %123 }
  0x77   :  { %v27_v18 = vsel %vm22_vm1, %v21_v17, 0  ;;  %v129_v22 = vsel %vm22_vm1, %v124_v19, 0 }
  0x78   :  { %3925 = vmatpush3.bf16.xpose.msra.mxu0 %v27_v18 }
  0x79   :  { %3936 = vmatprep.subr.bf16.mxu0 %v4520_v3 }
  0x7a   :  { %v73_v20 = vpop.permute.xlu0 %72  ;;  %v175_v23 = vpop.permute.xlu1 %174 }
  0x7b   :  { %v78_v21 = vsel %vm22_vm1, %v73_v20, 0  ;;  %v180_v24 = vsel %vm22_vm1, %v175_v23, 0 }
  0x7c   :  { %3931 = vmatpush3.bf16.xpose.msra.mxu1 %v78_v21 }
  0x7d   :  { %3942 = vmatprep.subr.bf16.mxu1 %v4520_v3 }
  0x7e   :  { %v226_v25 = vpop.permute.xlu0 %225  ;;  %v277_v27 = vpop.permute.xlu1 %276 }
  0x7f   :  { %3927 = vmatmul.mubr.msk.bf16.vlgmr.msra.gmra.mrb[0].mxu0 %vm22_vm1, %v9_v0  ;;  %v231_v26 = vsel %vm22_vm1, %v226_v25, 0  ;;  %v282_v28 = vsel %vm22_vm1, %v277_v27, 0 }
  0x80   :  { %3937 = vmatpush3.bf16.xpose.msra.mxu0 %v129_v22  ;;  %3938 = vmatprep.mubr.msk.bf16.mxu0 %vm4521_vm0, %v4520_v3 }
  0x81   :  { %3948 = vmatprep.subr.bf16.mxu0 %v4520_v3 }
  0x82   :  { %v328_v29 = vpop.permute.xlu0 %327  ;;  %v379_v31 = vpop.permute.xlu1 %378 }
  0x83   :  { %3933 = vmatmul.mubr.msk.bf16.vlgmr.msra.gmra.mrb[0].mxu1 %vm22_vm1, %v10_v1  ;;  %v333_v30 = vsel %vm22_vm1, %v328_v29, 0  ;;  %v384_v32 = vsel %vm22_vm1, %v379_v31, 0 }
  0x84   :  { %3943 = vmatpush3.bf16.xpose.msra.mxu1 %v180_v24  ;;  %3944 = vmatprep.mubr.msk.bf16.mxu1 %vm4521_vm0, %v4520_v3 }
  0x85   :  { %3954 = vmatprep.subr.bf16.mxu1 %v4520_v3 }
  0x86   :  { %v532_v33 = vpop.permute.xlu1 %531  ;;  %v582_v34 = vpop.permute.xlu0 %581 }
  0x87   :  { %3939 = vmatmul.mubr.msk.bf16.vlgmr.msra.gmra.mrb[4].mxu0 %vm22_vm1, %v11_v2  ;;  %v539_v35 = vsel %vm537_vm2, %v532_v33, 0  ;;  %v587_v36 = vsel %vm537_vm2, %v582_v34, 0 }
  0x88   :  { %3949 = vmatpush3.bf16.xpose.msra.mxu0 %v231_v26  ;;  %3950 = vmatprep.mubr.msk.bf16.mxu0 %vm4521_vm0, %v4520_v3 }
  0x89   :  { %3960 = vmatprep.subr.bf16.mxu0 %v4520_v3 }
  0x8b   :  { %3945 = vmatmul.mubr.msk.bf16.vlgmr.msra.gmra.mrb[4].mxu1 %vm22_vm1, %v12_v6 }
  0x8c   :  { %3955 = vmatpush3.bf16.xpose.msra.mxu1 %v282_v28  ;;  %3956 = vmatprep.mubr.msk.bf16.mxu1 %vm4521_vm0, %v4520_v3 }
  0x8d   :  { %3966 = vmatprep.subr.bf16.mxu1 %v4520_v3 }
  0x8f   :  { %3951 = vmatmul.mubr.msk.bf16.vlgmr.msra.gmra.mrb[8].mxu0 %vm22_vm1, %v13_v9 }
  0x90   :  { %3961 = vmatpush3.bf16.xpose.msra.mxu0 %v333_v30  ;;  %3962 = vmatprep.mubr.msk.bf16.mxu0 %vm4521_vm0, %v4520_v3  ;;  %v4667_v30 = vpop.permute.xlu1 %629 }
  0x91   :  { %3972 = vmatprep.subr.bf16.mxu0 %v4520_v3 }
  0x93   :  { %3957 = vmatmul.mubr.msk.bf16.vlgmr.msra.gmra.mrb[8].mxu1 %vm22_vm1, %v14_v10 }
  0x94   :  { %3967 = vmatpush3.bf16.xpose.msra.mxu1 %v384_v32  ;;  %3968 = vmatprep.mubr.msk.bf16.mxu1 %vm4521_vm0, %v4520_v3  ;;  %v4669_v31 = vpop.permute.xlu1 %677 }
  0x95   :  { %3978 = vmatprep.subr.bf16.mxu1 %v4520_v3 }
  0x97   :  { %3963 = vmatmul.mubr.msk.bf16.vlgmr.msra.gmra.mrb[12].mxu0 %vm22_vm1, %v15_v13 }
  0x98   :  { %3974 = vmatprep.mubr.msk.bf16.mxu0 %vm4521_vm0, %v4520_v3  ;;  %3973 = vmatpush3.bf16.msra.mxu0 %v539_v35 }
  0x99   :  { %3984 = vmatprep.subr.bf16.mxu0 %v4520_v3 }
  0x9b   :  { %3969 = vmatmul.mubr.msk.bf16.vlgmr.msra.gmra.mrb[12].mxu1 %vm22_vm1, %v16_v14 }
  0x9c   :  { %3980 = vmatprep.mubr.msk.bf16.mxu1 %vm4521_vm0, %v4520_v3  ;;  %3979 = vmatpush3.bf16.msra.mxu1 %v587_v36 }
  0x9d   :  { %3990 = vmatprep.subr.bf16.mxu1 %v4520_v3 }
 0x152   :  { %v63_v37 = vpop.f32.mrb[0].mxu0 }
 0x153   :  { %v426_v38 = vmul.f32 0.5, %v63_v37  ;;  %v3928_v39 = vpop.f32.mrb[1].mxu0 }
 0x154   :  { %v66_v40 = vpop.f32.mrb[2].mxu0 }
 0x155   :  { %v3929_v41 = vpop.f32.mrb[3].mxu0  ;;  %v435_v42 = vsel %vm434_vm3, %v426_v38, -inf }
 0x156   :  { %436 = vmax.xlane.f32.xlu0 %v435_v42  ;;  %v114_v43 = vpop.f32.mrb[0].mxu1 }
 0x157   :  { %v427_v44 = vmul.f32 0.5, %v114_v43  ;;  %v3934_v45 = vpop.f32.mrb[1].mxu1 }
 0x158   :  { %v117_v46 = vpop.f32.mrb[2].mxu1 }
 0x159   :  { %v3935_v47 = vpop.f32.mrb[3].mxu1  ;;  %v438_v48 = vsel %vm434_vm3, %v427_v44, -inf }
 0x15a   :  { %v165_v49 = vpop.f32.mrb[4].mxu0  ;;  %439 = vmax.xlane.f32.xlu1 %v438_v48 }
 0x15b   :  { %v428_v50 = vmul.f32 0.5, %v165_v49  ;;  %v3940_v51 = vpop.f32.mrb[5].mxu0 }
 0x15c   :  { %v168_v52 = vpop.f32.mrb[6].mxu0 }
 0x15d   :  { %v3941_v53 = vpop.f32.mrb[7].mxu0  ;;  %v441_v54 = vsel %vm434_vm3, %v428_v50, -inf }
 0x15e   :  { %442 = vmax.xlane.f32.xlu0 %v441_v54  ;;  %v216_v55 = vpop.f32.mrb[4].mxu1 }
 0x15f   :  { %v429_v56 = vmul.f32 0.5, %v216_v55  ;;  %v3946_v57 = vpop.f32.mrb[5].mxu1 }
 0x160   :  { %v219_v58 = vpop.f32.mrb[6].mxu1 }
 0x161   :  { %v3947_v59 = vpop.f32.mrb[7].mxu1  ;;  %v444_v60 = vsel %vm434_vm3, %v429_v56, -inf }
 0x162   :  { %445 = vmax.xlane.f32.xlu0 %v444_v60  ;;  %v267_v61 = vpop.f32.mrb[8].mxu0 }
 0x163   :  { %v430_v62 = vmul.f32 0.5, %v267_v61  ;;  %v3952_v63 = vpop.f32.mrb[9].mxu0 }
 0x164   :  { %v270_v0 = vpop.f32.mrb[10].mxu0 }
 0x165   :  { %v3953_v1 = vpop.f32.mrb[11].mxu0  ;;  %v447_v2 = vsel %vm434_vm3, %v430_v62, -inf }
 0x166   :  { %v318_v6 = vpop.f32.mrb[8].mxu1  ;;  %448 = vmax.xlane.f32.xlu1 %v447_v2 }
 0x167   :  { %v431_v9 = vmul.f32 0.5, %v318_v6  ;;  %v3958_v10 = vpop.f32.mrb[9].mxu1 }
 0x168   :  { %v321_v13 = vpop.f32.mrb[10].mxu1 }
 0x169   :  { %v3959_v14 = vpop.f32.mrb[11].mxu1  ;;  %v450_v17 = vsel %vm434_vm3, %v431_v9, -inf }
 0x16a   :  { %451 = vmax.xlane.f32.xlu0 %v450_v17  ;;  %v369_v18 = vpop.f32.mrb[12].mxu0 }
 0x16b   :  { %v4658_v19 = vmul.f32 0.5, %v369_v18  ;;  %v3964_v20 = vpop.f32.mrb[13].mxu0 }
 0x16c   :  { %v372_v21 = vpop.f32.mrb[14].mxu0 }
 0x16d   :  { %v453_v22 = vsel %vm434_vm3, %v4658_v19, -inf  ;;  %v3965_v23 = vpop.f32.mrb[15].mxu0 }
 0x16e   :  { %v420_v24 = vpop.f32.mrb[12].mxu1  ;;  %454 = vmax.xlane.f32.xlu1 %v453_v22 }
 0x16f   :  { %v433_v25 = vmul.f32 0.5, %v420_v24  ;;  %v3970_v26 = vpop.f32.mrb[13].mxu1 }
 0x170   :  { %v423_v27 = vpop.f32.mrb[14].mxu1 }
 0x171   :  { %v456_v28 = vsel %vm434_vm3, %v433_v25, -inf  ;;  %v3971_v29 = vpop.f32.mrb[15].mxu1  ;;  %v635_v27 = vsel %vm537_vm2, %v4667_v30, 0 }
 0x172   :  { %457 = vmax.xlane.f32.xlu0 %v456_v28 }
 0x17f   :  { %773 = vrot.lane.b32.xlu1 %v4584_v12, %s4523_s23 }
 0x188   :  { %725 = vrot.lane.b32.xlu0 %v4582_v11, %s4523_s23 }
 0x1e3   :  { %v437_v32 = vpop.xlane.xlu0 %436 }
 0x1e4   :  { %v459_v33 = vsub.f32 %v426_v38, %v437_v32 }
 0x1e6   :  { %v467_v34 = vmul.f32 1.442695, %v459_v33 }
 0x1e7   :  { %v440_v35 = vpop.xlane.xlu1 %439 }
 0x1e8   :  { %4392 = vpow2.f32 %v467_v34  ;;  %v460_v36 = vsub.f32 %v427_v44, %v440_v35  ;;  %v683_v34 = vsel %vm537_vm2, %v4669_v31, 0 }
 0x1ea   :  { %v469_v37 = vmul.f32 1.442695, %v460_v36 }
 0x1eb   :  { %v443_v39 = vpop.xlane.xlu0 %442 }
 0x1ec   :  { %4394 = vpow2.f32 %v469_v37  ;;  %v461_v40 = vsub.f32 %v428_v50, %v443_v39 }
 0x1ee   :  { %v471_v41 = vmul.f32 1.442695, %v461_v40 }
 0x1ef   :  { %v446_v42 = vpop.xlane.xlu0 %445 }
 0x1f0   :  { %4396 = vpow2.f32 %v471_v41  ;;  %v462_v43 = vsub.f32 %v429_v56, %v446_v42 }
 0x1f2   :  { %v4671_v45 = vpop.eup %4392  ;;  %v473_v46 = vmul.f32 1.442695, %v462_v43 }
 0x1f3   :  { %v449_v47 = vpop.xlane.xlu1 %448  ;;  %v483_v48 = vsel %vm434_vm3, %v4671_v45, 0.0 }
 0x1f4   :  { %4398 = vpow2.f32 %v473_v46  ;;  %v463_v38 = vsub.f32 %v430_v62, %v449_v47  ;;  %484 = vadd.xlane.f32.xlu1 %v483_v48 }
 0x1f6   :  { %v4675_v49 = vpop.eup %4394  ;;  %v475_v44 = vmul.f32 1.442695, %v463_v38 }
 0x1f7   :  { %v452_v51 = vpop.xlane.xlu0 %451  ;;  %v486_v50 = vsel %vm434_vm3, %v4675_v49, 0.0 }
 0x1f8   :  { %4400 = vpow2.f32 %v475_v44  ;;  %v464_v52 = vsub.f32 %v431_v9, %v452_v51  ;;  %487 = vadd.xlane.f32.xlu0 %v486_v50 }
 0x1fa   :  { %v4679_v53 = vpop.eup %4396  ;;  %v477_v54 = vmul.f32 1.442695, %v464_v52 }
 0x1fb   :  { %v489_v55 = vsel %vm434_vm3, %v4679_v53, 0.0  ;;  %v455_v62 = vpop.xlane.xlu1 %454 }
 0x1fc   :  { %4402 = vpow2.f32 %v477_v54  ;;  %490 = vadd.xlane.f32.xlu1 %v489_v55  ;;  %v465_v63 = vsub.f32 %v4658_v19, %v455_v62 }
 0x1fe   :  { %v4683_v56 = vpop.eup %4398  ;;  %v479_v1 = vmul.f32 1.442695, %v465_v63 }
 0x1ff   :  { %v492_v57 = vsel %vm434_vm3, %v4683_v56, 0.0  ;;  %v458_v0 = vpop.xlane.xlu0 %457  ;;  %v774_v17 = vpop.permute.xlu1 %773 }
 0x200   :  { %493 = vadd.xlane.f32.xlu0 %v492_v57  ;;  %v466_v2 = vsub.f32 %v433_v25, %v458_v0  ;;  %4404 = vpow2.f32 %v479_v1  ;;  %v779_v42 = vsel %vm537_vm2, %v774_v17, 0 }
 0x202   :  { %v4687_v58 = vpop.eup %4400  ;;  %v481_v6 = vmul.f32 1.442695, %v466_v2 }
 0x203   :  { %v495_v59 = vsel %vm434_vm3, %v4687_v58, 0.0  ;;  %v726_v18 = vpop.permute.xlu0 %725 }
 0x204   :  { %496 = vadd.xlane.f32.xlu1 %v495_v59  ;;  %4406 = vpow2.f32 %v481_v6  ;;  %v731_v39 = vsel %vm537_vm2, %v726_v18, 0 }
 0x206   :  { %v4691_v60 = vpop.eup %4402 }
 0x207   :  { %v498_v61 = vsel %vm434_vm3, %v4691_v60, 0.0 }
 0x208   :  { %499 = vadd.xlane.f32.xlu0 %v498_v61 }
 0x20a   :  { %v4700_v9 = vpop.eup %4404 }
 0x20b   :  { %v501_v10 = vsel %vm434_vm3, %v4700_v9, 0.0 }
 0x20e   :  { %v4704_v13 = vpop.eup %4406 }
 0x20f   :  { %v504_v14 = vsel %vm434_vm3, %v4704_v13, 0.0 }
 0x215   :  { %869 = vrot.lane.b32.xlu1 %v4596_v16, %s4523_s23 }
 0x21e   :  { %821 = vrot.lane.b32.xlu0 %v4594_v15, %s4523_s23 }
 0x239   :  { %502 = vadd.xlane.f32.xlu1 %v501_v10 }
 0x23d   :  { %505 = vadd.xlane.f32.xlu0 %v504_v14 }
 0x24a   :  { %969 = vrot.lane.b32.xlu1 %v4569_v7, %s4524_s0 }
 0x24e   :  { %967 = vrot.lane.b32.xlu1 %v4569_v7, %s4525_s24 }
 0x252   :  { %1069 = vrot.lane.b32.xlu1 %v4572_v8, %s4524_s0 }
 0x253   :  { %919 = vrot.lane.b32.xlu0 %v4557_v4, %s4524_s0 }
 0x256   :  { %1067 = vrot.lane.b32.xlu1 %v4572_v8, %s4525_s24 }
 0x257   :  { %917 = vrot.lane.b32.xlu0 %v4557_v4, %s4525_s24 }
 0x25a   :  { %1169 = vrot.lane.b32.xlu1 %v4584_v12, %s4524_s0 }
 0x25b   :  { %1019 = vrot.lane.b32.xlu0 %v4559_v5, %s4524_s0 }
 0x25e   :  { %1167 = vrot.lane.b32.xlu1 %v4584_v12, %s4525_s24 }
 0x25f   :  { %1017 = vrot.lane.b32.xlu0 %v4559_v5, %s4525_s24 }
 0x262   :  { %1269 = vrot.lane.b32.xlu1 %v4596_v16, %s4524_s0 }
 0x263   :  { %1119 = vrot.lane.b32.xlu0 %v4582_v11, %s4524_s0 }
 0x266   :  { %1267 = vrot.lane.b32.xlu1 %v4596_v16, %s4525_s24 }
 0x267   :  { %1117 = vrot.lane.b32.xlu0 %v4582_v11, %s4525_s24 }
 0x26a   :  { %1421 = vrot.lane.b32.xlu1 %v4557_v4, %s4526_s25 }
 0x26b   :  { %1219 = vrot.lane.b32.xlu0 %v4594_v15, %s4524_s0 }
 0x26e   :  { %1517 = vrot.lane.b32.xlu1 %v4559_v5, %s4526_s25 }
 0x26f   :  { %1217 = vrot.lane.b32.xlu0 %v4594_v15, %s4525_s24 }
 0x272   :  { %1565 = vrot.lane.b32.xlu1 %v4572_v8, %s4526_s25 }
 0x273   :  { %1469 = vrot.lane.b32.xlu0 %v4569_v7, %s4526_s25 }
 0x281   :  { %v485_v19 = vpop.xlane.xlu1 %484 }
 0x282   :  { %4408 = vrcp.f32 %v485_v19 }
 0x285   :  { %v488_v20 = vpop.xlane.xlu0 %487 }
 0x286   :  { %4410 = vrcp.f32 %v488_v20 }
 0x289   :  { %v491_v21 = vpop.xlane.xlu1 %490 }
 0x28a   :  { %4412 = vrcp.f32 %v491_v21 }
 0x28c   :  { %v4409_v22 = vpop.eup %4408 }
 0x28d   :  { %v494_v23 = vpop.xlane.xlu0 %493  ;;  %v508_v24 = vmul.f32 %v4409_v22, %v4671_v45 }
 0x28e   :  { %4414 = vrcp.f32 %v494_v23 }
 0x28f   :  { %v523_v25 = vpack.c.bf16 %v508_v24, %v508_v24 }
 0x290   :  { %v4411_v26 = vpop.eup %4410 }
 0x291   :  { %3975 = vmatmul.mubr.msk.bf16.vlgmr.msra.gmra.mrb[16].mxu0 %vm533_vm4, %v523_v25  ;;  %v497_v28 = vpop.xlane.xlu1 %496  ;;  %v510_v29 = vmul.f32 %v4411_v26, %v4675_v49 }
 0x292   :  { %3985 = vmatpush3.bf16.msra.mxu0 %v635_v27  ;;  %4416 = vrcp.f32 %v497_v28  ;;  %3986 = vmatprep.mubr.msk.bf16.mxu0 %vm4521_vm0, %v4520_v3 }
 0x293   :  { %v524_v32 = vpack.c.bf16 %v510_v29, %v510_v29  ;;  %3996 = vmatprep.subr.bf16.mxu0 %v4520_v3 }
 0x294   :  { %v4413_v33 = vpop.eup %4412 }
 0x295   :  { %3981 = vmatmul.mubr.msk.bf16.vlgmr.msra.gmra.mrb[16].mxu1 %vm533_vm4, %v524_v32  ;;  %v500_v30 = vpop.xlane.xlu0 %499  ;;  %v512_v35 = vmul.f32 %v4413_v33, %v4679_v53  ;;  %v870_v49 = vpop.permute.xlu1 %869 }
 0x296   :  { %3991 = vmatpush3.bf16.msra.mxu1 %v683_v34  ;;  %4418 = vrcp.f32 %v500_v30  ;;  %3992 = vmatprep.mubr.msk.bf16.mxu1 %vm4521_vm0, %v4520_v3  ;;  %v875_v51 = vsel %vm537_vm2, %v870_v49, 0 }
 0x297   :  { %v525_v36 = vpack.c.bf16 %v512_v35, %v512_v35  ;;  %4002 = vmatprep.subr.bf16.mxu1 %v4520_v3 }
 0x298   :  { %v4415_v37 = vpop.eup %4414 }
 0x299   :  { %3987 = vmatmul.mubr.msk.bf16.vlgmr.msra.gmra.mrb[20].mxu0 %vm533_vm4, %v525_v36  ;;  %v514_v31 = vmul.f32 %v4415_v37, %v4683_v56  ;;  %v822_v45 = vpop.permute.xlu0 %821 }
 0x29a   :  { %3997 = vmatpush3.bf16.msra.mxu0 %v731_v39  ;;  %3998 = vmatprep.mubr.msk.bf16.mxu0 %vm4521_vm0, %v4520_v3  ;;  %v827_v48 = vsel %vm537_vm2, %v822_v45, 0 }
 0x29b   :  { %v526_v40 = vpack.c.bf16 %v514_v31, %v514_v31  ;;  %4008 = vmatprep.subr.bf16.mxu0 %v4520_v3 }
 0x29c   :  { %v4417_v41 = vpop.eup %4416 }
 0x29d   :  { %3993 = vmatmul.mubr.msk.bf16.vlgmr.msra.gmra.mrb[20].mxu1 %vm533_vm4, %v526_v40  ;;  %v516_v43 = vmul.f32 %v4417_v41, %v4687_v58 }
 0x29e   :  { %4003 = vmatpush3.bf16.msra.mxu1 %v779_v42  ;;  %4004 = vmatprep.mubr.msk.bf16.mxu1 %vm4521_vm0, %v4520_v3 }
 0x29f   :  { %v527_v46 = vpack.c.bf16 %v516_v43, %v516_v43  ;;  %4014 = vmatprep.subr.bf16.mxu1 %v4520_v3 }
 0x2a0   :  { %v4419_v47 = vpop.eup %4418 }
 0x2a1   :  { %3999 = vmatmul.mubr.msk.bf16.vlgmr.msra.gmra.mrb[24].mxu0 %vm533_vm4, %v527_v46  ;;  %v518_v38 = vmul.f32 %v4419_v47, %v4691_v60 }
 0x2a2   :  { %4009 = vmatpush3.bf16.msra.mxu0 %v827_v48  ;;  %4010 = vmatprep.mubr.msk.bf16.mxu0 %vm4521_vm0, %v4520_v3 }
 0x2a3   :  { %v528_v44 = vpack.c.bf16 %v518_v38, %v518_v38  ;;  %4020 = vmatprep.subr.bf16.mxu0 %v4520_v3 }
 0x2a5   :  { %4005 = vmatmul.mubr.msk.bf16.vlgmr.msra.gmra.mrb[24].mxu1 %vm533_vm4, %v528_v44 }
 0x2a6   :  { %4015 = vmatpush3.bf16.msra.mxu1 %v875_v51  ;;  %4016 = vmatprep.mubr.msk.bf16.mxu1 %vm4521_vm0, %v4520_v3 }
 0x2a7   :  { %4026 = vmatprep.subr.bf16.mxu1 %v4520_v3 }
 0x2c6   :  { %v503_v50 = vpop.xlane.xlu1 %502 }
 0x2c7   :  { %4420 = vrcp.f32 %v503_v50 }
 0x2ca   :  { %v506_v52 = vpop.xlane.xlu0 %505  ;;  %v970_v53 = vpop.permute.xlu1 %969 }
 0x2cb   :  { %4422 = vrcp.f32 %v506_v52  ;;  %v975_v1 = vsel %vm22_vm1, %v970_v53, 0 }
 0x2ce   :  { %v920_v54 = vpop.permute.xlu0 %919  ;;  %v968_v55 = vpop.permute.xlu1 %967 }
 0x2cf   :  { %v925_v59 = vsel %vm22_vm1, %v920_v54, 0 }
 0x2d1   :  { %v4421_v56 = vpop.eup %4420 }
 0x2d2   :  { %v520_v57 = vmul.f32 %v4421_v56, %v4700_v9  ;;  %v918_v58 = vpop.permute.xlu0 %917  ;;  %v1070_v62 = vpop.permute.xlu1 %1069 }
 0x2d3   :  { %v1075_v14 = vsel %vm22_vm1, %v1070_v62, 0 }
 0x2d4   :  { %v529_v60 = vpack.c.bf16 %v520_v57, %v520_v57 }
 0x2d5   :  { %v4423_v61 = vpop.eup %4422 }
 0x2d6   :  { %4011 = vmatmul.mubr.msk.bf16.vlgmr.msra.gmra.mrb[28].mxu0 %vm533_vm4, %v529_v60  ;;  %v522_v63 = vmul.f32 %v4423_v61, %v4704_v13  ;;  %v1020_v0 = vpop.permute.xlu0 %1019  ;;  %v1068_v9 = vpop.permute.xlu1 %1067 }
 0x2d7   :  { %4021 = vmatpush3.bf16.xpose.msra.mxu0 %v925_v59  ;;  %4022 = vmatprep.mubr.msk.bf16.mxu0 %vm4521_vm0, %v4520_v3  ;;  %v1025_v10 = vsel %vm22_vm1, %v1020_v0, 0 }
 0x2d8   :  { %v530_v2 = vpack.c.bf16 %v522_v63, %v522_v63  ;;  %4032 = vmatprep.subr.bf16.mxu0 %v4520_v3 }
 0x2da   :  { %4017 = vmatmul.mubr.msk.bf16.vlgmr.msra.gmra.mrb[28].mxu1 %vm533_vm4, %v530_v2  ;;  %v1018_v6 = vpop.permute.xlu0 %1017  ;;  %v1170_v17 = vpop.permute.xlu1 %1169 }
 0x2db   :  { %4027 = vmatpush3.bf16.xpose.msra.mxu1 %v975_v1  ;;  %4028 = vmatprep.mubr.msk.bf16.mxu1 %vm4521_vm0, %v4520_v3  ;;  %v1175_v21 = vsel %vm22_vm1, %v1170_v17, 0 }
 0x2dc   :  { %4038 = vmatprep.subr.bf16.mxu1 %v4520_v3 }
 0x2de   :  { %4023 = vmatmul.mubr.msk.bf16.vlgmr.msra.gmra.mrb[32].mxu0 %vm22_vm1, %v918_v58  ;;  %v1120_v13 = vpop.permute.xlu0 %1119  ;;  %v1168_v20 = vpop.permute.xlu1 %1167 }
 0x2df   :  { %4033 = vmatpush3.bf16.xpose.msra.mxu0 %v1025_v10  ;;  %4034 = vmatprep.mubr.msk.bf16.mxu0 %vm4521_vm0, %v4520_v3  ;;  %v1125_v19 = vsel %vm22_vm1, %v1120_v13, 0 }
 0x2e0   :  { %4044 = vmatprep.subr.bf16.mxu0 %v4520_v3 }
 0x2e2   :  { %4029 = vmatmul.mubr.msk.bf16.vlgmr.msra.gmra.mrb[32].mxu1 %vm22_vm1, %v968_v55  ;;  %v1118_v18 = vpop.permute.xlu0 %1117  ;;  %v1270_v24 = vpop.permute.xlu1 %1269 }
 0x2e3   :  { %4039 = vmatpush3.bf16.xpose.msra.mxu1 %v1075_v14  ;;  %4040 = vmatprep.mubr.msk.bf16.mxu1 %vm4521_vm0, %v4520_v3  ;;  %v1275_v25 = vsel %vm22_vm1, %v1270_v24, 0 }
 0x2e4   :  { %4050 = vmatprep.subr.bf16.mxu1 %v4520_v3 }
 0x2e6   :  { %4035 = vmatmul.mubr.msk.bf16.vlgmr.msra.gmra.mrb[36].mxu0 %vm22_vm1, %v1018_v6  ;;  %v1220_v22 = vpop.permute.xlu0 %1219  ;;  %v1268_v27 = vpop.permute.xlu1 %1267 }
 0x2e7   :  { %4045 = vmatpush3.bf16.xpose.msra.mxu0 %v1125_v19  ;;  %4046 = vmatprep.mubr.msk.bf16.mxu0 %vm4521_vm0, %v4520_v3  ;;  %v1225_v23 = vsel %vm22_vm1, %v1220_v22, 0 }
 0x2e8   :  { %4056 = vmatprep.subr.bf16.mxu0 %v4520_v3 }
 0x2ea   :  { %4041 = vmatmul.mubr.msk.bf16.vlgmr.msra.gmra.mrb[36].mxu1 %vm22_vm1, %v1068_v9  ;;  %v1218_v26 = vpop.permute.xlu0 %1217  ;;  %v1422_v40 = vpop.permute.xlu1 %1421 }
 0x2eb   :  { %4051 = vmatpush3.bf16.xpose.msra.mxu1 %v1175_v21  ;;  %4052 = vmatprep.mubr.msk.bf16.mxu1 %vm4521_vm0, %v4520_v3  ;;  %v1427_v42 = vsel %vm537_vm2, %v1422_v40, 0 }
 0x2ec   :  { %4062 = vmatprep.subr.bf16.mxu1 %v4520_v3 }
 0x2ee   :  { %4047 = vmatmul.mubr.msk.bf16.vlgmr.msra.gmra.mrb[40].mxu0 %vm22_vm1, %v1118_v18  ;;  %v1470_v43 = vpop.permute.xlu0 %1469 }
 0x2ef   :  { %4057 = vmatpush3.bf16.xpose.msra.mxu0 %v1225_v23  ;;  %4058 = vmatprep.mubr.msk.bf16.mxu0 %vm4521_vm0, %v4520_v3  ;;  %v1475_v46 = vsel %vm537_vm2, %v1470_v43, 0 }
 0x2f0   :  { %4068 = vmatprep.subr.bf16.mxu0 %v4520_v3 }
 0x2f2   :  { %4053 = vmatmul.mubr.msk.bf16.vlgmr.msra.gmra.mrb[40].mxu1 %vm22_vm1, %v1168_v20 }
 0x2f3   :  { %4063 = vmatpush3.bf16.xpose.msra.mxu1 %v1275_v25  ;;  %4064 = vmatprep.mubr.msk.bf16.mxu1 %vm4521_vm0, %v4520_v3 }
 0x2f4   :  { %4074 = vmatprep.subr.bf16.mxu1 %v4520_v3 }
 0x2f6   :  { %4059 = vmatmul.mubr.msk.bf16.vlgmr.msra.gmra.mrb[44].mxu0 %vm22_vm1, %v1218_v26 }
 0x2f7   :  { %4070 = vmatprep.mubr.msk.bf16.mxu0 %vm4521_vm0, %v4520_v3  ;;  %4069 = vmatpush3.bf16.msra.mxu0 %v1427_v42 }
 0x2f8   :  { %4080 = vmatprep.subr.bf16.mxu0 %v4520_v3 }
 0x2fa   :  { %4065 = vmatmul.mubr.msk.bf16.vlgmr.msra.gmra.mrb[44].mxu1 %vm22_vm1, %v1268_v27 }
 0x2fb   :  { %4076 = vmatprep.mubr.msk.bf16.mxu1 %vm4521_vm0, %v4520_v3  ;;  %4075 = vmatpush3.bf16.msra.mxu1 %v1475_v46 }
 0x2fc   :  { %4086 = vmatprep.subr.bf16.mxu1 %v4520_v3 }
 0x364   :  { %v4818_v28 = vpop.f32.mrb[16].mxu0 }
 0x365   :  { %v3976_v29 = vpop.f32.mrb[17].mxu0 }
 0x366   :  { %v578_v32 = vpop.f32.mrb[18].mxu0 }
 0x367   :  { %v3977_v33 = vpop.f32.mrb[19].mxu0 }
 0x368   :  { %v4820_v34 = vpop.f32.mrb[16].mxu1 }
 0x369   :  { %v3982_v30 = vpop.f32.mrb[17].mxu1 }
 0x36a   :  { %v626_v35 = vpop.f32.mrb[18].mxu1 }
 0x36b   :  { %v3983_v36 = vpop.f32.mrb[19].mxu1 }
 0x36c   :  { %v4822_v37 = vpop.f32.mrb[20].mxu0 }
 0x36d   :  { %v3988_v39 = vpop.f32.mrb[21].mxu0 }
 0x36e   :  { %v674_v31 = vpop.f32.mrb[22].mxu0 }
 0x36f   :  { %v3989_v41 = vpop.f32.mrb[23].mxu0 }
 0x370   :  { %v4825_v45 = vpop.f32.mrb[20].mxu1 }
 0x371   :  { %v3994_v47 = vpop.f32.mrb[21].mxu1 }
 0x372   :  { %v722_v48 = vpop.f32.mrb[22].mxu1 }
 0x373   :  { %v3995_v38 = vpop.f32.mrb[23].mxu1 }
 0x374   :  { %v4830_v49 = vpop.f32.mrb[24].mxu0 }
 0x375   :  { %v4000_v44 = vpop.f32.mrb[25].mxu0 }
 0x376   :  { %v770_v51 = vpop.f32.mrb[26].mxu0 }
 0x377   :  { %v4001_v50 = vpop.f32.mrb[27].mxu0 }
 0x378   :  { %v4832_v52 = vpop.f32.mrb[24].mxu1 }
 0x379   :  { %v4006_v53 = vpop.f32.mrb[25].mxu1 }
 0x37a   :  { %v818_v54 = vpop.f32.mrb[26].mxu1 }
 0x37b   :  { %v4007_v55 = vpop.f32.mrb[27].mxu1 }
 0x3a9   :  { %v4834_v56 = vpop.f32.mrb[28].mxu0 }
 0x3aa   :  { %v4012_v57 = vpop.f32.mrb[29].mxu0 }
 0x3ab   :  { %v866_v58 = vpop.f32.mrb[30].mxu0 }
 0x3ac   :  { %v4013_v59 = vpop.f32.mrb[31].mxu0 }
 0x3ad   :  { %v4836_v60 = vpop.f32.mrb[28].mxu1 }
 0x3ae   :  { %v4018_v61 = vpop.f32.mrb[29].mxu1 }
 0x3af   :  { %v914_v62 = vpop.f32.mrb[30].mxu1 }
 0x3b0   :  { %v4019_v63 = vpop.f32.mrb[31].mxu1 }
 0x3b1   :  { %v961_v0 = vpop.f32.mrb[32].mxu0 }
 0x3b2   :  { %v1317_v1 = vmul.f32 0.5, %v961_v0  ;;  %v4024_v2 = vpop.f32.mrb[33].mxu0 }
 0x3b3   :  { %v964_v6 = vpop.f32.mrb[34].mxu0  ;;  %v4853_v2 = vpop.permute.xlu1 %1517 }
 0x3b4   :  { %v4025_v9 = vpop.f32.mrb[35].mxu0  ;;  %v1325_v10 = vsel %vm434_vm3, %v1317_v1, -inf }
 0x3b5   :  { %v1011_v13 = vpop.f32.mrb[32].mxu1  ;;  %1326 = vmax.xlane.f32.xlu0 %v1325_v10 }
 0x3b6   :  { %v1318_v14 = vmul.f32 0.5, %v1011_v13  ;;  %v4030_v17 = vpop.f32.mrb[33].mxu1 }
 0x3b7   :  { %v1014_v18 = vpop.f32.mrb[34].mxu1  ;;  %v4855_v6 = vpop.permute.xlu1 %1565 }
 0x3b8   :  { %v4031_v19 = vpop.f32.mrb[35].mxu1  ;;  %v1328_v20 = vsel %vm434_vm3, %v1318_v14, -inf }
 0x3b9   :  { %1329 = vmax.xlane.f32.xlu1 %v1328_v20  ;;  %v1061_v21 = vpop.f32.mrb[36].mxu0 }
 0x3ba   :  { %v1319_v22 = vmul.f32 0.5, %v1061_v21  ;;  %v4036_v23 = vpop.f32.mrb[37].mxu0 }
 0x3bb   :  { %v1064_v24 = vpop.f32.mrb[38].mxu0 }
 0x3bc   :  { %v4037_v25 = vpop.f32.mrb[39].mxu0  ;;  %v1331_v26 = vsel %vm434_vm3, %v1319_v22, -inf }
 0x3bd   :  { %v1111_v27 = vpop.f32.mrb[36].mxu1  ;;  %1332 = vmax.xlane.f32.xlu0 %v1331_v26 }
 0x3be   :  { %v1320_v29 = vmul.f32 0.5, %v1111_v27  ;;  %v4042_v32 = vpop.f32.mrb[37].mxu1 }
 0x3bf   :  { %v1114_v33 = vpop.f32.mrb[38].mxu1 }
 0x3c0   :  { %v4043_v30 = vpop.f32.mrb[39].mxu1  ;;  %v1334_v35 = vsel %vm434_vm3, %v1320_v29, -inf }
 0x3c1   :  { %1335 = vmax.xlane.f32.xlu0 %v1334_v35  ;;  %v1161_v36 = vpop.f32.mrb[40].mxu0 }
 0x3c2   :  { %v1321_v39 = vmul.f32 0.5, %v1161_v36  ;;  %v4048_v31 = vpop.f32.mrb[41].mxu0 }
 0x3c3   :  { %v1164_v40 = vpop.f32.mrb[42].mxu0 }
 0x3c4   :  { %v4049_v41 = vpop.f32.mrb[43].mxu0  ;;  %v1337_v42 = vsel %vm434_vm3, %v1321_v39, -inf }
 0x3c5   :  { %v1211_v43 = vpop.f32.mrb[40].mxu1  ;;  %1338 = vmax.xlane.f32.xlu1 %v1337_v42 }
 0x3c6   :  { %v1322_v46 = vmul.f32 0.5, %v1211_v43  ;;  %v4054_v47 = vpop.f32.mrb[41].mxu1 }
 0x3c7   :  { %v1214_v48 = vpop.f32.mrb[42].mxu1 }
 0x3c8   :  { %v4055_v38 = vpop.f32.mrb[43].mxu1  ;;  %v1340_v44 = vsel %vm434_vm3, %v1322_v46, -inf }
 0x3c9   :  { %1341 = vmax.xlane.f32.xlu0 %v1340_v44  ;;  %v1261_v51 = vpop.f32.mrb[44].mxu0 }
 0x3ca   :  { %v4844_v50 = vmul.f32 0.5, %v1261_v51  ;;  %v4060_v53 = vpop.f32.mrb[45].mxu0 }
 0x3cb   :  { %v1264_v54 = vpop.f32.mrb[46].mxu0 }
 0x3cc   :  { %v1343_v55 = vsel %vm434_vm3, %v4844_v50, -inf  ;;  %v4061_v57 = vpop.f32.mrb[47].mxu0 }
 0x3cd   :  { %v1311_v58 = vpop.f32.mrb[44].mxu1  ;;  %1344 = vmax.xlane.f32.xlu1 %v1343_v55 }
 0x3ce   :  { %v1324_v59 = vmul.f32 0.5, %v1311_v58  ;;  %v4066_v61 = vpop.f32.mrb[45].mxu1 }
 0x3cf   :  { %v1314_v62 = vpop.f32.mrb[46].mxu1 }
 0x3d0   :  { %v1346_v63 = vsel %vm434_vm3, %v1324_v59, -inf  ;;  %v4067_v0 = vpop.f32.mrb[47].mxu1 }
 0x3d1   :  { %1347 = vmax.xlane.f32.xlu0 %v1346_v63 }
 0x3de   :  { %1661 = vrot.lane.b32.xlu1 %v4584_v12, %s4526_s25 }
 0x3e7   :  { %1613 = vrot.lane.b32.xlu0 %v4582_v11, %s4526_s25 }
 0x442   :  { %v1327_v9 = vpop.xlane.xlu0 %1326 }
 0x443   :  { %v1349_v10 = vsub.f32 %v1317_v1, %v1327_v9 }
 0x445   :  { %v1357_v13 = vmul.f32 1.442695, %v1349_v10 }
 0x446   :  { %v1330_v17 = vpop.xlane.xlu1 %1329 }
 0x447   :  { %4424 = vpow2.f32 %v1357_v13  ;;  %v1350_v18 = vsub.f32 %v1318_v14, %v1330_v17 }
 0x449   :  { %v1359_v19 = vmul.f32 1.442695, %v1350_v18 }
 0x44a   :  { %v1333_v20 = vpop.xlane.xlu0 %1332 }
 0x44b   :  { %4426 = vpow2.f32 %v1359_v19  ;;  %v1351_v21 = vsub.f32 %v1319_v22, %v1333_v20  ;;  %v1523_v19 = vsel %vm537_vm2, %v4853_v2, 0 }
 0x44d   :  { %v1361_v23 = vmul.f32 1.442695, %v1351_v21 }
 0x44e   :  { %v1336_v24 = vpop.xlane.xlu0 %1335 }
 0x44f   :  { %4428 = vpow2.f32 %v1361_v23  ;;  %v1352_v25 = vsub.f32 %v1320_v29, %v1336_v24 }
 0x451   :  { %v4857_v26 = vpop.eup %4424  ;;  %v1363_v27 = vmul.f32 1.442695, %v1352_v25  ;;  %v1571_v25 = vsel %vm537_vm2, %v4855_v6, 0 }
 0x452   :  { %v1339_v32 = vpop.xlane.xlu1 %1338  ;;  %v1373_v33 = vsel %vm434_vm3, %v4857_v26, 0.0 }
 0x453   :  { %4430 = vpow2.f32 %v1363_v27  ;;  %v1353_v1 = vsub.f32 %v1321_v39, %v1339_v32  ;;  %1374 = vadd.xlane.f32.xlu1 %v1373_v33 }
 0x455   :  { %v4861_v30 = vpop.eup %4426  ;;  %v1365_v14 = vmul.f32 1.442695, %v1353_v1 }
 0x456   :  { %v1342_v35 = vpop.xlane.xlu0 %1341  ;;  %v1376_v22 = vsel %vm434_vm3, %v4861_v30, 0.0 }
 0x457   :  { %4432 = vpow2.f32 %v1365_v14  ;;  %v1354_v36 = vsub.f32 %v1322_v46, %v1342_v35  ;;  %1377 = vadd.xlane.f32.xlu0 %v1376_v22 }
 0x459   :  { %v4865_v29 = vpop.eup %4428  ;;  %v1367_v31 = vmul.f32 1.442695, %v1354_v36 }
 0x45a   :  { %v1379_v40 = vsel %vm434_vm3, %v4865_v29, 0.0  ;;  %v1345_v48 = vpop.xlane.xlu1 %1344 }
 0x45b   :  { %4434 = vpow2.f32 %v1367_v31  ;;  %1380 = vadd.xlane.f32.xlu1 %v1379_v40  ;;  %v1355_v38 = vsub.f32 %v4844_v50, %v1345_v48 }
 0x45d   :  { %v4869_v39 = vpop.eup %4430  ;;  %v1369_v51 = vmul.f32 1.442695, %v1355_v38 }
 0x45e   :  { %v1382_v41 = vsel %vm434_vm3, %v4869_v39, 0.0  ;;  %v1348_v44 = vpop.xlane.xlu0 %1347  ;;  %v1662_v50 = vpop.permute.xlu1 %1661 }
 0x45f   :  { %1383 = vadd.xlane.f32.xlu0 %v1382_v41  ;;  %v1356_v53 = vsub.f32 %v1324_v59, %v1348_v44  ;;  %4436 = vpow2.f32 %v1369_v51  ;;  %v1667_v14 = vsel %vm537_vm2, %v1662_v50, 0 }
 0x461   :  { %v4873_v42 = vpop.eup %4432  ;;  %v1371_v54 = vmul.f32 1.442695, %v1356_v53 }
 0x462   :  { %v1385_v43 = vsel %vm434_vm3, %v4873_v42, 0.0  ;;  %v1614_v59 = vpop.permute.xlu0 %1613 }
 0x463   :  { %1386 = vadd.xlane.f32.xlu1 %v1385_v43  ;;  %4438 = vpow2.f32 %v1371_v54  ;;  %v1619_v33 = vsel %vm537_vm2, %v1614_v59, 0 }
 0x465   :  { %v4877_v46 = vpop.eup %4434 }
 0x466   :  { %v1388_v47 = vsel %vm434_vm3, %v4877_v46, 0.0 }
 0x467   :  { %1389 = vadd.xlane.f32.xlu0 %v1388_v47 }
 0x469   :  { %v4886_v55 = vpop.eup %4436 }
 0x46a   :  { %v1391_v57 = vsel %vm434_vm3, %v4886_v55, 0.0 }
 0x46d   :  { %v4890_v58 = vpop.eup %4438 }
 0x46e   :  { %v1394_v61 = vsel %vm434_vm3, %v4890_v58, 0.0 }
 0x474   :  { %1757 = vrot.lane.b32.xlu1 %v4596_v16, %s4526_s25 }
 0x47d   :  { %1709 = vrot.lane.b32.xlu0 %v4594_v15, %s4526_s25 }
 0x498   :  { %1392 = vadd.xlane.f32.xlu1 %v1391_v57 }
 0x49c   :  { %1395 = vadd.xlane.f32.xlu0 %v1394_v61 }
 0x4a9   :  { %1857 = vrot.lane.b32.xlu1 %v4569_v7, %s4527_s26 }
 0x4ad   :  { %1855 = vrot.lane.b32.xlu1 %v4569_v7, %s4528_s27 }
 0x4b1   :  { %1957 = vrot.lane.b32.xlu1 %v4572_v8, %s4527_s26 }
 0x4b2   :  { %1807 = vrot.lane.b32.xlu0 %v4557_v4, %s4527_s26 }
 0x4b5   :  { %1955 = vrot.lane.b32.xlu1 %v4572_v8, %s4528_s27 }
 0x4b6   :  { %1805 = vrot.lane.b32.xlu0 %v4557_v4, %s4528_s27 }
 0x4b9   :  { %2057 = vrot.lane.b32.xlu1 %v4584_v12, %s4527_s26 }
 0x4ba   :  { %1907 = vrot.lane.b32.xlu0 %v4559_v5, %s4527_s26 }
 0x4bd   :  { %2055 = vrot.lane.b32.xlu1 %v4584_v12, %s4528_s27 }
 0x4be   :  { %1905 = vrot.lane.b32.xlu0 %v4559_v5, %s4528_s27 }
 0x4c1   :  { %2157 = vrot.lane.b32.xlu1 %v4596_v16, %s4527_s26 }
 0x4c2   :  { %2007 = vrot.lane.b32.xlu0 %v4582_v11, %s4527_s26 }
 0x4c5   :  { %2155 = vrot.lane.b32.xlu1 %v4596_v16, %s4528_s27 }
 0x4c6   :  { %2005 = vrot.lane.b32.xlu0 %v4582_v11, %s4528_s27 }
 0x4c9   :  { %2309 = vrot.lane.b32.xlu1 %v4557_v4, %s4529_s28 }
 0x4ca   :  { %2107 = vrot.lane.b32.xlu0 %v4594_v15, %s4527_s26 }
 0x4cd   :  { %2405 = vrot.lane.b32.xlu1 %v4559_v5, %s4529_s28 }
 0x4ce   :  { %2105 = vrot.lane.b32.xlu0 %v4594_v15, %s4528_s27 }
 0x4d1   :  { %2453 = vrot.lane.b32.xlu1 %v4572_v8, %s4529_s28 }
 0x4d2   :  { %2357 = vrot.lane.b32.xlu0 %v4569_v7, %s4529_s28 }
 0x4e0   :  { %v1375_v62 = vpop.xlane.xlu1 %1374 }
 0x4e1   :  { %4440 = vrcp.f32 %v1375_v62 }
 0x4e4   :  { %v1378_v63 = vpop.xlane.xlu0 %1377 }
 0x4e5   :  { %4442 = vrcp.f32 %v1378_v63 }
 0x4e8   :  { %v1381_v0 = vpop.xlane.xlu1 %1380 }
 0x4e9   :  { %4444 = vrcp.f32 %v1381_v0 }
 0x4eb   :  { %v4441_v9 = vpop.eup %4440 }
 0x4ec   :  { %v1384_v10 = vpop.xlane.xlu0 %1383  ;;  %v1398_v13 = vmul.f32 %v4441_v9, %v4857_v26 }
 0x4ed   :  { %4446 = vrcp.f32 %v1384_v10 }
 0x4ee   :  { %v1413_v17 = vpack.c.bf16 %v1398_v13, %v1398_v13 }
 0x4ef   :  { %v4443_v18 = vpop.eup %4442 }
 0x4f0   :  { %4071 = vmatmul.mubr.msk.bf16.vlgmr.msra.gmra.mrb[48].mxu0 %vm533_vm4, %v1413_v17  ;;  %v1387_v20 = vpop.xlane.xlu1 %1386  ;;  %v1400_v21 = vmul.f32 %v4443_v18, %v4861_v30 }
 0x4f1   :  { %4081 = vmatpush3.bf16.msra.mxu0 %v1523_v19  ;;  %4448 = vrcp.f32 %v1387_v20  ;;  %4082 = vmatprep.mubr.msk.bf16.mxu0 %vm4521_vm0, %v4520_v3 }
 0x4f2   :  { %v1414_v23 = vpack.c.bf16 %v1400_v21, %v1400_v21  ;;  %4092 = vmatprep.subr.bf16.mxu0 %v4520_v3 }
 0x4f3   :  { %v4445_v24 = vpop.eup %4444 }
 0x4f4   :  { %4077 = vmatmul.mubr.msk.bf16.vlgmr.msra.gmra.mrb[48].mxu1 %vm533_vm4, %v1414_v23  ;;  %v1390_v2 = vpop.xlane.xlu0 %1389  ;;  %v1402_v26 = vmul.f32 %v4445_v24, %v4865_v29 }
 0x4f5   :  { %4087 = vmatpush3.bf16.msra.mxu1 %v1571_v25  ;;  %4450 = vrcp.f32 %v1390_v2  ;;  %4088 = vmatprep.mubr.msk.bf16.mxu1 %vm4521_vm0, %v4520_v3 }
 0x4f6   :  { %v1415_v27 = vpack.c.bf16 %v1402_v26, %v1402_v26  ;;  %4098 = vmatprep.subr.bf16.mxu1 %v4520_v3 }
 0x4f7   :  { %v4447_v32 = vpop.eup %4446 }
 0x4f8   :  { %4083 = vmatmul.mubr.msk.bf16.vlgmr.msra.gmra.mrb[52].mxu0 %vm533_vm4, %v1415_v27  ;;  %v1404_v6 = vmul.f32 %v4447_v32, %v4869_v39  ;;  %v1710_v22 = vpop.permute.xlu0 %1709  ;;  %v1758_v39 = vpop.permute.xlu1 %1757 }
 0x4f9   :  { %4093 = vmatpush3.bf16.msra.mxu0 %v1619_v33  ;;  %4094 = vmatprep.mubr.msk.bf16.mxu0 %vm4521_vm0, %v4520_v3  ;;  %v1715_v40 = vsel %vm537_vm2, %v1710_v22, 0 }
 0x4fa   :  { %v1416_v1 = vpack.c.bf16 %v1404_v6, %v1404_v6  ;;  %4104 = vmatprep.subr.bf16.mxu0 %v4520_v3 }
 0x4fb   :  { %v4449_v30 = vpop.eup %4448 }
 0x4fc   :  { %v1406_v35 = vmul.f32 %v4449_v30, %v4873_v42  ;;  %4089 = vmatmul.mubr.msk.bf16.vlgmr.msra.gmra.mrb[52].mxu1 %vm533_vm4, %v1416_v1  ;;  %v1763_v42 = vsel %vm537_vm2, %v1758_v39, 0 }
 0x4fd   :  { %4099 = vmatpush3.bf16.msra.mxu1 %v1667_v14  ;;  %4100 = vmatprep.mubr.msk.bf16.mxu1 %vm4521_vm0, %v4520_v3 }
 0x4fe   :  { %v1417_v36 = vpack.c.bf16 %v1406_v35, %v1406_v35  ;;  %4110 = vmatprep.subr.bf16.mxu1 %v4520_v3 }
 0x4ff   :  { %v4451_v29 = vpop.eup %4450 }
 0x500   :  { %v1408_v31 = vmul.f32 %v4451_v29, %v4877_v46  ;;  %4095 = vmatmul.mubr.msk.bf16.vlgmr.msra.gmra.mrb[56].mxu0 %vm533_vm4, %v1417_v36 }
 0x501   :  { %4105 = vmatpush3.bf16.msra.mxu0 %v1715_v40  ;;  %4106 = vmatprep.mubr.msk.bf16.mxu0 %vm4521_vm0, %v4520_v3 }
 0x502   :  { %v1418_v41 = vpack.c.bf16 %v1408_v31, %v1408_v31  ;;  %4116 = vmatprep.subr.bf16.mxu0 %v4520_v3 }
 0x504   :  { %4101 = vmatmul.mubr.msk.bf16.vlgmr.msra.gmra.mrb[56].mxu1 %vm533_vm4, %v1418_v41 }
 0x505   :  { %4111 = vmatpush3.bf16.msra.mxu1 %v1763_v42  ;;  %4112 = vmatprep.mubr.msk.bf16.mxu1 %vm4521_vm0, %v4520_v3 }
 0x506   :  { %4122 = vmatprep.subr.bf16.mxu1 %v4520_v3 }
 0x525   :  { %v1393_v43 = vpop.xlane.xlu1 %1392 }
 0x526   :  { %4452 = vrcp.f32 %v1393_v43 }
 0x529   :  { %v1396_v46 = vpop.xlane.xlu0 %1395  ;;  %v1858_v47 = vpop.permute.xlu1 %1857 }
 0x52a   :  { %4454 = vrcp.f32 %v1396_v46  ;;  %v1863_v63 = vsel %vm22_vm1, %v1858_v47, 0 }
 0x52d   :  { %v1808_v48 = vpop.permute.xlu0 %1807  ;;  %v1856_v38 = vpop.permute.xlu1 %1855 }
 0x52e   :  { %v1813_v54 = vsel %vm22_vm1, %v1808_v48, 0 }
 0x530   :  { %v4453_v44 = vpop.eup %4452 }
 0x531   :  { %v1410_v51 = vmul.f32 %v4453_v44, %v4886_v55  ;;  %v1806_v53 = vpop.permute.xlu0 %1805  ;;  %v1958_v50 = vpop.permute.xlu1 %1957 }
 0x532   :  { %v1963_v13 = vsel %vm22_vm1, %v1958_v50, 0 }
 0x533   :  { %v1419_v57 = vpack.c.bf16 %v1410_v51, %v1410_v51 }
 0x534   :  { %v4455_v61 = vpop.eup %4454 }
 0x535   :  { %v1412_v59 = vmul.f32 %v4455_v61, %v4890_v58  ;;  %4107 = vmatmul.mubr.msk.bf16.vlgmr.msra.gmra.mrb[60].mxu0 %vm533_vm4, %v1419_v57  ;;  %v1908_v62 = vpop.permute.xlu0 %1907  ;;  %v1956_v58 = vpop.permute.xlu1 %1955 }
 0x536   :  { %4117 = vmatpush3.bf16.xpose.msra.mxu0 %v1813_v54  ;;  %4118 = vmatprep.mubr.msk.bf16.mxu0 %vm4521_vm0, %v4520_v3  ;;  %v1913_v9 = vsel %vm22_vm1, %v1908_v62, 0 }
 0x537   :  { %v1420_v0 = vpack.c.bf16 %v1412_v59, %v1412_v59  ;;  %4128 = vmatprep.subr.bf16.mxu0 %v4520_v3 }
 0x539   :  { %4113 = vmatmul.mubr.msk.bf16.vlgmr.msra.gmra.mrb[60].mxu1 %vm533_vm4, %v1420_v0  ;;  %v1906_v55 = vpop.permute.xlu0 %1905  ;;  %v2058_v17 = vpop.permute.xlu1 %2057 }
 0x53a   :  { %4123 = vmatpush3.bf16.xpose.msra.mxu1 %v1863_v63  ;;  %4124 = vmatprep.mubr.msk.bf16.mxu1 %vm4521_vm0, %v4520_v3  ;;  %v2063_v21 = vsel %vm22_vm1, %v2058_v17, 0 }
 0x53b   :  { %4134 = vmatprep.subr.bf16.mxu1 %v4520_v3 }
 0x53d   :  { %4119 = vmatmul.mubr.msk.bf16.vlgmr.msra.gmra.mrb[64].mxu0 %vm22_vm1, %v1806_v53  ;;  %v2008_v10 = vpop.permute.xlu0 %2007  ;;  %v2056_v20 = vpop.permute.xlu1 %2055 }
 0x53e   :  { %4129 = vmatpush3.bf16.xpose.msra.mxu0 %v1913_v9  ;;  %4130 = vmatprep.mubr.msk.bf16.mxu0 %vm4521_vm0, %v4520_v3  ;;  %v2013_v19 = vsel %vm22_vm1, %v2008_v10, 0 }
 0x53f   :  { %4140 = vmatprep.subr.bf16.mxu0 %v4520_v3 }
 0x541   :  { %4125 = vmatmul.mubr.msk.bf16.vlgmr.msra.gmra.mrb[64].mxu1 %vm22_vm1, %v1856_v38  ;;  %v2006_v18 = vpop.permute.xlu0 %2005  ;;  %v2158_v25 = vpop.permute.xlu1 %2157 }
 0x542   :  { %4135 = vmatpush3.bf16.xpose.msra.mxu1 %v1963_v13  ;;  %4136 = vmatprep.mubr.msk.bf16.mxu1 %vm4521_vm0, %v4520_v3  ;;  %v2163_v2 = vsel %vm22_vm1, %v2158_v25, 0 }
 0x543   :  { %4146 = vmatprep.subr.bf16.mxu1 %v4520_v3 }
 0x545   :  { %4131 = vmatmul.mubr.msk.bf16.vlgmr.msra.gmra.mrb[68].mxu0 %vm22_vm1, %v1906_v55  ;;  %v2108_v23 = vpop.permute.xlu0 %2107  ;;  %v2156_v27 = vpop.permute.xlu1 %2155 }
 0x546   :  { %4141 = vmatpush3.bf16.xpose.msra.mxu0 %v2013_v19  ;;  %4142 = vmatprep.mubr.msk.bf16.mxu0 %vm4521_vm0, %v4520_v3  ;;  %v2113_v24 = vsel %vm22_vm1, %v2108_v23, 0 }
 0x547   :  { %4152 = vmatprep.subr.bf16.mxu0 %v4520_v3 }
 0x549   :  { %4137 = vmatmul.mubr.msk.bf16.vlgmr.msra.gmra.mrb[68].mxu1 %vm22_vm1, %v1956_v58  ;;  %v2106_v26 = vpop.permute.xlu0 %2105  ;;  %v2310_v39 = vpop.permute.xlu1 %2309 }
 0x54a   :  { %4147 = vmatpush3.bf16.xpose.msra.mxu1 %v2063_v21  ;;  %4148 = vmatprep.mubr.msk.bf16.mxu1 %vm4521_vm0, %v4520_v3  ;;  %v2315_v42 = vsel %vm537_vm2, %v2310_v39, 0 }
 0x54b   :  { %4158 = vmatprep.subr.bf16.mxu1 %v4520_v3 }
 0x54d   :  { %4143 = vmatmul.mubr.msk.bf16.vlgmr.msra.gmra.mrb[72].mxu0 %vm22_vm1, %v2006_v18  ;;  %v2358_v43 = vpop.permute.xlu0 %2357 }
 0x54e   :  { %4153 = vmatpush3.bf16.xpose.msra.mxu0 %v2113_v24  ;;  %4154 = vmatprep.mubr.msk.bf16.mxu0 %vm4521_vm0, %v4520_v3  ;;  %v2363_v47 = vsel %vm537_vm2, %v2358_v43, 0 }
 0x54f   :  { %4164 = vmatprep.subr.bf16.mxu0 %v4520_v3 }
 0x551   :  { %4149 = vmatmul.mubr.msk.bf16.vlgmr.msra.gmra.mrb[72].mxu1 %vm22_vm1, %v2056_v20 }
 0x552   :  { %4159 = vmatpush3.bf16.xpose.msra.mxu1 %v2163_v2  ;;  %4160 = vmatprep.mubr.msk.bf16.mxu1 %vm4521_vm0, %v4520_v3 }
 0x553   :  { %4170 = vmatprep.subr.bf16.mxu1 %v4520_v3 }
 0x555   :  { %4155 = vmatmul.mubr.msk.bf16.vlgmr.msra.gmra.mrb[76].mxu0 %vm22_vm1, %v2106_v26 }
 0x556   :  { %4166 = vmatprep.mubr.msk.bf16.mxu0 %vm4521_vm0, %v4520_v3  ;;  %4165 = vmatpush3.bf16.msra.mxu0 %v2315_v42 }
 0x557   :  { %4176 = vmatprep.subr.bf16.mxu0 %v4520_v3 }
 0x559   :  { %4161 = vmatmul.mubr.msk.bf16.vlgmr.msra.gmra.mrb[76].mxu1 %vm22_vm1, %v2156_v27 }
 0x55a   :  { %4172 = vmatprep.mubr.msk.bf16.mxu1 %vm4521_vm0, %v4520_v3  ;;  %4171 = vmatpush3.bf16.msra.mxu1 %v2363_v47 }
 0x55b   :  { %4182 = vmatprep.subr.bf16.mxu1 %v4520_v3 }
 0x5c3   :  { %v5004_v32 = vpop.f32.mrb[48].mxu0 }
 0x5c4   :  { %v4072_v33 = vpop.f32.mrb[49].mxu0 }
 0x5c5   :  { %v1466_v6 = vpop.f32.mrb[50].mxu0 }
 0x5c6   :  { %v4073_v1 = vpop.f32.mrb[51].mxu0 }
 0x5c7   :  { %v5006_v30 = vpop.f32.mrb[48].mxu1 }
 0x5c8   :  { %v4324_v14 = vpack.i.bf16 %v5006_v30, %v5004_v32  ;;  %v4078_v35 = vpop.f32.mrb[49].mxu1 }
 0x5c9   :  { %v1514_v22 = vpop.f32.mrb[50].mxu1 }
 0x5ca   :  { %v4079_v36 = vpop.f32.mrb[51].mxu1 }
 0x5cb   :  { %v5010_v29 = vpop.f32.mrb[52].mxu0 }
 0x5cc   :  { %v4084_v31 = vpop.f32.mrb[53].mxu0 }
 0x5cd   :  { %v1562_v40 = vpop.f32.mrb[54].mxu0 }
 0x5ce   :  { %v4085_v41 = vpop.f32.mrb[55].mxu0 }
 0x5cf   :  { %v5013_v46 = vpop.f32.mrb[52].mxu1 }
 0x5d0   :  { %v4329_v48 = vpack.i.bf16 %v5013_v46, %v5010_v29  ;;  %v4090_v38 = vpop.f32.mrb[53].mxu1 }
 0x5d1   :  { %v1610_v44 = vpop.f32.mrb[54].mxu1 }
 0x5d2   :  { %v4091_v51 = vpop.f32.mrb[55].mxu1 }
 0x5d3   :  { %v5020_v53 = vpop.f32.mrb[56].mxu0 }
 0x5d4   :  { %v4096_v54 = vpop.f32.mrb[57].mxu0 }
 0x5d5   :  { %v1658_v57 = vpop.f32.mrb[58].mxu0 }
 0x5d6   :  { %v4097_v61 = vpop.f32.mrb[59].mxu0 }
 0x5d7   :  { %v5022_v50 = vpop.f32.mrb[56].mxu1 }
 0x5d8   :  { %v4334_v59 = vpack.i.bf16 %v5022_v50, %v5020_v53  ;;  %v4102_v62 = vpop.f32.mrb[57].mxu1 }
 0x5d9   :  { %v1706_v63 = vpop.f32.mrb[58].mxu1 }
 0x5da   :  { %v4103_v0 = vpop.f32.mrb[59].mxu1 }
 0x608   :  { %v5026_v55 = vpop.f32.mrb[60].mxu0 }
 0x609   :  { %v4108_v58 = vpop.f32.mrb[61].mxu0 }
 0x60a   :  { %v1754_v9 = vpop.f32.mrb[62].mxu0 }
 0x60b   :  { %v4109_v10 = vpop.f32.mrb[63].mxu0 }
 0x60c   :  { %v5028_v13 = vpop.f32.mrb[60].mxu1 }
 0x60d   :  { %v4339_v17 = vpack.i.bf16 %v5028_v13, %v5026_v55  ;;  %v4114_v18 = vpop.f32.mrb[61].mxu1 }
 0x60e   :  { %v1802_v19 = vpop.f32.mrb[62].mxu1 }
 0x60f   :  { %v4115_v20 = vpop.f32.mrb[63].mxu1 }
 0x610   :  { %v1849_v21 = vpop.f32.mrb[64].mxu0 }
 0x611   :  { %v2205_v23 = vmul.f32 0.5, %v1849_v21  ;;  %v4120_v24 = vpop.f32.mrb[65].mxu0 }
 0x612   :  { %v1852_v25 = vpop.f32.mrb[66].mxu0 }
 0x613   :  { %v4121_v2 = vpop.f32.mrb[67].mxu0  ;;  %v2213_v26 = vsel %vm434_vm3, %v2205_v23, -inf }
 0x614   :  { %v1899_v27 = vpop.f32.mrb[64].mxu1  ;;  %2214 = vmax.xlane.f32.xlu0 %v2213_v26 }
 0x615   :  { %v2206_v33 = vmul.f32 0.5, %v1899_v27  ;;  %v4126_v6 = vpop.f32.mrb[65].mxu1 }
 0x616   :  { %v1902_v1 = vpop.f32.mrb[66].mxu1 }
 0x617   :  { %v4127_v35 = vpop.f32.mrb[67].mxu1  ;;  %v2216_v22 = vsel %vm434_vm3, %v2206_v33, -inf }
 0x618   :  { %2217 = vmax.xlane.f32.xlu1 %v2216_v22  ;;  %v1949_v36 = vpop.f32.mrb[68].mxu0 }
 0x619   :  { %v2207_v31 = vmul.f32 0.5, %v1949_v36  ;;  %v4132_v40 = vpop.f32.mrb[69].mxu0 }
 0x61a   :  { %v1952_v39 = vpop.f32.mrb[70].mxu0 }
 0x61b   :  { %v4133_v41 = vpop.f32.mrb[71].mxu0  ;;  %v2219_v42 = vsel %vm434_vm3, %v2207_v31, -inf }
 0x61c   :  { %v1999_v43 = vpop.f32.mrb[68].mxu1  ;;  %2220 = vmax.xlane.f32.xlu0 %v2219_v42  ;;  %v5047_v41 = vpop.permute.xlu1 %2405 }
 0x61d   :  { %v2208_v47 = vmul.f32 0.5, %v1999_v43  ;;  %v4138_v38 = vpop.f32.mrb[69].mxu1 }
 0x61e   :  { %v2002_v44 = vpop.f32.mrb[70].mxu1 }
 0x61f   :  { %v4139_v51 = vpop.f32.mrb[71].mxu1  ;;  %v2222_v54 = vsel %vm434_vm3, %v2208_v47, -inf }
 0x620   :  { %2223 = vmax.xlane.f32.xlu0 %v2222_v54  ;;  %v2049_v57 = vpop.f32.mrb[72].mxu0  ;;  %v5049_v42 = vpop.permute.xlu1 %2453 }
 0x621   :  { %v2209_v61 = vmul.f32 0.5, %v2049_v57  ;;  %v4144_v62 = vpop.f32.mrb[73].mxu0 }
 0x622   :  { %v2052_v63 = vpop.f32.mrb[74].mxu0 }
 0x623   :  { %v4145_v0 = vpop.f32.mrb[75].mxu0  ;;  %v2225_v58 = vsel %vm434_vm3, %v2209_v61, -inf }
 0x624   :  { %v2099_v9 = vpop.f32.mrb[72].mxu1  ;;  %2226 = vmax.xlane.f32.xlu1 %v2225_v58 }
 0x625   :  { %v2210_v10 = vmul.f32 0.5, %v2099_v9  ;;  %v4150_v18 = vpop.f32.mrb[73].mxu1 }
 0x626   :  { %v2102_v19 = vpop.f32.mrb[74].mxu1 }
 0x627   :  { %v4151_v20 = vpop.f32.mrb[75].mxu1  ;;  %v2228_v21 = vsel %vm434_vm3, %v2210_v10, -inf }
 0x628   :  { %2229 = vmax.xlane.f32.xlu0 %v2228_v21  ;;  %v2149_v24 = vpop.f32.mrb[76].mxu0 }
 0x629   :  { %v5038_v25 = vmul.f32 0.5, %v2149_v24  ;;  %v4156_v2 = vpop.f32.mrb[77].mxu0 }
 0x62a   :  { %v2152_v26 = vpop.f32.mrb[78].mxu0 }
 0x62b   :  { %v2231_v27 = vsel %vm434_vm3, %v5038_v25, -inf  ;;  %v4157_v6 = vpop.f32.mrb[79].mxu0 }
 0x62c   :  { %v2199_v1 = vpop.f32.mrb[76].mxu1  ;;  %2232 = vmax.xlane.f32.xlu1 %v2231_v27 }
 0x62d   :  { %v2212_v35 = vmul.f32 0.5, %v2199_v1  ;;  %v4162_v22 = vpop.f32.mrb[77].mxu1 }
 0x62e   :  { %v2202_v36 = vpop.f32.mrb[78].mxu1 }
 0x62f   :  { %v2234_v40 = vsel %vm434_vm3, %v2212_v35, -inf  ;;  %v4163_v39 = vpop.f32.mrb[79].mxu1 }
 0x630   :  { %2235 = vmax.xlane.f32.xlu0 %v2234_v40 }
 0x63d   :  { %2549 = vrot.lane.b32.xlu1 %v4584_v12, %s4529_s28 }
 0x646   :  { %2501 = vrot.lane.b32.xlu0 %v4582_v11, %s4529_s28 }
 0x6a1   :  { %v2215_v43 = vpop.xlane.xlu0 %2214 }
 0x6a2   :  { %v2237_v38 = vsub.f32 %v2205_v23, %v2215_v43 }
 0x6a4   :  { %v2245_v44 = vmul.f32 1.442695, %v2237_v38 }
 0x6a5   :  { %v2218_v51 = vpop.xlane.xlu1 %2217 }
 0x6a6   :  { %4456 = vpow2.f32 %v2245_v44  ;;  %v2238_v54 = vsub.f32 %v2206_v33, %v2218_v51 }
 0x6a8   :  { %v2247_v57 = vmul.f32 1.442695, %v2238_v54 }
 0x6a9   :  { %v2221_v62 = vpop.xlane.xlu0 %2220 }
 0x6aa   :  { %4458 = vpow2.f32 %v2247_v57  ;;  %v2239_v63 = vsub.f32 %v2207_v31, %v2221_v62 }
 0x6ac   :  { %v2249_v0 = vmul.f32 1.442695, %v2239_v63 }
 0x6ad   :  { %v2224_v58 = vpop.xlane.xlu0 %2223 }
 0x6ae   :  { %4460 = vpow2.f32 %v2249_v0  ;;  %v2240_v9 = vsub.f32 %v2208_v47, %v2224_v58 }
 0x6b0   :  { %v5051_v18 = vpop.eup %4456  ;;  %v2251_v19 = vmul.f32 1.442695, %v2240_v9 }
 0x6b1   :  { %v2227_v20 = vpop.xlane.xlu1 %2226  ;;  %v2261_v21 = vsel %vm434_vm3, %v5051_v18, 0.0 }
 0x6b2   :  { %4462 = vpow2.f32 %v2251_v19  ;;  %v2241_v23 = vsub.f32 %v2209_v61, %v2227_v20  ;;  %2262 = vadd.xlane.f32.xlu1 %v2261_v21 }
 0x6b4   :  { %v5055_v24 = vpop.eup %4458  ;;  %v2253_v33 = vmul.f32 1.442695, %v2241_v23 }
 0x6b5   :  { %v2230_v2 = vpop.xlane.xlu0 %2229  ;;  %v2264_v31 = vsel %vm434_vm3, %v5055_v24, 0.0 }
 0x6b6   :  { %4464 = vpow2.f32 %v2253_v33  ;;  %v2242_v26 = vsub.f32 %v2210_v10, %v2230_v2  ;;  %2265 = vadd.xlane.f32.xlu0 %v2264_v31  ;;  %v2411_v31 = vsel %vm537_vm2, %v5047_v41, 0 }
 0x6b8   :  { %v5059_v47 = vpop.eup %4460  ;;  %v2255_v27 = vmul.f32 1.442695, %v2242_v26 }
 0x6b9   :  { %v2267_v6 = vsel %vm434_vm3, %v5059_v47, 0.0  ;;  %v2233_v39 = vpop.xlane.xlu1 %2232 }
 0x6ba   :  { %4466 = vpow2.f32 %v2255_v27  ;;  %2268 = vadd.xlane.f32.xlu1 %v2267_v6  ;;  %v2243_v43 = vsub.f32 %v5038_v25, %v2233_v39 }
 0x6bc   :  { %v5063_v61 = vpop.eup %4462  ;;  %v2257_v44 = vmul.f32 1.442695, %v2243_v43 }
 0x6bd   :  { %v2270_v1 = vsel %vm434_vm3, %v5063_v61, 0.0  ;;  %v2236_v38 = vpop.xlane.xlu0 %2235  ;;  %v2550_v25 = vpop.permute.xlu1 %2549 }
 0x6be   :  { %2271 = vadd.xlane.f32.xlu0 %v2270_v1  ;;  %v2244_v51 = vsub.f32 %v2212_v35, %v2236_v38  ;;  %4468 = vpow2.f32 %v2257_v44  ;;  %v2459_v1 = vsel %vm537_vm2, %v5049_v42, 0  ;;  %v2555_v38 = vsel %vm537_vm2, %v2550_v25, 0 }
 0x6c0   :  { %v5067_v22 = vpop.eup %4464  ;;  %v2259_v54 = vmul.f32 1.442695, %v2244_v51 }
 0x6c1   :  { %v2273_v10 = vsel %vm434_vm3, %v5067_v22, 0.0  ;;  %v2502_v35 = vpop.permute.xlu0 %2501 }
 0x6c2   :  { %2274 = vadd.xlane.f32.xlu1 %v2273_v10  ;;  %4470 = vpow2.f32 %v2259_v54  ;;  %v2507_v39 = vsel %vm537_vm2, %v2502_v35, 0 }
 0x6c4   :  { %v5071_v36 = vpop.eup %4466 }
 0x6c5   :  { %v2276_v40 = vsel %vm434_vm3, %v5071_v36, 0.0 }
 0x6c6   :  { %2277 = vadd.xlane.f32.xlu0 %v2276_v40 }
 0x6c8   :  { %v5080_v57 = vpop.eup %4468 }
 0x6c9   :  { %v2279_v62 = vsel %vm434_vm3, %v5080_v57, 0.0 }
 0x6cc   :  { %v5084_v63 = vpop.eup %4470 }
 0x6cd   :  { %v2282_v0 = vsel %vm434_vm3, %v5084_v63, 0.0 }
 0x6d3   :  { %2645 = vrot.lane.b32.xlu1 %v4596_v16, %s4529_s28 }
 0x6dc   :  { %2597 = vrot.lane.b32.xlu0 %v4594_v15, %s4529_s28 }
 0x6f7   :  { %2280 = vadd.xlane.f32.xlu1 %v2279_v62 }
 0x6fb   :  { %2283 = vadd.xlane.f32.xlu0 %v2282_v0 }
 0x708   :  { %2745 = vrot.lane.b32.xlu1 %v4569_v7, %s4530_s29 }
 0x70c   :  { %2743 = vrot.lane.b32.xlu1 %v4569_v7, %s4531_s30 }
 0x710   :  { %2845 = vrot.lane.b32.xlu1 %v4572_v8, %s4530_s29 }
 0x711   :  { %2695 = vrot.lane.b32.xlu0 %v4557_v4, %s4530_s29 }
 0x714   :  { %2843 = vrot.lane.b32.xlu1 %v4572_v8, %s4531_s30 }
 0x715   :  { %2693 = vrot.lane.b32.xlu0 %v4557_v4, %s4531_s30 }
 0x718   :  { %2945 = vrot.lane.b32.xlu1 %v4584_v12, %s4530_s29 }
 0x719   :  { %2795 = vrot.lane.b32.xlu0 %v4559_v5, %s4530_s29 }
 0x71c   :  { %2943 = vrot.lane.b32.xlu1 %v4584_v12, %s4531_s30 }
 0x71d   :  { %2793 = vrot.lane.b32.xlu0 %v4559_v5, %s4531_s30 }
 0x720   :  { %3045 = vrot.lane.b32.xlu1 %v4596_v16, %s4530_s29 }
 0x721   :  { %2895 = vrot.lane.b32.xlu0 %v4582_v11, %s4530_s29 }
 0x724   :  { %3043 = vrot.lane.b32.xlu1 %v4596_v16, %s4531_s30 }
 0x725   :  { %2893 = vrot.lane.b32.xlu0 %v4582_v11, %s4531_s30 }
 0x728   :  { %3197 = vrot.lane.b32.xlu1 %v4557_v4, %s4532_s2 }
 0x729   :  { %2995 = vrot.lane.b32.xlu0 %v4594_v15, %s4530_s29 }
 0x72d   :  { %2993 = vrot.lane.b32.xlu0 %v4594_v15, %s4531_s30 }
 0x73f   :  { %v2263_v58 = vpop.xlane.xlu1 %2262 }
 0x740   :  { %4472 = vrcp.f32 %v2263_v58 }
 0x743   :  { %v2266_v9 = vpop.xlane.xlu0 %2265 }
 0x744   :  { %4474 = vrcp.f32 %v2266_v9 }
 0x747   :  { %v2269_v19 = vpop.xlane.xlu1 %2268 }
 0x748   :  { %4476 = vrcp.f32 %v2269_v19 }
 0x74a   :  { %v4473_v20 = vpop.eup %4472 }
 0x74b   :  { %v2286_v21 = vmul.f32 %v4473_v20, %v5051_v18  ;;  %v2272_v23 = vpop.xlane.xlu0 %2271 }
 0x74c   :  { %4478 = vrcp.f32 %v2272_v23 }
 0x74d   :  { %v2301_v33 = vpack.c.bf16 %v2286_v21, %v2286_v21 }
 0x74e   :  { %v4475_v2 = vpop.eup %4474 }
 0x74f   :  { %v2288_v26 = vmul.f32 %v4475_v2, %v5055_v24  ;;  %4167 = vmatmul.mubr.msk.bf16.vlgmr.msra.gmra.mrb[80].mxu0 %vm533_vm4, %v2301_v33  ;;  %v2275_v27 = vpop.xlane.xlu1 %2274 }
 0x750   :  { %4177 = vmatpush3.bf16.msra.mxu0 %v2411_v31  ;;  %4480 = vrcp.f32 %v2275_v27  ;;  %4178 = vmatprep.mubr.msk.bf16.mxu0 %vm4521_vm0, %v4520_v3 }
 0x751   :  { %v2302_v6 = vpack.c.bf16 %v2288_v26, %v2288_v26  ;;  %4188 = vmatprep.subr.bf16.mxu0 %v4520_v3 }
 0x752   :  { %v4477_v18 = vpop.eup %4476 }
 0x753   :  { %v2290_v10 = vmul.f32 %v4477_v18, %v5059_v47  ;;  %4173 = vmatmul.mubr.msk.bf16.vlgmr.msra.gmra.mrb[80].mxu1 %vm533_vm4, %v2302_v6  ;;  %v2278_v41 = vpop.xlane.xlu0 %2277  ;;  %v2646_v25 = vpop.permute.xlu1 %2645 }
 0x754   :  { %4183 = vmatpush3.bf16.msra.mxu1 %v2459_v1  ;;  %4482 = vrcp.f32 %v2278_v41  ;;  %4184 = vmatprep.mubr.msk.bf16.mxu1 %vm4521_vm0, %v4520_v3  ;;  %v2651_v35 = vsel %vm537_vm2, %v2646_v25, 0 }
 0x755   :  { %v2303_v24 = vpack.c.bf16 %v2290_v10, %v2290_v10  ;;  %4194 = vmatprep.subr.bf16.mxu1 %v4520_v3 }
 0x756   :  { %v4479_v40 = vpop.eup %4478 }
 0x757   :  { %v2292_v43 = vmul.f32 %v4479_v40, %v5063_v61  ;;  %4179 = vmatmul.mubr.msk.bf16.vlgmr.msra.gmra.mrb[84].mxu0 %vm533_vm4, %v2303_v24  ;;  %v2598_v51 = vpop.permute.xlu0 %2597 }
 0x758   :  { %4189 = vmatpush3.bf16.msra.mxu0 %v2507_v39  ;;  %4190 = vmatprep.mubr.msk.bf16.mxu0 %vm4521_vm0, %v4520_v3  ;;  %v2603_v0 = vsel %vm537_vm2, %v2598_v51, 0 }
 0x759   :  { %v2304_v42 = vpack.c.bf16 %v2292_v43, %v2292_v43  ;;  %4200 = vmatprep.subr.bf16.mxu0 %v4520_v3 }
 0x75a   :  { %v4481_v47 = vpop.eup %4480 }
 0x75b   :  { %v2294_v44 = vmul.f32 %v4481_v47, %v5067_v22  ;;  %4185 = vmatmul.mubr.msk.bf16.vlgmr.msra.gmra.mrb[84].mxu1 %vm533_vm4, %v2304_v42 }
 0x75c   :  { %4195 = vmatpush3.bf16.msra.mxu1 %v2555_v38  ;;  %4196 = vmatprep.mubr.msk.bf16.mxu1 %vm4521_vm0, %v4520_v3 }
 0x75d   :  { %v2305_v61 = vpack.c.bf16 %v2294_v44, %v2294_v44  ;;  %4206 = vmatprep.subr.bf16.mxu1 %v4520_v3 }
 0x75e   :  { %v4483_v54 = vpop.eup %4482 }
 0x75f   :  { %v2296_v62 = vmul.f32 %v4483_v54, %v5071_v36  ;;  %4191 = vmatmul.mubr.msk.bf16.vlgmr.msra.gmra.mrb[88].mxu0 %vm533_vm4, %v2305_v61 }
 0x760   :  { %4201 = vmatpush3.bf16.msra.mxu0 %v2603_v0  ;;  %4202 = vmatprep.mubr.msk.bf16.mxu0 %vm4521_vm0, %v4520_v3 }
 0x761   :  { %v2306_v22 = vpack.c.bf16 %v2296_v62, %v2296_v62  ;;  %4212 = vmatprep.subr.bf16.mxu0 %v4520_v3 }
 0x763   :  { %4197 = vmatmul.mubr.msk.bf16.vlgmr.msra.gmra.mrb[88].mxu1 %vm533_vm4, %v2306_v22 }
 0x764   :  { %4207 = vmatpush3.bf16.msra.mxu1 %v2651_v35  ;;  %4208 = vmatprep.mubr.msk.bf16.mxu1 %vm4521_vm0, %v4520_v3 }
 0x765   :  { %4218 = vmatprep.subr.bf16.mxu1 %v4520_v3 }
 0x784   :  { %v2281_v36 = vpop.xlane.xlu1 %2280 }
 0x785   :  { %4484 = vrcp.f32 %v2281_v36 }
 0x788   :  { %v2284_v58 = vpop.xlane.xlu0 %2283  ;;  %v2746_v9 = vpop.permute.xlu1 %2745 }
 0x789   :  { %4486 = vrcp.f32 %v2284_v58  ;;  %v2751_v1 = vsel %vm22_vm1, %v2746_v9, 0 }
 0x78c   :  { %v2696_v19 = vpop.permute.xlu0 %2695  ;;  %v2744_v20 = vpop.permute.xlu1 %2743 }
 0x78d   :  { %v2701_v2 = vsel %vm22_vm1, %v2696_v19, 0 }
 0x78f   :  { %v4485_v21 = vpop.eup %4484 }
 0x790   :  { %v2298_v23 = vmul.f32 %v4485_v21, %v5080_v57  ;;  %v2694_v33 = vpop.permute.xlu0 %2693  ;;  %v2846_v27 = vpop.permute.xlu1 %2845 }
 0x791   :  { %v2851_v40 = vsel %vm22_vm1, %v2846_v27, 0 }
 0x792   :  { %v2307_v31 = vpack.c.bf16 %v2298_v23, %v2298_v23 }
 0x793   :  { %v4487_v26 = vpop.eup %4486 }
 0x794   :  { %v2300_v6 = vmul.f32 %v4487_v26, %v5084_v63  ;;  %4203 = vmatmul.mubr.msk.bf16.vlgmr.msra.gmra.mrb[92].mxu0 %vm533_vm4, %v2307_v31  ;;  %v2796_v18 = vpop.permute.xlu0 %2795  ;;  %v2844_v63 = vpop.permute.xlu1 %2843 }
 0x795   :  { %4213 = vmatpush3.bf16.xpose.msra.mxu0 %v2701_v2  ;;  %4214 = vmatprep.mubr.msk.bf16.mxu0 %vm4521_vm0, %v4520_v3  ;;  %v2801_v41 = vsel %vm22_vm1, %v2796_v18, 0 }
 0x796   :  { %v2308_v10 = vpack.c.bf16 %v2300_v6, %v2300_v6  ;;  %4224 = vmatprep.subr.bf16.mxu0 %v4520_v3 }
 0x798   :  { %4209 = vmatmul.mubr.msk.bf16.vlgmr.msra.gmra.mrb[92].mxu1 %vm533_vm4, %v2308_v10  ;;  %v2794_v57 = vpop.permute.xlu0 %2793  ;;  %v2946_v39 = vpop.permute.xlu1 %2945 }
 0x799   :  { %4219 = vmatpush3.bf16.xpose.msra.mxu1 %v2751_v1  ;;  %4220 = vmatprep.mubr.msk.bf16.mxu1 %vm4521_vm0, %v4520_v3  ;;  %v2951_v38 = vsel %vm22_vm1, %v2946_v39, 0 }
 0x79a   :  { %4230 = vmatprep.subr.bf16.mxu1 %v4520_v3 }
 0x79c   :  { %4215 = vmatmul.mubr.msk.bf16.vlgmr.msra.gmra.mrb[96].mxu0 %vm22_vm1, %v2694_v33  ;;  %v2896_v24 = vpop.permute.xlu0 %2895  ;;  %v2944_v47 = vpop.permute.xlu1 %2943 }
 0x79d   :  { %4225 = vmatpush3.bf16.xpose.msra.mxu0 %v2801_v41  ;;  %4226 = vmatprep.mubr.msk.bf16.mxu0 %vm4521_vm0, %v4520_v3  ;;  %v2901_v42 = vsel %vm22_vm1, %v2896_v24, 0 }
 0x79e   :  { %4236 = vmatprep.subr.bf16.mxu0 %v4520_v3 }
 0x7a0   :  { %4221 = vmatmul.mubr.msk.bf16.vlgmr.msra.gmra.mrb[96].mxu1 %vm22_vm1, %v2744_v20  ;;  %v2894_v43 = vpop.permute.xlu0 %2893  ;;  %v3046_v61 = vpop.permute.xlu1 %3045 }
 0x7a1   :  { %4231 = vmatpush3.bf16.xpose.msra.mxu1 %v2851_v40  ;;  %4232 = vmatprep.mubr.msk.bf16.mxu1 %vm4521_vm0, %v4520_v3  ;;  %v3051_v54 = vsel %vm22_vm1, %v3046_v61, 0 }
 0x7a2   :  { %4242 = vmatprep.subr.bf16.mxu1 %v4520_v3 }
 0x7a4   :  { %4227 = vmatmul.mubr.msk.bf16.vlgmr.msra.gmra.mrb[100].mxu0 %vm22_vm1, %v2794_v57  ;;  %v2996_v44 = vpop.permute.xlu0 %2995  ;;  %v3044_v0 = vpop.permute.xlu1 %3043 }
 0x7a5   :  { %4237 = vmatpush3.bf16.xpose.msra.mxu0 %v2901_v42  ;;  %4238 = vmatprep.mubr.msk.bf16.mxu0 %vm4521_vm0, %v4520_v3  ;;  %v3001_v51 = vsel %vm22_vm1, %v2996_v44, 0 }
 0x7a6   :  { %4248 = vmatprep.subr.bf16.mxu0 %v4520_v3 }
 0x7a8   :  { %4233 = vmatmul.mubr.msk.bf16.vlgmr.msra.gmra.mrb[100].mxu1 %vm22_vm1, %v2844_v63  ;;  %v2994_v62 = vpop.permute.xlu0 %2993  ;;  %v3198_v31 = vpop.permute.xlu1 %3197 }
 0x7a9   :  { %4243 = vmatpush3.bf16.xpose.msra.mxu1 %v2951_v38  ;;  %4244 = vmatprep.mubr.msk.bf16.mxu1 %vm4521_vm0, %v4520_v3  ;;  %v3203_v4 = vsel %vm537_vm2, %v3198_v31, 0 }
 0x7aa   :  { %4254 = vmatprep.subr.bf16.mxu1 %v4520_v3 }
 0x7ac   :  { %4239 = vmatmul.mubr.msk.bf16.vlgmr.msra.gmra.mrb[104].mxu0 %vm22_vm1, %v2894_v43 }
 0x7ad   :  { %4249 = vmatpush3.bf16.xpose.msra.mxu0 %v3001_v51  ;;  %4250 = vmatprep.mubr.msk.bf16.mxu0 %vm4521_vm0, %v4520_v3 }
 0x7ae   :  { %4260 = vmatprep.subr.bf16.mxu0 %v4520_v3 }
 0x7b0   :  { %4245 = vmatmul.mubr.msk.bf16.vlgmr.msra.gmra.mrb[104].mxu1 %vm22_vm1, %v2944_v47 }
 0x7b1   :  { %4255 = vmatpush3.bf16.xpose.msra.mxu1 %v3051_v54  ;;  %4256 = vmatprep.mubr.msk.bf16.mxu1 %vm4521_vm0, %v4520_v3 }
 0x7b2   :  { %4266 = vmatprep.subr.bf16.mxu1 %v4520_v3 }
 0x7b4   :  { %4251 = vmatmul.mubr.msk.bf16.vlgmr.msra.gmra.mrb[108].mxu0 %vm22_vm1, %v2994_v62 }
 0x7b5   :  { %4262 = vmatprep.mubr.msk.bf16.mxu0 %vm4521_vm0, %v4520_v3  ;;  %4261 = vmatpush3.bf16.msra.mxu0 %v3203_v4 }
 0x7b6   :  { %4272 = vmatprep.subr.bf16.mxu0 %v4520_v3 }
 0x7b8   :  { %4257 = vmatmul.mubr.msk.bf16.vlgmr.msra.gmra.mrb[108].mxu1 %vm22_vm1, %v3044_v0 }
 0x7b9   :  { %4268 = vmatprep.mubr.msk.bf16.mxu1 %vm4521_vm0, %v4520_v3 }
 0x822   :  { %v5192_v25 = vpop.f32.mrb[80].mxu0 }
 0x823   :  { %v4168_v22 = vpop.f32.mrb[81].mxu0 }
 0x824   :  { %v2354_v35 = vpop.f32.mrb[82].mxu0 }
 0x825   :  { %v4169_v36 = vpop.f32.mrb[83].mxu0 }
 0x826   :  { %v5194_v58 = vpop.f32.mrb[80].mxu1 }
 0x827   :  { %v4344_v9 = vpack.i.bf16 %v5194_v58, %v5192_v25  ;;  %v4174_v19 = vpop.f32.mrb[81].mxu1 }
 0x828   :  { %v2402_v20 = vpop.f32.mrb[82].mxu1 }
 0x829   :  { %v4175_v21 = vpop.f32.mrb[83].mxu1 }
 0x82a   :  { %v5198_v23 = vpop.f32.mrb[84].mxu0 }
 0x82b   :  { %v4180_v33 = vpop.f32.mrb[85].mxu0 }
 0x82c   :  { %v2450_v2 = vpop.f32.mrb[86].mxu0 }
 0x82d   :  { %v4181_v26 = vpop.f32.mrb[87].mxu0 }
 0x82e   :  { %v5201_v27 = vpop.f32.mrb[84].mxu1 }
 0x82f   :  { %v4349_v6 = vpack.i.bf16 %v5201_v27, %v5198_v23  ;;  %v4186_v18 = vpop.f32.mrb[85].mxu1 }
 0x830   :  { %v2498_v1 = vpop.f32.mrb[86].mxu1 }
 0x831   :  { %v4187_v10 = vpop.f32.mrb[87].mxu1 }
 0x832   :  { %v5206_v57 = vpop.f32.mrb[88].mxu0 }
 0x833   :  { %v4192_v63 = vpop.f32.mrb[89].mxu0 }
 0x834   :  { %v2546_v41 = vpop.f32.mrb[90].mxu0 }
 0x835   :  { %v4193_v24 = vpop.f32.mrb[91].mxu0 }
 0x836   :  { %v5208_v40 = vpop.f32.mrb[88].mxu1 }
 0x837   :  { %v4354_v39 = vpack.i.bf16 %v5208_v40, %v5206_v57  ;;  %v4198_v43 = vpop.f32.mrb[89].mxu1 }
 0x838   :  { %v2594_v42 = vpop.f32.mrb[90].mxu1 }
 0x839   :  { %v4199_v47 = vpop.f32.mrb[91].mxu1 }
 0x867   :  { %v5212_v38 = vpop.f32.mrb[92].mxu0 }
 0x868   :  { %v4204_v44 = vpop.f32.mrb[93].mxu0 }
 0x869   :  { %v2642_v51 = vpop.f32.mrb[94].mxu0 }
 0x86a   :  { %v4205_v61 = vpop.f32.mrb[95].mxu0 }
 0x86b   :  { %v5214_v54 = vpop.f32.mrb[92].mxu1 }
 0x86c   :  { %v4359_v62 = vpack.i.bf16 %v5214_v54, %v5212_v38  ;;  %v4210_v0 = vpop.f32.mrb[93].mxu1 }
 0x86d   :  { %v2690_v22 = vpop.f32.mrb[94].mxu1 }
 0x86e   :  { %v4211_v35 = vpop.f32.mrb[95].mxu1 }
 0x86f   :  { %v2737_v36 = vpop.f32.mrb[96].mxu0 }
 0x870   :  { %v3093_v19 = vmul.f32 0.5, %v2737_v36  ;;  %v4216_v20 = vpop.f32.mrb[97].mxu0 }
 0x871   :  { %v2740_v21 = vpop.f32.mrb[98].mxu0 }
 0x872   :  { %v4217_v33 = vpop.f32.mrb[99].mxu0  ;;  %v3101_v2 = vsel %vm434_vm3, %v3093_v19, -inf }
 0x873   :  { %v2787_v31 = vpop.f32.mrb[96].mxu1  ;;  %3102 = vmax.xlane.f32.xlu0 %v3101_v2 }
 0x874   :  { %v3094_v26 = vmul.f32 0.5, %v2787_v31  ;;  %v4222_v4 = vpop.f32.mrb[97].mxu1 }
 0x875   :  { %v2790_v18 = vpop.f32.mrb[98].mxu1 }
 0x876   :  { %v4223_v1 = vpop.f32.mrb[99].mxu1  ;;  %v3104_v10 = vsel %vm434_vm3, %v3094_v26, -inf }
 0x877   :  { %3105 = vmax.xlane.f32.xlu1 %v3104_v10  ;;  %v2837_v63 = vpop.f32.mrb[100].mxu0 }
 0x878   :  { %v3095_v41 = vmul.f32 0.5, %v2837_v63  ;;  %v4228_v24 = vpop.f32.mrb[101].mxu0 }
 0x879   :  { %v2840_v43 = vpop.f32.mrb[102].mxu0 }
 0x87a   :  { %v4229_v42 = vpop.f32.mrb[103].mxu0  ;;  %v3107_v47 = vsel %vm434_vm3, %v3095_v41, -inf }
 0x87b   :  { %v2887_v44 = vpop.f32.mrb[100].mxu1  ;;  %3108 = vmax.xlane.f32.xlu0 %v3107_v47 }
 0x87c   :  { %v3096_v51 = vmul.f32 0.5, %v2887_v44  ;;  %v4234_v61 = vpop.f32.mrb[101].mxu1 }
 0x87d   :  { %v2890_v0 = vpop.f32.mrb[102].mxu1 }
 0x87e   :  { %v4235_v22 = vpop.f32.mrb[103].mxu1  ;;  %v3110_v35 = vsel %vm434_vm3, %v3096_v51, -inf }
 0x87f   :  { %3111 = vmax.xlane.f32.xlu0 %v3110_v35  ;;  %v2937_v36 = vpop.f32.mrb[104].mxu0 }
 0x880   :  { %v5222_v20 = vmul.f32 0.5, %v2937_v36  ;;  %v4240_v21 = vpop.f32.mrb[105].mxu0 }
 0x881   :  { %v2940_v33 = vpop.f32.mrb[106].mxu0 }
 0x882   :  { %v3113_v2 = vsel %vm434_vm3, %v5222_v20, -inf  ;;  %v4241_v31 = vpop.f32.mrb[107].mxu0 }
 0x883   :  { %v2987_v4 = vpop.f32.mrb[104].mxu1  ;;  %3114 = vmax.xlane.f32.xlu1 %v3113_v2 }
 0x884   :  { %v5226_v18 = vmul.f32 0.5, %v2987_v4  ;;  %v4246_v1 = vpop.f32.mrb[105].mxu1 }
 0x885   :  { %v2990_v10 = vpop.f32.mrb[106].mxu1 }
 0x886   :  { %v3116_v63 = vsel %vm434_vm3, %v5226_v18, -inf  ;;  %v4247_v24 = vpop.f32.mrb[107].mxu1 }
 0x887   :  { %3117 = vmax.xlane.f32.xlu0 %v3116_v63  ;;  %v3037_v43 = vpop.f32.mrb[108].mxu0 }
 0x888   :  { %v3099_v42 = vmul.f32 0.5, %v3037_v43  ;;  %v4252_v47 = vpop.f32.mrb[109].mxu0 }
 0x889   :  { %v3040_v44 = vpop.f32.mrb[110].mxu0 }
 0x88a   :  { %v3119_v61 = vsel %vm434_vm3, %v3099_v42, -inf  ;;  %v4253_v0 = vpop.f32.mrb[111].mxu0 }
 0x88b   :  { %v3087_v22 = vpop.f32.mrb[108].mxu1  ;;  %3120 = vmax.xlane.f32.xlu1 %v3119_v61 }
 0x88c   :  { %v3100_v35 = vmul.f32 0.5, %v3087_v22  ;;  %v4258_v36 = vpop.f32.mrb[109].mxu1 }
 0x88d   :  { %v3090_v21 = vpop.f32.mrb[110].mxu1 }
 0x88e   :  { %v3122_v33 = vsel %vm434_vm3, %v3100_v35, -inf  ;;  %v4259_v2 = vpop.f32.mrb[111].mxu1 }
 0x88f   :  { %3123 = vmax.xlane.f32.xlu0 %v3122_v33 }
 0x89c   :  { %3293 = vrot.lane.b32.xlu1 %v4559_v5, %s4532_s2 }
 0x8a0   :  { %3341 = vrot.lane.b32.xlu1 %v4572_v8, %s4532_s2 }
 0x8a5   :  { %3245 = vrot.lane.b32.xlu0 %v4569_v7, %s4532_s2 }
 0x900   :  { %v3103_v31 = vpop.xlane.xlu0 %3102 }
 0x901   :  { %v3125_v4 = vsub.f32 %v3093_v19, %v3103_v31 }
 0x903   :  { %v3133_v1 = vmul.f32 1.442695, %v3125_v4 }
 0x904   :  { %v3106_v10 = vpop.xlane.xlu1 %3105 }
 0x905   :  { %4488 = vpow2.f32 %v3133_v1  ;;  %v3126_v63 = vsub.f32 %v3094_v26, %v3106_v10 }
 0x907   :  { %v3135_v24 = vmul.f32 1.442695, %v3126_v63 }
 0x908   :  { %v3109_v43 = vpop.xlane.xlu0 %3108 }
 0x909   :  { %4490 = vpow2.f32 %v3135_v24  ;;  %v3127_v47 = vsub.f32 %v3095_v41, %v3109_v43 }
 0x90b   :  { %v3137_v44 = vmul.f32 1.442695, %v3127_v47 }
 0x90c   :  { %v3112_v61 = vpop.xlane.xlu0 %3111 }
 0x90d   :  { %4492 = vpow2.f32 %v3137_v44  ;;  %v3128_v5 = vsub.f32 %v3096_v51, %v3112_v61 }
 0x90f   :  { %v5238_v0 = vpop.eup %4488  ;;  %v3139_v8 = vmul.f32 1.442695, %v3128_v5 }
 0x910   :  { %v3149_v7 = vsel %vm434_vm3, %v5238_v0, 0.0  ;;  %v3115_v4 = vpop.xlane.xlu1 %3114 }
 0x911   :  { %4494 = vpow2.f32 %v3139_v8  ;;  %3150 = vadd.xlane.f32.xlu1 %v3149_v7  ;;  %v3129_v1 = vsub.f32 %v5222_v20, %v3115_v4 }
 0x913   :  { %v5242_v19 = vpop.eup %4490  ;;  %v3141_v24 = vmul.f32 1.442695, %v3129_v1 }
 0x914   :  { %v3152_v26 = vsel %vm434_vm3, %v5242_v19, 0.0  ;;  %v3118_v41 = vpop.xlane.xlu0 %3117 }
 0x915   :  { %3153 = vadd.xlane.f32.xlu0 %v3152_v26  ;;  %v3130_v63 = vsub.f32 %v5226_v18, %v3118_v41  ;;  %4496 = vpow2.f32 %v3141_v24 }
 0x917   :  { %v5246_v22 = vpop.eup %4492  ;;  %v3143_v47 = vmul.f32 1.442695, %v3130_v63 }
 0x918   :  { %v3155_v51 = vsel %vm434_vm3, %v5246_v22, 0.0  ;;  %v3121_v10 = vpop.xlane.xlu1 %3120 }
 0x919   :  { %3156 = vadd.xlane.f32.xlu1 %v3155_v51  ;;  %v3131_v43 = vsub.f32 %v3099_v42, %v3121_v10  ;;  %4498 = vpow2.f32 %v3143_v47 }
 0x91b   :  { %v5250_v36 = vpop.eup %4494  ;;  %v3145_v44 = vmul.f32 1.442695, %v3131_v43 }
 0x91c   :  { %v3124_v21 = vpop.xlane.xlu0 %3123  ;;  %v3158_v33 = vsel %vm434_vm3, %v5250_v36, 0.0 }
 0x91d   :  { %3159 = vadd.xlane.f32.xlu0 %v3158_v33  ;;  %v3132_v61 = vsub.f32 %v3100_v35, %v3124_v21  ;;  %4500 = vpow2.f32 %v3145_v44 }
 0x91f   :  { %v3147_v5 = vmul.f32 1.442695, %v3132_v61 }
 0x920   :  { %v3246_v2 = vpop.permute.xlu0 %3245 }
 0x921   :  { %v3251_v31 = vsel %vm537_vm2, %v3246_v2, 0  ;;  %4502 = vpow2.f32 %v3147_v5 }
 0x922   :  { %4267 = vmatpush3.bf16.msra.mxu1 %v3251_v31 }
 0x923   :  { %4278 = vmatprep.subr.bf16.mxu1 %v4520_v3 }
 0x92a   :  { %3437 = vrot.lane.b32.xlu1 %v4584_v12, %s4532_s2  ;;  %v5262_v12 = vpop.eup %4496 }
 0x92b   :  { %v5264_v8 = vpop.eup %4498 }
 0x92c   :  { %v5268_v20 = vpop.eup %4500  ;;  %v3164_v42 = vsel %vm434_vm3, %v5264_v8, 0.0 }
 0x92d   :  { %v3167_v18 = vsel %vm434_vm3, %v5268_v20, 0.0  ;;  %v5274_v35 = vpop.eup %4502 }
 0x92e   :  { %v3170_v7 = vsel %vm434_vm3, %v5274_v35, 0.0 }
 0x933   :  { %3389 = vrot.lane.b32.xlu0 %v4582_v11, %s4532_s2  ;;  %v3161_v11 = vsel %vm434_vm3, %v5262_v12, 0.0 }
 0x94e   :  { %3162 = vadd.xlane.f32.xlu1 %v3161_v11 }
 0x952   :  { %3168 = vadd.xlane.f32.xlu1 %v3167_v18  ;;  %3165 = vadd.xlane.f32.xlu0 %v3164_v42 }
 0x956   :  { %3171 = vadd.xlane.f32.xlu0 %v3170_v7 }
 0x963   :  { %3533 = vrot.lane.b32.xlu1 %v4596_v16, %s4532_s2 }
 0x967   :  { %4330 = vrot.lane.b32.xlu1 %v4329_v48, %s4533_s3 }
 0x96b   :  { %4340 = vrot.lane.b32.xlu1 %v4339_v17, %s4533_s3 }
 0x96c   :  { %3485 = vrot.lane.b32.xlu0 %v4594_v15, %s4532_s2  ;;  %v3294_v15 = vpop.permute.xlu1 %3293 }
 0x96f   :  { %4350 = vrot.lane.b32.xlu1 %v4349_v6, %s4534_s4 }
 0x970   :  { %4325 = vrot.lane.b32.xlu0 %v4324_v14, %s4533_s3  ;;  %v3342_v16 = vpop.permute.xlu1 %3341 }
 0x971   :  { %v3347_v25 = vsel %vm537_vm2, %v3342_v16, 0 }
 0x973   :  { %4360 = vrot.lane.b32.xlu1 %v4359_v62, %s4534_s4 }
 0x974   :  { %4335 = vrot.lane.b32.xlu0 %v4334_v59, %s4533_s3  ;;  %v3299_v59 = vsel %vm537_vm2, %v3294_v15, 0 }
 0x978   :  { %4345 = vrot.lane.b32.xlu0 %v4344_v9, %s4534_s4 }
 0x97c   :  { %4355 = vrot.lane.b32.xlu0 %v4354_v39, %s4534_s4 }
 0x99e   :  { %v3151_v32 = vpop.xlane.xlu1 %3150 }
 0x99f   :  { %4504 = vrcp.f32 %v3151_v32 }
 0x9a2   :  { %v3154_v30 = vpop.xlane.xlu0 %3153 }
 0x9a3   :  { %4506 = vrcp.f32 %v3154_v30 }
 0x9a6   :  { %v3157_v14 = vpop.xlane.xlu1 %3156 }
 0x9a7   :  { %4508 = vrcp.f32 %v3157_v14 }
 0x9a9   :  { %v4505_v29 = vpop.eup %4504 }
 0x9aa   :  { %v3174_v46 = vmul.f32 %v4505_v29, %v5238_v0  ;;  %v3160_v48 = vpop.xlane.xlu0 %3159  ;;  %v3438_v40 = vpop.permute.xlu1 %3437 }
 0x9ab   :  { %4510 = vrcp.f32 %v3160_v48  ;;  %v3443_v38 = vsel %vm537_vm2, %v3438_v40, 0 }
 0x9ac   :  { %v3189_v53 = vpack.c.bf16 %v3174_v46, %v3174_v46 }
 0x9ad   :  { %v4507_v50 = vpop.eup %4506 }
 0x9ae   :  { %v3176_v55 = vmul.f32 %v4507_v50, %v5242_v19  ;;  %4263 = vmatmul.mubr.msk.bf16.vlgmr.msra.gmra.mrb[112].mxu0 %vm533_vm4, %v3189_v53  ;;  %v3390_v9 = vpop.permute.xlu0 %3389 }
 0x9af   :  { %4273 = vmatpush3.bf16.msra.mxu0 %v3299_v59  ;;  %4274 = vmatprep.mubr.msk.bf16.mxu0 %vm4521_vm0, %v4520_v3  ;;  %v3395_v57 = vsel %vm537_vm2, %v3390_v9, 0 }
 0x9b0   :  { %v3190_v13 = vpack.c.bf16 %v3176_v55, %v3176_v55  ;;  %4284 = vmatprep.subr.bf16.mxu0 %v4520_v3 }
 0x9b1   :  { %v4509_v17 = vpop.eup %4508 }
 0x9b2   :  { %v3178_v58 = vmul.f32 %v4509_v17, %v5246_v22  ;;  %4269 = vmatmul.mubr.msk.bf16.vlgmr.msra.gmra.mrb[112].mxu1 %vm533_vm4, %v3190_v13 }
 0x9b3   :  { %4279 = vmatpush3.bf16.msra.mxu1 %v3347_v25  ;;  %4280 = vmatprep.mubr.msk.bf16.mxu1 %vm4521_vm0, %v4520_v3 }
 0x9b4   :  { %v3191_v23 = vpack.c.bf16 %v3178_v58, %v3178_v58  ;;  %4290 = vmatprep.subr.bf16.mxu1 %v4520_v3 }
 0x9b5   :  { %v4511_v27 = vpop.eup %4510 }
 0x9b6   :  { %v3180_v6 = vmul.f32 %v4511_v27, %v5250_v36  ;;  %4275 = vmatmul.mubr.msk.bf16.vlgmr.msra.gmra.mrb[116].mxu0 %vm533_vm4, %v3191_v23 }
 0x9b7   :  { %4285 = vmatpush3.bf16.msra.mxu0 %v3395_v57  ;;  %4286 = vmatprep.mubr.msk.bf16.mxu0 %vm4521_vm0, %v4520_v3 }
 0x9b8   :  { %v3192_v39 = vpack.c.bf16 %v3180_v6, %v3180_v6  ;;  %4296 = vmatprep.subr.bf16.mxu0 %v4520_v3 }
 0x9ba   :  { %4281 = vmatmul.mubr.msk.bf16.vlgmr.msra.gmra.mrb[116].mxu1 %vm533_vm4, %v3192_v39 }
 0x9bb   :  { %4291 = vmatpush3.bf16.msra.mxu1 %v3443_v38  ;;  %4292 = vmatprep.mubr.msk.bf16.mxu1 %vm4521_vm0, %v4520_v3 }
 0x9bc   :  { %4302 = vmatprep.subr.bf16.mxu1 %v4520_v3 }
 0x9db   :  { %v3163_v54 = vpop.xlane.xlu1 %3162 }
 0x9dc   :  { %4512 = vrcp.f32 %v3163_v54 }
 0x9df   :  { %v3169_v62 = vpop.xlane.xlu1 %3168  ;;  %v3166_v0 = vpop.xlane.xlu0 %3165 }
 0x9e0   :  { %4514 = vrcp.f32 %v3169_v62 }
 0x9e1   :  { %4516 = vrcp.f32 %v3166_v0 }
 0x9e3   :  { %v3534_v19 = vpop.permute.xlu1 %3533  ;;  %v3172_v26 = vpop.xlane.xlu0 %3171 }
 0x9e4   :  { %4518 = vrcp.f32 %v3172_v26  ;;  %v3539_v47 = vsel %vm537_vm2, %v3534_v19, 0 }
 0x9e6   :  { %v4513_v22 = vpop.eup %4512 }
 0x9e7   :  { %v3182_v41 = vmul.f32 %v4513_v22, %v5262_v12  ;;  %v5331_v51 = vpop.permute.xlu1 %4330  ;;  %v3486_v36 = vpop.permute.xlu0 %3485 }
 0x9e8   :  { %v3491_v21 = vsel %vm537_vm2, %v3486_v36, 0 }
 0x9e9   :  { %v3193_v33 = vpack.c.bf16 %v3182_v41, %v3182_v41 }
 0x9ea   :  { %v4515_v2 = vpop.eup %4514 }
 0x9eb   :  { %v4517_v31 = vpop.eup %4516  ;;  %v4341_v4 = vpop.permute.xlu1 %4340  ;;  %4287 = vmatmul.mubr.msk.bf16.vlgmr.msra.gmra.mrb[120].mxu0 %vm533_vm4, %v3193_v33  ;;  %v3186_v43 = vmul.f32 %v4515_v2, %v5268_v20 }
 0x9ec   :  { %v5335_v1 = vpop.permute.xlu0 %4325  ;;  %v3184_v10 = vmul.f32 %v4517_v31, %v5264_v8  ;;  %v4343_v63 = vunpack.i.h.bf16 %v4341_v4  ;;  %v4342_v24 = vunpack.i.l.bf16 %v4341_v4  ;;  %4297 = vmatpush3.bf16.msra.mxu0 %v3491_v21  ;;  %4298 = vmatprep.mubr.msk.bf16.mxu0 %vm4521_vm0, %v4520_v3 }
 0x9ed   :  { %v3195_v7 = vpack.c.bf16 %v3186_v43, %v3186_v43 }
 0x9ee   :  { %v3684_v44 = vsel %vm22_vm1, %v4836_v60, %v4343_v63  ;;  %v3683_v61 = vsel %vm22_vm1, %v4834_v56, %v4342_v24  ;;  %v3194_v5 = vpack.c.bf16 %v3184_v10, %v3184_v10  ;;  %v4519_v12 = vpop.eup %4518 }
 0x9ef   :  { %v5346_v11 = vpop.permute.xlu1 %4350  ;;  %v3188_v20 = vmul.f32 %v4519_v12, %v5274_v35  ;;  %v4327_v12 = vunpack.i.l.bf16 %v5335_v1 }
 0x9f0   :  { %v4336_v8 = vpop.permute.xlu0 %4335  ;;  %4293 = vmatmul.mubr.msk.bf16.vlgmr.msra.gmra.mrb[120].mxu1 %vm533_vm4, %v3194_v5  ;;  %v4328_v5 = vunpack.i.h.bf16 %v5335_v1 }
 0x9f1   :  { %v4338_v18 = vunpack.i.h.bf16 %v4336_v8  ;;  %v4337_v42 = vunpack.i.l.bf16 %v4336_v8  ;;  %4303 = vmatpush3.bf16.msra.mxu1 %v3539_v47  ;;  %4304 = vmatprep.mubr.msk.bf16.mxu1 %vm4521_vm0, %v4520_v3  ;;  %v3196_v35 = vpack.c.bf16 %v3188_v20, %v3188_v20  ;;  %v3677_v20 = vsel %vm22_vm1, %v4818_v28, %v4327_v12 }
 0x9f2   :  { %v4352_v28 = vunpack.i.l.bf16 %v5346_v11 }
 0x9f3   :  { %v3682_v60 = vsel %vm22_vm1, %v4832_v52, %v4338_v18  ;;  %v3681_v56 = vsel %vm22_vm1, %v4830_v49, %v4337_v42  ;;  %v4361_v15 = vpop.permute.xlu1 %4360  ;;  %4299 = vmatmul.mubr.msk.bf16.vlgmr.msra.gmra.mrb[124].mxu0 %vm533_vm4, %v3195_v7  ;;  %v3678_v7 = vsel %vm22_vm1, %v4820_v34, %v4328_v5  ;;  %v4332_v34 = vunpack.i.l.bf16 %v5331_v51 }
 0x9f4   :  { %v5357_v16 = vpop.permute.xlu0 %4345  ;;  %v4363_v32 = vunpack.i.h.bf16 %v4361_v15  ;;  %v4362_v30 = vunpack.i.l.bf16 %v4361_v15 }
 0x9f5   :  { %v4348_v8 = vunpack.i.h.bf16 %v5357_v16  ;;  %v4347_v18 = vunpack.i.l.bf16 %v5357_v16 }
 0x9f6   :  { %v5360_v14 = vsel %vm3685_vm5, %v3683_v61, %v4362_v30  ;;  %v5363_v3 = vsel %vm3685_vm5, %v3684_v44, %v4363_v32 }
 0x9f7   :  { %v3686_v15 = vsel %vm3685_vm5, %v3677_v20, %v4347_v18  ;;  %v3687_v32 = vsel %vm3685_vm5, %v3678_v7, %v4348_v8 }
 0x9f8   :  { %v4356_v29 = vpop.permute.xlu0 %4355  ;;  %4305 = vmatmul.mubr.msk.bf16.vlgmr.msra.gmra.mrb[124].mxu1 %vm533_vm4, %v3196_v35 }
 0x9f9   :  { %v4358_v52 = vunpack.i.h.bf16 %v4356_v29  ;;  %v4357_v49 = vunpack.i.l.bf16 %v4356_v29  ;;  %v4333_v29 = vunpack.i.h.bf16 %v5331_v51  ;;  %v3679_v51 = vsel %vm22_vm1, %v4822_v37, %v4332_v34 }
 0x9fb   :  { %v5367_v46 = vsel %vm3685_vm5, %v3681_v56, %v4357_v49  ;;  %v5370_v48 = vsel %vm3685_vm5, %v3682_v60, %v4358_v52  ;;  %v4353_v52 = vunpack.i.h.bf16 %v5346_v11  ;;  %v3688_v11 = vsel %vm3685_vm5, %v3679_v51, %v4352_v28 }
 0xa81   :  { %v3239_v53 = vpop.f32.mrb[112].mxu0 }
 0xa82   :  { %v4264_v50 = vpop.f32.mrb[113].mxu0 }
 0xa83   :  { %v3242_v59 = vpop.f32.mrb[114].mxu0 }
 0xa84   :  { %v4265_v55 = vpop.f32.mrb[115].mxu0 }
 0xa85   :  { %v3287_v13 = vpop.f32.mrb[112].mxu1 }
 0xa86   :  { %v4364_v17 = vpack.i.bf16 %v3287_v13, %v3239_v53  ;;  %v4270_v25 = vpop.f32.mrb[113].mxu1  ;;  %v3680_v53 = vsel %vm22_vm1, %v4825_v45, %v4333_v29 }
 0xa87   :  { %v3290_v58 = vpop.f32.mrb[114].mxu1  ;;  %v3689_v55 = vsel %vm3685_vm5, %v3680_v53, %v4353_v52 }
 0xa88   :  { %4365 = vrot.lane.b32.xlu0 %v4364_v17, %s4535_s5  ;;  %v4271_v9 = vpop.f32.mrb[115].mxu1 }
 0xa89   :  { %v3335_v23 = vpop.f32.mrb[116].mxu0 }
 0xa8a   :  { %v4276_v27 = vpop.f32.mrb[117].mxu0 }
 0xa8b   :  { %v3338_v6 = vpop.f32.mrb[118].mxu0 }
 0xa8c   :  { %v4277_v57 = vpop.f32.mrb[119].mxu0 }
 0xa8d   :  { %v3383_v40 = vpop.f32.mrb[116].mxu1 }
 0xa8e   :  { %v4369_v39 = vpack.i.bf16 %v3383_v40, %v3335_v23  ;;  %v4282_v38 = vpop.f32.mrb[117].mxu1 }
 0xa8f   :  { %v3386_v54 = vpop.f32.mrb[118].mxu1 }
 0xa90   :  { %4370 = vrot.lane.b32.xlu1 %v4369_v39, %s4535_s5  ;;  %v4283_v62 = vpop.f32.mrb[119].mxu1 }
 0xabe   :  { %v3431_v0 = vpop.f32.mrb[120].mxu0 }
 0xabf   :  { %v4288_v19 = vpop.f32.mrb[121].mxu0 }
 0xac0   :  { %v3434_v26 = vpop.f32.mrb[122].mxu0 }
 0xac1   :  { %v4289_v22 = vpop.f32.mrb[123].mxu0 }
 0xac3   :  { %v3479_v41 = vpop.f32.mrb[120].mxu1 }
 0xac4   :  { %v4374_v36 = vpack.i.bf16 %v3479_v41, %v3431_v0  ;;  %v4294_v21 = vpop.f32.mrb[121].mxu1 }
 0xac5   :  { %v3482_v33 = vpop.f32.mrb[122].mxu1 }
 0xac6   :  { %4375 = vrot.lane.b32.xlu0 %v4374_v36, %s4535_s5  ;;  %v4295_v2 = vpop.f32.mrb[123].mxu1  ;;  %v3527_v31 = vpop.f32.mrb[124].mxu0 }
 0xac7   :  { %v4300_v4 = vpop.f32.mrb[125].mxu0 }
 0xac8   :  { %v3530_v10 = vpop.f32.mrb[126].mxu0 }
 0xac9   :  { %v4301_v63 = vpop.f32.mrb[127].mxu0 }
 0xacb   :  { %v3575_v24 = vpop.f32.mrb[124].mxu1 }
 0xacc   :  { %v4379_v43 = vpack.i.bf16 %v3575_v24, %v3527_v31  ;;  %v4306_v47 = vpop.f32.mrb[125].mxu1 }
 0xacd   :  { %v3578_v44 = vpop.f32.mrb[126].mxu1 }
 0xace   :  { %v4307_v61 = vpop.f32.mrb[127].mxu1  ;;  %4380 = vrot.lane.b32.xlu1 %v4379_v43, %s4535_s5 }
 0xafa   :  { %v4366_v42 = vpop.permute.xlu0 %4365 }
 0xafb   :  { %v4368_v60 = vunpack.i.h.bf16 %v4366_v42  ;;  %v4367_v56 = vunpack.i.l.bf16 %v4366_v42 }
 0xafd   :  { %v3695_v1 = vsel %vm3694_vm6, %v3686_v15, %v4367_v56  ;;  %v3696_v30 = vsel %vm3694_vm6, %v3687_v32, %v4368_v60 }
 0xafe   :  { %v3703_v16 = vpack.c.bf16 %v3695_v1, %v3695_v1  ;;  %v3704_v35 = vpack.c.bf16 %v3696_v30, %v3696_v30 }
 0xb00   :  { %3712 = vst.msk [vmem:[%s5441_s1] sm:$0x7] %vm3711_vm7, %v3703_v16  ;;  %3713 = vst.msk [vmem:[%s5441_s1 + $0x4] sm:$0x7] %vm3711_vm7, %v3704_v35 }
 0xb02   :  { %v4371_v49 = vpop.permute.xlu1 %4370 }
 0xb03   :  { %v4373_v50 = vunpack.i.h.bf16 %v4371_v49  ;;  %v4372_v59 = vunpack.i.l.bf16 %v4371_v49 }
 0xb05   :  { %v3698_v13 = vsel %vm3694_vm6, %v3689_v55, %v4373_v50  ;;  %v3697_v17 = vsel %vm3694_vm6, %v3688_v11, %v4372_v59 }
 0xb06   :  { %v3706_v25 = vpack.c.bf16 %v3698_v13, %v3698_v13  ;;  %v3705_v58 = vpack.c.bf16 %v3697_v17, %v3697_v17 }
 0xb08   :  { %3715 = vst.msk [vmem:[%s5441_s1 + $0xc] sm:$0x7] %vm3711_vm7, %v3706_v25  ;;  %3714 = vst.msk [vmem:[%s5441_s1 + $0x8] sm:$0x7] %vm3711_vm7, %v3705_v58 }
 0xb38   :  { %v4376_v37 = vpop.permute.xlu0 %4375 }
 0xb39   :  { %v4378_v45 = vunpack.i.h.bf16 %v4376_v37  ;;  %v4377_v9 = vunpack.i.l.bf16 %v4376_v37 }
 0xb3b   :  { %v3699_v23 = vsel %vm3694_vm6, %v5367_v46, %v4377_v9  ;;  %v3700_v27 = vsel %vm3694_vm6, %v5370_v48, %v4378_v45 }
 0xb3c   :  { %v3707_v6 = vpack.c.bf16 %v3699_v23, %v3699_v23  ;;  %v3708_v57 = vpack.c.bf16 %v3700_v27, %v3700_v27 }
 0xb3e   :  { %3716 = vst.msk [vmem:[%s5441_s1 + $0x10] sm:$0x7] %vm3711_vm7, %v3707_v6  ;;  %3717 = vst.msk [vmem:[%s5441_s1 + $0x14] sm:$0x7] %vm3711_vm7, %v3708_v57 }
 0xb40   :  { %v4381_v40 = vpop.permute.xlu1 %4380 }
 0xb41   :  { %v4383_v39 = vunpack.i.h.bf16 %v4381_v40  ;;  %v4382_v38 = vunpack.i.l.bf16 %v4381_v40 }
 0xb43   :  { %v3702_v46 = vsel %vm3694_vm6, %v5363_v3, %v4383_v39  ;;  %v3701_v48 = vsel %vm3694_vm6, %v5360_v14, %v4382_v38 }
 0xb44   :  { %v3710_v54 = vpack.c.bf16 %v3702_v46, %v3702_v46  ;;  %v3709_v62 = vpack.c.bf16 %v3701_v48, %v3701_v48 }
 0xb46   :  { %3719 = vst.msk [vmem:[%s5441_s1 + $0x1c] sm:$0x7] %vm3711_vm7, %v3710_v54  ;;  %3718 = vst.msk [vmem:[%s5441_s1 + $0x18] sm:$0x7] %vm3711_vm7, %v3709_v62 }

// kernel: separator_forward.31
= control target key start
LH: loop header
LB: loop body
LE: loop exit
PB: predicated region body
PF: predicated region fallthrough
CT: control target
= control target key end

     0   :  { %s317_s1 = inlined_call_operand.vmem [shape: bf16[128,128], index: 1, kind: input, shape index: {}]   ;;  %s318_s3 = inlined_call_operand.vmem [shape: f32[1,128], index: 3, kind: input, shape index: {}, may-alias: {3,4}]   ;;  %s319_s4 = inlined_call_operand.vmem [shape: f32[1,128], index: 4, kind: input, shape index: {}, may-alias: {3,4}]   ;;  %s320_s5 = inlined_call_operand.<no memory space> [shape: f32[1,1], index: 5, kind: input, shape index: {}]   ;;  %s321_s0 = inlined_call_operand.vmem [shape: bf16[24,128], index: 0, kind: input, shape index: {}]   ;;  %s322_s2 = inlined_call_operand.vmem [shape: f32[1,128], index: 2, kind: input, shape index: {}]   ;;  %s323_s6 = inlined_call_operand.vmem [shape: bf16[24,128], index: 6, kind: output, shape index: {}]  }
   0x1   :  { %v233_v0 = vld [vmem:[%s317_s1] sm:$0xff]   ;;  %v234_v1 = vld [vmem:[%s317_s1 + $0x8] sm:$0xff]   ;;  %v235_v2 = vld [vmem:[%s317_s1 + $0x10] sm:$0xff]  }
   0x2   :  { %213 = vmatprep.subr.bf16.mxu0 %v233_v0  ;;  %v241_v3 = vld [vmem:[%s321_s0] sm:$0xff]   ;;  %v236_v4 = vld [vmem:[%s317_s1 + $0x18] sm:$0xff]   ;;  %v238_v6 = vld [vmem:[%s317_s1 + $0x28] sm:$0xff]  }
   0x3   :  { %214 = vmatpush3.bf16.xpose.msra.mxu0 %v233_v0  ;;  %229 = vmatprep.mubr.bf16.mxu0 %v241_v3  ;;  %v237_v5 = vld [vmem:[%s317_s1 + $0x20] sm:$0xff]   ;;  %v239_v7 = vld [vmem:[%s317_s1 + $0x30] sm:$0xff]   ;;  %v240_v8 = vld [vmem:[%s317_s1 + $0x38] sm:$0xff]  }
   0x4   :  { %215 = vmatprep.subr.bf16.mxu0 %v234_v1  ;;  %v242_v9 = vld [vmem:[%s321_s0 + $0x8] ss:$0 sps:$4 sm:$0xff]   ;;  %v181_v10 = vld [vmem:[%s322_s2] ss:$0 sm:$0xff] }
   0xb   :  { %216 = vmatpush3.bf16.xpose.msra.mxu0 %v234_v1 }
   0xc   :  { %217 = vmatprep.subr.bf16.mxu0 %v235_v2 }
  0x13   :  { %218 = vmatpush3.bf16.xpose.msra.mxu0 %v235_v2 }
  0x14   :  { %219 = vmatprep.subr.bf16.mxu0 %v236_v4 }
  0x1b   :  { %220 = vmatpush3.bf16.xpose.msra.mxu0 %v236_v4 }
  0x1c   :  { %221 = vmatprep.subr.bf16.mxu0 %v237_v5 }
  0x23   :  { %222 = vmatpush3.bf16.xpose.msra.mxu0 %v237_v5 }
  0x24   :  { %223 = vmatprep.subr.bf16.mxu0 %v238_v6 }
  0x2b   :  { %224 = vmatpush3.bf16.xpose.msra.mxu0 %v238_v6 }
  0x2c   :  { %225 = vmatprep.subr.bf16.mxu0 %v239_v7 }
  0x33   :  { %226 = vmatpush3.bf16.xpose.msra.mxu0 %v239_v7 }
  0x34   :  { %227 = vmatprep.subr.bf16.mxu0 %v240_v8 }
  0x3b   :  { %228 = vmatpush3.bf16.xpose.msra.mxu0 %v240_v8 }
  0x42   :  { %230 = vmatmul.mubr.bf16.vlgmr.msra.gmra.mrb[0].mxu0 %v242_v9 }
 0x115   :  { %v231_v11 = vpop.f32.mrb[0].mxu0 }
 0x116   :  { %v153_v12 = vadd.f32 %v231_v11, %v181_v10  ;;  %v144_v13 = vpop.f32.mrb[1].mxu0 }
 0x117   :  { %v145_v14 = vadd.f32 %v181_v10, %v144_v13  ;;  %v232_v15 = vpop.f32.mrb[2].mxu0 }
 0x118   :  { %v160_v16 = vmax.f32 %v153_v12, 0.0  ;;  %v147_v17 = vpop.f32.mrb[3].mxu0 }
 0x119   :  { %v148_v18 = vadd.f32 %v181_v10, %v147_v17  ;;  %v158_v20 = vmax.f32 %v145_v14, 0.0 }
 0x11a   :  { %v197_v19 = vpack.c.bf16 %v160_v16, %v160_v16 }
 0x11b   :  { %v159_v21 = vmax.f32 %v148_v18, 0.0 }
 0x11c   :  { %176 = vst [vmem:[%s323_s6 + $0x8] sm:$0xf] %v197_v19 }
 0x11d   :  { %v201_v22 = vpack.c.bf16 %v159_v21, %v158_v20 }
 0x11f   :  { %202 = vst [vmem:[%s323_s6] sm:$0xff] %v201_v22  }

// kernel: separator_forward.33
= control target key start
LH: loop header
LB: loop body
LE: loop exit
PB: predicated region body
PF: predicated region fallthrough
CT: control target
= control target key end

     0   :  { %s487_s12 = smov 0   ;;  %s489_s13 = smov 0   ;;  %s533_s0 = inlined_call_operand.vmem [shape: bf16[2,1,12,16], index: 0, kind: input, shape index: {}]   ;;  %s534_s1 = inlined_call_operand.vmem [shape: bf16[1,12,16], index: 1, kind: input, shape index: {}]   ;;  %s535_s2 = inlined_call_operand.vmem [shape: bf16[8,16], index: 2, kind: input, shape index: {}]   ;;  %s536_s3 = inlined_call_operand.vmem [shape: f32[2,1,4,13], index: 3, kind: output, shape index: {}]  }
   0x1   :  { %s491_s14 = smov 0  }
   0x2 LB: > { %s22_s15 = sadd.s32 1, %s458_s13  ;;  %p396_p0 = scmp.ge.s32.totalorder %s462_s14, 1  ;;  %s462_s14 = sphi %s491_s14, %s13_s14   ;;  %s458_s13 = sphi %s489_s13, %s538_s13   ;;  %s454_s12 = sphi %s487_s12, %s537_s12  }
   0x3   : > { %p23_p1 = scmp.ge.s32.totalorder %s22_s15, 2  ;;  %p167_p2 = scmp.lt.s32.totalorder %s462_s14, 3 }
   0x5   : > { %s540_s15 = smov (%p23_p1, %s22_s15), 0  ;;  %p168_p3 = pnand %p396_p0, %p167_p2 }
   0x6   : > { %p202_p4 = scmp.lt.s32.totalorder (!%p168_p3), %s454_s12, 1  ;;  %v464_v0 = vmov (!%p168_p3), 0.0   ;;  %vm465_vm0 = vmmov (!%p168_p3), 0   ;;  %v226_v1 = vld [vmem:[%s534_s1] sm:$0xf] (!%p168_p3)  ;;  %vm236_vm1 = vcmask (!%p168_p3), 130048  }
   0x7   : > { %171 = sbr.rel (%p168_p3) target bundleno = 363 (0x16b), region = 32  ;;  %407 = vmatprep.subr.bf16.mxu0 (!%p168_p3), %v464_v0  ;;  %409 = vmatprep.mubr.msk.bf16.mxu0 (!%p168_p3), %vm465_vm0, %v464_v0  ;;  %v227_v2 = vld [vmem:[%s534_s1 + $0x4] sm:$0x3] (!%p168_p3)  ;;  %v230_v9 = vld [vmem:[%s535_s2] sm:$0xf] (!%p168_p3)  ;;  %s466_s26 = smov (!%p168_p3), 1  }
   0x8   : > { %vm283_vm2 = vcmask (!%p168_p3), 97280   ;;  %vm290_vm3 = vcmask (!%p168_p3), 7168   ;;  %vm293_vm4 = vcmask (!%p168_p3), 101376  }
   0xe   : > { %s542_s12 = smov (!%p202_p4, %s454_s12), 1 }
   0xf   : > { %s404_s16 = sshll.u32 %s542_s12, 3  ;;  %s399_s27 = sshll.u32 %s542_s12, 2 }
  0x10   : > { %s210_s23 = scalar_lea.vmem %s533_s0, %s404_s16  ;;  %s222_s30 = scalar_lea.vmem %s536_s3, %s399_s27 }
  0x11   : > { %v224_v3 = vld [vmem:[%s210_s23] sm:$0xf]  ;;  %v225_v4 = vld [vmem:[%s210_s23 + $0x4] sm:$0x3] }
  0x12   : > { %v228_v5 = vmul.bf16 %v226_v1, %v224_v3  ;;  %v229_v6 = vmul.bf16 %v227_v2, %v225_v4 }
  0x14   : > { %v400_v7 = vcombine.low %v228_v5, %v229_v6 }
  0x16   : > { %v241_v8 = vsel %vm236_vm1, %v400_v7, 0 }
  0x17   : > { %408 = vmatpush3.bf16.xpose.msra.mxu0 %v241_v8 }
  0x1e   : > { %410 = vmatmul.mubr.msk.bf16.vlgmr.msra.gmra.mrb[0].mxu0 %vm236_vm1, %v230_v9 }
  0xf1   : > { %v277_v10 = vpop.f32.mrb[0].mxu0 }
  0xf2   : > { %v411_v11 = vpop.f32.mrb[1].mxu0  ;;  %v286_v12 = vrot.slane %v277_v10, 4  ;;  %v284_v16 = vsel %vm283_vm2, %v277_v10, 0.0 }
  0xf3   : > { %v280_v13 = vpop.f32.mrb[2].mxu0 }
  0xf4   : > { %v412_v14 = vpop.f32.mrb[3].mxu0  ;;  %287 = vrot.lane.b32.xlu0 %v286_v12, %s466_s26 }
 0x166   : > { %v288_v15 = vpop.permute.xlu0 %287 }
 0x167   : > { %v291_v17 = vsel %vm290_vm3, 0.0, %v288_v15 }
 0x168   : > { %v292_v18 = vadd.f32 %v291_v17, %v284_v16 }
 0x16a   : > { %294 = vst.msk [vmem:[%s222_s30] sm:$0xf] %vm293_vm4, %v292_v18 }
 0x16b PF: > { %s13_s14 = sadd.s32 1, %s462_s14   ;;  %s537_s12 = smov %s458_s13 }
 0x16c   : > { %p10_p5 = scmp.ge.s32.totalorder %s13_s14, 4   ;;  %s538_s13 = smov %s540_s15 }
 0x16e   :  { %12 = sbr.rel (!%p10_p5) target bundleno = 2 (0x2), region = 65 }

</bundles_post_ra>
